<compile_context>
chip_gen: v7x
topology: tpu7x:2x2x1
jax: 0.10.0
libtpu: 0.0.40
codegen_flags: <defaults>
</compile_context>

<pallas_src>
import functools
import numpy as np
import jax
import jax.numpy as jnp
from jax.experimental import pallas as pl
from jax.experimental.pallas import tpu as pltpu

# ----- shapes consistent with GridNetwork.__init__ -----
GRID = 8          # grid_length
K1 = 3            # kernel1
K2 = 3            # kernel2
C_HID = 16        # n_hidden == channels into the attention convs
F_IN = 32         # feature-extractor input feature dim (stand-in)
C1 = 20           # conv1 out channels
C2 = 5            # conv2 out channels
G1 = GRID - K1 + 1                 # 6
G2 = G1 - K2 + 1                   # 4
TOTAL = G2 * G2 * C2               # 80
H_FC = 1000                        # MLP hidden_topology = [1000]
D_IN = GRID * GRID * F_IN          # 2048 = flattened kernel input per sample
N1 = G1 * G1 * C1                  # 720  = NHWC-flattened conv1 output
TB = 256                           # samples per grid step (multiple of 128)


def grid_network_kernel(x_ref, w1_ref, b1_ref, w2_ref, b2_ref,
                        wfc1_ref, bfc1_ref, wfc2_ref, bfc2_ref, out_ref):
    f32, bf16 = jnp.float32, jnp.bfloat16

    # conv1 (+ folded stand-in feature extractor) as ONE dense MXU matmul + ReLU.
    x = x_ref[...]                                                       # (TB, 2048) bf16
    y1 = jnp.maximum(
        jnp.dot(x, w1_ref[...], preferred_element_type=f32)
        + b1_ref[...], 0.0)                                              # (TB, 720) f32

    # conv2 as ONE dense matmul (NHWC-flattened) + ReLU.
    y2 = jnp.maximum(
        jnp.dot(y1.astype(bf16), w2_ref[...], preferred_element_type=f32)
        + b2_ref[...], 0.0)                                              # (TB, 80) f32

    # MLP tail in transposed (features, TB) orientation: contract the 80-dim of both
    # operands (NT matmul), so fc2 lands directly as a lane-dense (1, TB) row.
    h = jnp.maximum(
        jax.lax.dot_general(wfc1_ref[...], y2.astype(bf16),
                            dimension_numbers=(((1,), (1,)), ((), ())),
                            preferred_element_type=f32)
        + bfc1_ref[...], 0.0)                                            # (1000, TB) f32
    # Dropout(p=0.0) == identity

    o = jnp.dot(wfc2_ref[...], h.astype(bf16),
                preferred_element_type=f32) + bfc2_ref[...]              # (1, TB) f32
    out_ref[...] = jnp.maximum(o, 0.0)


# ----------------------- host-side one-time constant prep -----------------------

def make_dense_conv_weights(p):
    """Fold conv1/conv2 (and the stand-in FE Linear) into dense NHWC matrices (f64)."""
    # conv1 as dense: rows = NHWC features (pix*C_HID + c), cols = NHWC out (q*C1 + co)
    w1t = p["w1_t"].astype(np.float64)                                   # (C1, C_HID, K1, K1)
    w1fold = np.zeros((GRID * GRID * C_HID, N1), np.float64)
    b1fold = np.tile(p["b1"].astype(np.float64), G1 * G1)                # index q*C1 + co
    for qi in range(G1):
        for qj in range(G1):
            q = qi * G1 + qj
            for di in range(K1):
                for dj in range(K1):
                    pix = (qi + di) * GRID + (qj + dj)
                    w1fold[pix * C_HID:(pix + 1) * C_HID,
                           q * C1:(q + 1) * C1] = w1t[:, :, di, dj].T
    # Fuse the stand-in feature extractor Linear (F_IN -> C_HID) into the conv1 slab:
    # feat[pix*C_HID + c] = sum_f x[pix*F_IN + f] * wfe[c, f] + bfe[c]
    wfe = p["wfe_t"].astype(np.float64)                                  # (C_HID, F_IN)
    w1fused = np.zeros((D_IN, N1), np.float64)
    for pix in range(GRID * GRID):
        w1fused[pix * F_IN:(pix + 1) * F_IN, :] = \
            wfe.T @ w1fold[pix * C_HID:(pix + 1) * C_HID, :]
    b1fused = b1fold + np.tile(p["bfe"].astype(np.float64), GRID * GRID) @ w1fold

    # conv2 as dense: rows = NHWC conv1 output, cols = NHWC conv2 output (q*C2 + co)
    w2t = p["w2_t"].astype(np.float64)                                   # (C2, C1, K2, K2)
    w2fold = np.zeros((N1, TOTAL), np.float64)
    b2fold = np.tile(p["b2"].astype(np.float64), G2 * G2)
    for qi in range(G2):
        for qj in range(G2):
            q = qi * G2 + qj
            for di in range(K2):
                for dj in range(K2):
                    pix = (qi + di) * G1 + (qj + dj)
                    w2fold[pix * C1:(pix + 1) * C1,
                           q * C2:(q + 1) * C2] = w2t[:, :, di, dj].T
    return w1fused, b1fused, w2fold, b2fold


def prepare_constants(params):
    """One-time host-side folding / re-layout of all constant operands."""
    bf16, f32 = jnp.bfloat16, jnp.float32
    w1fused, b1fused, w2fold, b2fold = make_dense_conv_weights(params)
    # fc1 weight for the transposed tail; permute columns from torch NCHW flatten
    # order (co*G2*G2 + q) to our NHWC order (q*C2 + co).
    perm = np.array([co * (G2 * G2) + q for q in range(G2 * G2) for co in range(C2)])
    wfc1_perm = params["wfc1_t"].astype(np.float64)[:, perm]             # (H_FC, 80)
    return (
        jnp.asarray(w1fused, bf16),                                      # (2048, 720)
        jnp.asarray(b1fused.reshape(1, N1), f32),                        # (1, 720)
        jnp.asarray(w2fold, bf16),                                       # (720, 80)
        jnp.asarray(b2fold.reshape(1, TOTAL), f32),                      # (1, 80)
        jnp.asarray(wfc1_perm, bf16),                                    # (1000, 80)
        jnp.asarray(params["bfc1"].reshape(H_FC, 1), f32),               # (1000, 1)
        jnp.asarray(params["wfc2_t"].reshape(1, H_FC), bf16),            # (1, 1000)
        jnp.asarray(params["bfc2"].reshape(1, 1), f32),                  # (1, 1)
    )


# ------------------------------- forward wrapper --------------------------------

@functools.partial(jax.jit, static_argnames=("tb",))
def grid_network_forward(x, consts, *, tb=TB):
    """x: (B, GRID*GRID, F_IN). Each row is one GridNetwork.forward; returns (B, 1)."""
    B = x.shape[0]
    nb = pl.cdiv(B, tb)
    bp = nb * tb
    xb = x.reshape(B, D_IN).astype(jnp.bfloat16)     # bf16 + flatten in the wrapper
    if bp != B:
        xb = jnp.pad(xb, ((0, bp - B), (0, 0)))

    def const_spec(arr):                              # whole array resident in VMEM
        nd = arr.ndim
        return pl.BlockSpec(arr.shape, lambda b, _nd=nd: (0,) * _nd)

    out = pl.pallas_call(
        grid_network_kernel,
        out_shape=jax.ShapeDtypeStruct((1, bp), jnp.float32),
        grid=(nb,),
        in_specs=[pl.BlockSpec((tb, D_IN), lambda b: (b, 0))]
                 + [const_spec(c) for c in consts],
        out_specs=pl.BlockSpec((1, tb), lambda b: (0, b)),   # lane-dense output blocks
        compiler_params=pltpu.CompilerParams(
            dimension_semantics=("parallel",)),
    )(xb, *consts)
    return out.reshape(bp, 1)[:B]


# --------------------------- params & numpy reference ---------------------------

def xavier_uniform(key, shape, fan_in, fan_out):
    a = float(np.sqrt(6.0 / (fan_in + fan_out)))
    return jax.random.uniform(key, shape, jnp.float32, -a, a)


def init_params(key):
    ks = jax.random.split(key, 10)
    p = {}
    p["wfe_t"] = np.asarray(xavier_uniform(ks[0], (C_HID, F_IN), F_IN, C_HID))
    p["bfe"] = np.asarray(jax.random.uniform(ks[1], (C_HID,), jnp.float32, -0.1, 0.1))
    p["w1_t"] = np.asarray(xavier_uniform(ks[2], (C1, C_HID, K1, K1),
                                          C_HID * K1 * K1, C1 * K1 * K1))
    p["b1"] = np.asarray(jax.random.uniform(ks[3], (C1,), jnp.float32, -0.1, 0.1))
    p["w2_t"] = np.asarray(xavier_uniform(ks[4], (C2, C1, K2, K2),
                                          C1 * K2 * K2, C2 * K2 * K2))
    p["b2"] = np.asarray(jax.random.uniform(ks[5], (C2,), jnp.float32, -0.1, 0.1))
    p["wfc1_t"] = np.asarray(xavier_uniform(ks[6], (H_FC, TOTAL), TOTAL, H_FC))
    p["bfc1"] = np.asarray(jax.random.uniform(ks[7], (H_FC,), jnp.float32, -0.1, 0.1))
    p["wfc2_t"] = np.asarray(xavier_uniform(ks[8], (1, H_FC), H_FC, 1))
    p["bfc2"] = np.asarray(jax.random.uniform(ks[9], (1,), jnp.float32, -0.1, 0.1))
    return p


def reference_forward(x_np, p):
    """Independent float64 NHWC conv reference for the whole batch."""
    xb = x_np.astype(np.float64)                                         # (B, 64, F_IN)
    feat = xb @ p["wfe_t"].T.astype(np.float64) + p["bfe"].astype(np.float64)
    img = feat.reshape(-1, GRID, GRID, C_HID)
    w1 = p["w1_t"].astype(np.float64)
    w2 = p["w2_t"].astype(np.float64)
    y1 = np.zeros((xb.shape[0], G1, G1, C1))
    for di in range(K1):
        for dj in range(K1):
            y1 += np.einsum('bijc,oc->bijo',
                            img[:, di:di + G1, dj:dj + G1, :], w1[:, :, di, dj])
    y1 = np.maximum(y1 + p["b1"].astype(np.float64), 0.0)
    y2 = np.zeros((xb.shape[0], G2, G2, C2))
    for di in range(K2):
        for dj in range(K2):
            y2 += np.einsum('bijc,oc->bijo',
                            y1[:, di:di + G2, dj:dj + G2, :], w2[:, :, di, dj])
    y2 = np.maximum(y2 + p["b2"].astype(np.float64), 0.0)
    flat = y2.transpose(0, 3, 1, 2).reshape(xb.shape[0], TOTAL)          # NCHW flatten
    h = np.maximum(flat @ p["wfc1_t"].T.astype(np.float64)
                   + p["bfc1"].astype(np.float64), 0.0)
    out = np.maximum(h @ p["wfc2_t"].T.astype(np.float64)
                     + p["bfc2"].astype(np.float64), 0.0)
    return out                                                           # (B, 1)


if __name__ == "__main__":
    key = jax.random.PRNGKey(0)
    k_param, k_x = jax.random.split(key)
    params = init_params(k_param)
    consts = prepare_constants(params)   # cached once; per-call path is just pallas_call

    B = 4 * TB   # 4 grid steps of TB samples (>=2 so both v7x TensorCores get work)
    # module input per sample: (1, grid_length**2, F_IN); batched here over B samples
    x = jax.random.normal(k_x, (B, GRID * GRID, F_IN), jnp.float32)

    out = grid_network_forward(x, consts)
    out = jax.block_until_ready(out)

    ref = reference_forward(np.asarray(x), params)                        # (B, 1) float64
    # bf16 matmul operands -> slightly relaxed tolerance vs the float64 reference
    if np.allclose(np.asarray(out, np.float64), ref, rtol=5e-2, atol=2.5e-2):
        print("KERNEL_OK")
    else:
        err = np.abs(np.asarray(out, np.float64) - ref)
        print("MISMATCH max_abs_err=%.4g max_ref=%.4g" % (err.max(), np.abs(ref).max()))
</pallas_src>

<mosaic_0001>
module attributes {stable_mosaic.version = 11 : i64} {
  func.func @grid_network_kernel(%arg0: i32, %arg1: memref<256x2048xbf16, #tpu.memory_space<vmem>>, %arg2: memref<2048x720xbf16, #tpu.memory_space<vmem>>, %arg3: memref<1x720xf32, #tpu.memory_space<vmem>>, %arg4: memref<720x80xbf16, #tpu.memory_space<vmem>>, %arg5: memref<1x80xf32, #tpu.memory_space<vmem>>, %arg6: memref<1000x80xbf16, #tpu.memory_space<vmem>>, %arg7: memref<1000x1xf32, #tpu.memory_space<vmem>>, %arg8: memref<1x1000xbf16, #tpu.memory_space<vmem>>, %arg9: memref<1x1xf32, #tpu.memory_space<vmem>>, %arg10: memref<1x256xf32, #tpu.memory_space<vmem>>) attributes {dimension_semantics = [#tpu.dimension_semantics<parallel>], iteration_bounds = array<i64: 4>, scalar_prefetch = 0 : i64, scratch_operands = 0 : i64, tpu.core_type = #tpu.core_type<tc>, window_params = [{transform_indices = @transform_0, window_bounds = array<i64: 256, 2048>}, {pipeline_mode = #tpu.pipeline_mode<synchronous>, transform_indices = @transform_1, window_bounds = array<i64: 2048, 720>}, {pipeline_mode = #tpu.pipeline_mode<synchronous>, transform_indices = @transform_2, window_bounds = array<i64: 1, 720>}, {pipeline_mode = #tpu.pipeline_mode<synchronous>, transform_indices = @transform_3, window_bounds = array<i64: 720, 80>}, {pipeline_mode = #tpu.pipeline_mode<synchronous>, transform_indices = @transform_4, window_bounds = array<i64: 1, 80>}, {pipeline_mode = #tpu.pipeline_mode<synchronous>, transform_indices = @transform_5, window_bounds = array<i64: 1000, 80>}, {pipeline_mode = #tpu.pipeline_mode<synchronous>, transform_indices = @transform_6, window_bounds = array<i64: 1000, 1>}, {pipeline_mode = #tpu.pipeline_mode<synchronous>, transform_indices = @transform_7, window_bounds = array<i64: 1, 1000>}, {pipeline_mode = #tpu.pipeline_mode<synchronous>, transform_indices = @transform_8, window_bounds = array<i64: 1, 1>}, {transform_indices = @transform_9, window_bounds = array<i64: 1, 256>}]} {
    %c0 = arith.constant 0 : index
    %c0_0 = arith.constant 0 : index
    %0 = vector.load %arg1[%c0, %c0_0] : memref<256x2048xbf16, #tpu.memory_space<vmem>>, vector<256x2048xbf16>
    %c0_1 = arith.constant 0 : index
    %c0_2 = arith.constant 0 : index
    %1 = vector.load %arg2[%c0_1, %c0_2] : memref<2048x720xbf16, #tpu.memory_space<vmem>>, vector<2048x720xbf16>
    %cst = arith.constant dense<0.000000e+00> : vector<256x720xf32>
    %2 = tpu.matmul %0, %1, %cst {dimension_numbers = #tpu.dot_dimension_numbers<[1], [0], [0], [1], [0, 0, 1, 1], [], []>} : vector<256x2048xbf16>, vector<2048x720xbf16>, vector<256x720xf32> -> vector<256x720xf32>
    %c0_3 = arith.constant 0 : index
    %c0_4 = arith.constant 0 : index
    %3 = vector.load %arg3[%c0_3, %c0_4] : memref<1x720xf32, #tpu.memory_space<vmem>>, vector<1x720xf32>
    %4 = vector.broadcast %3 : vector<1x720xf32> to vector<256x720xf32>
    %5 = arith.addf %2, %4 : vector<256x720xf32>
    %cst_5 = arith.constant 0.000000e+00 : f32
    %6 = vector.broadcast %cst_5 : f32 to vector<256x720xf32>
    %7 = arith.maximumf %5, %6 : vector<256x720xf32>
    %8 = arith.truncf %7 : vector<256x720xf32> to vector<256x720xbf16>
    %c0_6 = arith.constant 0 : index
    %c0_7 = arith.constant 0 : index
    %9 = vector.load %arg4[%c0_6, %c0_7] : memref<720x80xbf16, #tpu.memory_space<vmem>>, vector<720x80xbf16>
    %cst_8 = arith.constant dense<0.000000e+00> : vector<256x80xf32>
    %10 = tpu.matmul %8, %9, %cst_8 {dimension_numbers = #tpu.dot_dimension_numbers<[1], [0], [0], [1], [0, 0, 1, 1], [], []>} : vector<256x720xbf16>, vector<720x80xbf16>, vector<256x80xf32> -> vector<256x80xf32>
    %c0_9 = arith.constant 0 : index
    %c0_10 = arith.constant 0 : index
    %11 = vector.load %arg5[%c0_9, %c0_10] : memref<1x80xf32, #tpu.memory_space<vmem>>, vector<1x80xf32>
    %12 = vector.broadcast %11 : vector<1x80xf32> to vector<256x80xf32>
    %13 = arith.addf %10, %12 : vector<256x80xf32>
    %cst_11 = arith.constant 0.000000e+00 : f32
    %14 = vector.broadcast %cst_11 : f32 to vector<256x80xf32>
    %15 = arith.maximumf %13, %14 : vector<256x80xf32>
    %c0_12 = arith.constant 0 : index
    %c0_13 = arith.constant 0 : index
    %16 = vector.load %arg6[%c0_12, %c0_13] : memref<1000x80xbf16, #tpu.memory_space<vmem>>, vector<1000x80xbf16>
    %17 = arith.truncf %15 : vector<256x80xf32> to vector<256x80xbf16>
    %cst_14 = arith.constant dense<0.000000e+00> : vector<1000x256xf32>
    %18 = tpu.matmul %16, %17, %cst_14 {dimension_numbers = #tpu.dot_dimension_numbers<[1], [1], [0], [0], [0, 0, 1, 0], [], []>} : vector<1000x80xbf16>, vector<256x80xbf16>, vector<1000x256xf32> -> vector<1000x256xf32>
    %c0_15 = arith.constant 0 : index
    %c0_16 = arith.constant 0 : index
    %19 = vector.load %arg7[%c0_15, %c0_16] : memref<1000x1xf32, #tpu.memory_space<vmem>>, vector<1000x1xf32>
    %20 = vector.broadcast %19 : vector<1000x1xf32> to vector<1000x256xf32>
    %21 = arith.addf %18, %20 : vector<1000x256xf32>
    %cst_17 = arith.constant 0.000000e+00 : f32
    %22 = vector.broadcast %cst_17 : f32 to vector<1000x256xf32>
    %23 = arith.maximumf %21, %22 : vector<1000x256xf32>
    %c0_18 = arith.constant 0 : index
    %c0_19 = arith.constant 0 : index
    %24 = vector.load %arg8[%c0_18, %c0_19] : memref<1x1000xbf16, #tpu.memory_space<vmem>>, vector<1x1000xbf16>
    %25 = arith.truncf %23 : vector<1000x256xf32> to vector<1000x256xbf16>
    %cst_20 = arith.constant dense<0.000000e+00> : vector<1x256xf32>
    %26 = tpu.matmul %24, %25, %cst_20 {dimension_numbers = #tpu.dot_dimension_numbers<[1], [0], [0], [1], [0, 0, 1, 1], [], []>} : vector<1x1000xbf16>, vector<1000x256xbf16>, vector<1x256xf32> -> vector<1x256xf32>
    %c0_21 = arith.constant 0 : index
    %c0_22 = arith.constant 0 : index
    %27 = vector.load %arg9[%c0_21, %c0_22] : memref<1x1xf32, #tpu.memory_space<vmem>>, vector<1x1xf32>
    %28 = vector.broadcast %27 : vector<1x1xf32> to vector<1x256xf32>
    %29 = arith.addf %26, %28 : vector<1x256xf32>
    %cst_23 = arith.constant 0.000000e+00 : f32
    %30 = vector.broadcast %cst_23 : f32 to vector<1x256xf32>
    %31 = arith.maximumf %29, %30 : vector<1x256xf32>
    %c0_24 = arith.constant 0 : index
    %c0_25 = arith.constant 0 : index
    %32 = vector.load %arg10[%c0_24, %c0_25] : memref<1x256xf32, #tpu.memory_space<vmem>>, vector<1x256xf32>
    tpu.vector_store %arg10[%c0_24, %c0_25], %31 {strides = array<i32>} : memref<1x256xf32, #tpu.memory_space<vmem>>, vector<1x256xf32>,
    return
  }
  func.func @transform_0(%arg0: i32) -> (i32, i32) {
    %c0_i32 = arith.constant 0 : i32
    %c0_i32_0 = arith.constant 0 : i32
    return %arg0, %c0_i32 : i32, i32
  }
  func.func @transform_1(%arg0: i32) -> (i32, i32) {
    %c0_i32 = arith.constant 0 : i32
    %c0_i32_0 = arith.constant 0 : i32
    %c0_i32_1 = arith.constant 0 : i32
    return %c0_i32, %c0_i32_0 : i32, i32
  }
  func.func @transform_2(%arg0: i32) -> (i32, i32) {
    %c0_i32 = arith.constant 0 : i32
    %c0_i32_0 = arith.constant 0 : i32
    %c0_i32_1 = arith.constant 0 : i32
    return %c0_i32, %c0_i32_0 : i32, i32
  }
  func.func @transform_3(%arg0: i32) -> (i32, i32) {
    %c0_i32 = arith.constant 0 : i32
    %c0_i32_0 = arith.constant 0 : i32
    %c0_i32_1 = arith.constant 0 : i32
    return %c0_i32, %c0_i32_0 : i32, i32
  }
  func.func @transform_4(%arg0: i32) -> (i32, i32) {
    %c0_i32 = arith.constant 0 : i32
    %c0_i32_0 = arith.constant 0 : i32
    %c0_i32_1 = arith.constant 0 : i32
    return %c0_i32, %c0_i32_0 : i32, i32
  }
  func.func @transform_5(%arg0: i32) -> (i32, i32) {
    %c0_i32 = arith.constant 0 : i32
    %c0_i32_0 = arith.constant 0 : i32
    %c0_i32_1 = arith.constant 0 : i32
    return %c0_i32, %c0_i32_0 : i32, i32
  }
  func.func @transform_6(%arg0: i32) -> (i32, i32) {
    %c0_i32 = arith.constant 0 : i32
    %c0_i32_0 = arith.constant 0 : i32
    %c0_i32_1 = arith.constant 0 : i32
    return %c0_i32, %c0_i32_0 : i32, i32
  }
  func.func @transform_7(%arg0: i32) -> (i32, i32) {
    %c0_i32 = arith.constant 0 : i32
    %c0_i32_0 = arith.constant 0 : i32
    %c0_i32_1 = arith.constant 0 : i32
    return %c0_i32, %c0_i32_0 : i32, i32
  }
  func.func @transform_8(%arg0: i32) -> (i32, i32) {
    %c0_i32 = arith.constant 0 : i32
    %c0_i32_0 = arith.constant 0 : i32
    %c0_i32_1 = arith.constant 0 : i32
    return %c0_i32, %c0_i32_0 : i32, i32
  }
  func.func @transform_9(%arg0: i32) -> (i32, i32) {
    %c0_i32 = arith.constant 0 : i32
    %c0_i32_0 = arith.constant 0 : i32
    return %c0_i32, %arg0 : i32, i32
  }
}

</mosaic_0001>

<bundles_post_ra>
// kernel: grid_network_forward.1
= control target key start
LH: loop header
LB: loop body
LE: loop exit
PB: predicated region body
PF: predicated region fallthrough
CT: control target
= control target key end

     0   :  { %s25654_s0 = inlined_call_operand.vmem [shape: bf16[1024,2048], index: 0, kind: input, shape index: {}]   ;;  %s25655_s1 = inlined_call_operand.vmem [shape: bf16[2048,720], index: 1, kind: input, shape index: {}]   ;;  %s25656_s2 = inlined_call_operand.vmem [shape: f32[1,720], index: 2, kind: input, shape index: {}]   ;;  %s25657_s3 = inlined_call_operand.vmem [shape: bf16[720,80], index: 3, kind: input, shape index: {}]   ;;  %s25658_s4 = inlined_call_operand.vmem [shape: f32[1,80], index: 4, kind: input, shape index: {}]   ;;  %s25659_s5 = inlined_call_operand.vmem [shape: bf16[1000,80], index: 5, kind: input, shape index: {}]   ;;  %s25660_s6 = inlined_call_operand.vmem [shape: f32[1000,1], index: 6, kind: input, shape index: {}]   ;;  %s25661_s7 = inlined_call_operand.vmem [shape: bf16[1,1000], index: 7, kind: input, shape index: {}]   ;;  %s25662_s8 = inlined_call_operand.<no memory space> [shape: f32[1,1], index: 8, kind: input, shape index: {}]   ;;  %s25663_s9 = inlined_call_operand.hbm [shape: f32[1,1024], index: 9, kind: output, shape index: {}]  }
   0x1   :  { %v14_v0 = vstv %s25662_s8 }
   0x2   :  { %15 = vst [vmem:[#allocation2] sm:$0x1] %v14_v0 }
   0x3   :  { %16 = vsyncpa [#allocation4], 0 }
   0x4   :  { %18 = vsyncpa [#allocation4 + $0x1], 0  ;;  %s19765_s11 = smov 0   ;;  %s19767_s12 = smov 0  }
   0x5   :  { %s19769_s13 = smov 0   ;;  %s19771_s14 = smov 0  }
   0x6 LB: > { %s15186_s8 = sadd.s32 4294967295, %s19707_s14   ;;  %s15187_s15 = sadd.s32 4294967294, %s19707_s14   ;;  %s19707_s14 = sphi %s19771_s14, %s26441_s14   ;;  %s19703_s13 = sphi %s19769_s13, %s26440_s13   ;;  %s19699_s12 = sphi %s19767_s12, %s26439_s12   ;;  %s19695_s11 = sphi %s19765_s11, %s26438_s11  }
   0x7   : > { %s19788_s16 = sadd.s32 1, %s19707_s14   ;;  %s225_s17 = sadd.s32 1, %s19703_s13 }
   0x8   : > { %s222_s18 = ssub.s32 %s19707_s14, %s19788_s16  ;;  %p235_p0 = scmp.ne.s32.totalorder %s19703_s13, %s19699_s12 }
   0x9   : > { %p223_p1 = scmp.eq.s32.totalorder %s222_s18, 0  ;;  %p236_p2 = scmp.eq.s32.totalorder %s15186_s8, 3 }
   0xa   : > { %p241_p3 = scmp.ne.s32.totalorder %s19699_s12, %s19695_s11  ;;  %p242_p4 = scmp.eq.s32.totalorder %s15187_s15, 3 }
   0xb   : > { %s19800_s19 = scalar_select %p223_p1, %s19703_s13, %s225_s17  }
   0xc   : > { %p19802_p5 = por %p236_p2, %p235_p0  ;;  %p19806_p6 = por %p242_p4, %p241_p3 }
   0xd   : > { %p15190_p7 = scmp.ge.s32.totalorder %s19707_s14, 1  ;;  %p294_p8 = scmp.lt.s32.totalorder %s19707_s14, 5 }
   0xf   : > { %p295_p9 = pnand %p15190_p7, %p294_p8 }
  0x11   : > { %298 = sbr.rel (%p295_p9) target bundleno = 3535 (0xdcf), region = 56 }
  0x18   : > { %v18381_v1 = vld [vmem:[%s25655_s1 + $0x4] ss:$24 sps:$4 sm:$0xff]   ;;  %v18385_v3 = vld [vmem:[%s25655_s1] ss:$24 sps:$4 sm:$0xff]   ;;  %v18387_v5 = vld [vmem:[%s25655_s1 + $0x34] ss:$24 sps:$4 sm:$0xff]  }
  0x19   : > { %v18383_v2 = vld [vmem:[%s25655_s1 + $0xc] ss:$24 sps:$4 sm:$0xff]   ;;  %6516 = vmatprep.subr.bf16.mxu0 %v18381_v1  ;;  %v18386_v4 = vld [vmem:[%s25655_s1 + $0x8] ss:$24 sps:$4 sm:$0xff]   ;;  %v18389_v6 = vld [vmem:[%s25655_s1 + $0x3c] ss:$24 sps:$4 sm:$0xff]  }
  0x1a   : > { %8060 = vmatprep.subr.bf16.mxu1 %v18383_v2  ;;  %6517 = vmatpush1.bf16.msra.mxu0 %v18385_v3  ;;  %v18391_v7 = vld [vmem:[%s25655_s1 + $0x30] ss:$24 sps:$4 sm:$0xff]   ;;  %v18393_v9 = vld [vmem:[%s25655_s1 + $0x64] ss:$24 sps:$4 sm:$0xff]   ;;  %v18397_v11 = vld [vmem:[%s25655_s1 + $0x60] ss:$24 sps:$4 sm:$0xff]  }
  0x1b   : > { %8061 = vmatpush1.bf16.msra.mxu1 %v18386_v4  ;;  %6518 = vmatprep.subr.bf16.mxu0 %v18387_v5  ;;  %v18392_v8 = vld [vmem:[%s25655_s1 + $0x38] ss:$24 sps:$4 sm:$0xff]   ;;  %v18395_v10 = vld [vmem:[%s25655_s1 + $0x6c] ss:$24 sps:$4 sm:$0xff]   ;;  %v18398_v12 = vld [vmem:[%s25655_s1 + $0x68] ss:$24 sps:$4 sm:$0xff]  }
  0x1c   : > { %8062 = vmatprep.subr.bf16.mxu1 %v18389_v6  ;;  %v18399_v13 = vld [vmem:[%s25655_s1 + $0x94] ss:$24 sps:$4 sm:$0xff]   ;;  %v18403_v15 = vld [vmem:[%s25655_s1 + $0x90] ss:$24 sps:$4 sm:$0xff]   ;;  %v18405_v17 = vld [vmem:[%s25655_s1 + $0xc4] ss:$24 sps:$4 sm:$0xff]  }
  0x1d   : > { %v18401_v14 = vld [vmem:[%s25655_s1 + $0x9c] ss:$24 sps:$4 sm:$0xff]   ;;  %v18404_v16 = vld [vmem:[%s25655_s1 + $0x98] ss:$24 sps:$4 sm:$0xff]   ;;  %v18407_v18 = vld [vmem:[%s25655_s1 + $0xcc] ss:$24 sps:$4 sm:$0xff]  }
  0x1e   : > { %6519 = vmatpush1.bf16.msra.mxu0 %v18391_v7  ;;  %v18409_v19 = vld [vmem:[%s25655_s1 + $0xc0] ss:$24 sps:$4 sm:$0xff]   ;;  %v18411_v21 = vld [vmem:[%s25655_s1 + $0xf4] ss:$24 sps:$4 sm:$0xff]   ;;  %v18415_v23 = vld [vmem:[%s25655_s1 + $0xf0] ss:$24 sps:$4 sm:$0xff]  }
  0x1f   : > { %8063 = vmatpush1.bf16.msra.mxu1 %v18392_v8  ;;  %6520 = vmatprep.subr.bf16.mxu0 %v18393_v9  ;;  %v18410_v20 = vld [vmem:[%s25655_s1 + $0xc8] ss:$24 sps:$4 sm:$0xff]   ;;  %v18413_v22 = vld [vmem:[%s25655_s1 + $0xfc] ss:$24 sps:$4 sm:$0xff]   ;;  %v18416_v24 = vld [vmem:[%s25655_s1 + $0xf8] ss:$24 sps:$4 sm:$0xff]  }
  0x20   : > { %8064 = vmatprep.subr.bf16.mxu1 %v18395_v10  ;;  %v18417_v25 = vld [vmem:[%s25655_s1 + $0x124] ss:$24 sps:$4 sm:$0xff]   ;;  %v18421_v27 = vld [vmem:[%s25655_s1 + $0x120] ss:$24 sps:$4 sm:$0xff]   ;;  %v18423_v29 = vld [vmem:[%s25655_s1 + $0x154] ss:$24 sps:$4 sm:$0xff]  }
  0x21   : > { %v18419_v26 = vld [vmem:[%s25655_s1 + $0x12c] ss:$24 sps:$4 sm:$0xff]   ;;  %v18422_v28 = vld [vmem:[%s25655_s1 + $0x128] ss:$24 sps:$4 sm:$0xff]   ;;  %v18425_v30 = vld [vmem:[%s25655_s1 + $0x15c] ss:$24 sps:$4 sm:$0xff]  }
  0x22   : > { %6521 = vmatpush1.bf16.msra.mxu0 %v18397_v11  ;;  %s19904_s30 = sshll.u32 %s15186_s8, 5  ;;  %v18427_v31 = vld [vmem:[%s25655_s1 + $0x150] ss:$24 sps:$4 sm:$0xff]   ;;  %v18429_v33 = vld [vmem:[%s25655_s1 + $0x184] ss:$24 sps:$4 sm:$0xff]   ;;  %vm11803_vm0 = vcmask 654336  }
  0x23   : > { %8065 = vmatpush1.bf16.msra.mxu1 %v18398_v12  ;;  %6522 = vmatprep.subr.bf16.mxu0 %v18399_v13  ;;  %v18428_v32 = vld [vmem:[%s25655_s1 + $0x158] ss:$24 sps:$4 sm:$0xff]   ;;  %p332_p10 = scmp.lt.s32.totalorder %s19904_s30, 127  ;;  %v18431_v34 = vld [vmem:[%s25655_s1 + $0x18c] ss:$24 sps:$4 sm:$0xff]   ;;  %vm14913_vm1 = vcmask 850944   ;;  %s25612_s25 = scalar_lea.hbm %s25663_s9, %s19904_s30 }
  0x24   : > { %8066 = vmatprep.subr.bf16.mxu1 %v18401_v14  ;;  %v18433_v35 = vld [vmem:[%s25655_s1 + $0x180] ss:$24 sps:$4 sm:$0xff]   ;;  %v18435_v37 = vld [vmem:[%s25655_s1 + $0x1b4] ss:$24 sps:$4 sm:$0xff]   ;;  %v18439_v39 = vld [vmem:[%s25655_s1 + $0x1b0] ss:$24 sps:$4 sm:$0xff]  }
  0x25   : > { %v18434_v36 = vld [vmem:[%s25655_s1 + $0x188] ss:$24 sps:$4 sm:$0xff]   ;;  %s333_s15 = scalar_select %p332_p10, %s19904_s30, 127  ;;  %v18437_v38 = vld [vmem:[%s25655_s1 + $0x1bc] ss:$24 sps:$4 sm:$0xff]   ;;  %vm14917_vm2 = vcmask 1043456  }
  0x26   : > { %6523 = vmatpush1.bf16.msra.mxu0 %v18403_v15  ;;  %v18440_v40 = vld [vmem:[%s25655_s1 + $0x1b8] ss:$24 sps:$4 sm:$0xff]   ;;  %v18441_v41 = vld [vmem:[%s25655_s1 + $0x1e4] ss:$24 sps:$4 sm:$0xff]   ;;  %v18446_v44 = vld [vmem:[%s25655_s1 + $0x1e8] ss:$24 sps:$4 sm:$0xff]  }
  0x27   : > { %8067 = vmatpush1.bf16.msra.mxu1 %v18404_v16  ;;  %6524 = vmatprep.subr.bf16.mxu0 %v18405_v17  ;;  %s16414_s27 = sshll.u32 %s333_s15, 6  ;;  %v18443_v42 = vld [vmem:[%s25655_s1 + $0x1ec] ss:$24 sps:$4 sm:$0xff]   ;;  %v18445_v43 = vld [vmem:[%s25655_s1 + $0x1e0] ss:$24 sps:$4 sm:$0xff]   ;;  %s328_s17 = sand.u32 1, %s19699_s12  }
  0x28   : > { %8068 = vmatprep.subr.bf16.mxu1 %v18407_v18  ;;  %s19953_s24 = scalar_lea.vmem %s25654_s0, %s16414_s27  ;;  %v18447_v45 = vld [vmem:[%s25655_s1 + $0x214] ss:$24 sps:$4 sm:$0xff]   ;;  %v18451_v49 = vld [vmem:[%s25655_s1 + $0x210] ss:$24 sps:$4 sm:$0xff]   ;;  %v18453_v52 = vld [vmem:[%s25655_s1 + $0x244] ss:$24 sps:$4 sm:$0xff]  }
  0x29   : > { %v18449_v46 = vld [vmem:[%s25655_s1 + $0x21c] ss:$24 sps:$4 sm:$0xff]   ;;  %v340_v47 = vld [vmem:[%s19953_s24] sm:$0xff]  ;;  %v18452_v50 = vld [vmem:[%s25655_s1 + $0x218] ss:$24 sps:$4 sm:$0xff]   ;;  %s15191_s18 = sshll.u32 %s328_s17, 1 }
  0x2a   : > { %6525 = vmatpush1.bf16.msra.mxu0 %v18409_v19  ;;  %v348_v48 = vld [vmem:[%s19953_s24 + $0x40] sm:$0xff]  ;;  %v18459_v56 = vld [vmem:[%s25655_s1 + $0x274] ss:$24 sps:$4 sm:$0xff]   ;;  %v18463_v58 = vld [vmem:[%s25655_s1 + $0x270] ss:$24 sps:$4 sm:$0xff]   ;;  %s330_s22 = scalar_lea.vmem [#allocation3], %s15191_s18 }
  0x2b   : > { %8069 = vmatpush1.bf16.msra.mxu1 %v18410_v20  ;;  %6526 = vmatprep.subr.bf16.mxu0 %v18411_v21  ;;  %v19969_v51 = vcombine.high %v340_v47, %v348_v48  ;;  %v18455_v53 = vld [vmem:[%s25655_s1 + $0x24c] ss:$24 sps:$4 sm:$0xff]   ;;  %v18457_v54 = vld [vmem:[%s25655_s1 + $0x240] ss:$24 sps:$4 sm:$0xff]   ;;  %v18461_v57 = vld [vmem:[%s25655_s1 + $0x27c] ss:$24 sps:$4 sm:$0xff]   ;;  %v20029_v8 = vcombine.low %v340_v47, %v348_v48 }
  0x2c   : > { %8070 = vmatprep.subr.bf16.mxu1 %v18413_v22  ;;  %v18458_v55 = vld [vmem:[%s25655_s1 + $0x248] ss:$24 sps:$4 sm:$0xff]   ;;  %v18464_v59 = vld [vmem:[%s25655_s1 + $0x278] ss:$24 sps:$4 sm:$0xff]   ;;  %v18465_v60 = vld [vmem:[%s25655_s1 + $0x2a4] ss:$24 sps:$4 sm:$0xff]  }
  0x2d   : > { %6548 = vmatprep.mubr.bf16.mxu0 %v19969_v51  ;;  %8092 = vmatprep.mubr.bf16.mxu1 %v19969_v51  ;;  %v18467_v61 = vld [vmem:[%s25655_s1 + $0x2ac] ss:$24 sps:$4 sm:$0xff]   ;;  %v18469_v62 = vld [vmem:[%s25655_s1 + $0x2a0] ss:$24 sps:$4 sm:$0xff]   ;;  %v18473_v1 = vld [vmem:[%s25655_s1 + $0x2dc] ss:$24 sps:$4 sm:$0xff]  }
  0x2e   : > { %6527 = vmatpush1.bf16.msra.mxu0 %v18415_v23  ;;  %v18470_v63 = vld [vmem:[%s25655_s1 + $0x2a8] ss:$24 sps:$4 sm:$0xff]   ;;  %v18471_v0 = vld [vmem:[%s25655_s1 + $0x2d4] ss:$24 sps:$4 sm:$0xff]   ;;  %v18476_v3 = vld [vmem:[%s25655_s1 + $0x2d8] ss:$24 sps:$4 sm:$0xff]  }
  0x2f   : > { %8071 = vmatpush1.bf16.msra.mxu1 %v18416_v24  ;;  %6528 = vmatprep.subr.bf16.mxu0 %v18417_v25  ;;  %v18475_v2 = vld [vmem:[%s25655_s1 + $0x2d0] ss:$24 sps:$4 sm:$0xff]   ;;  %v356_v4 = vld [vmem:[%s19953_s24 + $0x80] sm:$0xff]  ;;  %v18485_v12 = vld [vmem:[%s25655_s1 + $0x334] ss:$24 sps:$4 sm:$0xff]   ;;  %s15128_s23 = sshll.u32 %s330_s22, 4  ;;  %s25614_s23 = int_to_ptr.vmem [resolvable:$true] %s15128_s23 }
  0x30   : > { %8072 = vmatprep.subr.bf16.mxu1 %v18419_v26  ;;  %v364_v5 = vld [vmem:[%s19953_s24 + $0xc0] sm:$0xff]  ;;  %v18488_v13 = vld [vmem:[%s25655_s1 + $0x33c] ss:$24 sps:$4 sm:$0xff]   ;;  %v18483_v16 = vld [vmem:[%s25655_s1 + $0x330] ss:$24 sps:$4 sm:$0xff]   ;;  %s19645_s26 = scalar_lea.vmem %s25614_s23, 32 }
  0x31   : > { %v18479_v6 = vld [vmem:[%s25655_s1 + $0x304] ss:$24 sps:$4 sm:$0xff]   ;;  %v20031_v9 = vcombine.high %v356_v4, %v364_v5  ;;  %v18477_v10 = vld [vmem:[%s25655_s1 + $0x300] ss:$24 sps:$4 sm:$0xff]   ;;  %v20063_v20 = vcombine.low %v356_v4, %v364_v5  ;;  %v18497_v24 = vld [vmem:[%s25655_s1 + $0x394] ss:$24 sps:$4 sm:$0xff]   ;;  %p19646_p11 = scmp.ne.s32.totalorder %s25614_s23, %s19645_s26 }
  0x32   : > { %6529 = vmatpush1.bf16.msra.mxu0 %v18421_v27  ;;  %v18482_v7 = vld [vmem:[%s25655_s1 + $0x30c] ss:$24 sps:$4 sm:$0xff]   ;;  %v18480_v11 = vld [vmem:[%s25655_s1 + $0x308] ss:$24 sps:$4 sm:$0xff]   ;;  %v18486_v17 = vld [vmem:[%s25655_s1 + $0x338] ss:$24 sps:$4 sm:$0xff]  }
  0x33   : > { %8073 = vmatpush1.bf16.msra.mxu1 %v18422_v28  ;;  %6530 = vmatprep.subr.bf16.mxu0 %v18423_v29  ;;  %v372_v14 = vld [vmem:[%s19953_s24 + $0x100] sm:$0xff]  ;;  %v18500_v25 = vld [vmem:[%s25655_s1 + $0x39c] ss:$24 sps:$4 sm:$0xff]   ;;  %v18495_v28 = vld [vmem:[%s25655_s1 + $0x390] ss:$24 sps:$4 sm:$0xff]   ;;  %p19647_p12 = pnand %p19646_p11, %p19802_p5  ;;  %s19711_s28 = smov [#allocation3]  }
  0x34   : > { %8074 = vmatprep.subr.bf16.mxu1 %v18425_v30  ;;  %v380_v15 = vld [vmem:[%s19953_s24 + $0x140] sm:$0xff]  ;;  %v18498_v29 = vld [vmem:[%s25655_s1 + $0x398] ss:$24 sps:$4 sm:$0xff]   ;;  %v18521_v48 = vld [vmem:[%s25655_s1 + $0x454] ss:$24 sps:$4 sm:$0xff]   ;;  %s19649_s27 = sshll.u32 %s19711_s28, 4  ;;  %s19650_s27 = int_to_ptr.vmem [resolvable:$false] %s19649_s27 }
  0x35   : > { %v18491_v18 = vld [vmem:[%s25655_s1 + $0x364] ss:$24 sps:$4 sm:$0xff]   ;;  %v20065_v21 = vcombine.high %v372_v14, %v380_v15  ;;  %v18489_v22 = vld [vmem:[%s25655_s1 + $0x360] ss:$24 sps:$4 sm:$0xff]   ;;  %p19648_p13 = pneg %p19647_p12  ;;  %s19651_s29 = scalar_lea.vmem %s19650_s27, 64 }
  0x36   : > { %6531 = vmatpush1.bf16.msra.mxu0 %v18427_v31  ;;  %v18494_v19 = vld [vmem:[%s25655_s1 + $0x36c] ss:$24 sps:$4 sm:$0xff]   ;;  %v18492_v23 = vld [vmem:[%s25655_s1 + $0x368] ss:$24 sps:$4 sm:$0xff]   ;;  %p19652_p0 = scmp.lt.s32.totalorder %s25614_s23, %s19650_s27  ;;  %p19653_p1 = scmp.lt.s32.totalorder %s19651_s29, %s19645_s26 }
  0x37   : > { %8075 = vmatpush1.bf16.msra.mxu1 %v18428_v32  ;;  %6532 = vmatprep.subr.bf16.mxu0 %v18429_v33  ;;  %v388_v26 = vld [vmem:[%s19953_s24 + $0x180] sm:$0xff]  ;;  %v20097_v32 = vcombine.low %v372_v14, %v380_v15  ;;  %v18543_v15 = vld [vmem:[%s25655_s1 + $0x510] ss:$24 sps:$4 sm:$0xff]  }
  0x38   : > { %8076 = vmatprep.subr.bf16.mxu1 %v18431_v34  ;;  %v396_v27 = vld [vmem:[%s19953_s24 + $0x1c0] sm:$0xff]  ;;  %p19654_p2 = por %p19653_p1, %p19652_p0 }
  0x39   : > { %v18503_v30 = vld [vmem:[%s25655_s1 + $0x3c4] ss:$24 sps:$4 sm:$0xff]   ;;  %v20099_v33 = vcombine.high %v388_v26, %v396_v27  ;;  %v18501_v34 = vld [vmem:[%s25655_s1 + $0x3c0] ss:$24 sps:$4 sm:$0xff]  }
  0x3a   : > { %6533 = vmatpush1.bf16.msra.mxu0 %v18433_v35  ;;  %v18506_v31 = vld [vmem:[%s25655_s1 + $0x3cc] ss:$24 sps:$4 sm:$0xff]   ;;  %v18504_v35 = vld [vmem:[%s25655_s1 + $0x3c8] ss:$24 sps:$4 sm:$0xff]   ;;  %p19655_p3 = pnand %p19654_p2, %p19648_p13 }
  0x3b   : > { %8077 = vmatpush1.bf16.msra.mxu1 %v18434_v36  ;;  %6534 = vmatprep.subr.bf16.mxu0 %v18435_v37  ;;  %v18509_v36 = vld [vmem:[%s25655_s1 + $0x3f4] ss:$24 sps:$4 sm:$0xff]   ;;  %v18516_v47 = vld [vmem:[%s25655_s1 + $0x428] ss:$24 sps:$4 sm:$0xff]  }
  0x3c   : > { %8078 = vmatprep.subr.bf16.mxu1 %v18437_v38  ;;  %v18512_v37 = vld [vmem:[%s25655_s1 + $0x3fc] ss:$24 sps:$4 sm:$0xff]   ;;  %v404_v38 = vld [vmem:[%s19953_s24 + $0x200] sm:$0xff] }
  0x3d   : > { %v18542_v4 = vld [vmem:[%s25655_s1 + $0x4ec] ss:$24 sps:$4 sm:$0xff]  }
  0x3e   : > { %6535 = vmatpush1.bf16.msra.mxu0 %v18439_v39  ;;  %v412_v39 = vld [vmem:[%s19953_s24 + $0x240] sm:$0xff] }
  0x3f   : > { %8079 = vmatpush1.bf16.msra.mxu1 %v18440_v40  ;;  %6536 = vmatprep.subr.bf16.mxu0 %v18441_v41  ;;  %v18507_v40 = vld [vmem:[%s25655_s1 + $0x3f0] ss:$24 sps:$4 sm:$0xff]   ;;  %v460_v14 = vld [vmem:[%s19953_s24 + $0x3c0] sm:$0xff] }
  0x40   : > { %8080 = vmatprep.subr.bf16.mxu1 %v18443_v42  ;;  %v18510_v41 = vld [vmem:[%s25655_s1 + $0x3f8] ss:$24 sps:$4 sm:$0xff]   ;;  %v18515_v42 = vld [vmem:[%s25655_s1 + $0x424] ss:$24 sps:$4 sm:$0xff]  }
  0x42   : > { %6537 = vmatpush1.bf16.msra.mxu0 %v18445_v43  ;;  %v18518_v43 = vld [vmem:[%s25655_s1 + $0x42c] ss:$24 sps:$4 sm:$0xff]  }
  0x43   : > { %8081 = vmatpush1.bf16.msra.mxu1 %v18446_v44  ;;  %6538 = vmatprep.subr.bf16.mxu0 %v18447_v45  ;;  %v20131_v44 = vcombine.low %v388_v26, %v396_v27  ;;  %v20133_v45 = vcombine.high %v404_v38, %v412_v39  ;;  %v18560_v26 = vld [vmem:[%s25655_s1 + $0x57c] ss:$24 sps:$4 sm:$0xff]   ;;  %v468_v27 = vld [vmem:[%s19953_s24 + $0x400] sm:$0xff] }
  0x44   : > { %8082 = vmatprep.subr.bf16.mxu1 %v18449_v46  ;;  %v18513_v46 = vld [vmem:[%s25655_s1 + $0x420] ss:$24 sps:$4 sm:$0xff]  }
  0x46   : > { %6539 = vmatpush1.bf16.msra.mxu0 %v18451_v49  ;;  %v18524_v49 = vld [vmem:[%s25655_s1 + $0x45c] ss:$24 sps:$4 sm:$0xff]  }
  0x47   : > { %8083 = vmatpush1.bf16.msra.mxu1 %v18452_v50  ;;  %6540 = vmatprep.subr.bf16.mxu0 %v18453_v52  ;;  %v420_v50 = vld [vmem:[%s19953_s24 + $0x280] sm:$0xff] }
  0x48   : > { %8084 = vmatprep.subr.bf16.mxu1 %v18455_v53  ;;  %v428_v52 = vld [vmem:[%s19953_s24 + $0x2c0] sm:$0xff]  ;;  %v18519_v53 = vld [vmem:[%s25655_s1 + $0x450] ss:$24 sps:$4 sm:$0xff]  }
  0x49   : > { %v20199_v5 = vcombine.low %v420_v50, %v428_v52 }
  0x4a   : > { %6541 = vmatpush1.bf16.msra.mxu0 %v18457_v54  ;;  %v18522_v54 = vld [vmem:[%s25655_s1 + $0x458] ss:$24 sps:$4 sm:$0xff]  }
  0x4b   : > { %8085 = vmatpush1.bf16.msra.mxu1 %v18458_v55  ;;  %6542 = vmatprep.subr.bf16.mxu0 %v18459_v56  ;;  %v18527_v55 = vld [vmem:[%s25655_s1 + $0x484] ss:$24 sps:$4 sm:$0xff]  }
  0x4c   : > { %8086 = vmatprep.subr.bf16.mxu1 %v18461_v57  ;;  %v18530_v56 = vld [vmem:[%s25655_s1 + $0x48c] ss:$24 sps:$4 sm:$0xff]   ;;  %v20165_v57 = vcombine.low %v404_v38, %v412_v39 }
  0x4d   : > { %v18569_v39 = vld [vmem:[%s25655_s1 + $0x5d4] ss:$24 sps:$4 sm:$0xff]  }
  0x4e   : > { %6543 = vmatpush1.bf16.msra.mxu0 %v18463_v58  ;;  %v20167_v58 = vcombine.high %v420_v50, %v428_v52  ;;  %v18578_v50 = vld [vmem:[%s25655_s1 + $0x60c] ss:$24 sps:$4 sm:$0xff]  }
  0x4f   : > { %8087 = vmatpush1.bf16.msra.mxu1 %v18464_v59  ;;  %6544 = vmatprep.subr.bf16.mxu0 %v18465_v60  ;;  %v18525_v59 = vld [vmem:[%s25655_s1 + $0x480] ss:$24 sps:$4 sm:$0xff]  }
  0x50   : > { %8088 = vmatprep.subr.bf16.mxu1 %v18467_v61  ;;  %v18528_v60 = vld [vmem:[%s25655_s1 + $0x488] ss:$24 sps:$4 sm:$0xff]   ;;  %v18533_v61 = vld [vmem:[%s25655_s1 + $0x4b4] ss:$24 sps:$4 sm:$0xff]  }
  0x51   : > { %v500_v52 = vld [vmem:[%s19953_s24 + $0x500] sm:$0xff] }
  0x52   : > { %6545 = vmatpush1.bf16.msra.mxu0 %v18469_v62  ;;  %v18536_v62 = vld [vmem:[%s25655_s1 + $0x4bc] ss:$24 sps:$4 sm:$0xff]  }
  0x53   : > { %8089 = vmatpush1.bf16.msra.mxu1 %v18470_v63  ;;  %6546 = vmatprep.subr.bf16.mxu0 %v18471_v0  ;;  %v436_v63 = vld [vmem:[%s19953_s24 + $0x300] sm:$0xff] }
  0x54   : > { %8090 = vmatprep.subr.bf16.mxu1 %v18473_v1  ;;  %v444_v0 = vld [vmem:[%s19953_s24 + $0x340] sm:$0xff]  ;;  %v18531_v1 = vld [vmem:[%s25655_s1 + $0x4b0] ss:$24 sps:$4 sm:$0xff]  }
  0x56   : > { %6547 = vmatpush1.bf16.msra.mxu0 %v18475_v2  ;;  %v18534_v2 = vld [vmem:[%s25655_s1 + $0x4b8] ss:$24 sps:$4 sm:$0xff]  }
  0x57   : > { %8091 = vmatpush1.bf16.msra.mxu1 %v18476_v3  ;;  %6709 = vmatprep.subr.bf16.mxu0 %v18479_v6  ;;  %v18539_v3 = vld [vmem:[%s25655_s1 + $0x4e4] ss:$24 sps:$4 sm:$0xff]   ;;  %v18537_v6 = vld [vmem:[%s25655_s1 + $0x4e0] ss:$24 sps:$4 sm:$0xff]  }
  0x58   : > { %8253 = vmatprep.subr.bf16.mxu1 %v18482_v7  ;;  %v18540_v7 = vld [vmem:[%s25655_s1 + $0x4e8] ss:$24 sps:$4 sm:$0xff]  }
  0x59   : > { %6549 = vmatmul.mubr.bf16.vlgmr.msra.gmra.mrb[0].mxu0 %v20029_v8 }
  0x5a   : > { %8093 = vmatmul.mubr.bf16.vlgmr.msra.gmra.mrb[0].mxu1 %v20029_v8  ;;  %6558 = vmatprep.mubr.bf16.mxu0 %v20031_v9 }
  0x5b   : > { %8102 = vmatprep.mubr.bf16.mxu1 %v20031_v9  ;;  %6710 = vmatpush1.bf16.msra.mxu0 %v18477_v10  ;;  %v20207_v10 = vcombine.high %v436_v63, %v444_v0 }
  0x5c   : > { %8254 = vmatpush1.bf16.msra.mxu1 %v18480_v11  ;;  %6711 = vmatprep.subr.bf16.mxu0 %v18485_v12  ;;  %v18545_v11 = vld [vmem:[%s25655_s1 + $0x514] ss:$24 sps:$4 sm:$0xff]  }
  0x5d   : > { %8255 = vmatprep.subr.bf16.mxu1 %v18488_v13  ;;  %v18548_v12 = vld [vmem:[%s25655_s1 + $0x51c] ss:$24 sps:$4 sm:$0xff]   ;;  %v452_v13 = vld [vmem:[%s19953_s24 + $0x380] sm:$0xff] }
  0x5f   : > { %6712 = vmatpush1.bf16.msra.mxu0 %v18483_v16  ;;  %v18546_v16 = vld [vmem:[%s25655_s1 + $0x518] ss:$24 sps:$4 sm:$0xff]  }
  0x60   : > { %8256 = vmatpush1.bf16.msra.mxu1 %v18486_v17  ;;  %6713 = vmatprep.subr.bf16.mxu0 %v18491_v18  ;;  %v18551_v17 = vld [vmem:[%s25655_s1 + $0x544] ss:$24 sps:$4 sm:$0xff]  }
  0x61   : > { %8257 = vmatprep.subr.bf16.mxu1 %v18494_v19  ;;  %6559 = vmatmul.mubr.bf16.gmra.mrb[4].mxu0 %v20063_v20  ;;  %v18554_v18 = vld [vmem:[%s25655_s1 + $0x54c] ss:$24 sps:$4 sm:$0xff]   ;;  %v20233_v19 = vcombine.low %v436_v63, %v444_v0 }
  0x62   : > { %8103 = vmatmul.mubr.bf16.gmra.mrb[4].mxu1 %v20063_v20  ;;  %6568 = vmatprep.mubr.bf16.mxu0 %v20065_v21  ;;  %v540_v63 = vld [vmem:[%s19953_s24 + $0x640] sm:$0xff] }
  0x63   : > { %8112 = vmatprep.mubr.bf16.mxu1 %v20065_v21  ;;  %6714 = vmatpush1.bf16.msra.mxu0 %v18489_v22  ;;  %v18549_v22 = vld [vmem:[%s25655_s1 + $0x540] ss:$24 sps:$4 sm:$0xff]  }
  0x64   : > { %8258 = vmatpush1.bf16.msra.mxu1 %v18492_v23  ;;  %6715 = vmatprep.subr.bf16.mxu0 %v18497_v24  ;;  %v18552_v23 = vld [vmem:[%s25655_s1 + $0x548] ss:$24 sps:$4 sm:$0xff]   ;;  %v20241_v24 = vcombine.high %v452_v13, %v460_v14 }
  0x65   : > { %8259 = vmatprep.subr.bf16.mxu1 %v18500_v25  ;;  %v18557_v25 = vld [vmem:[%s25655_s1 + $0x574] ss:$24 sps:$4 sm:$0xff]  }
  0x67   : > { %6716 = vmatpush1.bf16.msra.mxu0 %v18495_v28  ;;  %v476_v28 = vld [vmem:[%s19953_s24 + $0x440] sm:$0xff] }
  0x68   : > { %8260 = vmatpush1.bf16.msra.mxu1 %v18498_v29  ;;  %6717 = vmatprep.subr.bf16.mxu0 %v18503_v30  ;;  %v18555_v29 = vld [vmem:[%s25655_s1 + $0x570] ss:$24 sps:$4 sm:$0xff]   ;;  %v20275_v38 = vcombine.high %v468_v27, %v476_v28 }
  0x69   : > { %8261 = vmatprep.subr.bf16.mxu1 %v18506_v31  ;;  %6569 = vmatmul.mubr.bf16.gmra.mrb[8].mxu0 %v20097_v32  ;;  %v18558_v30 = vld [vmem:[%s25655_s1 + $0x578] ss:$24 sps:$4 sm:$0xff]   ;;  %v18563_v31 = vld [vmem:[%s25655_s1 + $0x5a4] ss:$24 sps:$4 sm:$0xff]  }
  0x6a   : > { %8113 = vmatmul.mubr.bf16.gmra.mrb[8].mxu1 %v20097_v32  ;;  %6578 = vmatprep.mubr.bf16.mxu0 %v20099_v33 }
  0x6b   : > { %8122 = vmatprep.mubr.bf16.mxu1 %v20099_v33  ;;  %6718 = vmatpush1.bf16.msra.mxu0 %v18501_v34  ;;  %v18566_v34 = vld [vmem:[%s25655_s1 + $0x5ac] ss:$24 sps:$4 sm:$0xff]  }
  0x6c   : > { %8262 = vmatpush1.bf16.msra.mxu1 %v18504_v35  ;;  %6719 = vmatprep.subr.bf16.mxu0 %v18509_v36  ;;  %v20267_v35 = vcombine.low %v452_v13, %v460_v14  ;;  %v18561_v36 = vld [vmem:[%s25655_s1 + $0x5a0] ss:$24 sps:$4 sm:$0xff]  }
  0x6d   : > { %8263 = vmatprep.subr.bf16.mxu1 %v18512_v37  ;;  %v18564_v37 = vld [vmem:[%s25655_s1 + $0x5a8] ss:$24 sps:$4 sm:$0xff]  }
  0x6e   : > { %v580_v14 = vld [vmem:[%s19953_s24 + $0x780] sm:$0xff] }
  0x6f   : > { %6720 = vmatpush1.bf16.msra.mxu0 %v18507_v40  ;;  %v18572_v40 = vld [vmem:[%s25655_s1 + $0x5dc] ss:$24 sps:$4 sm:$0xff]  }
  0x70   : > { %8264 = vmatpush1.bf16.msra.mxu1 %v18510_v41  ;;  %6721 = vmatprep.subr.bf16.mxu0 %v18515_v42  ;;  %v484_v41 = vld [vmem:[%s19953_s24 + $0x480] sm:$0xff] }
  0x71   : > { %8265 = vmatprep.subr.bf16.mxu1 %v18518_v43  ;;  %6579 = vmatmul.mubr.bf16.gmra.mrb[12].mxu0 %v20131_v44  ;;  %v492_v42 = vld [vmem:[%s19953_s24 + $0x4c0] sm:$0xff]  ;;  %v18567_v43 = vld [vmem:[%s25655_s1 + $0x5d0] ss:$24 sps:$4 sm:$0xff]  }
  0x72   : > { %8123 = vmatmul.mubr.bf16.gmra.mrb[12].mxu1 %v20131_v44  ;;  %6588 = vmatprep.mubr.bf16.mxu0 %v20133_v45 }
  0x73   : > { %8132 = vmatprep.mubr.bf16.mxu1 %v20133_v45  ;;  %6722 = vmatpush1.bf16.msra.mxu0 %v18513_v46  ;;  %v18570_v46 = vld [vmem:[%s25655_s1 + $0x5d8] ss:$24 sps:$4 sm:$0xff]  }
  0x74   : > { %8266 = vmatpush1.bf16.msra.mxu1 %v18516_v47  ;;  %6723 = vmatprep.subr.bf16.mxu0 %v18521_v48  ;;  %v20295_v47 = vcombine.low %v468_v27, %v476_v28  ;;  %v20297_v48 = vcombine.high %v484_v41, %v492_v42  ;;  %v365_v27 = vld [vmem:[%s19953_s24 + $0xc8] sm:$0xff] }
  0x75   : > { %8267 = vmatprep.subr.bf16.mxu1 %v18524_v49  ;;  %v18575_v49 = vld [vmem:[%s25655_s1 + $0x604] ss:$24 sps:$4 sm:$0xff]  }
  0x77   : > { %6724 = vmatpush1.bf16.msra.mxu0 %v18519_v53  ;;  %v508_v53 = vld [vmem:[%s19953_s24 + $0x540] sm:$0xff] }
  0x78   : > { %8268 = vmatpush1.bf16.msra.mxu1 %v18522_v54  ;;  %6725 = vmatprep.subr.bf16.mxu0 %v18527_v55  ;;  %v20311_v54 = vcombine.low %v484_v41, %v492_v42  ;;  %v20313_v55 = vcombine.high %v500_v52, %v508_v53  ;;  %v18582_v41 = vld [vmem:[%s25655_s1 + $0x638] ss:$24 sps:$4 sm:$0xff]   ;;  %v18587_v42 = vld [vmem:[%s25655_s1 + $0x664] ss:$24 sps:$4 sm:$0xff]  }
  0x79   : > { %8269 = vmatprep.subr.bf16.mxu1 %v18530_v56  ;;  %6589 = vmatmul.mubr.bf16.gmra.mrb[16].mxu0 %v20165_v57  ;;  %v516_v56 = vld [vmem:[%s19953_s24 + $0x580] sm:$0xff] }
  0x7a   : > { %8133 = vmatmul.mubr.bf16.gmra.mrb[16].mxu1 %v20165_v57  ;;  %6598 = vmatprep.mubr.bf16.mxu0 %v20167_v58 }
  0x7b   : > { %8142 = vmatprep.mubr.bf16.mxu1 %v20167_v58  ;;  %6726 = vmatpush1.bf16.msra.mxu0 %v18525_v59  ;;  %v524_v59 = vld [vmem:[%s19953_s24 + $0x5c0] sm:$0xff] }
  0x7c   : > { %8270 = vmatpush1.bf16.msra.mxu1 %v18528_v60  ;;  %6727 = vmatprep.subr.bf16.mxu0 %v18533_v61  ;;  %v20321_v60 = vcombine.low %v500_v52, %v508_v53  ;;  %v20323_v61 = vcombine.high %v516_v56, %v524_v59  ;;  %v20331_v0 = vcombine.low %v516_v56, %v524_v59  ;;  %v18593_v53 = vld [vmem:[%s25655_s1 + $0x694] ss:$24 sps:$4 sm:$0xff]  }
  0x7d   : > { %8271 = vmatprep.subr.bf16.mxu1 %v18536_v62  ;;  %v532_v62 = vld [vmem:[%s19953_s24 + $0x600] sm:$0xff]  ;;  %v18596_v56 = vld [vmem:[%s25655_s1 + $0x69c] ss:$24 sps:$4 sm:$0xff]   ;;  %v389_v59 = vld [vmem:[%s19953_s24 + $0x188] sm:$0xff] }
  0x7f   : > { %6728 = vmatpush1.bf16.msra.mxu0 %v18531_v1  ;;  %v20333_v1 = vcombine.high %v532_v62, %v540_v63 }
  0x80   : > { %8272 = vmatpush1.bf16.msra.mxu1 %v18534_v2  ;;  %6729 = vmatprep.subr.bf16.mxu0 %v18539_v3  ;;  %v548_v2 = vld [vmem:[%s19953_s24 + $0x680] sm:$0xff] }
  0x81   : > { %8273 = vmatprep.subr.bf16.mxu1 %v18542_v4  ;;  %6599 = vmatmul.mubr.bf16.gmra.mrb[20].mxu0 %v20199_v5  ;;  %v556_v3 = vld [vmem:[%s19953_s24 + $0x6c0] sm:$0xff]  ;;  %v20341_v4 = vcombine.low %v532_v62, %v540_v63  ;;  %v397_v62 = vld [vmem:[%s19953_s24 + $0x1c8] sm:$0xff] }
  0x82   : > { %8143 = vmatmul.mubr.bf16.gmra.mrb[20].mxu1 %v20199_v5  ;;  %6608 = vmatprep.mubr.bf16.mxu0 %v20207_v10  ;;  %v18591_v63 = vld [vmem:[%s25655_s1 + $0x690] ss:$24 sps:$4 sm:$0xff]  }
  0x83   : > { %8152 = vmatprep.mubr.bf16.mxu1 %v20207_v10  ;;  %6730 = vmatpush1.bf16.msra.mxu0 %v18537_v6  ;;  %v20343_v6 = vcombine.high %v548_v2, %v556_v3 }
  0x84   : > { %8274 = vmatpush1.bf16.msra.mxu1 %v18540_v7  ;;  %6731 = vmatprep.subr.bf16.mxu0 %v18545_v11  ;;  %v564_v7 = vld [vmem:[%s19953_s24 + $0x700] sm:$0xff] }
  0x85   : > { %8275 = vmatprep.subr.bf16.mxu1 %v18548_v12  ;;  %v572_v11 = vld [vmem:[%s19953_s24 + $0x740] sm:$0xff]  ;;  %v20351_v12 = vcombine.low %v548_v2, %v556_v3  ;;  %v18594_v2 = vld [vmem:[%s25655_s1 + $0x698] ss:$24 sps:$4 sm:$0xff]  }
  0x86   : > { %v20353_v13 = vcombine.high %v564_v7, %v572_v11  ;;  %v18599_v3 = vld [vmem:[%s25655_s1 + $0x6c4] ss:$24 sps:$4 sm:$0xff]  }
  0x87   : > { %6732 = vmatpush1.bf16.msra.mxu0 %v18543_v15  ;;  %v588_v15 = vld [vmem:[%s19953_s24 + $0x7c0] sm:$0xff] }
  0x88   : > { %8276 = vmatpush1.bf16.msra.mxu1 %v18546_v16  ;;  %6733 = vmatprep.subr.bf16.mxu0 %v18551_v17  ;;  %v20361_v16 = vcombine.low %v564_v7, %v572_v11  ;;  %v20363_v17 = vcombine.high %v580_v14, %v588_v15  ;;  %v18602_v7 = vld [vmem:[%s25655_s1 + $0x6cc] ss:$24 sps:$4 sm:$0xff]  }
  0x89   : > { %8277 = vmatprep.subr.bf16.mxu1 %v18554_v18  ;;  %6609 = vmatmul.mubr.bf16.gmra.mrb[24].mxu0 %v20233_v19  ;;  %v341_v18 = vld [vmem:[%s19953_s24 + $0x8] sm:$0xff] }
  0x8a   : > { %8153 = vmatmul.mubr.bf16.gmra.mrb[24].mxu1 %v20233_v19  ;;  %6618 = vmatprep.mubr.bf16.mxu0 %v20241_v24 }
  0x8b   : > { %8162 = vmatprep.mubr.bf16.mxu1 %v20241_v24  ;;  %6734 = vmatpush1.bf16.msra.mxu0 %v18549_v22  ;;  %v349_v22 = vld [vmem:[%s19953_s24 + $0x48] sm:$0xff] }
  0x8c   : > { %8278 = vmatpush1.bf16.msra.mxu1 %v18552_v23  ;;  %6735 = vmatprep.subr.bf16.mxu0 %v18557_v25  ;;  %v20371_v23 = vcombine.low %v580_v14, %v588_v15  ;;  %v20373_v25 = vcombine.high %v341_v18, %v349_v22  ;;  %v20381_v28 = vcombine.low %v341_v18, %v349_v22  ;;  %v18597_v14 = vld [vmem:[%s25655_s1 + $0x6c0] ss:$24 sps:$4 sm:$0xff]   ;;  %v18605_v22 = vld [vmem:[%s25655_s1 + $0x6f4] ss:$24 sps:$4 sm:$0xff]  }
  0x8d   : > { %8279 = vmatprep.subr.bf16.mxu1 %v18560_v26  ;;  %v357_v26 = vld [vmem:[%s19953_s24 + $0x88] sm:$0xff]  ;;  %v20457_v18 = vcombine.high %v389_v59, %v397_v62 }
  0x8e   : > { %v18600_v15 = vld [vmem:[%s25655_s1 + $0x6c8] ss:$24 sps:$4 sm:$0xff]  }
  0x8f   : > { %6736 = vmatpush1.bf16.msra.mxu0 %v18555_v29  ;;  %v18573_v29 = vld [vmem:[%s25655_s1 + $0x600] ss:$24 sps:$4 sm:$0xff]  }
  0x90   : > { %8280 = vmatpush1.bf16.msra.mxu1 %v18558_v30  ;;  %6737 = vmatprep.subr.bf16.mxu0 %v18563_v31  ;;  %v18576_v30 = vld [vmem:[%s25655_s1 + $0x608] ss:$24 sps:$4 sm:$0xff]   ;;  %v20389_v31 = vcombine.high %v357_v26, %v365_v27 }
  0x91   : > { %8281 = vmatprep.subr.bf16.mxu1 %v18566_v34  ;;  %6619 = vmatmul.mubr.bf16.gmra.mrb[28].mxu0 %v20267_v35  ;;  %v18581_v34 = vld [vmem:[%s25655_s1 + $0x634] ss:$24 sps:$4 sm:$0xff]  }
  0x92   : > { %8163 = vmatmul.mubr.bf16.gmra.mrb[28].mxu1 %v20267_v35  ;;  %6628 = vmatprep.mubr.bf16.mxu0 %v20275_v38 }
  0x93   : > { %8172 = vmatprep.mubr.bf16.mxu1 %v20275_v38  ;;  %6738 = vmatpush1.bf16.msra.mxu0 %v18561_v36  ;;  %v18584_v36 = vld [vmem:[%s25655_s1 + $0x63c] ss:$24 sps:$4 sm:$0xff]  }
  0x94   : > { %8282 = vmatpush1.bf16.msra.mxu1 %v18564_v37  ;;  %6739 = vmatprep.subr.bf16.mxu0 %v18569_v39  ;;  %v373_v37 = vld [vmem:[%s19953_s24 + $0x108] sm:$0xff] }
  0x95   : > { %8283 = vmatprep.subr.bf16.mxu1 %v18572_v40  ;;  %v381_v39 = vld [vmem:[%s19953_s24 + $0x148] sm:$0xff] }
  0x96   : > { %v18579_v40 = vld [vmem:[%s25655_s1 + $0x630] ss:$24 sps:$4 sm:$0xff]   ;;  %v20423_v52 = vcombine.high %v373_v37, %v381_v39  ;;  %v20449_v11 = vcombine.low %v373_v37, %v381_v39  ;;  %v18614_v37 = vld [vmem:[%s25655_s1 + $0x72c] ss:$24 sps:$4 sm:$0xff]   ;;  %v20483_v39 = vcombine.low %v389_v59, %v397_v62 }
  0x97   : > { %6740 = vmatpush1.bf16.msra.mxu0 %v18567_v43  ;;  %v18590_v43 = vld [vmem:[%s25655_s1 + $0x66c] ss:$24 sps:$4 sm:$0xff]   ;;  %v18618_v59 = vld [vmem:[%s25655_s1 + $0x758] ss:$24 sps:$4 sm:$0xff]  }
  0x98   : > { %8284 = vmatpush1.bf16.msra.mxu1 %v18570_v46  ;;  %6902 = vmatprep.subr.bf16.mxu0 %v18575_v49  ;;  %v20415_v46 = vcombine.low %v357_v26, %v365_v27  ;;  %v18585_v49 = vld [vmem:[%s25655_s1 + $0x660] ss:$24 sps:$4 sm:$0xff]   ;;  %v18608_v26 = vld [vmem:[%s25655_s1 + $0x6fc] ss:$24 sps:$4 sm:$0xff]   ;;  %v405_v27 = vld [vmem:[%s19953_s24 + $0x208] sm:$0xff] }
  0x99   : > { %6629 = vmatmul.mubr.bf16.gmra.mrb[32].mxu0 %v20295_v47  ;;  %8446 = vmatprep.subr.bf16.mxu1 %v18578_v50  ;;  %v18588_v50 = vld [vmem:[%s25655_s1 + $0x668] ss:$24 sps:$4 sm:$0xff]   ;;  %v18623_v62 = vld [vmem:[%s25655_s1 + $0x784] ss:$24 sps:$4 sm:$0xff]  }
  0x9a   : > { %8173 = vmatmul.mubr.bf16.gmra.mrb[32].mxu1 %v20295_v47  ;;  %6638 = vmatprep.mubr.bf16.mxu0 %v20297_v48 }
  0x9b   : > { %8182 = vmatprep.mubr.bf16.mxu1 %v20297_v48 }
  0xa1   : > { %6639 = vmatmul.mubr.bf16.gmra.mrb[36].mxu0 %v20311_v54 }
  0xa2   : > { %8183 = vmatmul.mubr.bf16.gmra.mrb[36].mxu1 %v20311_v54  ;;  %6648 = vmatprep.mubr.bf16.mxu0 %v20313_v55 }
  0xa3   : > { %8192 = vmatprep.mubr.bf16.mxu1 %v20313_v55 }
  0xa9   : > { %6649 = vmatmul.mubr.bf16.gmra.mrb[40].mxu0 %v20321_v60 }
  0xaa   : > { %8193 = vmatmul.mubr.bf16.gmra.mrb[40].mxu1 %v20321_v60  ;;  %6658 = vmatprep.mubr.bf16.mxu0 %v20323_v61 }
  0xab   : > { %8202 = vmatprep.mubr.bf16.mxu1 %v20323_v61 }
  0xb1   : > { %6659 = vmatmul.mubr.bf16.gmra.mrb[44].mxu0 %v20331_v0 }
  0xb2   : > { %8203 = vmatmul.mubr.bf16.gmra.mrb[44].mxu1 %v20331_v0  ;;  %6668 = vmatprep.mubr.bf16.mxu0 %v20333_v1 }
  0xb3   : > { %8212 = vmatprep.mubr.bf16.mxu1 %v20333_v1 }
  0xb9   : > { %6669 = vmatmul.mubr.bf16.gmra.mrb[48].mxu0 %v20341_v4 }
  0xba   : > { %8213 = vmatmul.mubr.bf16.gmra.mrb[48].mxu1 %v20341_v4  ;;  %6678 = vmatprep.mubr.bf16.mxu0 %v20343_v6 }
  0xbb   : > { %8222 = vmatprep.mubr.bf16.mxu1 %v20343_v6 }
  0xc1   : > { %6679 = vmatmul.mubr.bf16.gmra.mrb[52].mxu0 %v20351_v12 }
  0xc2   : > { %8223 = vmatmul.mubr.bf16.gmra.mrb[52].mxu1 %v20351_v12  ;;  %6688 = vmatprep.mubr.bf16.mxu0 %v20353_v13 }
  0xc3   : > { %8232 = vmatprep.mubr.bf16.mxu1 %v20353_v13 }
  0xc9   : > { %6689 = vmatmul.mubr.bf16.gmra.mrb[56].mxu0 %v20361_v16 }
  0xca   : > { %8233 = vmatmul.mubr.bf16.gmra.mrb[56].mxu1 %v20361_v16  ;;  %6698 = vmatprep.mubr.bf16.mxu0 %v20363_v17 }
  0xcb   : > { %8242 = vmatprep.mubr.bf16.mxu1 %v20363_v17 }
  0xd1   : > { %6699 = vmatmul.mubr.bf16.gmra.mrb[60].mxu0 %v20371_v23 }
  0xd2   : > { %8243 = vmatmul.mubr.bf16.gmra.mrb[60].mxu1 %v20371_v23  ;;  %6741 = vmatprep.mubr.bf16.mxu0 %v20373_v25 }
  0xd3   : > { %8285 = vmatprep.mubr.bf16.mxu1 %v20373_v25 }
  0xd9   : > { %6742 = vmatmul.mubr.bf16.vlgmr.msra.gmra.mrb[0].mxu0 %v20381_v28 }
  0xda   : > { %8286 = vmatmul.mubr.bf16.vlgmr.msra.gmra.mrb[0].mxu1 %v20381_v28  ;;  %6751 = vmatprep.mubr.bf16.mxu0 %v20389_v31 }
  0xdb   : > { %8295 = vmatprep.mubr.bf16.mxu1 %v20389_v31  ;;  %6903 = vmatpush1.bf16.msra.mxu0 %v18573_v29  ;;  %v413_v29 = vld [vmem:[%s19953_s24 + $0x248] sm:$0xff] }
  0xdc   : > { %8447 = vmatpush1.bf16.msra.mxu1 %v18576_v30  ;;  %6904 = vmatprep.subr.bf16.mxu0 %v18581_v34  ;;  %v18603_v30 = vld [vmem:[%s25655_s1 + $0x6f0] ss:$24 sps:$4 sm:$0xff]  }
  0xdd   : > { %8448 = vmatprep.subr.bf16.mxu1 %v18584_v36  ;;  %v18606_v34 = vld [vmem:[%s25655_s1 + $0x6f8] ss:$24 sps:$4 sm:$0xff]   ;;  %v18611_v36 = vld [vmem:[%s25655_s1 + $0x724] ss:$24 sps:$4 sm:$0xff]  }
  0xdf   : > { %6905 = vmatpush1.bf16.msra.mxu0 %v18579_v40  ;;  %v18609_v40 = vld [vmem:[%s25655_s1 + $0x720] ss:$24 sps:$4 sm:$0xff]  }
  0xe0   : > { %8449 = vmatpush1.bf16.msra.mxu1 %v18582_v41  ;;  %6906 = vmatprep.subr.bf16.mxu0 %v18587_v42  ;;  %v18612_v41 = vld [vmem:[%s25655_s1 + $0x728] ss:$24 sps:$4 sm:$0xff]   ;;  %v20491_v42 = vcombine.high %v405_v27, %v413_v29 }
  0xe1   : > { %8450 = vmatprep.subr.bf16.mxu1 %v18590_v43  ;;  %6752 = vmatmul.mubr.bf16.gmra.mrb[4].mxu0 %v20415_v46  ;;  %v18617_v43 = vld [vmem:[%s25655_s1 + $0x754] ss:$24 sps:$4 sm:$0xff]  }
  0xe2   : > { %8296 = vmatmul.mubr.bf16.gmra.mrb[4].mxu1 %v20415_v46  ;;  %6761 = vmatprep.mubr.bf16.mxu0 %v20423_v52 }
  0xe3   : > { %8305 = vmatprep.mubr.bf16.mxu1 %v20423_v52  ;;  %6907 = vmatpush1.bf16.msra.mxu0 %v18585_v49  ;;  %v18620_v49 = vld [vmem:[%s25655_s1 + $0x75c] ss:$24 sps:$4 sm:$0xff]  }
  0xe4   : > { %8451 = vmatpush1.bf16.msra.mxu1 %v18588_v50  ;;  %6908 = vmatprep.subr.bf16.mxu0 %v18593_v53  ;;  %v421_v50 = vld [vmem:[%s19953_s24 + $0x288] sm:$0xff] }
  0xe5   : > { %8452 = vmatprep.subr.bf16.mxu1 %v18596_v56  ;;  %v429_v53 = vld [vmem:[%s19953_s24 + $0x2c8] sm:$0xff] }
  0xe6   : > { %v18615_v56 = vld [vmem:[%s25655_s1 + $0x750] ss:$24 sps:$4 sm:$0xff]  }
  0xe7   : > { %6909 = vmatpush1.bf16.msra.mxu0 %v18591_v63  ;;  %v18626_v63 = vld [vmem:[%s25655_s1 + $0x78c] ss:$24 sps:$4 sm:$0xff]  }
  0xe8   : > { %8453 = vmatpush1.bf16.msra.mxu1 %v18594_v2  ;;  %6910 = vmatprep.subr.bf16.mxu0 %v18599_v3  ;;  %v20517_v2 = vcombine.low %v405_v27, %v413_v29  ;;  %v18621_v3 = vld [vmem:[%s25655_s1 + $0x780] ss:$24 sps:$4 sm:$0xff]   ;;  %v445_v27 = vld [vmem:[%s19953_s24 + $0x348] sm:$0xff] }
  0xe9   : > { %8454 = vmatprep.subr.bf16.mxu1 %v18602_v7  ;;  %6762 = vmatmul.mubr.bf16.gmra.mrb[8].mxu0 %v20449_v11  ;;  %v18624_v7 = vld [vmem:[%s25655_s1 + $0x788] ss:$24 sps:$4 sm:$0xff]  }
  0xea   : > { %8306 = vmatmul.mubr.bf16.gmra.mrb[8].mxu1 %v20449_v11  ;;  %6771 = vmatprep.mubr.bf16.mxu0 %v20457_v18  ;;  %v18627_v29 = vld [vmem:[%s25655_s1 + $0x7b0] ss:$24 sps:$4 sm:$0xff]  }
  0xeb   : > { %8315 = vmatprep.mubr.bf16.mxu1 %v20457_v18  ;;  %6911 = vmatpush1.bf16.msra.mxu0 %v18597_v14  ;;  %v20525_v14 = vcombine.high %v421_v50, %v429_v53 }
  0xec   : > { %8455 = vmatpush1.bf16.msra.mxu1 %v18600_v15  ;;  %6912 = vmatprep.subr.bf16.mxu0 %v18605_v22  ;;  %v18629_v15 = vld [vmem:[%s25655_s1 + $0x7b4] ss:$24 sps:$4 sm:$0xff]  }
  0xed   : > { %8456 = vmatprep.subr.bf16.mxu1 %v18608_v26  ;;  %v18632_v22 = vld [vmem:[%s25655_s1 + $0x7bc] ss:$24 sps:$4 sm:$0xff]   ;;  %v437_v26 = vld [vmem:[%s19953_s24 + $0x308] sm:$0xff] }
  0xef   : > { %6913 = vmatpush1.bf16.msra.mxu0 %v18603_v30  ;;  %v18630_v30 = vld [vmem:[%s25655_s1 + $0x7b8] ss:$24 sps:$4 sm:$0xff]  }
  0xf0   : > { %8457 = vmatpush1.bf16.msra.mxu1 %v18606_v34  ;;  %6914 = vmatprep.subr.bf16.mxu0 %v18611_v36  ;;  %v18635_v34 = vld [vmem:[%s25655_s1 + $0x7e4] ss:$24 sps:$4 sm:$0xff]  }
  0xf1   : > { %8458 = vmatprep.subr.bf16.mxu1 %v18614_v37  ;;  %6772 = vmatmul.mubr.bf16.gmra.mrb[12].mxu0 %v20483_v39  ;;  %v18638_v36 = vld [vmem:[%s25655_s1 + $0x7ec] ss:$24 sps:$4 sm:$0xff]   ;;  %v20551_v37 = vcombine.low %v421_v50, %v429_v53 }
  0xf2   : > { %8316 = vmatmul.mubr.bf16.gmra.mrb[12].mxu1 %v20483_v39  ;;  %6781 = vmatprep.mubr.bf16.mxu0 %v20491_v42  ;;  %v453_v50 = vld [vmem:[%s19953_s24 + $0x388] sm:$0xff] }
  0xf3   : > { %8325 = vmatprep.mubr.bf16.mxu1 %v20491_v42  ;;  %6915 = vmatpush1.bf16.msra.mxu0 %v18609_v40  ;;  %v18633_v40 = vld [vmem:[%s25655_s1 + $0x7e0] ss:$24 sps:$4 sm:$0xff]   ;;  %v461_v53 = vld [vmem:[%s19953_s24 + $0x3c8] sm:$0xff] }
  0xf4   : > { %8459 = vmatpush1.bf16.msra.mxu1 %v18612_v41  ;;  %6916 = vmatprep.subr.bf16.mxu0 %v18617_v43  ;;  %v18636_v41 = vld [vmem:[%s25655_s1 + $0x7e8] ss:$24 sps:$4 sm:$0xff]   ;;  %v20559_v43 = vcombine.high %v437_v26, %v445_v27 }
  0xf5   : > { %8460 = vmatprep.subr.bf16.mxu1 %v18620_v49  ;;  %v18641_v49 = vld [vmem:[%s25655_s1 + $0x814] ss:$24 sps:$4 sm:$0xff]  }
  0xf7   : > { %6917 = vmatpush1.bf16.msra.mxu0 %v18615_v56  ;;  %v18644_v56 = vld [vmem:[%s25655_s1 + $0x81c] ss:$24 sps:$4 sm:$0xff]  }
  0xf8   : > { %8461 = vmatpush1.bf16.msra.mxu1 %v18618_v59  ;;  %6918 = vmatprep.subr.bf16.mxu0 %v18623_v62  ;;  %v18639_v59 = vld [vmem:[%s25655_s1 + $0x810] ss:$24 sps:$4 sm:$0xff]  }
  0xf9   : > { %8462 = vmatprep.subr.bf16.mxu1 %v18626_v63  ;;  %6782 = vmatmul.mubr.bf16.gmra.mrb[16].mxu0 %v20517_v2  ;;  %v18642_v62 = vld [vmem:[%s25655_s1 + $0x818] ss:$24 sps:$4 sm:$0xff]   ;;  %v18647_v63 = vld [vmem:[%s25655_s1 + $0x844] ss:$24 sps:$4 sm:$0xff]  }
  0xfa   : > { %8326 = vmatmul.mubr.bf16.gmra.mrb[16].mxu1 %v20517_v2  ;;  %6791 = vmatprep.mubr.bf16.mxu0 %v20525_v14 }
  0xfb   : > { %8335 = vmatprep.mubr.bf16.mxu1 %v20525_v14  ;;  %6919 = vmatpush1.bf16.msra.mxu0 %v18621_v3  ;;  %v18650_v3 = vld [vmem:[%s25655_s1 + $0x84c] ss:$24 sps:$4 sm:$0xff]  }
  0xfc   : > { %8463 = vmatpush1.bf16.msra.mxu1 %v18624_v7  ;;  %6920 = vmatprep.subr.bf16.mxu0 %v18629_v15  ;;  %v20585_v7 = vcombine.low %v437_v26, %v445_v27  ;;  %v18645_v15 = vld [vmem:[%s25655_s1 + $0x840] ss:$24 sps:$4 sm:$0xff]   ;;  %v469_v26 = vld [vmem:[%s19953_s24 + $0x408] sm:$0xff] }
  0xfd   : > { %8464 = vmatprep.subr.bf16.mxu1 %v18632_v22  ;;  %v18648_v22 = vld [vmem:[%s25655_s1 + $0x848] ss:$24 sps:$4 sm:$0xff]  }
  0xfe   : > { %v477_v27 = vld [vmem:[%s19953_s24 + $0x448] sm:$0xff] }
  0xff   : > { %6921 = vmatpush1.bf16.msra.mxu0 %v18627_v29  ;;  %v20593_v29 = vcombine.high %v453_v50, %v461_v53 }
 0x100   : > { %8465 = vmatpush1.bf16.msra.mxu1 %v18630_v30  ;;  %6922 = vmatprep.subr.bf16.mxu0 %v18635_v34  ;;  %v18653_v30 = vld [vmem:[%s25655_s1 + $0x874] ss:$24 sps:$4 sm:$0xff]  }
 0x101   : > { %8466 = vmatprep.subr.bf16.mxu1 %v18638_v36  ;;  %6792 = vmatmul.mubr.bf16.gmra.mrb[20].mxu0 %v20551_v37  ;;  %v18656_v34 = vld [vmem:[%s25655_s1 + $0x87c] ss:$24 sps:$4 sm:$0xff]   ;;  %v18651_v36 = vld [vmem:[%s25655_s1 + $0x870] ss:$24 sps:$4 sm:$0xff]  }
 0x102   : > { %8336 = vmatmul.mubr.bf16.gmra.mrb[20].mxu1 %v20551_v37  ;;  %6801 = vmatprep.mubr.bf16.mxu0 %v20559_v43 }
 0x103   : > { %8345 = vmatprep.mubr.bf16.mxu1 %v20559_v43  ;;  %6923 = vmatpush1.bf16.msra.mxu0 %v18633_v40  ;;  %v18654_v40 = vld [vmem:[%s25655_s1 + $0x878] ss:$24 sps:$4 sm:$0xff]  }
 0x104   : > { %8467 = vmatpush1.bf16.msra.mxu1 %v18636_v41  ;;  %6924 = vmatprep.subr.bf16.mxu0 %v18641_v49  ;;  %v18659_v41 = vld [vmem:[%s25655_s1 + $0x8a4] ss:$24 sps:$4 sm:$0xff]  }
 0x105   : > { %8468 = vmatprep.subr.bf16.mxu1 %v18644_v56  ;;  %v18662_v49 = vld [vmem:[%s25655_s1 + $0x8ac] ss:$24 sps:$4 sm:$0xff]   ;;  %v20619_v56 = vcombine.low %v453_v50, %v461_v53 }
 0x106   : > { %v485_v50 = vld [vmem:[%s19953_s24 + $0x488] sm:$0xff] }
 0x107   : > { %6925 = vmatpush1.bf16.msra.mxu0 %v18639_v59  ;;  %v18657_v59 = vld [vmem:[%s25655_s1 + $0x8a0] ss:$24 sps:$4 sm:$0xff]   ;;  %v493_v53 = vld [vmem:[%s19953_s24 + $0x4c8] sm:$0xff] }
 0x108   : > { %8469 = vmatpush1.bf16.msra.mxu1 %v18642_v62  ;;  %6926 = vmatprep.subr.bf16.mxu0 %v18647_v63  ;;  %v18660_v62 = vld [vmem:[%s25655_s1 + $0x8a8] ss:$24 sps:$4 sm:$0xff]   ;;  %v20627_v63 = vcombine.high %v469_v26, %v477_v27 }
 0x109   : > { %8470 = vmatprep.subr.bf16.mxu1 %v18650_v3  ;;  %6802 = vmatmul.mubr.bf16.gmra.mrb[24].mxu0 %v20585_v7  ;;  %v18665_v3 = vld [vmem:[%s25655_s1 + $0x8d4] ss:$24 sps:$4 sm:$0xff]  }
 0x10a   : > { %8346 = vmatmul.mubr.bf16.gmra.mrb[24].mxu1 %v20585_v7  ;;  %6811 = vmatprep.mubr.bf16.mxu0 %v20593_v29  ;;  %25925 = vst [vmem:[#allocation6_spill] sm:$0xff] %v20627_v63 }
 0x10b   : > { %8355 = vmatprep.mubr.bf16.mxu1 %v20593_v29  ;;  %6927 = vmatpush1.bf16.msra.mxu0 %v18645_v15  ;;  %v18668_v15 = vld [vmem:[%s25655_s1 + $0x8dc] ss:$24 sps:$4 sm:$0xff]  }
 0x10c   : > { %8471 = vmatpush1.bf16.msra.mxu1 %v18648_v22  ;;  %6928 = vmatprep.subr.bf16.mxu0 %v18653_v30  ;;  %v18663_v22 = vld [vmem:[%s25655_s1 + $0x8d0] ss:$24 sps:$4 sm:$0xff]  }
 0x10d   : > { %8472 = vmatprep.subr.bf16.mxu1 %v18656_v34  ;;  %v18666_v30 = vld [vmem:[%s25655_s1 + $0x8d8] ss:$24 sps:$4 sm:$0xff]   ;;  %v20647_v34 = vcombine.low %v469_v26, %v477_v27  ;;  %v501_v26 = vld [vmem:[%s19953_s24 + $0x508] sm:$0xff] }
 0x10e   : > { %v509_v27 = vld [vmem:[%s19953_s24 + $0x548] sm:$0xff] }
 0x10f   : > { %6929 = vmatpush1.bf16.msra.mxu0 %v18651_v36  ;;  %25926 = vst [vmem:[#allocation7_spill] sm:$0xff] %v20647_v34  ;;  %v20649_v36 = vcombine.high %v485_v50, %v493_v53 }
 0x110   : > { %8473 = vmatpush1.bf16.msra.mxu1 %v18654_v40  ;;  %6930 = vmatprep.subr.bf16.mxu0 %v18659_v41  ;;  %v18671_v40 = vld [vmem:[%s25655_s1 + $0x904] ss:$24 sps:$4 sm:$0xff]  }
 0x111   : > { %8474 = vmatprep.subr.bf16.mxu1 %v18662_v49  ;;  %6812 = vmatmul.mubr.bf16.gmra.mrb[28].mxu0 %v20619_v56  ;;  %25927 = vst [vmem:[#allocation8_spill] sm:$0xff] %v20649_v36  ;;  %v18674_v41 = vld [vmem:[%s25655_s1 + $0x90c] ss:$24 sps:$4 sm:$0xff]   ;;  %v20663_v49 = vcombine.low %v485_v50, %v493_v53 }
 0x112   : > { %8356 = vmatmul.mubr.bf16.gmra.mrb[28].mxu1 %v20619_v56  ;;  %6821 = vmatprep.mubr.bf16.mxu0 %v20627_v63  ;;  %v533_v50 = vld [vmem:[%s19953_s24 + $0x608] sm:$0xff] }
 0x113   : > { %8365 = vmatprep.mubr.bf16.mxu1 %v20627_v63  ;;  %6931 = vmatpush1.bf16.msra.mxu0 %v18657_v59  ;;  %25928 = vst [vmem:[#allocation9_spill] sm:$0xff] %v20663_v49  ;;  %v20665_v59 = vcombine.high %v501_v26, %v509_v27  ;;  %v541_v53 = vld [vmem:[%s19953_s24 + $0x648] sm:$0xff] }
 0x114   : > { %8475 = vmatpush1.bf16.msra.mxu1 %v18660_v62  ;;  %6932 = vmatprep.subr.bf16.mxu0 %v18665_v3  ;;  %v517_v62 = vld [vmem:[%s19953_s24 + $0x588] sm:$0xff] }
 0x115   : > { %8476 = vmatprep.subr.bf16.mxu1 %v18668_v15  ;;  %25929 = vst [vmem:[#allocation10_spill] sm:$0xff] %v20665_v59  ;;  %v525_v3 = vld [vmem:[%s19953_s24 + $0x5c8] sm:$0xff]  ;;  %v20673_v15 = vcombine.low %v501_v26, %v509_v27  ;;  %v20693_v27 = vcombine.low %v533_v50, %v541_v53 }
 0x116   : > { %v557_v26 = vld [vmem:[%s19953_s24 + $0x6c8] sm:$0xff] }
 0x117   : > { %6933 = vmatpush1.bf16.msra.mxu0 %v18663_v22  ;;  %25930 = vst [vmem:[#allocation11_spill] sm:$0xff] %v20673_v15  ;;  %v20675_v22 = vcombine.high %v517_v62, %v525_v3  ;;  %25934 = vst [vmem:[#allocation15_spill] sm:$0xff] %v20693_v27 }
 0x118   : > { %8477 = vmatpush1.bf16.msra.mxu1 %v18666_v30  ;;  %7095 = vmatprep.subr.bf16.mxu0 %v18671_v40  ;;  %v20683_v30 = vcombine.low %v517_v62, %v525_v3  ;;  %v20685_v40 = vcombine.high %v533_v50, %v541_v53  ;;  %v565_v62 = vld [vmem:[%s19953_s24 + $0x708] sm:$0xff] }
 0x119   : > { %6822 = vmatmul.mubr.bf16.gmra.mrb[32].mxu0 %v20647_v34  ;;  %8639 = vmatprep.subr.bf16.mxu1 %v18674_v41  ;;  %25931 = vst [vmem:[#allocation12_spill] sm:$0xff] %v20675_v22  ;;  %v549_v41 = vld [vmem:[%s19953_s24 + $0x688] sm:$0xff] }
 0x11a   : > { %8366 = vmatmul.mubr.bf16.gmra.mrb[32].mxu1 %v20647_v34  ;;  %6831 = vmatprep.mubr.bf16.mxu0 %v20649_v36  ;;  %25932 = vst [vmem:[#allocation13_spill] sm:$0xff] %v20683_v30  ;;  %25933 = vst [vmem:[#allocation14_spill] sm:$0xff] %v20685_v40  ;;  %v573_v3 = vld [vmem:[%s19953_s24 + $0x748] sm:$0xff] }
 0x11b   : > { %8375 = vmatprep.mubr.bf16.mxu1 %v20649_v36  ;;  %v581_v50 = vld [vmem:[%s19953_s24 + $0x788] sm:$0xff] }
 0x11c   : > { %v589_v53 = vld [vmem:[%s19953_s24 + $0x7c8] sm:$0xff] }
 0x11d   : > { %v18684_v34 = vld [vmem:[%s25655_s1 + $0x968] ss:$24 sps:$4 sm:$0xff]  }
 0x121   : > { %6832 = vmatmul.mubr.bf16.gmra.mrb[36].mxu0 %v20663_v49 }
 0x122   : > { %8376 = vmatmul.mubr.bf16.gmra.mrb[36].mxu1 %v20663_v49  ;;  %6841 = vmatprep.mubr.bf16.mxu0 %v20665_v59  ;;  %v18683_v49 = vld [vmem:[%s25655_s1 + $0x964] ss:$24 sps:$4 sm:$0xff]  }
 0x123   : > { %8385 = vmatprep.mubr.bf16.mxu1 %v20665_v59  ;;  %v18678_v59 = vld [vmem:[%s25655_s1 + $0x938] ss:$24 sps:$4 sm:$0xff]  }
 0x129   : > { %6842 = vmatmul.mubr.bf16.gmra.mrb[40].mxu0 %v20673_v15 }
 0x12a   : > { %8386 = vmatmul.mubr.bf16.gmra.mrb[40].mxu1 %v20673_v15  ;;  %6851 = vmatprep.mubr.bf16.mxu0 %v20675_v22  ;;  %v18675_v15 = vld [vmem:[%s25655_s1 + $0x930] ss:$24 sps:$4 sm:$0xff]  }
 0x12b   : > { %8395 = vmatprep.mubr.bf16.mxu1 %v20675_v22  ;;  %v20695_v22 = vcombine.high %v549_v41, %v557_v26 }
 0x12d   : > { %25935 = vst [vmem:[#allocation16_spill] sm:$0xff] %v20695_v22 }
 0x131   : > { %6852 = vmatmul.mubr.bf16.gmra.mrb[44].mxu0 %v20683_v30 }
 0x132   : > { %8396 = vmatmul.mubr.bf16.gmra.mrb[44].mxu1 %v20683_v30  ;;  %6861 = vmatprep.mubr.bf16.mxu0 %v20685_v40  ;;  %v20705_v30 = vcombine.high %v565_v62, %v573_v3 }
 0x133   : > { %8405 = vmatprep.mubr.bf16.mxu1 %v20685_v40  ;;  %v20703_v40 = vcombine.low %v549_v41, %v557_v26  ;;  %v342_v41 = vld [vmem:[%s19953_s24 + $0x10] sm:$0xff] }
 0x134   : > { %25937 = vst [vmem:[#allocation18_spill] sm:$0xff] %v20705_v30  ;;  %v350_v26 = vld [vmem:[%s19953_s24 + $0x50] sm:$0xff] }
 0x135   : > { %25936 = vst [vmem:[#allocation17_spill] sm:$0xff] %v20703_v40 }
 0x139   : > { %6862 = vmatmul.mubr.bf16.gmra.mrb[48].mxu0 %v20693_v27 }
 0x13a   : > { %8406 = vmatmul.mubr.bf16.gmra.mrb[48].mxu1 %v20693_v27  ;;  %6871 = vmatprep.mubr.bf16.mxu0 %v20695_v22  ;;  %v20715_v27 = vcombine.high %v581_v50, %v589_v53 }
 0x13b   : > { %8415 = vmatprep.mubr.bf16.mxu1 %v20695_v22  ;;  %v20713_v22 = vcombine.low %v565_v62, %v573_v3  ;;  %v358_v62 = vld [vmem:[%s19953_s24 + $0x90] sm:$0xff] }
 0x13c   : > { %25939 = vst [vmem:[#allocation20_spill] sm:$0xff] %v20715_v27  ;;  %v366_v3 = vld [vmem:[%s19953_s24 + $0xd0] sm:$0xff] }
 0x13d   : > { %25938 = vst [vmem:[#allocation19_spill] sm:$0xff] %v20713_v22  ;;  %v20767_v36 = vcombine.low %v358_v62, %v366_v3 }
 0x13f   : > { %25944 = vst [vmem:[#allocation25_spill] sm:$0xff] %v20767_v36 }
 0x141   : > { %6872 = vmatmul.mubr.bf16.gmra.mrb[52].mxu0 %v20703_v40 }
 0x142   : > { %8416 = vmatmul.mubr.bf16.gmra.mrb[52].mxu1 %v20703_v40  ;;  %6881 = vmatprep.mubr.bf16.mxu0 %v20705_v30  ;;  %v20723_v40 = vcombine.low %v581_v50, %v589_v53  ;;  %v18669_v50 = vld [vmem:[%s25655_s1 + $0x900] ss:$24 sps:$4 sm:$0xff]  }
 0x143   : > { %8425 = vmatprep.mubr.bf16.mxu1 %v20705_v30  ;;  %v20725_v30 = vcombine.high %v342_v41, %v350_v26  ;;  %v18672_v53 = vld [vmem:[%s25655_s1 + $0x908] ss:$24 sps:$4 sm:$0xff]  }
 0x144   : > { %25940 = vst [vmem:[#allocation21_spill] sm:$0xff] %v20723_v40 }
 0x145   : > { %25941 = vst [vmem:[#allocation22_spill] sm:$0xff] %v20725_v30 }
 0x149   : > { %6882 = vmatmul.mubr.bf16.gmra.mrb[56].mxu0 %v20713_v22 }
 0x14a   : > { %8426 = vmatmul.mubr.bf16.gmra.mrb[56].mxu1 %v20713_v22  ;;  %6891 = vmatprep.mubr.bf16.mxu0 %v20715_v27  ;;  %v20733_v22 = vcombine.low %v342_v41, %v350_v26  ;;  %v374_v41 = vld [vmem:[%s19953_s24 + $0x110] sm:$0xff] }
 0x14b   : > { %8435 = vmatprep.mubr.bf16.mxu1 %v20715_v27  ;;  %v20741_v27 = vcombine.high %v358_v62, %v366_v3  ;;  %v382_v26 = vld [vmem:[%s19953_s24 + $0x150] sm:$0xff] }
 0x14c   : > { %25942 = vst [vmem:[#allocation23_spill] sm:$0xff] %v20733_v22  ;;  %v20775_v63 = vcombine.high %v374_v41, %v382_v26  ;;  %v398_v62 = vld [vmem:[%s19953_s24 + $0x1d0] sm:$0xff] }
 0x14d   : > { %25943 = vst [vmem:[#allocation24_spill] sm:$0xff] %v20741_v27  ;;  %v18687_v3 = vld [vmem:[%s25655_s1 + $0x990] ss:$24 sps:$4 sm:$0xff]  }
 0x14e   : > { %25945 = vst [vmem:[#allocation26_spill] sm:$0xff] %v20775_v63 }
 0x151   : > { %6892 = vmatmul.mubr.bf16.gmra.mrb[60].mxu0 %v20723_v40 }
 0x152   : > { %8436 = vmatmul.mubr.bf16.gmra.mrb[60].mxu1 %v20723_v40  ;;  %6934 = vmatprep.mubr.bf16.mxu0 %v20725_v30  ;;  %v18677_v40 = vld [vmem:[%s25655_s1 + $0x934] ss:$24 sps:$4 sm:$0xff]  }
 0x153   : > { %8478 = vmatprep.mubr.bf16.mxu1 %v20725_v30  ;;  %v18680_v30 = vld [vmem:[%s25655_s1 + $0x93c] ss:$24 sps:$4 sm:$0xff]  }
 0x159   : > { %6935 = vmatmul.mubr.bf16.vlgmr.msra.gmra.mrb[0].mxu0 %v20733_v22 }
 0x15a   : > { %8479 = vmatmul.mubr.bf16.vlgmr.msra.gmra.mrb[0].mxu1 %v20733_v22  ;;  %6944 = vmatprep.mubr.bf16.mxu0 %v20741_v27  ;;  %v18686_v22 = vld [vmem:[%s25655_s1 + $0x96c] ss:$24 sps:$4 sm:$0xff]  }
 0x15b   : > { %8488 = vmatprep.mubr.bf16.mxu1 %v20741_v27  ;;  %7096 = vmatpush1.bf16.msra.mxu0 %v18669_v50  ;;  %v18681_v27 = vld [vmem:[%s25655_s1 + $0x960] ss:$24 sps:$4 sm:$0xff]   ;;  %v18689_v50 = vld [vmem:[%s25655_s1 + $0x994] ss:$24 sps:$4 sm:$0xff]  }
 0x15c   : > { %8640 = vmatpush1.bf16.msra.mxu1 %v18672_v53  ;;  %7097 = vmatprep.subr.bf16.mxu0 %v18677_v40  ;;  %v390_v40 = vld [vmem:[%s19953_s24 + $0x190] sm:$0xff] }
 0x15d   : > { %8641 = vmatprep.subr.bf16.mxu1 %v18680_v30  ;;  %v18692_v30 = vld [vmem:[%s25655_s1 + $0x99c] ss:$24 sps:$4 sm:$0xff]   ;;  %v18690_v53 = vld [vmem:[%s25655_s1 + $0x998] ss:$24 sps:$4 sm:$0xff]  }
 0x15f   : > { %7098 = vmatpush1.bf16.msra.mxu0 %v18675_v15  ;;  %v20801_v15 = vcombine.low %v374_v41, %v382_v26  ;;  %v406_v41 = vld [vmem:[%s19953_s24 + $0x210] sm:$0xff] }
 0x160   : > { %8642 = vmatpush1.bf16.msra.mxu1 %v18678_v59  ;;  %7099 = vmatprep.subr.bf16.mxu0 %v18683_v49  ;;  %v18695_v49 = vld [vmem:[%s25655_s1 + $0x9c4] ss:$24 sps:$4 sm:$0xff]   ;;  %v414_v26 = vld [vmem:[%s19953_s24 + $0x250] sm:$0xff] }
 0x161   : > { %8643 = vmatprep.subr.bf16.mxu1 %v18686_v22  ;;  %6945 = vmatmul.mubr.bf16.gmra.mrb[4].mxu0 %v20767_v36  ;;  %v18698_v59 = vld [vmem:[%s25655_s1 + $0x9cc] ss:$24 sps:$4 sm:$0xff]   ;;  %25946 = vst [vmem:[#allocation27_spill] sm:$0xff] %v20801_v15  ;;  %v18693_v22 = vld [vmem:[%s25655_s1 + $0x9c0] ss:$24 sps:$4 sm:$0xff]  }
 0x162   : > { %8489 = vmatmul.mubr.bf16.gmra.mrb[4].mxu1 %v20767_v36  ;;  %6954 = vmatprep.mubr.bf16.mxu0 %v20775_v63  ;;  %v20809_v36 = vcombine.high %v390_v40, %v398_v62 }
 0x163   : > { %8498 = vmatprep.mubr.bf16.mxu1 %v20775_v63  ;;  %7100 = vmatpush1.bf16.msra.mxu0 %v18681_v27  ;;  %v18696_v63 = vld [vmem:[%s25655_s1 + $0x9c8] ss:$24 sps:$4 sm:$0xff]   ;;  %v18701_v27 = vld [vmem:[%s25655_s1 + $0x9f4] ss:$24 sps:$4 sm:$0xff]  }
 0x164   : > { %8644 = vmatpush1.bf16.msra.mxu1 %v18684_v34  ;;  %7101 = vmatprep.subr.bf16.mxu0 %v18689_v50  ;;  %25947 = vst [vmem:[#allocation28_spill] sm:$0xff] %v20809_v36  ;;  %v18704_v34 = vld [vmem:[%s25655_s1 + $0x9fc] ss:$24 sps:$4 sm:$0xff]   ;;  %v18699_v50 = vld [vmem:[%s25655_s1 + $0x9f0] ss:$24 sps:$4 sm:$0xff]  }
 0x165   : > { %8645 = vmatprep.subr.bf16.mxu1 %v18692_v30  ;;  %v18702_v30 = vld [vmem:[%s25655_s1 + $0x9f8] ss:$24 sps:$4 sm:$0xff]  }
 0x167   : > { %7102 = vmatpush1.bf16.msra.mxu0 %v18687_v3  ;;  %v18707_v3 = vld [vmem:[%s25655_s1 + $0xa24] ss:$24 sps:$4 sm:$0xff]  }
 0x168   : > { %8646 = vmatpush1.bf16.msra.mxu1 %v18690_v53  ;;  %7103 = vmatprep.subr.bf16.mxu0 %v18695_v49  ;;  %v18710_v53 = vld [vmem:[%s25655_s1 + $0xa2c] ss:$24 sps:$4 sm:$0xff]   ;;  %v20835_v49 = vcombine.low %v390_v40, %v398_v62  ;;  %v422_v40 = vld [vmem:[%s19953_s24 + $0x290] sm:$0xff] }
 0x169   : > { %8647 = vmatprep.subr.bf16.mxu1 %v18698_v59  ;;  %6955 = vmatmul.mubr.bf16.gmra.mrb[8].mxu0 %v20801_v15  ;;  %v18705_v59 = vld [vmem:[%s25655_s1 + $0xa20] ss:$24 sps:$4 sm:$0xff]   ;;  %v430_v62 = vld [vmem:[%s19953_s24 + $0x2d0] sm:$0xff] }
 0x16a   : > { %8499 = vmatmul.mubr.bf16.gmra.mrb[8].mxu1 %v20801_v15  ;;  %6964 = vmatprep.mubr.bf16.mxu0 %v20809_v36  ;;  %25948 = vst [vmem:[#allocation29_spill] sm:$0xff] %v20835_v49  ;;  %v20843_v15 = vcombine.high %v406_v41, %v414_v26 }
 0x16b   : > { %8508 = vmatprep.mubr.bf16.mxu1 %v20809_v36  ;;  %7104 = vmatpush1.bf16.msra.mxu0 %v18693_v22  ;;  %v18708_v36 = vld [vmem:[%s25655_s1 + $0xa28] ss:$24 sps:$4 sm:$0xff]   ;;  %v18713_v22 = vld [vmem:[%s25655_s1 + $0xa54] ss:$24 sps:$4 sm:$0xff]  }
 0x16c   : > { %8648 = vmatpush1.bf16.msra.mxu1 %v18696_v63  ;;  %7105 = vmatprep.subr.bf16.mxu0 %v18701_v27  ;;  %25949 = vst [vmem:[#allocation30_spill] sm:$0xff] %v20843_v15  ;;  %v18716_v63 = vld [vmem:[%s25655_s1 + $0xa5c] ss:$24 sps:$4 sm:$0xff]   ;;  %v18711_v27 = vld [vmem:[%s25655_s1 + $0xa50] ss:$24 sps:$4 sm:$0xff]  }
 0x16d   : > { %8649 = vmatprep.subr.bf16.mxu1 %v18704_v34  ;;  %v18714_v34 = vld [vmem:[%s25655_s1 + $0xa58] ss:$24 sps:$4 sm:$0xff]  }
 0x16f   : > { %7106 = vmatpush1.bf16.msra.mxu0 %v18699_v50  ;;  %v18719_v50 = vld [vmem:[%s25655_s1 + $0xa84] ss:$24 sps:$4 sm:$0xff]  }
 0x170   : > { %8650 = vmatpush1.bf16.msra.mxu1 %v18702_v30  ;;  %7107 = vmatprep.subr.bf16.mxu0 %v18707_v3  ;;  %v18722_v30 = vld [vmem:[%s25655_s1 + $0xa8c] ss:$24 sps:$4 sm:$0xff]   ;;  %v20869_v3 = vcombine.low %v406_v41, %v414_v26  ;;  %v438_v41 = vld [vmem:[%s19953_s24 + $0x310] sm:$0xff] }
 0x171   : > { %8651 = vmatprep.subr.bf16.mxu1 %v18710_v53  ;;  %6965 = vmatmul.mubr.bf16.gmra.mrb[12].mxu0 %v20835_v49  ;;  %v18717_v53 = vld [vmem:[%s25655_s1 + $0xa80] ss:$24 sps:$4 sm:$0xff]   ;;  %v446_v26 = vld [vmem:[%s19953_s24 + $0x350] sm:$0xff] }
 0x172   : > { %8509 = vmatmul.mubr.bf16.gmra.mrb[12].mxu1 %v20835_v49  ;;  %6974 = vmatprep.mubr.bf16.mxu0 %v20843_v15  ;;  %25950 = vst [vmem:[#allocation31_spill] sm:$0xff] %v20869_v3  ;;  %v20877_v49 = vcombine.high %v422_v40, %v430_v62 }
 0x173   : > { %8518 = vmatprep.mubr.bf16.mxu1 %v20843_v15  ;;  %7108 = vmatpush1.bf16.msra.mxu0 %v18705_v59  ;;  %v18720_v15 = vld [vmem:[%s25655_s1 + $0xa88] ss:$24 sps:$4 sm:$0xff]   ;;  %v18725_v59 = vld [vmem:[%s25655_s1 + $0xab4] ss:$24 sps:$4 sm:$0xff]  }
 0x174   : > { %8652 = vmatpush1.bf16.msra.mxu1 %v18708_v36  ;;  %7109 = vmatprep.subr.bf16.mxu0 %v18713_v22  ;;  %25951 = vst [vmem:[#allocation32_spill] sm:$0xff] %v20877_v49  ;;  %v18728_v36 = vld [vmem:[%s25655_s1 + $0xabc] ss:$24 sps:$4 sm:$0xff]   ;;  %v18723_v22 = vld [vmem:[%s25655_s1 + $0xab0] ss:$24 sps:$4 sm:$0xff]  }
 0x175   : > { %8653 = vmatprep.subr.bf16.mxu1 %v18716_v63  ;;  %v18726_v63 = vld [vmem:[%s25655_s1 + $0xab8] ss:$24 sps:$4 sm:$0xff]  }
 0x177   : > { %7110 = vmatpush1.bf16.msra.mxu0 %v18711_v27  ;;  %v18731_v27 = vld [vmem:[%s25655_s1 + $0xae4] ss:$24 sps:$4 sm:$0xff]  }
 0x178   : > { %8654 = vmatpush1.bf16.msra.mxu1 %v18714_v34  ;;  %7111 = vmatprep.subr.bf16.mxu0 %v18719_v50  ;;  %v18734_v34 = vld [vmem:[%s25655_s1 + $0xaec] ss:$24 sps:$4 sm:$0xff]   ;;  %v20903_v50 = vcombine.low %v422_v40, %v430_v62  ;;  %v454_v40 = vld [vmem:[%s19953_s24 + $0x390] sm:$0xff] }
 0x179   : > { %8655 = vmatprep.subr.bf16.mxu1 %v18722_v30  ;;  %6975 = vmatmul.mubr.bf16.gmra.mrb[16].mxu0 %v20869_v3  ;;  %v18729_v30 = vld [vmem:[%s25655_s1 + $0xae0] ss:$24 sps:$4 sm:$0xff]   ;;  %v462_v62 = vld [vmem:[%s19953_s24 + $0x3d0] sm:$0xff] }
 0x17a   : > { %8519 = vmatmul.mubr.bf16.gmra.mrb[16].mxu1 %v20869_v3  ;;  %6984 = vmatprep.mubr.bf16.mxu0 %v20877_v49  ;;  %25952 = vst [vmem:[#allocation33_spill] sm:$0xff] %v20903_v50  ;;  %v20911_v3 = vcombine.high %v438_v41, %v446_v26 }
 0x17b   : > { %8528 = vmatprep.mubr.bf16.mxu1 %v20877_v49  ;;  %7112 = vmatpush1.bf16.msra.mxu0 %v18717_v53  ;;  %v18732_v49 = vld [vmem:[%s25655_s1 + $0xae8] ss:$24 sps:$4 sm:$0xff]   ;;  %v18737_v53 = vld [vmem:[%s25655_s1 + $0xb14] ss:$24 sps:$4 sm:$0xff]  }
 0x17c   : > { %8656 = vmatpush1.bf16.msra.mxu1 %v18720_v15  ;;  %7113 = vmatprep.subr.bf16.mxu0 %v18725_v59  ;;  %25953 = vst [vmem:[#allocation34_spill] sm:$0xff] %v20911_v3  ;;  %v18740_v15 = vld [vmem:[%s25655_s1 + $0xb1c] ss:$24 sps:$4 sm:$0xff]   ;;  %v18735_v59 = vld [vmem:[%s25655_s1 + $0xb10] ss:$24 sps:$4 sm:$0xff]  }
 0x17d   : > { %8657 = vmatprep.subr.bf16.mxu1 %v18728_v36  ;;  %v18738_v36 = vld [vmem:[%s25655_s1 + $0xb18] ss:$24 sps:$4 sm:$0xff]  }
 0x17f   : > { %7114 = vmatpush1.bf16.msra.mxu0 %v18723_v22  ;;  %v18743_v22 = vld [vmem:[%s25655_s1 + $0xb44] ss:$24 sps:$4 sm:$0xff]  }
 0x180   : > { %8658 = vmatpush1.bf16.msra.mxu1 %v18726_v63  ;;  %7115 = vmatprep.subr.bf16.mxu0 %v18731_v27  ;;  %v18746_v63 = vld [vmem:[%s25655_s1 + $0xb4c] ss:$24 sps:$4 sm:$0xff]   ;;  %v20937_v27 = vcombine.low %v438_v41, %v446_v26  ;;  %v470_v41 = vld [vmem:[%s19953_s24 + $0x410] sm:$0xff] }
 0x181   : > { %8659 = vmatprep.subr.bf16.mxu1 %v18734_v34  ;;  %6985 = vmatmul.mubr.bf16.gmra.mrb[20].mxu0 %v20903_v50  ;;  %v18741_v34 = vld [vmem:[%s25655_s1 + $0xb40] ss:$24 sps:$4 sm:$0xff]   ;;  %v478_v26 = vld [vmem:[%s19953_s24 + $0x450] sm:$0xff] }
 0x182   : > { %8529 = vmatmul.mubr.bf16.gmra.mrb[20].mxu1 %v20903_v50  ;;  %6994 = vmatprep.mubr.bf16.mxu0 %v20911_v3  ;;  %25954 = vst [vmem:[#allocation35_spill] sm:$0xff] %v20937_v27  ;;  %v20945_v50 = vcombine.high %v454_v40, %v462_v62 }
 0x183   : > { %8538 = vmatprep.mubr.bf16.mxu1 %v20911_v3  ;;  %7116 = vmatpush1.bf16.msra.mxu0 %v18729_v30  ;;  %v18744_v3 = vld [vmem:[%s25655_s1 + $0xb48] ss:$24 sps:$4 sm:$0xff]   ;;  %v18749_v30 = vld [vmem:[%s25655_s1 + $0xb74] ss:$24 sps:$4 sm:$0xff]  }
 0x184   : > { %8660 = vmatpush1.bf16.msra.mxu1 %v18732_v49  ;;  %7117 = vmatprep.subr.bf16.mxu0 %v18737_v53  ;;  %25955 = vst [vmem:[#allocation36_spill] sm:$0xff] %v20945_v50  ;;  %v18752_v49 = vld [vmem:[%s25655_s1 + $0xb7c] ss:$24 sps:$4 sm:$0xff]   ;;  %v18747_v53 = vld [vmem:[%s25655_s1 + $0xb70] ss:$24 sps:$4 sm:$0xff]  }
 0x185   : > { %8661 = vmatprep.subr.bf16.mxu1 %v18740_v15  ;;  %v18750_v15 = vld [vmem:[%s25655_s1 + $0xb78] ss:$24 sps:$4 sm:$0xff]  }
 0x187   : > { %7118 = vmatpush1.bf16.msra.mxu0 %v18735_v59  ;;  %v18755_v59 = vld [vmem:[%s25655_s1 + $0xba4] ss:$24 sps:$4 sm:$0xff]  }
 0x188   : > { %8662 = vmatpush1.bf16.msra.mxu1 %v18738_v36  ;;  %7119 = vmatprep.subr.bf16.mxu0 %v18743_v22  ;;  %v18758_v36 = vld [vmem:[%s25655_s1 + $0xbac] ss:$24 sps:$4 sm:$0xff]   ;;  %v20971_v22 = vcombine.low %v454_v40, %v462_v62  ;;  %v486_v40 = vld [vmem:[%s19953_s24 + $0x490] sm:$0xff] }
 0x189   : > { %8663 = vmatprep.subr.bf16.mxu1 %v18746_v63  ;;  %6995 = vmatmul.mubr.bf16.gmra.mrb[24].mxu0 %v20937_v27  ;;  %v18753_v63 = vld [vmem:[%s25655_s1 + $0xba0] ss:$24 sps:$4 sm:$0xff]   ;;  %v494_v62 = vld [vmem:[%s19953_s24 + $0x4d0] sm:$0xff] }
 0x18a   : > { %8539 = vmatmul.mubr.bf16.gmra.mrb[24].mxu1 %v20937_v27  ;;  %7004 = vmatprep.mubr.bf16.mxu0 %v20945_v50  ;;  %25956 = vst [vmem:[#allocation37_spill] sm:$0xff] %v20971_v22  ;;  %v20979_v27 = vcombine.high %v470_v41, %v478_v26 }
 0x18b   : > { %8548 = vmatprep.mubr.bf16.mxu1 %v20945_v50  ;;  %7120 = vmatpush1.bf16.msra.mxu0 %v18741_v34  ;;  %v18756_v50 = vld [vmem:[%s25655_s1 + $0xba8] ss:$24 sps:$4 sm:$0xff]   ;;  %v18761_v34 = vld [vmem:[%s25655_s1 + $0xbd4] ss:$24 sps:$4 sm:$0xff]  }
 0x18c   : > { %8664 = vmatpush1.bf16.msra.mxu1 %v18744_v3  ;;  %7121 = vmatprep.subr.bf16.mxu0 %v18749_v30  ;;  %25957 = vst [vmem:[#allocation38_spill] sm:$0xff] %v20979_v27  ;;  %v18764_v3 = vld [vmem:[%s25655_s1 + $0xbdc] ss:$24 sps:$4 sm:$0xff]   ;;  %v18759_v30 = vld [vmem:[%s25655_s1 + $0xbd0] ss:$24 sps:$4 sm:$0xff]  }
 0x18d   : > { %8665 = vmatprep.subr.bf16.mxu1 %v18752_v49  ;;  %v18762_v49 = vld [vmem:[%s25655_s1 + $0xbd8] ss:$24 sps:$4 sm:$0xff]  }
 0x18f   : > { %7122 = vmatpush1.bf16.msra.mxu0 %v18747_v53  ;;  %v20999_v53 = vcombine.low %v470_v41, %v478_v26  ;;  %v510_v41 = vld [vmem:[%s19953_s24 + $0x550] sm:$0xff]  ;;  %v21015_v26 = vcombine.low %v486_v40, %v494_v62 }
 0x190   : > { %8666 = vmatpush1.bf16.msra.mxu1 %v18750_v15  ;;  %7123 = vmatprep.subr.bf16.mxu0 %v18755_v59  ;;  %v21001_v15 = vcombine.high %v486_v40, %v494_v62  ;;  %v18767_v59 = vld [vmem:[%s25655_s1 + $0xc04] ss:$24 sps:$4 sm:$0xff]   ;;  %v534_v40 = vld [vmem:[%s19953_s24 + $0x610] sm:$0xff] }
 0x191   : > { %8667 = vmatprep.subr.bf16.mxu1 %v18758_v36  ;;  %7005 = vmatmul.mubr.bf16.gmra.mrb[28].mxu0 %v20971_v22  ;;  %25958 = vst [vmem:[#allocation39_spill] sm:$0xff] %v20999_v53  ;;  %v18770_v36 = vld [vmem:[%s25655_s1 + $0xc0c] ss:$24 sps:$4 sm:$0xff]   ;;  %25960 = vst [vmem:[#allocation41_spill] sm:$0xff] %v21015_v26  ;;  %v542_v62 = vld [vmem:[%s19953_s24 + $0x650] sm:$0xff] }
 0x192   : > { %8549 = vmatmul.mubr.bf16.gmra.mrb[28].mxu1 %v20971_v22  ;;  %7014 = vmatprep.mubr.bf16.mxu0 %v20979_v27  ;;  %25959 = vst [vmem:[#allocation40_spill] sm:$0xff] %v21001_v15 }
 0x193   : > { %8558 = vmatprep.mubr.bf16.mxu1 %v20979_v27  ;;  %7124 = vmatpush1.bf16.msra.mxu0 %v18753_v63  ;;  %v18780_v27 = vld [vmem:[%s25655_s1 + $0xc68] ss:$24 sps:$4 sm:$0xff]  }
 0x194   : > { %8668 = vmatpush1.bf16.msra.mxu1 %v18756_v50  ;;  %7125 = vmatprep.subr.bf16.mxu0 %v18761_v34  ;;  %v502_v50 = vld [vmem:[%s19953_s24 + $0x510] sm:$0xff] }
 0x195   : > { %8669 = vmatprep.subr.bf16.mxu1 %v18764_v3  ;;  %v21017_v63 = vcombine.high %v502_v50, %v510_v41  ;;  %v518_v34 = vld [vmem:[%s19953_s24 + $0x590] sm:$0xff] }
 0x196   : > { %v526_v3 = vld [vmem:[%s19953_s24 + $0x5d0] sm:$0xff] }
 0x197   : > { %7126 = vmatpush1.bf16.msra.mxu0 %v18759_v30  ;;  %25961 = vst [vmem:[#allocation42_spill] sm:$0xff] %v21017_v63  ;;  %v21025_v30 = vcombine.low %v502_v50, %v510_v41  ;;  %v550_v50 = vld [vmem:[%s19953_s24 + $0x690] sm:$0xff] }
 0x198   : > { %8670 = vmatpush1.bf16.msra.mxu1 %v18762_v49  ;;  %7288 = vmatprep.subr.bf16.mxu0 %v18767_v59  ;;  %v21027_v49 = vcombine.high %v518_v34, %v526_v3  ;;  %v21035_v59 = vcombine.low %v518_v34, %v526_v3  ;;  %v558_v41 = vld [vmem:[%s19953_s24 + $0x6d0] sm:$0xff] }
 0x199   : > { %7015 = vmatmul.mubr.bf16.gmra.mrb[32].mxu0 %v20999_v53  ;;  %8832 = vmatprep.subr.bf16.mxu1 %v18770_v36  ;;  %25962 = vst [vmem:[#allocation43_spill] sm:$0xff] %v21025_v30  ;;  %v21037_v36 = vcombine.high %v534_v40, %v542_v62  ;;  %v566_v34 = vld [vmem:[%s19953_s24 + $0x710] sm:$0xff] }
 0x19a   : > { %8559 = vmatmul.mubr.bf16.gmra.mrb[32].mxu1 %v20999_v53  ;;  %7024 = vmatprep.mubr.bf16.mxu0 %v21001_v15  ;;  %25963 = vst [vmem:[#allocation44_spill] sm:$0xff] %v21027_v49  ;;  %25964 = vst [vmem:[#allocation45_spill] sm:$0xff] %v21035_v59  ;;  %v574_v3 = vld [vmem:[%s19953_s24 + $0x750] sm:$0xff] }
 0x19b   : > { %8568 = vmatprep.mubr.bf16.mxu1 %v21001_v15  ;;  %25965 = vst [vmem:[#allocation46_spill] sm:$0xff] %v21037_v36  ;;  %v18779_v15 = vld [vmem:[%s25655_s1 + $0xc64] ss:$24 sps:$4 sm:$0xff]  }
 0x1a1   : > { %7025 = vmatmul.mubr.bf16.gmra.mrb[36].mxu0 %v21015_v26 }
 0x1a2   : > { %8569 = vmatmul.mubr.bf16.gmra.mrb[36].mxu1 %v21015_v26  ;;  %7034 = vmatprep.mubr.bf16.mxu0 %v21017_v63  ;;  %v18774_v26 = vld [vmem:[%s25655_s1 + $0xc38] ss:$24 sps:$4 sm:$0xff]  }
 0x1a3   : > { %8578 = vmatprep.mubr.bf16.mxu1 %v21017_v63  ;;  %v18771_v63 = vld [vmem:[%s25655_s1 + $0xc30] ss:$24 sps:$4 sm:$0xff]  }
 0x1a9   : > { %7035 = vmatmul.mubr.bf16.gmra.mrb[40].mxu0 %v21025_v30 }
 0x1aa   : > { %8579 = vmatmul.mubr.bf16.gmra.mrb[40].mxu1 %v21025_v30  ;;  %7044 = vmatprep.mubr.bf16.mxu0 %v21027_v49  ;;  %v21047_v30 = vcombine.high %v550_v50, %v558_v41 }
 0x1ab   : > { %8588 = vmatprep.mubr.bf16.mxu1 %v21027_v49  ;;  %v21045_v49 = vcombine.low %v534_v40, %v542_v62  ;;  %v582_v40 = vld [vmem:[%s19953_s24 + $0x790] sm:$0xff] }
 0x1ac   : > { %25967 = vst [vmem:[#allocation48_spill] sm:$0xff] %v21047_v30  ;;  %v590_v62 = vld [vmem:[%s19953_s24 + $0x7d0] sm:$0xff] }
 0x1ad   : > { %25966 = vst [vmem:[#allocation47_spill] sm:$0xff] %v21045_v49 }
 0x1b1   : > { %7045 = vmatmul.mubr.bf16.gmra.mrb[44].mxu0 %v21035_v59 }
 0x1b2   : > { %8589 = vmatmul.mubr.bf16.gmra.mrb[44].mxu1 %v21035_v59  ;;  %7054 = vmatprep.mubr.bf16.mxu0 %v21037_v36  ;;  %v21057_v59 = vcombine.high %v566_v34, %v574_v3 }
 0x1b3   : > { %8598 = vmatprep.mubr.bf16.mxu1 %v21037_v36  ;;  %v21055_v36 = vcombine.low %v550_v50, %v558_v41  ;;  %v343_v50 = vld [vmem:[%s19953_s24 + $0x18] sm:$0xff] }
 0x1b4   : > { %25969 = vst [vmem:[#allocation50_spill] sm:$0xff] %v21057_v59  ;;  %v351_v41 = vld [vmem:[%s19953_s24 + $0x58] sm:$0xff] }
 0x1b5   : > { %25968 = vst [vmem:[#allocation49_spill] sm:$0xff] %v21055_v36 }
 0x1b9   : > { %7055 = vmatmul.mubr.bf16.gmra.mrb[48].mxu0 %v21045_v49 }
 0x1ba   : > { %8599 = vmatmul.mubr.bf16.gmra.mrb[48].mxu1 %v21045_v49  ;;  %7064 = vmatprep.mubr.bf16.mxu0 %v21047_v30  ;;  %v21067_v49 = vcombine.high %v582_v40, %v590_v62 }
 0x1bb   : > { %8608 = vmatprep.mubr.bf16.mxu1 %v21047_v30  ;;  %v21065_v30 = vcombine.low %v566_v34, %v574_v3  ;;  %v359_v34 = vld [vmem:[%s19953_s24 + $0x98] sm:$0xff] }
 0x1bc   : > { %25971 = vst [vmem:[#allocation52_spill] sm:$0xff] %v21067_v49  ;;  %v367_v3 = vld [vmem:[%s19953_s24 + $0xd8] sm:$0xff] }
 0x1bd   : > { %25970 = vst [vmem:[#allocation51_spill] sm:$0xff] %v21065_v30  ;;  %v21119_v53 = vcombine.low %v359_v34, %v367_v3 }
 0x1bf   : > { %25976 = vst [vmem:[#allocation57_spill] sm:$0xff] %v21119_v53 }
 0x1c1   : > { %7065 = vmatmul.mubr.bf16.gmra.mrb[52].mxu0 %v21055_v36 }
 0x1c2   : > { %8609 = vmatmul.mubr.bf16.gmra.mrb[52].mxu1 %v21055_v36  ;;  %7074 = vmatprep.mubr.bf16.mxu0 %v21057_v59  ;;  %v21075_v36 = vcombine.low %v582_v40, %v590_v62  ;;  %v18765_v40 = vld [vmem:[%s25655_s1 + $0xc00] ss:$24 sps:$4 sm:$0xff]  }
 0x1c3   : > { %8618 = vmatprep.mubr.bf16.mxu1 %v21057_v59  ;;  %v21077_v59 = vcombine.high %v343_v50, %v351_v41  ;;  %v18768_v62 = vld [vmem:[%s25655_s1 + $0xc08] ss:$24 sps:$4 sm:$0xff]  }
 0x1c4   : > { %25972 = vst [vmem:[#allocation53_spill] sm:$0xff] %v21075_v36 }
 0x1c5   : > { %25973 = vst [vmem:[#allocation54_spill] sm:$0xff] %v21077_v59 }
 0x1c9   : > { %7075 = vmatmul.mubr.bf16.gmra.mrb[56].mxu0 %v21065_v30 }
 0x1ca   : > { %8619 = vmatmul.mubr.bf16.gmra.mrb[56].mxu1 %v21065_v30  ;;  %7084 = vmatprep.mubr.bf16.mxu0 %v21067_v49  ;;  %v21085_v30 = vcombine.low %v343_v50, %v351_v41  ;;  %v375_v50 = vld [vmem:[%s19953_s24 + $0x118] sm:$0xff] }
 0x1cb   : > { %8628 = vmatprep.mubr.bf16.mxu1 %v21067_v49  ;;  %v21093_v49 = vcombine.high %v359_v34, %v367_v3  ;;  %v383_v41 = vld [vmem:[%s19953_s24 + $0x158] sm:$0xff]  ;;  %v18783_v3 = vld [vmem:[%s25655_s1 + $0xc90] ss:$24 sps:$4 sm:$0xff]  }
 0x1cc   : > { %25974 = vst [vmem:[#allocation55_spill] sm:$0xff] %v21085_v30  ;;  %v21127_v22 = vcombine.high %v375_v50, %v383_v41  ;;  %v399_v34 = vld [vmem:[%s19953_s24 + $0x1d8] sm:$0xff] }
 0x1cd   : > { %25975 = vst [vmem:[#allocation56_spill] sm:$0xff] %v21093_v49 }
 0x1ce   : > { %25977 = vst [vmem:[#allocation58_spill] sm:$0xff] %v21127_v22 }
 0x1d1   : > { %7085 = vmatmul.mubr.bf16.gmra.mrb[60].mxu0 %v21075_v36 }
 0x1d2   : > { %8629 = vmatmul.mubr.bf16.gmra.mrb[60].mxu1 %v21075_v36  ;;  %7127 = vmatprep.mubr.bf16.mxu0 %v21077_v59  ;;  %v18773_v36 = vld [vmem:[%s25655_s1 + $0xc34] ss:$24 sps:$4 sm:$0xff]  }
 0x1d3   : > { %8671 = vmatprep.mubr.bf16.mxu1 %v21077_v59  ;;  %v18776_v59 = vld [vmem:[%s25655_s1 + $0xc3c] ss:$24 sps:$4 sm:$0xff]  }
 0x1d9   : > { %7128 = vmatmul.mubr.bf16.vlgmr.msra.gmra.mrb[0].mxu0 %v21085_v30 }
 0x1da   : > { %8672 = vmatmul.mubr.bf16.vlgmr.msra.gmra.mrb[0].mxu1 %v21085_v30  ;;  %7137 = vmatprep.mubr.bf16.mxu0 %v21093_v49  ;;  %v18782_v30 = vld [vmem:[%s25655_s1 + $0xc6c] ss:$24 sps:$4 sm:$0xff]  }
 0x1db   : > { %8681 = vmatprep.mubr.bf16.mxu1 %v21093_v49  ;;  %7289 = vmatpush1.bf16.msra.mxu0 %v18765_v40  ;;  %v18777_v49 = vld [vmem:[%s25655_s1 + $0xc60] ss:$24 sps:$4 sm:$0xff]   ;;  %v18785_v40 = vld [vmem:[%s25655_s1 + $0xc94] ss:$24 sps:$4 sm:$0xff]  }
 0x1dc   : > { %8833 = vmatpush1.bf16.msra.mxu1 %v18768_v62  ;;  %7290 = vmatprep.subr.bf16.mxu0 %v18773_v36  ;;  %v391_v36 = vld [vmem:[%s19953_s24 + $0x198] sm:$0xff] }
 0x1dd   : > { %8834 = vmatprep.subr.bf16.mxu1 %v18776_v59  ;;  %v18788_v59 = vld [vmem:[%s25655_s1 + $0xc9c] ss:$24 sps:$4 sm:$0xff]   ;;  %v18786_v62 = vld [vmem:[%s25655_s1 + $0xc98] ss:$24 sps:$4 sm:$0xff]  }
 0x1df   : > { %7291 = vmatpush1.bf16.msra.mxu0 %v18771_v63  ;;  %v21153_v63 = vcombine.low %v375_v50, %v383_v41  ;;  %v407_v50 = vld [vmem:[%s19953_s24 + $0x218] sm:$0xff] }
 0x1e0   : > { %8835 = vmatpush1.bf16.msra.mxu1 %v18774_v26  ;;  %7292 = vmatprep.subr.bf16.mxu0 %v18779_v15  ;;  %v18791_v15 = vld [vmem:[%s25655_s1 + $0xcc4] ss:$24 sps:$4 sm:$0xff]  }
 0x1e1   : > { %8836 = vmatprep.subr.bf16.mxu1 %v18782_v30  ;;  %7138 = vmatmul.mubr.bf16.gmra.mrb[4].mxu0 %v21119_v53  ;;  %v18794_v26 = vld [vmem:[%s25655_s1 + $0xccc] ss:$24 sps:$4 sm:$0xff]   ;;  %25978 = vst [vmem:[#allocation59_spill] sm:$0xff] %v21153_v63  ;;  %v18789_v30 = vld [vmem:[%s25655_s1 + $0xcc0] ss:$24 sps:$4 sm:$0xff]  }
 0x1e2   : > { %8682 = vmatmul.mubr.bf16.gmra.mrb[4].mxu1 %v21119_v53  ;;  %7147 = vmatprep.mubr.bf16.mxu0 %v21127_v22  ;;  %v21161_v53 = vcombine.high %v391_v36, %v399_v34  ;;  %v415_v41 = vld [vmem:[%s19953_s24 + $0x258] sm:$0xff] }
 0x1e3   : > { %8691 = vmatprep.mubr.bf16.mxu1 %v21127_v22  ;;  %7293 = vmatpush1.bf16.msra.mxu0 %v18777_v49  ;;  %v18792_v22 = vld [vmem:[%s25655_s1 + $0xcc8] ss:$24 sps:$4 sm:$0xff]   ;;  %v18797_v49 = vld [vmem:[%s25655_s1 + $0xcf4] ss:$24 sps:$4 sm:$0xff]  }
 0x1e4   : > { %8837 = vmatpush1.bf16.msra.mxu1 %v18780_v27  ;;  %7294 = vmatprep.subr.bf16.mxu0 %v18785_v40  ;;  %25979 = vst [vmem:[#allocation60_spill] sm:$0xff] %v21161_v53  ;;  %v18800_v27 = vld [vmem:[%s25655_s1 + $0xcfc] ss:$24 sps:$4 sm:$0xff]   ;;  %v18795_v40 = vld [vmem:[%s25655_s1 + $0xcf0] ss:$24 sps:$4 sm:$0xff]  }
 0x1e5   : > { %8838 = vmatprep.subr.bf16.mxu1 %v18788_v59  ;;  %v18798_v59 = vld [vmem:[%s25655_s1 + $0xcf8] ss:$24 sps:$4 sm:$0xff]  }
 0x1e7   : > { %7295 = vmatpush1.bf16.msra.mxu0 %v18783_v3  ;;  %v18803_v3 = vld [vmem:[%s25655_s1 + $0xd24] ss:$24 sps:$4 sm:$0xff]  }
 0x1e8   : > { %8839 = vmatpush1.bf16.msra.mxu1 %v18786_v62  ;;  %7296 = vmatprep.subr.bf16.mxu0 %v18791_v15  ;;  %v18806_v62 = vld [vmem:[%s25655_s1 + $0xd2c] ss:$24 sps:$4 sm:$0xff]   ;;  %v21187_v15 = vcombine.low %v391_v36, %v399_v34  ;;  %v423_v36 = vld [vmem:[%s19953_s24 + $0x298] sm:$0xff] }
 0x1e9   : > { %8840 = vmatprep.subr.bf16.mxu1 %v18794_v26  ;;  %7148 = vmatmul.mubr.bf16.gmra.mrb[8].mxu0 %v21153_v63  ;;  %v18801_v26 = vld [vmem:[%s25655_s1 + $0xd20] ss:$24 sps:$4 sm:$0xff]  }
 0x1ea   : > { %8692 = vmatmul.mubr.bf16.gmra.mrb[8].mxu1 %v21153_v63  ;;  %7157 = vmatprep.mubr.bf16.mxu0 %v21161_v53  ;;  %25980 = vst [vmem:[#allocation61_spill] sm:$0xff] %v21187_v15  ;;  %v21195_v63 = vcombine.high %v407_v50, %v415_v41  ;;  %v431_v34 = vld [vmem:[%s19953_s24 + $0x2d8] sm:$0xff] }
 0x1eb   : > { %8701 = vmatprep.mubr.bf16.mxu1 %v21161_v53  ;;  %7297 = vmatpush1.bf16.msra.mxu0 %v18789_v30  ;;  %v18804_v53 = vld [vmem:[%s25655_s1 + $0xd28] ss:$24 sps:$4 sm:$0xff]   ;;  %v18809_v30 = vld [vmem:[%s25655_s1 + $0xd54] ss:$24 sps:$4 sm:$0xff]  }
 0x1ec   : > { %8841 = vmatpush1.bf16.msra.mxu1 %v18792_v22  ;;  %7298 = vmatprep.subr.bf16.mxu0 %v18797_v49  ;;  %25981 = vst [vmem:[#allocation62_spill] sm:$0xff] %v21195_v63  ;;  %v18812_v22 = vld [vmem:[%s25655_s1 + $0xd5c] ss:$24 sps:$4 sm:$0xff]   ;;  %v18807_v49 = vld [vmem:[%s25655_s1 + $0xd50] ss:$24 sps:$4 sm:$0xff]  }
 0x1ed   : > { %8842 = vmatprep.subr.bf16.mxu1 %v18800_v27  ;;  %v18810_v27 = vld [vmem:[%s25655_s1 + $0xd58] ss:$24 sps:$4 sm:$0xff]  }
 0x1ef   : > { %7299 = vmatpush1.bf16.msra.mxu0 %v18795_v40  ;;  %v18815_v40 = vld [vmem:[%s25655_s1 + $0xd84] ss:$24 sps:$4 sm:$0xff]  }
 0x1f0   : > { %8843 = vmatpush1.bf16.msra.mxu1 %v18798_v59  ;;  %7300 = vmatprep.subr.bf16.mxu0 %v18803_v3  ;;  %v18818_v59 = vld [vmem:[%s25655_s1 + $0xd8c] ss:$24 sps:$4 sm:$0xff]   ;;  %v21221_v3 = vcombine.low %v407_v50, %v415_v41  ;;  %v18824_v50 = vld [vmem:[%s25655_s1 + $0xdbc] ss:$24 sps:$4 sm:$0xff]  }
 0x1f1   : > { %8844 = vmatprep.subr.bf16.mxu1 %v18806_v62  ;;  %7158 = vmatmul.mubr.bf16.gmra.mrb[12].mxu0 %v21187_v15  ;;  %v21223_v62 = vcombine.high %v423_v36, %v431_v34  ;;  %v439_v41 = vld [vmem:[%s19953_s24 + $0x318] sm:$0xff] }
 0x1f2   : > { %8702 = vmatmul.mubr.bf16.gmra.mrb[12].mxu1 %v21187_v15  ;;  %7167 = vmatprep.mubr.bf16.mxu0 %v21195_v63  ;;  %v18816_v15 = vld [vmem:[%s25655_s1 + $0xd88] ss:$24 sps:$4 sm:$0xff]  }
 0x1f3   : > { %8711 = vmatprep.mubr.bf16.mxu1 %v21195_v63  ;;  %7301 = vmatpush1.bf16.msra.mxu0 %v18801_v26  ;;  %v18813_v63 = vld [vmem:[%s25655_s1 + $0xd80] ss:$24 sps:$4 sm:$0xff]  }
 0x1f4   : > { %8845 = vmatpush1.bf16.msra.mxu1 %v18804_v53  ;;  %7302 = vmatprep.subr.bf16.mxu0 %v18809_v30  ;;  %v18821_v53 = vld [vmem:[%s25655_s1 + $0xdb4] ss:$24 sps:$4 sm:$0xff]   ;;  %v447_v26 = vld [vmem:[%s19953_s24 + $0x358] sm:$0xff]  ;;  %v18819_v30 = vld [vmem:[%s25655_s1 + $0xdb0] ss:$24 sps:$4 sm:$0xff]  }
 0x1f5   : > { %8846 = vmatprep.subr.bf16.mxu1 %v18812_v22  ;;  %v18822_v22 = vld [vmem:[%s25655_s1 + $0xdb8] ss:$24 sps:$4 sm:$0xff]  }
 0x1f7   : > { %7303 = vmatpush1.bf16.msra.mxu0 %v18807_v49  ;;  %v18827_v49 = vld [vmem:[%s25655_s1 + $0xde4] ss:$24 sps:$4 sm:$0xff]  }
 0x1f8   : > { %8847 = vmatpush1.bf16.msra.mxu1 %v18810_v27  ;;  %7304 = vmatprep.subr.bf16.mxu0 %v18815_v40  ;;  %v21257_v27 = vcombine.high %v439_v41, %v447_v26  ;;  %v18825_v40 = vld [vmem:[%s25655_s1 + $0xde0] ss:$24 sps:$4 sm:$0xff]  }
 0x1f9   : > { %8848 = vmatprep.subr.bf16.mxu1 %v18818_v59  ;;  %7168 = vmatmul.mubr.bf16.gmra.mrb[16].mxu0 %v21221_v3  ;;  %v18828_v59 = vld [vmem:[%s25655_s1 + $0xde8] ss:$24 sps:$4 sm:$0xff]  }
 0x1fa   : > { %8712 = vmatmul.mubr.bf16.gmra.mrb[16].mxu1 %v21221_v3  ;;  %7177 = vmatprep.mubr.bf16.mxu0 %v21223_v62  ;;  %25982 = vst [vmem:[#allocation63_spill] sm:$0xff] %v21257_v27 }
 0x1fb   : > { %8721 = vmatprep.mubr.bf16.mxu1 %v21223_v62  ;;  %7305 = vmatpush1.bf16.msra.mxu0 %v18813_v63  ;;  %v18830_v63 = vld [vmem:[%s25655_s1 + $0xdec] ss:$24 sps:$4 sm:$0xff]  }
 0x1fc   : > { %8849 = vmatpush1.bf16.msra.mxu1 %v18816_v15  ;;  %7306 = vmatprep.subr.bf16.mxu0 %v18821_v53  ;;  %v21255_v15 = vcombine.low %v423_v36, %v431_v34  ;;  %v18833_v53 = vld [vmem:[%s25655_s1 + $0xe14] ss:$24 sps:$4 sm:$0xff]   ;;  %v455_v34 = vld [vmem:[%s19953_s24 + $0x398] sm:$0xff] }
 0x1fd   : > { %8850 = vmatprep.subr.bf16.mxu1 %v18824_v50  ;;  %v18836_v36 = vld [vmem:[%s25655_s1 + $0xe1c] ss:$24 sps:$4 sm:$0xff]  }
 0x1fe   : > { %v463_v50 = vld [vmem:[%s19953_s24 + $0x3d8] sm:$0xff] }
 0x1ff   : > { %7307 = vmatpush1.bf16.msra.mxu0 %v18819_v30  ;;  %v18831_v30 = vld [vmem:[%s25655_s1 + $0xe10] ss:$24 sps:$4 sm:$0xff]  }
 0x200   : > { %8851 = vmatpush1.bf16.msra.mxu1 %v18822_v22  ;;  %7308 = vmatprep.subr.bf16.mxu0 %v18827_v49  ;;  %v18834_v22 = vld [vmem:[%s25655_s1 + $0xe18] ss:$24 sps:$4 sm:$0xff]   ;;  %v18839_v49 = vld [vmem:[%s25655_s1 + $0xe44] ss:$24 sps:$4 sm:$0xff]  }
 0x201   : > { %8852 = vmatprep.subr.bf16.mxu1 %v18830_v63  ;;  %7178 = vmatmul.mubr.bf16.gmra.mrb[20].mxu0 %v21255_v15  ;;  %v18842_v63 = vld [vmem:[%s25655_s1 + $0xe4c] ss:$24 sps:$4 sm:$0xff]  }
 0x202   : > { %8722 = vmatmul.mubr.bf16.gmra.mrb[20].mxu1 %v21255_v15  ;;  %7187 = vmatprep.mubr.bf16.mxu0 %v21257_v27 }
 0x203   : > { %8731 = vmatprep.mubr.bf16.mxu1 %v21257_v27  ;;  %7309 = vmatpush1.bf16.msra.mxu0 %v18825_v40  ;;  %v21289_v40 = vcombine.low %v439_v41, %v447_v26  ;;  %v18845_v27 = vld [vmem:[%s25655_s1 + $0xe74] ss:$24 sps:$4 sm:$0xff]   ;;  %v471_v26 = vld [vmem:[%s19953_s24 + $0x418] sm:$0xff] }
 0x204   : > { %8853 = vmatpush1.bf16.msra.mxu1 %v18828_v59  ;;  %7310 = vmatprep.subr.bf16.mxu0 %v18833_v53  ;;  %v21291_v59 = vcombine.high %v455_v34, %v463_v50  ;;  %v18837_v53 = vld [vmem:[%s25655_s1 + $0xe40] ss:$24 sps:$4 sm:$0xff]   ;;  %v18848_v41 = vld [vmem:[%s25655_s1 + $0xe7c] ss:$24 sps:$4 sm:$0xff]  }
 0x205   : > { %8854 = vmatprep.subr.bf16.mxu1 %v18836_v36  ;;  %25983 = vst [vmem:[#allocation64_spill] sm:$0xff] %v21289_v40  ;;  %v18840_v36 = vld [vmem:[%s25655_s1 + $0xe48] ss:$24 sps:$4 sm:$0xff]  }
 0x206   : > { %25984 = vst [vmem:[#allocation65_spill] sm:$0xff] %v21291_v59 }
 0x207   : > { %7311 = vmatpush1.bf16.msra.mxu0 %v18831_v30  ;;  %v479_v30 = vld [vmem:[%s19953_s24 + $0x458] sm:$0xff] }
 0x208   : > { %8855 = vmatpush1.bf16.msra.mxu1 %v18834_v22  ;;  %7312 = vmatprep.subr.bf16.mxu0 %v18839_v49  ;;  %v18843_v22 = vld [vmem:[%s25655_s1 + $0xe70] ss:$24 sps:$4 sm:$0xff]  }
 0x209   : > { %8856 = vmatprep.subr.bf16.mxu1 %v18842_v63  ;;  %7188 = vmatmul.mubr.bf16.gmra.mrb[24].mxu0 %v21289_v40  ;;  %v18846_v49 = vld [vmem:[%s25655_s1 + $0xe78] ss:$24 sps:$4 sm:$0xff]   ;;  %v18851_v63 = vld [vmem:[%s25655_s1 + $0xea4] ss:$24 sps:$4 sm:$0xff]  }
 0x20a   : > { %8732 = vmatmul.mubr.bf16.gmra.mrb[24].mxu1 %v21289_v40  ;;  %7197 = vmatprep.mubr.bf16.mxu0 %v21291_v59  ;;  %v18857_v40 = vld [vmem:[%s25655_s1 + $0xed4] ss:$24 sps:$4 sm:$0xff]  }
 0x20b   : > { %8741 = vmatprep.mubr.bf16.mxu1 %v21291_v59  ;;  %7313 = vmatpush1.bf16.msra.mxu0 %v18837_v53  ;;  %v18854_v53 = vld [vmem:[%s25655_s1 + $0xeac] ss:$24 sps:$4 sm:$0xff]   ;;  %v21325_v59 = vcombine.high %v471_v26, %v479_v30 }
 0x20c   : > { %8857 = vmatpush1.bf16.msra.mxu1 %v18840_v36  ;;  %7314 = vmatprep.subr.bf16.mxu0 %v18845_v27  ;;  %v21323_v36 = vcombine.low %v455_v34, %v463_v50  ;;  %v18849_v27 = vld [vmem:[%s25655_s1 + $0xea0] ss:$24 sps:$4 sm:$0xff]   ;;  %v18860_v34 = vld [vmem:[%s25655_s1 + $0xedc] ss:$24 sps:$4 sm:$0xff]  }
 0x20d   : > { %8858 = vmatprep.subr.bf16.mxu1 %v18848_v41  ;;  %25986 = vst [vmem:[#allocation67_spill] sm:$0xff] %v21325_v59  ;;  %v18852_v41 = vld [vmem:[%s25655_s1 + $0xea8] ss:$24 sps:$4 sm:$0xff]   ;;  %v487_v50 = vld [vmem:[%s19953_s24 + $0x498] sm:$0xff] }
 0x20e   : > { %25985 = vst [vmem:[#allocation66_spill] sm:$0xff] %v21323_v36 }
 0x20f   : > { %7315 = vmatpush1.bf16.msra.mxu0 %v18843_v22  ;;  %v495_v22 = vld [vmem:[%s19953_s24 + $0x4d8] sm:$0xff] }
 0x210   : > { %8859 = vmatpush1.bf16.msra.mxu1 %v18846_v49  ;;  %7316 = vmatprep.subr.bf16.mxu0 %v18851_v63  ;;  %v18855_v49 = vld [vmem:[%s25655_s1 + $0xed0] ss:$24 sps:$4 sm:$0xff]  }
 0x211   : > { %8860 = vmatprep.subr.bf16.mxu1 %v18854_v53  ;;  %7198 = vmatmul.mubr.bf16.gmra.mrb[28].mxu0 %v21323_v36  ;;  %v18858_v63 = vld [vmem:[%s25655_s1 + $0xed8] ss:$24 sps:$4 sm:$0xff]   ;;  %v21351_v53 = vcombine.low %v471_v26, %v479_v30  ;;  %v21367_v30 = vcombine.low %v487_v50, %v495_v22 }
 0x212   : > { %8742 = vmatmul.mubr.bf16.gmra.mrb[28].mxu1 %v21323_v36  ;;  %7207 = vmatprep.mubr.bf16.mxu0 %v21325_v59  ;;  %v21353_v36 = vcombine.high %v487_v50, %v495_v22  ;;  %v511_v26 = vld [vmem:[%s19953_s24 + $0x558] sm:$0xff] }
 0x213   : > { %8751 = vmatprep.mubr.bf16.mxu1 %v21325_v59  ;;  %7317 = vmatpush1.bf16.msra.mxu0 %v18849_v27  ;;  %25987 = vst [vmem:[#allocation68_spill] sm:$0xff] %v21351_v53  ;;  %v18863_v27 = vld [vmem:[%s25655_s1 + $0xf04] ss:$24 sps:$4 sm:$0xff]   ;;  %25989 = vst [vmem:[#allocation70_spill] sm:$0xff] %v21367_v30  ;;  %v18881_v59 = vld [vmem:[%s25655_s1 + $0xf94] ss:$24 sps:$4 sm:$0xff]  }
 0x214   : > { %8861 = vmatpush1.bf16.msra.mxu1 %v18852_v41  ;;  %7318 = vmatprep.subr.bf16.mxu0 %v18857_v40  ;;  %25988 = vst [vmem:[#allocation69_spill] sm:$0xff] %v21353_v36  ;;  %v18866_v41 = vld [vmem:[%s25655_s1 + $0xf0c] ss:$24 sps:$4 sm:$0xff]   ;;  %v503_v40 = vld [vmem:[%s19953_s24 + $0x518] sm:$0xff] }
 0x215   : > { %8862 = vmatprep.subr.bf16.mxu1 %v18860_v34  ;;  %v21369_v34 = vcombine.high %v503_v40, %v511_v26  ;;  %v535_v50 = vld [vmem:[%s19953_s24 + $0x618] sm:$0xff] }
 0x216   : > { %v543_v22 = vld [vmem:[%s19953_s24 + $0x658] sm:$0xff] }
 0x217   : > { %7319 = vmatpush1.bf16.msra.mxu0 %v18855_v49  ;;  %25990 = vst [vmem:[#allocation71_spill] sm:$0xff] %v21369_v34  ;;  %v519_v49 = vld [vmem:[%s19953_s24 + $0x598] sm:$0xff] }
 0x218   : > { %8863 = vmatpush1.bf16.msra.mxu1 %v18858_v63  ;;  %7481 = vmatprep.subr.bf16.mxu0 %v18863_v27  ;;  %v527_v63 = vld [vmem:[%s19953_s24 + $0x5d8] sm:$0xff]  ;;  %v21377_v27 = vcombine.low %v503_v40, %v511_v26 }
 0x219   : > { %7208 = vmatmul.mubr.bf16.gmra.mrb[32].mxu0 %v21351_v53  ;;  %9025 = vmatprep.subr.bf16.mxu1 %v18866_v41  ;;  %v21379_v41 = vcombine.high %v519_v49, %v527_v63  ;;  %v551_v40 = vld [vmem:[%s19953_s24 + $0x698] sm:$0xff] }
 0x21a   : > { %8752 = vmatmul.mubr.bf16.gmra.mrb[32].mxu1 %v21351_v53  ;;  %7217 = vmatprep.mubr.bf16.mxu0 %v21353_v36  ;;  %25991 = vst [vmem:[#allocation72_spill] sm:$0xff] %v21377_v27  ;;  %v559_v26 = vld [vmem:[%s19953_s24 + $0x6d8] sm:$0xff] }
 0x21b   : > { %8761 = vmatprep.mubr.bf16.mxu1 %v21353_v36  ;;  %25992 = vst [vmem:[#allocation73_spill] sm:$0xff] %v21379_v41  ;;  %v18867_v36 = vld [vmem:[%s25655_s1 + $0xf30] ss:$24 sps:$4 sm:$0xff]  }
 0x21c   : > { %v18870_v53 = vld [vmem:[%s25655_s1 + $0xf38] ss:$24 sps:$4 sm:$0xff]  }
 0x221   : > { %7218 = vmatmul.mubr.bf16.gmra.mrb[36].mxu0 %v21367_v30 }
 0x222   : > { %8762 = vmatmul.mubr.bf16.gmra.mrb[36].mxu1 %v21367_v30  ;;  %7227 = vmatprep.mubr.bf16.mxu0 %v21369_v34  ;;  %v21389_v30 = vcombine.high %v535_v50, %v543_v22 }
 0x223   : > { %8771 = vmatprep.mubr.bf16.mxu1 %v21369_v34  ;;  %v21387_v34 = vcombine.low %v519_v49, %v527_v63  ;;  %v567_v49 = vld [vmem:[%s19953_s24 + $0x718] sm:$0xff] }
 0x224   : > { %25994 = vst [vmem:[#allocation75_spill] sm:$0xff] %v21389_v30  ;;  %v575_v63 = vld [vmem:[%s19953_s24 + $0x758] sm:$0xff] }
 0x225   : > { %25993 = vst [vmem:[#allocation74_spill] sm:$0xff] %v21387_v34 }
 0x229   : > { %7228 = vmatmul.mubr.bf16.gmra.mrb[40].mxu0 %v21377_v27 }
 0x22a   : > { %8772 = vmatmul.mubr.bf16.gmra.mrb[40].mxu1 %v21377_v27  ;;  %7237 = vmatprep.mubr.bf16.mxu0 %v21379_v41  ;;  %v21399_v27 = vcombine.high %v551_v40, %v559_v26 }
 0x22b   : > { %8781 = vmatprep.mubr.bf16.mxu1 %v21379_v41  ;;  %v21397_v41 = vcombine.low %v535_v50, %v543_v22  ;;  %v583_v50 = vld [vmem:[%s19953_s24 + $0x798] sm:$0xff] }
 0x22c   : > { %25996 = vst [vmem:[#allocation77_spill] sm:$0xff] %v21399_v27  ;;  %v591_v22 = vld [vmem:[%s19953_s24 + $0x7d8] sm:$0xff] }
 0x22d   : > { %25995 = vst [vmem:[#allocation76_spill] sm:$0xff] %v21397_v41 }
 0x231   : > { %7238 = vmatmul.mubr.bf16.gmra.mrb[44].mxu0 %v21387_v34 }
 0x232   : > { %8782 = vmatmul.mubr.bf16.gmra.mrb[44].mxu1 %v21387_v34  ;;  %7247 = vmatprep.mubr.bf16.mxu0 %v21389_v30  ;;  %v21409_v34 = vcombine.high %v567_v49, %v575_v63 }
 0x233   : > { %8791 = vmatprep.mubr.bf16.mxu1 %v21389_v30  ;;  %v21407_v30 = vcombine.low %v551_v40, %v559_v26  ;;  %v344_v40 = vld [vmem:[%s19953_s24 + $0x20] sm:$0xff] }
 0x234   : > { %25998 = vst [vmem:[#allocation79_spill] sm:$0xff] %v21409_v34  ;;  %v352_v26 = vld [vmem:[%s19953_s24 + $0x60] sm:$0xff] }
 0x235   : > { %25997 = vst [vmem:[#allocation78_spill] sm:$0xff] %v21407_v30 }
 0x239   : > { %7248 = vmatmul.mubr.bf16.gmra.mrb[48].mxu0 %v21397_v41 }
 0x23a   : > { %8792 = vmatmul.mubr.bf16.gmra.mrb[48].mxu1 %v21397_v41  ;;  %7257 = vmatprep.mubr.bf16.mxu0 %v21399_v27  ;;  %v21419_v41 = vcombine.high %v583_v50, %v591_v22 }
 0x23b   : > { %8801 = vmatprep.mubr.bf16.mxu1 %v21399_v27  ;;  %v21417_v27 = vcombine.low %v567_v49, %v575_v63  ;;  %v360_v49 = vld [vmem:[%s19953_s24 + $0xa0] sm:$0xff] }
 0x23c   : > { %26000 = vst [vmem:[#allocation81_spill] sm:$0xff] %v21419_v41  ;;  %v368_v63 = vld [vmem:[%s19953_s24 + $0xe0] sm:$0xff] }
 0x23d   : > { %25999 = vst [vmem:[#allocation80_spill] sm:$0xff] %v21417_v27 }
 0x241   : > { %7258 = vmatmul.mubr.bf16.gmra.mrb[52].mxu0 %v21407_v30 }
 0x242   : > { %8802 = vmatmul.mubr.bf16.gmra.mrb[52].mxu1 %v21407_v30  ;;  %7267 = vmatprep.mubr.bf16.mxu0 %v21409_v34  ;;  %v21427_v30 = vcombine.low %v583_v50, %v591_v22  ;;  %v18861_v50 = vld [vmem:[%s25655_s1 + $0xf00] ss:$24 sps:$4 sm:$0xff]  }
 0x243   : > { %8811 = vmatprep.mubr.bf16.mxu1 %v21409_v34  ;;  %v21429_v34 = vcombine.high %v344_v40, %v352_v26  ;;  %v18864_v22 = vld [vmem:[%s25655_s1 + $0xf08] ss:$24 sps:$4 sm:$0xff]  }
 0x244   : > { %26001 = vst [vmem:[#allocation82_spill] sm:$0xff] %v21427_v30 }
 0x245   : > { %26002 = vst [vmem:[#allocation83_spill] sm:$0xff] %v21429_v34 }
 0x249   : > { %7268 = vmatmul.mubr.bf16.gmra.mrb[56].mxu0 %v21417_v27 }
 0x24a   : > { %8812 = vmatmul.mubr.bf16.gmra.mrb[56].mxu1 %v21417_v27  ;;  %7277 = vmatprep.mubr.bf16.mxu0 %v21419_v41  ;;  %v21437_v27 = vcombine.low %v344_v40, %v352_v26  ;;  %v376_v40 = vld [vmem:[%s19953_s24 + $0x120] sm:$0xff] }
 0x24b   : > { %8821 = vmatprep.mubr.bf16.mxu1 %v21419_v41  ;;  %v21439_v41 = vcombine.high %v360_v49, %v368_v63  ;;  %v384_v26 = vld [vmem:[%s19953_s24 + $0x160] sm:$0xff] }
 0x24c   : > { %26003 = vst [vmem:[#allocation84_spill] sm:$0xff] %v21437_v27 }
 0x24d   : > { %26004 = vst [vmem:[#allocation85_spill] sm:$0xff] %v21439_v41 }
 0x251   : > { %7278 = vmatmul.mubr.bf16.gmra.mrb[60].mxu0 %v21427_v30 }
 0x252   : > { %8822 = vmatmul.mubr.bf16.gmra.mrb[60].mxu1 %v21427_v30  ;;  %7320 = vmatprep.mubr.bf16.mxu0 %v21429_v34  ;;  %v18869_v30 = vld [vmem:[%s25655_s1 + $0xf34] ss:$24 sps:$4 sm:$0xff]  }
 0x253   : > { %8864 = vmatprep.mubr.bf16.mxu1 %v21429_v34  ;;  %v18872_v34 = vld [vmem:[%s25655_s1 + $0xf3c] ss:$24 sps:$4 sm:$0xff]  }
 0x259   : > { %7321 = vmatmul.mubr.bf16.vlgmr.msra.gmra.mrb[0].mxu0 %v21437_v27 }
 0x25a   : > { %8865 = vmatmul.mubr.bf16.vlgmr.msra.gmra.mrb[0].mxu1 %v21437_v27  ;;  %7330 = vmatprep.mubr.bf16.mxu0 %v21439_v41  ;;  %v18875_v27 = vld [vmem:[%s25655_s1 + $0xf64] ss:$24 sps:$4 sm:$0xff]  }
 0x25b   : > { %8874 = vmatprep.mubr.bf16.mxu1 %v21439_v41  ;;  %7482 = vmatpush1.bf16.msra.mxu0 %v18861_v50  ;;  %v18878_v50 = vld [vmem:[%s25655_s1 + $0xf6c] ss:$24 sps:$4 sm:$0xff]   ;;  %v21473_v41 = vcombine.high %v376_v40, %v384_v26 }
 0x25c   : > { %9026 = vmatpush1.bf16.msra.mxu1 %v18864_v22  ;;  %7483 = vmatprep.subr.bf16.mxu0 %v18869_v30  ;;  %v21471_v22 = vcombine.low %v360_v49, %v368_v63  ;;  %v18873_v30 = vld [vmem:[%s25655_s1 + $0xf60] ss:$24 sps:$4 sm:$0xff]   ;;  %v18884_v49 = vld [vmem:[%s25655_s1 + $0xf9c] ss:$24 sps:$4 sm:$0xff]  }
 0x25d   : > { %9027 = vmatprep.subr.bf16.mxu1 %v18872_v34  ;;  %26006 = vst [vmem:[#allocation87_spill] sm:$0xff] %v21473_v41  ;;  %v18876_v34 = vld [vmem:[%s25655_s1 + $0xf68] ss:$24 sps:$4 sm:$0xff]   ;;  %v18882_v63 = vld [vmem:[%s25655_s1 + $0xf98] ss:$24 sps:$4 sm:$0xff]  }
 0x25e   : > { %26005 = vst [vmem:[#allocation86_spill] sm:$0xff] %v21471_v22 }
 0x25f   : > { %7484 = vmatpush1.bf16.msra.mxu0 %v18867_v36  ;;  %v392_v36 = vld [vmem:[%s19953_s24 + $0x1a0] sm:$0xff] }
 0x260   : > { %9028 = vmatpush1.bf16.msra.mxu1 %v18870_v53  ;;  %7485 = vmatprep.subr.bf16.mxu0 %v18875_v27  ;;  %v400_v53 = vld [vmem:[%s19953_s24 + $0x1e0] sm:$0xff]  ;;  %v18879_v27 = vld [vmem:[%s25655_s1 + $0xf90] ss:$24 sps:$4 sm:$0xff]  }
 0x261   : > { %9029 = vmatprep.subr.bf16.mxu1 %v18878_v50  ;;  %7331 = vmatmul.mubr.bf16.gmra.mrb[4].mxu0 %v21471_v22  ;;  %v18887_v50 = vld [vmem:[%s25655_s1 + $0xfc4] ss:$24 sps:$4 sm:$0xff]  }
 0x262   : > { %8875 = vmatmul.mubr.bf16.gmra.mrb[4].mxu1 %v21471_v22  ;;  %7340 = vmatprep.mubr.bf16.mxu0 %v21473_v41  ;;  %v18893_v22 = vld [vmem:[%s25655_s1 + $0xff4] ss:$24 sps:$4 sm:$0xff]  }
 0x263   : > { %8884 = vmatprep.mubr.bf16.mxu1 %v21473_v41  ;;  %7486 = vmatpush1.bf16.msra.mxu0 %v18873_v30  ;;  %v18890_v30 = vld [vmem:[%s25655_s1 + $0xfcc] ss:$24 sps:$4 sm:$0xff]   ;;  %v21507_v41 = vcombine.high %v392_v36, %v400_v53 }
 0x264   : > { %9030 = vmatpush1.bf16.msra.mxu1 %v18876_v34  ;;  %7487 = vmatprep.subr.bf16.mxu0 %v18881_v59  ;;  %v21505_v34 = vcombine.low %v376_v40, %v384_v26  ;;  %v18885_v59 = vld [vmem:[%s25655_s1 + $0xfc0] ss:$24 sps:$4 sm:$0xff]   ;;  %v18896_v40 = vld [vmem:[%s25655_s1 + $0xffc] ss:$24 sps:$4 sm:$0xff]  }
 0x265   : > { %9031 = vmatprep.subr.bf16.mxu1 %v18884_v49  ;;  %26008 = vst [vmem:[#allocation89_spill] sm:$0xff] %v21507_v41  ;;  %v18888_v49 = vld [vmem:[%s25655_s1 + $0xfc8] ss:$24 sps:$4 sm:$0xff]  }
 0x266   : > { %26007 = vst [vmem:[#allocation88_spill] sm:$0xff] %v21505_v34  ;;  %v408_v26 = vld [vmem:[%s19953_s24 + $0x220] sm:$0xff] }
 0x267   : > { %7488 = vmatpush1.bf16.msra.mxu0 %v18879_v27  ;;  %v416_v27 = vld [vmem:[%s19953_s24 + $0x260] sm:$0xff] }
 0x268   : > { %9032 = vmatpush1.bf16.msra.mxu1 %v18882_v63  ;;  %7489 = vmatprep.subr.bf16.mxu0 %v18887_v50  ;;  %v18891_v63 = vld [vmem:[%s25655_s1 + $0xff0] ss:$24 sps:$4 sm:$0xff]  }
 0x269   : > { %9033 = vmatprep.subr.bf16.mxu1 %v18890_v30  ;;  %7341 = vmatmul.mubr.bf16.gmra.mrb[8].mxu0 %v21505_v34  ;;  %v18894_v50 = vld [vmem:[%s25655_s1 + $0xff8] ss:$24 sps:$4 sm:$0xff]   ;;  %v18899_v30 = vld [vmem:[%s25655_s1 + $0x1024] ss:$24 sps:$4 sm:$0xff]  }
 0x26a   : > { %8885 = vmatmul.mubr.bf16.gmra.mrb[8].mxu1 %v21505_v34  ;;  %7350 = vmatprep.mubr.bf16.mxu0 %v21507_v41  ;;  %v18905_v34 = vld [vmem:[%s25655_s1 + $0x1054] ss:$24 sps:$4 sm:$0xff]  }
 0x26b   : > { %8894 = vmatprep.mubr.bf16.mxu1 %v21507_v41  ;;  %7490 = vmatpush1.bf16.msra.mxu0 %v18885_v59  ;;  %v18902_v59 = vld [vmem:[%s25655_s1 + $0x102c] ss:$24 sps:$4 sm:$0xff]   ;;  %v21541_v41 = vcombine.high %v408_v26, %v416_v27 }
 0x26c   : > { %9034 = vmatpush1.bf16.msra.mxu1 %v18888_v49  ;;  %7491 = vmatprep.subr.bf16.mxu0 %v18893_v22  ;;  %v21539_v49 = vcombine.low %v392_v36, %v400_v53  ;;  %v18897_v22 = vld [vmem:[%s25655_s1 + $0x1020] ss:$24 sps:$4 sm:$0xff]   ;;  %v18908_v36 = vld [vmem:[%s25655_s1 + $0x105c] ss:$24 sps:$4 sm:$0xff]  }
 0x26d   : > { %9035 = vmatprep.subr.bf16.mxu1 %v18896_v40  ;;  %26010 = vst [vmem:[#allocation91_spill] sm:$0xff] %v21541_v41  ;;  %v18900_v40 = vld [vmem:[%s25655_s1 + $0x1028] ss:$24 sps:$4 sm:$0xff]  }
 0x26e   : > { %26009 = vst [vmem:[#allocation90_spill] sm:$0xff] %v21539_v49  ;;  %v424_v53 = vld [vmem:[%s19953_s24 + $0x2a0] sm:$0xff] }
 0x26f   : > { %7492 = vmatpush1.bf16.msra.mxu0 %v18891_v63  ;;  %v432_v63 = vld [vmem:[%s19953_s24 + $0x2e0] sm:$0xff] }
 0x270   : > { %9036 = vmatpush1.bf16.msra.mxu1 %v18894_v50  ;;  %7493 = vmatprep.subr.bf16.mxu0 %v18899_v30  ;;  %v18903_v50 = vld [vmem:[%s25655_s1 + $0x1050] ss:$24 sps:$4 sm:$0xff]  }
 0x271   : > { %9037 = vmatprep.subr.bf16.mxu1 %v18902_v59  ;;  %7351 = vmatmul.mubr.bf16.gmra.mrb[12].mxu0 %v21539_v49  ;;  %v18906_v30 = vld [vmem:[%s25655_s1 + $0x1058] ss:$24 sps:$4 sm:$0xff]   ;;  %v18911_v59 = vld [vmem:[%s25655_s1 + $0x1084] ss:$24 sps:$4 sm:$0xff]  }
 0x272   : > { %8895 = vmatmul.mubr.bf16.gmra.mrb[12].mxu1 %v21539_v49  ;;  %7360 = vmatprep.mubr.bf16.mxu0 %v21541_v41  ;;  %v18917_v49 = vld [vmem:[%s25655_s1 + $0x10b4] ss:$24 sps:$4 sm:$0xff]  }
 0x273   : > { %8904 = vmatprep.mubr.bf16.mxu1 %v21541_v41  ;;  %7494 = vmatpush1.bf16.msra.mxu0 %v18897_v22  ;;  %v18914_v22 = vld [vmem:[%s25655_s1 + $0x108c] ss:$24 sps:$4 sm:$0xff]   ;;  %v21575_v41 = vcombine.high %v424_v53, %v432_v63 }
 0x274   : > { %9038 = vmatpush1.bf16.msra.mxu1 %v18900_v40  ;;  %7495 = vmatprep.subr.bf16.mxu0 %v18905_v34  ;;  %v21573_v40 = vcombine.low %v408_v26, %v416_v27  ;;  %v18909_v34 = vld [vmem:[%s25655_s1 + $0x1080] ss:$24 sps:$4 sm:$0xff]   ;;  %v18920_v26 = vld [vmem:[%s25655_s1 + $0x10bc] ss:$24 sps:$4 sm:$0xff]  }
 0x275   : > { %9039 = vmatprep.subr.bf16.mxu1 %v18908_v36  ;;  %26012 = vst [vmem:[#allocation93_spill] sm:$0xff] %v21575_v41  ;;  %v18912_v36 = vld [vmem:[%s25655_s1 + $0x1088] ss:$24 sps:$4 sm:$0xff]  }
 0x276   : > { %26011 = vst [vmem:[#allocation92_spill] sm:$0xff] %v21573_v40  ;;  %v440_v27 = vld [vmem:[%s19953_s24 + $0x320] sm:$0xff] }
 0x277   : > { %7496 = vmatpush1.bf16.msra.mxu0 %v18903_v50  ;;  %v448_v50 = vld [vmem:[%s19953_s24 + $0x360] sm:$0xff] }
 0x278   : > { %9040 = vmatpush1.bf16.msra.mxu1 %v18906_v30  ;;  %7497 = vmatprep.subr.bf16.mxu0 %v18911_v59  ;;  %v18915_v30 = vld [vmem:[%s25655_s1 + $0x10b0] ss:$24 sps:$4 sm:$0xff]  }
 0x279   : > { %9041 = vmatprep.subr.bf16.mxu1 %v18914_v22  ;;  %7361 = vmatmul.mubr.bf16.gmra.mrb[16].mxu0 %v21573_v40  ;;  %v18918_v59 = vld [vmem:[%s25655_s1 + $0x10b8] ss:$24 sps:$4 sm:$0xff]   ;;  %v18923_v22 = vld [vmem:[%s25655_s1 + $0x10e4] ss:$24 sps:$4 sm:$0xff]  }
 0x27a   : > { %8905 = vmatmul.mubr.bf16.gmra.mrb[16].mxu1 %v21573_v40  ;;  %7370 = vmatprep.mubr.bf16.mxu0 %v21575_v41  ;;  %v18929_v40 = vld [vmem:[%s25655_s1 + $0x1114] ss:$24 sps:$4 sm:$0xff]  }
 0x27b   : > { %8914 = vmatprep.mubr.bf16.mxu1 %v21575_v41  ;;  %7498 = vmatpush1.bf16.msra.mxu0 %v18909_v34  ;;  %v18926_v34 = vld [vmem:[%s25655_s1 + $0x10ec] ss:$24 sps:$4 sm:$0xff]   ;;  %v21609_v41 = vcombine.high %v440_v27, %v448_v50 }
 0x27c   : > { %9042 = vmatpush1.bf16.msra.mxu1 %v18912_v36  ;;  %7499 = vmatprep.subr.bf16.mxu0 %v18917_v49  ;;  %v21607_v36 = vcombine.low %v424_v53, %v432_v63  ;;  %v18921_v49 = vld [vmem:[%s25655_s1 + $0x10e0] ss:$24 sps:$4 sm:$0xff]   ;;  %v18932_v53 = vld [vmem:[%s25655_s1 + $0x111c] ss:$24 sps:$4 sm:$0xff]  }
 0x27d   : > { %9043 = vmatprep.subr.bf16.mxu1 %v18920_v26  ;;  %26014 = vst [vmem:[#allocation95_spill] sm:$0xff] %v21609_v41  ;;  %v18924_v26 = vld [vmem:[%s25655_s1 + $0x10e8] ss:$24 sps:$4 sm:$0xff]  }
 0x27e   : > { %26013 = vst [vmem:[#allocation94_spill] sm:$0xff] %v21607_v36  ;;  %v456_v63 = vld [vmem:[%s19953_s24 + $0x3a0] sm:$0xff] }
 0x27f   : > { %7500 = vmatpush1.bf16.msra.mxu0 %v18915_v30  ;;  %v464_v30 = vld [vmem:[%s19953_s24 + $0x3e0] sm:$0xff] }
 0x280   : > { %9044 = vmatpush1.bf16.msra.mxu1 %v18918_v59  ;;  %7501 = vmatprep.subr.bf16.mxu0 %v18923_v22  ;;  %v18927_v59 = vld [vmem:[%s25655_s1 + $0x1110] ss:$24 sps:$4 sm:$0xff]  }
 0x281   : > { %9045 = vmatprep.subr.bf16.mxu1 %v18926_v34  ;;  %7371 = vmatmul.mubr.bf16.gmra.mrb[20].mxu0 %v21607_v36  ;;  %v18930_v22 = vld [vmem:[%s25655_s1 + $0x1118] ss:$24 sps:$4 sm:$0xff]   ;;  %v18935_v34 = vld [vmem:[%s25655_s1 + $0x1144] ss:$24 sps:$4 sm:$0xff]  }
 0x282   : > { %8915 = vmatmul.mubr.bf16.gmra.mrb[20].mxu1 %v21607_v36  ;;  %7380 = vmatprep.mubr.bf16.mxu0 %v21609_v41  ;;  %v18941_v36 = vld [vmem:[%s25655_s1 + $0x1174] ss:$24 sps:$4 sm:$0xff]  }
 0x283   : > { %8924 = vmatprep.mubr.bf16.mxu1 %v21609_v41  ;;  %7502 = vmatpush1.bf16.msra.mxu0 %v18921_v49  ;;  %v18938_v49 = vld [vmem:[%s25655_s1 + $0x114c] ss:$24 sps:$4 sm:$0xff]   ;;  %v21643_v41 = vcombine.high %v456_v63, %v464_v30 }
 0x284   : > { %9046 = vmatpush1.bf16.msra.mxu1 %v18924_v26  ;;  %7503 = vmatprep.subr.bf16.mxu0 %v18929_v40  ;;  %v21641_v26 = vcombine.low %v440_v27, %v448_v50  ;;  %v18933_v40 = vld [vmem:[%s25655_s1 + $0x1140] ss:$24 sps:$4 sm:$0xff]   ;;  %v18944_v27 = vld [vmem:[%s25655_s1 + $0x117c] ss:$24 sps:$4 sm:$0xff]  }
 0x285   : > { %9047 = vmatprep.subr.bf16.mxu1 %v18932_v53  ;;  %26016 = vst [vmem:[#allocation97_spill] sm:$0xff] %v21643_v41  ;;  %v18936_v53 = vld [vmem:[%s25655_s1 + $0x1148] ss:$24 sps:$4 sm:$0xff]  }
 0x286   : > { %26015 = vst [vmem:[#allocation96_spill] sm:$0xff] %v21641_v26  ;;  %v472_v50 = vld [vmem:[%s19953_s24 + $0x420] sm:$0xff] }
 0x287   : > { %7504 = vmatpush1.bf16.msra.mxu0 %v18927_v59  ;;  %v480_v59 = vld [vmem:[%s19953_s24 + $0x460] sm:$0xff] }
 0x288   : > { %9048 = vmatpush1.bf16.msra.mxu1 %v18930_v22  ;;  %7505 = vmatprep.subr.bf16.mxu0 %v18935_v34  ;;  %v18939_v22 = vld [vmem:[%s25655_s1 + $0x1170] ss:$24 sps:$4 sm:$0xff]  }
 0x289   : > { %9049 = vmatprep.subr.bf16.mxu1 %v18938_v49  ;;  %7381 = vmatmul.mubr.bf16.gmra.mrb[24].mxu0 %v21641_v26  ;;  %v18942_v34 = vld [vmem:[%s25655_s1 + $0x1178] ss:$24 sps:$4 sm:$0xff]   ;;  %v18947_v49 = vld [vmem:[%s25655_s1 + $0x11a4] ss:$24 sps:$4 sm:$0xff]  }
 0x28a   : > { %8925 = vmatmul.mubr.bf16.gmra.mrb[24].mxu1 %v21641_v26  ;;  %7390 = vmatprep.mubr.bf16.mxu0 %v21643_v41  ;;  %v18953_v26 = vld [vmem:[%s25655_s1 + $0x11d4] ss:$24 sps:$4 sm:$0xff]  }
 0x28b   : > { %8934 = vmatprep.mubr.bf16.mxu1 %v21643_v41  ;;  %7506 = vmatpush1.bf16.msra.mxu0 %v18933_v40  ;;  %v18950_v40 = vld [vmem:[%s25655_s1 + $0x11ac] ss:$24 sps:$4 sm:$0xff]   ;;  %v21677_v41 = vcombine.high %v472_v50, %v480_v59 }
 0x28c   : > { %9050 = vmatpush1.bf16.msra.mxu1 %v18936_v53  ;;  %7507 = vmatprep.subr.bf16.mxu0 %v18941_v36  ;;  %v21675_v53 = vcombine.low %v456_v63, %v464_v30  ;;  %v18945_v36 = vld [vmem:[%s25655_s1 + $0x11a0] ss:$24 sps:$4 sm:$0xff]   ;;  %v18956_v63 = vld [vmem:[%s25655_s1 + $0x11dc] ss:$24 sps:$4 sm:$0xff]  }
 0x28d   : > { %9051 = vmatprep.subr.bf16.mxu1 %v18944_v27  ;;  %26018 = vst [vmem:[#allocation99_spill] sm:$0xff] %v21677_v41  ;;  %v18948_v27 = vld [vmem:[%s25655_s1 + $0x11a8] ss:$24 sps:$4 sm:$0xff]  }
 0x28e   : > { %26017 = vst [vmem:[#allocation98_spill] sm:$0xff] %v21675_v53  ;;  %v488_v30 = vld [vmem:[%s19953_s24 + $0x4a0] sm:$0xff] }
 0x28f   : > { %7508 = vmatpush1.bf16.msra.mxu0 %v18939_v22  ;;  %v496_v22 = vld [vmem:[%s19953_s24 + $0x4e0] sm:$0xff] }
 0x290   : > { %9052 = vmatpush1.bf16.msra.mxu1 %v18942_v34  ;;  %7509 = vmatprep.subr.bf16.mxu0 %v18947_v49  ;;  %v18951_v34 = vld [vmem:[%s25655_s1 + $0x11d0] ss:$24 sps:$4 sm:$0xff]  }
 0x291   : > { %9053 = vmatprep.subr.bf16.mxu1 %v18950_v40  ;;  %7391 = vmatmul.mubr.bf16.gmra.mrb[28].mxu0 %v21675_v53  ;;  %v18954_v49 = vld [vmem:[%s25655_s1 + $0x11d8] ss:$24 sps:$4 sm:$0xff]   ;;  %v21703_v40 = vcombine.low %v472_v50, %v480_v59  ;;  %v512_v50 = vld [vmem:[%s19953_s24 + $0x560] sm:$0xff]  ;;  %v21719_v59 = vcombine.low %v488_v30, %v496_v22 }
 0x292   : > { %8935 = vmatmul.mubr.bf16.gmra.mrb[28].mxu1 %v21675_v53  ;;  %7400 = vmatprep.mubr.bf16.mxu0 %v21677_v41  ;;  %v21705_v53 = vcombine.high %v488_v30, %v496_v22  ;;  %v536_v30 = vld [vmem:[%s19953_s24 + $0x620] sm:$0xff] }
 0x293   : > { %8944 = vmatprep.mubr.bf16.mxu1 %v21677_v41  ;;  %7510 = vmatpush1.bf16.msra.mxu0 %v18945_v36  ;;  %26019 = vst [vmem:[#allocation100_spill] sm:$0xff] %v21703_v40  ;;  %v18959_v36 = vld [vmem:[%s25655_s1 + $0x1204] ss:$24 sps:$4 sm:$0xff]   ;;  %26021 = vst [vmem:[#allocation102_spill] sm:$0xff] %v21719_v59  ;;  %v18977_v41 = vld [vmem:[%s25655_s1 + $0x1294] ss:$24 sps:$4 sm:$0xff]  }
 0x294   : > { %9054 = vmatpush1.bf16.msra.mxu1 %v18948_v27  ;;  %7511 = vmatprep.subr.bf16.mxu0 %v18953_v26  ;;  %26020 = vst [vmem:[#allocation101_spill] sm:$0xff] %v21705_v53  ;;  %v18962_v27 = vld [vmem:[%s25655_s1 + $0x120c] ss:$24 sps:$4 sm:$0xff]  }
 0x295   : > { %9055 = vmatprep.subr.bf16.mxu1 %v18956_v63  ;;  %v504_v26 = vld [vmem:[%s19953_s24 + $0x520] sm:$0xff] }
 0x296   : > { %v21721_v63 = vcombine.high %v504_v26, %v512_v50  ;;  %v544_v22 = vld [vmem:[%s19953_s24 + $0x660] sm:$0xff] }
 0x297   : > { %7512 = vmatpush1.bf16.msra.mxu0 %v18951_v34  ;;  %v520_v34 = vld [vmem:[%s19953_s24 + $0x5a0] sm:$0xff] }
 0x298   : > { %9056 = vmatpush1.bf16.msra.mxu1 %v18954_v49  ;;  %7674 = vmatprep.subr.bf16.mxu0 %v18959_v36  ;;  %26022 = vst [vmem:[#allocation103_spill] sm:$0xff] %v21721_v63  ;;  %v528_v49 = vld [vmem:[%s19953_s24 + $0x5e0] sm:$0xff]  ;;  %v21729_v36 = vcombine.low %v504_v26, %v512_v50 }
 0x299   : > { %7401 = vmatmul.mubr.bf16.gmra.mrb[32].mxu0 %v21703_v40  ;;  %9218 = vmatprep.subr.bf16.mxu1 %v18962_v27  ;;  %v21731_v27 = vcombine.high %v520_v34, %v528_v49  ;;  %v552_v26 = vld [vmem:[%s19953_s24 + $0x6a0] sm:$0xff] }
 0x29a   : > { %8945 = vmatmul.mubr.bf16.gmra.mrb[32].mxu1 %v21703_v40  ;;  %7410 = vmatprep.mubr.bf16.mxu0 %v21705_v53  ;;  %26023 = vst [vmem:[#allocation104_spill] sm:$0xff] %v21729_v36  ;;  %v560_v50 = vld [vmem:[%s19953_s24 + $0x6e0] sm:$0xff]  ;;  %v18966_v40 = vld [vmem:[%s25655_s1 + $0x1238] ss:$24 sps:$4 sm:$0xff]  }
 0x29b   : > { %8954 = vmatprep.mubr.bf16.mxu1 %v21705_v53  ;;  %26024 = vst [vmem:[#allocation105_spill] sm:$0xff] %v21731_v27  ;;  %v18963_v53 = vld [vmem:[%s25655_s1 + $0x1230] ss:$24 sps:$4 sm:$0xff]  }
 0x2a1   : > { %7411 = vmatmul.mubr.bf16.gmra.mrb[36].mxu0 %v21719_v59 }
 0x2a2   : > { %8955 = vmatmul.mubr.bf16.gmra.mrb[36].mxu1 %v21719_v59  ;;  %7420 = vmatprep.mubr.bf16.mxu0 %v21721_v63  ;;  %v21741_v59 = vcombine.high %v536_v30, %v544_v22 }
 0x2a3   : > { %8964 = vmatprep.mubr.bf16.mxu1 %v21721_v63  ;;  %v21739_v63 = vcombine.low %v520_v34, %v528_v49  ;;  %v568_v34 = vld [vmem:[%s19953_s24 + $0x720] sm:$0xff] }
 0x2a4   : > { %26026 = vst [vmem:[#allocation107_spill] sm:$0xff] %v21741_v59  ;;  %v576_v49 = vld [vmem:[%s19953_s24 + $0x760] sm:$0xff] }
 0x2a5   : > { %26025 = vst [vmem:[#allocation106_spill] sm:$0xff] %v21739_v63 }
 0x2a9   : > { %7421 = vmatmul.mubr.bf16.gmra.mrb[40].mxu0 %v21729_v36 }
 0x2aa   : > { %8965 = vmatmul.mubr.bf16.gmra.mrb[40].mxu1 %v21729_v36  ;;  %7430 = vmatprep.mubr.bf16.mxu0 %v21731_v27  ;;  %v21751_v36 = vcombine.high %v552_v26, %v560_v50 }
 0x2ab   : > { %8974 = vmatprep.mubr.bf16.mxu1 %v21731_v27  ;;  %v21749_v27 = vcombine.low %v536_v30, %v544_v22  ;;  %v584_v30 = vld [vmem:[%s19953_s24 + $0x7a0] sm:$0xff] }
 0x2ac   : > { %26028 = vst [vmem:[#allocation109_spill] sm:$0xff] %v21751_v36  ;;  %v592_v22 = vld [vmem:[%s19953_s24 + $0x7e0] sm:$0xff] }
 0x2ad   : > { %26027 = vst [vmem:[#allocation108_spill] sm:$0xff] %v21749_v27 }
 0x2b1   : > { %7431 = vmatmul.mubr.bf16.gmra.mrb[44].mxu0 %v21739_v63 }
 0x2b2   : > { %8975 = vmatmul.mubr.bf16.gmra.mrb[44].mxu1 %v21739_v63  ;;  %7440 = vmatprep.mubr.bf16.mxu0 %v21741_v59  ;;  %v21761_v63 = vcombine.high %v568_v34, %v576_v49 }
 0x2b3   : > { %8984 = vmatprep.mubr.bf16.mxu1 %v21741_v59  ;;  %v21759_v59 = vcombine.low %v552_v26, %v560_v50  ;;  %v345_v26 = vld [vmem:[%s19953_s24 + $0x28] sm:$0xff] }
 0x2b4   : > { %26030 = vst [vmem:[#allocation111_spill] sm:$0xff] %v21761_v63  ;;  %v353_v50 = vld [vmem:[%s19953_s24 + $0x68] sm:$0xff] }
 0x2b5   : > { %26029 = vst [vmem:[#allocation110_spill] sm:$0xff] %v21759_v59 }
 0x2b9   : > { %7441 = vmatmul.mubr.bf16.gmra.mrb[48].mxu0 %v21749_v27 }
 0x2ba   : > { %8985 = vmatmul.mubr.bf16.gmra.mrb[48].mxu1 %v21749_v27  ;;  %7450 = vmatprep.mubr.bf16.mxu0 %v21751_v36  ;;  %v21771_v27 = vcombine.high %v584_v30, %v592_v22 }
 0x2bb   : > { %8994 = vmatprep.mubr.bf16.mxu1 %v21751_v36  ;;  %v21769_v36 = vcombine.low %v568_v34, %v576_v49  ;;  %v361_v34 = vld [vmem:[%s19953_s24 + $0xa8] sm:$0xff] }
 0x2bc   : > { %26032 = vst [vmem:[#allocation113_spill] sm:$0xff] %v21771_v27  ;;  %v369_v49 = vld [vmem:[%s19953_s24 + $0xe8] sm:$0xff] }
 0x2bd   : > { %26031 = vst [vmem:[#allocation112_spill] sm:$0xff] %v21769_v36 }
 0x2c1   : > { %7451 = vmatmul.mubr.bf16.gmra.mrb[52].mxu0 %v21759_v59 }
 0x2c2   : > { %8995 = vmatmul.mubr.bf16.gmra.mrb[52].mxu1 %v21759_v59  ;;  %7460 = vmatprep.mubr.bf16.mxu0 %v21761_v63  ;;  %v21779_v59 = vcombine.low %v584_v30, %v592_v22  ;;  %v18957_v30 = vld [vmem:[%s25655_s1 + $0x1200] ss:$24 sps:$4 sm:$0xff]  }
 0x2c3   : > { %9004 = vmatprep.mubr.bf16.mxu1 %v21761_v63  ;;  %v21781_v63 = vcombine.high %v345_v26, %v353_v50  ;;  %v18960_v22 = vld [vmem:[%s25655_s1 + $0x1208] ss:$24 sps:$4 sm:$0xff]  }
 0x2c4   : > { %26033 = vst [vmem:[#allocation114_spill] sm:$0xff] %v21779_v59 }
 0x2c5   : > { %26034 = vst [vmem:[#allocation115_spill] sm:$0xff] %v21781_v63 }
 0x2c9   : > { %7461 = vmatmul.mubr.bf16.gmra.mrb[56].mxu0 %v21769_v36 }
 0x2ca   : > { %9005 = vmatmul.mubr.bf16.gmra.mrb[56].mxu1 %v21769_v36  ;;  %7470 = vmatprep.mubr.bf16.mxu0 %v21771_v27  ;;  %v21789_v36 = vcombine.low %v345_v26, %v353_v50  ;;  %v377_v26 = vld [vmem:[%s19953_s24 + $0x128] sm:$0xff] }
 0x2cb   : > { %9014 = vmatprep.mubr.bf16.mxu1 %v21771_v27  ;;  %v21791_v27 = vcombine.high %v361_v34, %v369_v49  ;;  %v385_v50 = vld [vmem:[%s19953_s24 + $0x168] sm:$0xff] }
 0x2cc   : > { %26035 = vst [vmem:[#allocation116_spill] sm:$0xff] %v21789_v36 }
 0x2cd   : > { %26036 = vst [vmem:[#allocation117_spill] sm:$0xff] %v21791_v27 }
 0x2d1   : > { %7471 = vmatmul.mubr.bf16.gmra.mrb[60].mxu0 %v21779_v59 }
 0x2d2   : > { %9015 = vmatmul.mubr.bf16.gmra.mrb[60].mxu1 %v21779_v59  ;;  %7513 = vmatprep.mubr.bf16.mxu0 %v21781_v63  ;;  %v18965_v59 = vld [vmem:[%s25655_s1 + $0x1234] ss:$24 sps:$4 sm:$0xff]  }
 0x2d3   : > { %9057 = vmatprep.mubr.bf16.mxu1 %v21781_v63  ;;  %v18968_v63 = vld [vmem:[%s25655_s1 + $0x123c] ss:$24 sps:$4 sm:$0xff]  }
 0x2d9   : > { %7514 = vmatmul.mubr.bf16.vlgmr.msra.gmra.mrb[0].mxu0 %v21789_v36 }
 0x2da   : > { %9058 = vmatmul.mubr.bf16.vlgmr.msra.gmra.mrb[0].mxu1 %v21789_v36  ;;  %7523 = vmatprep.mubr.bf16.mxu0 %v21791_v27  ;;  %v18971_v36 = vld [vmem:[%s25655_s1 + $0x1264] ss:$24 sps:$4 sm:$0xff]  }
 0x2db   : > { %9067 = vmatprep.mubr.bf16.mxu1 %v21791_v27  ;;  %7675 = vmatpush1.bf16.msra.mxu0 %v18957_v30  ;;  %v18974_v30 = vld [vmem:[%s25655_s1 + $0x126c] ss:$24 sps:$4 sm:$0xff]   ;;  %v21825_v27 = vcombine.high %v377_v26, %v385_v50 }
 0x2dc   : > { %9219 = vmatpush1.bf16.msra.mxu1 %v18960_v22  ;;  %7676 = vmatprep.subr.bf16.mxu0 %v18965_v59  ;;  %v21823_v22 = vcombine.low %v361_v34, %v369_v49  ;;  %v18969_v59 = vld [vmem:[%s25655_s1 + $0x1260] ss:$24 sps:$4 sm:$0xff]   ;;  %v18980_v34 = vld [vmem:[%s25655_s1 + $0x129c] ss:$24 sps:$4 sm:$0xff]  }
 0x2dd   : > { %9220 = vmatprep.subr.bf16.mxu1 %v18968_v63  ;;  %26038 = vst [vmem:[#allocation119_spill] sm:$0xff] %v21825_v27  ;;  %v18972_v63 = vld [vmem:[%s25655_s1 + $0x1268] ss:$24 sps:$4 sm:$0xff]   ;;  %v18978_v49 = vld [vmem:[%s25655_s1 + $0x1298] ss:$24 sps:$4 sm:$0xff]  }
 0x2de   : > { %26037 = vst [vmem:[#allocation118_spill] sm:$0xff] %v21823_v22 }
 0x2df   : > { %7677 = vmatpush1.bf16.msra.mxu0 %v18963_v53  ;;  %v393_v53 = vld [vmem:[%s19953_s24 + $0x1a8] sm:$0xff] }
 0x2e0   : > { %9221 = vmatpush1.bf16.msra.mxu1 %v18966_v40  ;;  %7678 = vmatprep.subr.bf16.mxu0 %v18971_v36  ;;  %v401_v40 = vld [vmem:[%s19953_s24 + $0x1e8] sm:$0xff] }
 0x2e1   : > { %9222 = vmatprep.subr.bf16.mxu1 %v18974_v30  ;;  %7524 = vmatmul.mubr.bf16.gmra.mrb[4].mxu0 %v21823_v22  ;;  %v18975_v36 = vld [vmem:[%s25655_s1 + $0x1290] ss:$24 sps:$4 sm:$0xff]   ;;  %v18983_v30 = vld [vmem:[%s25655_s1 + $0x12c4] ss:$24 sps:$4 sm:$0xff]  }
 0x2e2   : > { %9068 = vmatmul.mubr.bf16.gmra.mrb[4].mxu1 %v21823_v22  ;;  %7533 = vmatprep.mubr.bf16.mxu0 %v21825_v27  ;;  %v18989_v22 = vld [vmem:[%s25655_s1 + $0x12f4] ss:$24 sps:$4 sm:$0xff]  }
 0x2e3   : > { %9077 = vmatprep.mubr.bf16.mxu1 %v21825_v27  ;;  %7679 = vmatpush1.bf16.msra.mxu0 %v18969_v59  ;;  %v18986_v59 = vld [vmem:[%s25655_s1 + $0x12cc] ss:$24 sps:$4 sm:$0xff]   ;;  %v21859_v27 = vcombine.high %v393_v53, %v401_v40 }
 0x2e4   : > { %9223 = vmatpush1.bf16.msra.mxu1 %v18972_v63  ;;  %7680 = vmatprep.subr.bf16.mxu0 %v18977_v41  ;;  %v21857_v63 = vcombine.low %v377_v26, %v385_v50  ;;  %v18981_v41 = vld [vmem:[%s25655_s1 + $0x12c0] ss:$24 sps:$4 sm:$0xff]   ;;  %v18992_v26 = vld [vmem:[%s25655_s1 + $0x12fc] ss:$24 sps:$4 sm:$0xff]   ;;  %v409_v50 = vld [vmem:[%s19953_s24 + $0x228] sm:$0xff] }
 0x2e5   : > { %9224 = vmatprep.subr.bf16.mxu1 %v18980_v34  ;;  %26040 = vst [vmem:[#allocation121_spill] sm:$0xff] %v21859_v27  ;;  %v18984_v34 = vld [vmem:[%s25655_s1 + $0x12c8] ss:$24 sps:$4 sm:$0xff]  }
 0x2e6   : > { %26039 = vst [vmem:[#allocation120_spill] sm:$0xff] %v21857_v63 }
 0x2e7   : > { %7681 = vmatpush1.bf16.msra.mxu0 %v18975_v36  ;;  %v417_v36 = vld [vmem:[%s19953_s24 + $0x268] sm:$0xff] }
 0x2e8   : > { %9225 = vmatpush1.bf16.msra.mxu1 %v18978_v49  ;;  %7682 = vmatprep.subr.bf16.mxu0 %v18983_v30  ;;  %v18987_v49 = vld [vmem:[%s25655_s1 + $0x12f0] ss:$24 sps:$4 sm:$0xff]  }
 0x2e9   : > { %9226 = vmatprep.subr.bf16.mxu1 %v18986_v59  ;;  %7534 = vmatmul.mubr.bf16.gmra.mrb[8].mxu0 %v21857_v63  ;;  %v18990_v30 = vld [vmem:[%s25655_s1 + $0x12f8] ss:$24 sps:$4 sm:$0xff]   ;;  %v18995_v59 = vld [vmem:[%s25655_s1 + $0x1324] ss:$24 sps:$4 sm:$0xff]  }
 0x2ea   : > { %9078 = vmatmul.mubr.bf16.gmra.mrb[8].mxu1 %v21857_v63  ;;  %7543 = vmatprep.mubr.bf16.mxu0 %v21859_v27  ;;  %v19001_v63 = vld [vmem:[%s25655_s1 + $0x1354] ss:$24 sps:$4 sm:$0xff]  }
 0x2eb   : > { %9087 = vmatprep.mubr.bf16.mxu1 %v21859_v27  ;;  %7683 = vmatpush1.bf16.msra.mxu0 %v18981_v41  ;;  %v18998_v41 = vld [vmem:[%s25655_s1 + $0x132c] ss:$24 sps:$4 sm:$0xff]   ;;  %v21893_v27 = vcombine.high %v409_v50, %v417_v36 }
 0x2ec   : > { %9227 = vmatpush1.bf16.msra.mxu1 %v18984_v34  ;;  %7684 = vmatprep.subr.bf16.mxu0 %v18989_v22  ;;  %v21891_v34 = vcombine.low %v393_v53, %v401_v40  ;;  %v18993_v22 = vld [vmem:[%s25655_s1 + $0x1320] ss:$24 sps:$4 sm:$0xff]   ;;  %v19004_v53 = vld [vmem:[%s25655_s1 + $0x135c] ss:$24 sps:$4 sm:$0xff]   ;;  %v425_v40 = vld [vmem:[%s19953_s24 + $0x2a8] sm:$0xff] }
 0x2ed   : > { %9228 = vmatprep.subr.bf16.mxu1 %v18992_v26  ;;  %26042 = vst [vmem:[#allocation123_spill] sm:$0xff] %v21893_v27  ;;  %v18996_v26 = vld [vmem:[%s25655_s1 + $0x1328] ss:$24 sps:$4 sm:$0xff]  }
 0x2ee   : > { %26041 = vst [vmem:[#allocation122_spill] sm:$0xff] %v21891_v34 }
 0x2ef   : > { %7685 = vmatpush1.bf16.msra.mxu0 %v18987_v49  ;;  %v433_v49 = vld [vmem:[%s19953_s24 + $0x2e8] sm:$0xff] }
 0x2f0   : > { %9229 = vmatpush1.bf16.msra.mxu1 %v18990_v30  ;;  %7686 = vmatprep.subr.bf16.mxu0 %v18995_v59  ;;  %v18999_v30 = vld [vmem:[%s25655_s1 + $0x1350] ss:$24 sps:$4 sm:$0xff]  }
 0x2f1   : > { %9230 = vmatprep.subr.bf16.mxu1 %v18998_v41  ;;  %7544 = vmatmul.mubr.bf16.gmra.mrb[12].mxu0 %v21891_v34  ;;  %v19002_v59 = vld [vmem:[%s25655_s1 + $0x1358] ss:$24 sps:$4 sm:$0xff]   ;;  %v19007_v41 = vld [vmem:[%s25655_s1 + $0x1384] ss:$24 sps:$4 sm:$0xff]  }
 0x2f2   : > { %9088 = vmatmul.mubr.bf16.gmra.mrb[12].mxu1 %v21891_v34  ;;  %7553 = vmatprep.mubr.bf16.mxu0 %v21893_v27  ;;  %v19013_v34 = vld [vmem:[%s25655_s1 + $0x13b4] ss:$24 sps:$4 sm:$0xff]  }
 0x2f3   : > { %9097 = vmatprep.mubr.bf16.mxu1 %v21893_v27  ;;  %7687 = vmatpush1.bf16.msra.mxu0 %v18993_v22  ;;  %v19010_v22 = vld [vmem:[%s25655_s1 + $0x138c] ss:$24 sps:$4 sm:$0xff]   ;;  %v21927_v27 = vcombine.high %v425_v40, %v433_v49 }
 0x2f4   : > { %9231 = vmatpush1.bf16.msra.mxu1 %v18996_v26  ;;  %7688 = vmatprep.subr.bf16.mxu0 %v19001_v63  ;;  %v21925_v26 = vcombine.low %v409_v50, %v417_v36  ;;  %v19005_v63 = vld [vmem:[%s25655_s1 + $0x1380] ss:$24 sps:$4 sm:$0xff]   ;;  %v19016_v50 = vld [vmem:[%s25655_s1 + $0x13bc] ss:$24 sps:$4 sm:$0xff]   ;;  %v441_v36 = vld [vmem:[%s19953_s24 + $0x328] sm:$0xff] }
 0x2f5   : > { %9232 = vmatprep.subr.bf16.mxu1 %v19004_v53  ;;  %26044 = vst [vmem:[#allocation125_spill] sm:$0xff] %v21927_v27  ;;  %v19008_v53 = vld [vmem:[%s25655_s1 + $0x1388] ss:$24 sps:$4 sm:$0xff]  }
 0x2f6   : > { %26043 = vst [vmem:[#allocation124_spill] sm:$0xff] %v21925_v26 }
 0x2f7   : > { %7689 = vmatpush1.bf16.msra.mxu0 %v18999_v30  ;;  %v449_v30 = vld [vmem:[%s19953_s24 + $0x368] sm:$0xff] }
 0x2f8   : > { %9233 = vmatpush1.bf16.msra.mxu1 %v19002_v59  ;;  %7690 = vmatprep.subr.bf16.mxu0 %v19007_v41  ;;  %v19011_v59 = vld [vmem:[%s25655_s1 + $0x13b0] ss:$24 sps:$4 sm:$0xff]  }
 0x2f9   : > { %9234 = vmatprep.subr.bf16.mxu1 %v19010_v22  ;;  %7554 = vmatmul.mubr.bf16.gmra.mrb[16].mxu0 %v21925_v26  ;;  %v19014_v41 = vld [vmem:[%s25655_s1 + $0x13b8] ss:$24 sps:$4 sm:$0xff]   ;;  %v19019_v22 = vld [vmem:[%s25655_s1 + $0x13e4] ss:$24 sps:$4 sm:$0xff]  }
 0x2fa   : > { %9098 = vmatmul.mubr.bf16.gmra.mrb[16].mxu1 %v21925_v26  ;;  %7563 = vmatprep.mubr.bf16.mxu0 %v21927_v27  ;;  %v19025_v26 = vld [vmem:[%s25655_s1 + $0x1414] ss:$24 sps:$4 sm:$0xff]  }
 0x2fb   : > { %9107 = vmatprep.mubr.bf16.mxu1 %v21927_v27  ;;  %7691 = vmatpush1.bf16.msra.mxu0 %v19005_v63  ;;  %v19022_v63 = vld [vmem:[%s25655_s1 + $0x13ec] ss:$24 sps:$4 sm:$0xff]   ;;  %v21961_v27 = vcombine.high %v441_v36, %v449_v30 }
 0x2fc   : > { %9235 = vmatpush1.bf16.msra.mxu1 %v19008_v53  ;;  %7692 = vmatprep.subr.bf16.mxu0 %v19013_v34  ;;  %v21959_v53 = vcombine.low %v425_v40, %v433_v49  ;;  %v19017_v34 = vld [vmem:[%s25655_s1 + $0x13e0] ss:$24 sps:$4 sm:$0xff]   ;;  %v19028_v40 = vld [vmem:[%s25655_s1 + $0x141c] ss:$24 sps:$4 sm:$0xff]   ;;  %v457_v49 = vld [vmem:[%s19953_s24 + $0x3a8] sm:$0xff] }
 0x2fd   : > { %9236 = vmatprep.subr.bf16.mxu1 %v19016_v50  ;;  %26046 = vst [vmem:[#allocation127_spill] sm:$0xff] %v21961_v27  ;;  %v19020_v50 = vld [vmem:[%s25655_s1 + $0x13e8] ss:$24 sps:$4 sm:$0xff]  }
 0x2fe   : > { %26045 = vst [vmem:[#allocation126_spill] sm:$0xff] %v21959_v53 }
 0x2ff   : > { %7693 = vmatpush1.bf16.msra.mxu0 %v19011_v59  ;;  %v465_v59 = vld [vmem:[%s19953_s24 + $0x3e8] sm:$0xff] }
 0x300   : > { %9237 = vmatpush1.bf16.msra.mxu1 %v19014_v41  ;;  %7694 = vmatprep.subr.bf16.mxu0 %v19019_v22  ;;  %v19023_v41 = vld [vmem:[%s25655_s1 + $0x1410] ss:$24 sps:$4 sm:$0xff]  }
 0x301   : > { %9238 = vmatprep.subr.bf16.mxu1 %v19022_v63  ;;  %7564 = vmatmul.mubr.bf16.gmra.mrb[20].mxu0 %v21959_v53  ;;  %v19026_v22 = vld [vmem:[%s25655_s1 + $0x1418] ss:$24 sps:$4 sm:$0xff]   ;;  %v19031_v63 = vld [vmem:[%s25655_s1 + $0x1444] ss:$24 sps:$4 sm:$0xff]  }
 0x302   : > { %9108 = vmatmul.mubr.bf16.gmra.mrb[20].mxu1 %v21959_v53  ;;  %7573 = vmatprep.mubr.bf16.mxu0 %v21961_v27  ;;  %v19037_v53 = vld [vmem:[%s25655_s1 + $0x1474] ss:$24 sps:$4 sm:$0xff]  }
 0x303   : > { %9117 = vmatprep.mubr.bf16.mxu1 %v21961_v27  ;;  %7695 = vmatpush1.bf16.msra.mxu0 %v19017_v34  ;;  %v19034_v34 = vld [vmem:[%s25655_s1 + $0x144c] ss:$24 sps:$4 sm:$0xff]   ;;  %v21995_v27 = vcombine.high %v457_v49, %v465_v59 }
 0x304   : > { %9239 = vmatpush1.bf16.msra.mxu1 %v19020_v50  ;;  %7696 = vmatprep.subr.bf16.mxu0 %v19025_v26  ;;  %v21993_v50 = vcombine.low %v441_v36, %v449_v30  ;;  %v19029_v26 = vld [vmem:[%s25655_s1 + $0x1440] ss:$24 sps:$4 sm:$0xff]   ;;  %v19040_v36 = vld [vmem:[%s25655_s1 + $0x147c] ss:$24 sps:$4 sm:$0xff]   ;;  %v473_v30 = vld [vmem:[%s19953_s24 + $0x428] sm:$0xff] }
 0x305   : > { %9240 = vmatprep.subr.bf16.mxu1 %v19028_v40  ;;  %26048 = vst [vmem:[#allocation129_spill] sm:$0xff] %v21995_v27  ;;  %v19032_v40 = vld [vmem:[%s25655_s1 + $0x1448] ss:$24 sps:$4 sm:$0xff]  }
 0x306   : > { %26047 = vst [vmem:[#allocation128_spill] sm:$0xff] %v21993_v50 }
 0x307   : > { %7697 = vmatpush1.bf16.msra.mxu0 %v19023_v41  ;;  %v481_v41 = vld [vmem:[%s19953_s24 + $0x468] sm:$0xff] }
 0x308   : > { %9241 = vmatpush1.bf16.msra.mxu1 %v19026_v22  ;;  %7698 = vmatprep.subr.bf16.mxu0 %v19031_v63  ;;  %v19035_v22 = vld [vmem:[%s25655_s1 + $0x1470] ss:$24 sps:$4 sm:$0xff]  }
 0x309   : > { %9242 = vmatprep.subr.bf16.mxu1 %v19034_v34  ;;  %7574 = vmatmul.mubr.bf16.gmra.mrb[24].mxu0 %v21993_v50  ;;  %v19038_v63 = vld [vmem:[%s25655_s1 + $0x1478] ss:$24 sps:$4 sm:$0xff]   ;;  %v19043_v34 = vld [vmem:[%s25655_s1 + $0x14a4] ss:$24 sps:$4 sm:$0xff]  }
 0x30a   : > { %9118 = vmatmul.mubr.bf16.gmra.mrb[24].mxu1 %v21993_v50  ;;  %7583 = vmatprep.mubr.bf16.mxu0 %v21995_v27  ;;  %v19049_v50 = vld [vmem:[%s25655_s1 + $0x14d4] ss:$24 sps:$4 sm:$0xff]  }
 0x30b   : > { %9127 = vmatprep.mubr.bf16.mxu1 %v21995_v27  ;;  %7699 = vmatpush1.bf16.msra.mxu0 %v19029_v26  ;;  %v19046_v26 = vld [vmem:[%s25655_s1 + $0x14ac] ss:$24 sps:$4 sm:$0xff]   ;;  %v22029_v27 = vcombine.high %v473_v30, %v481_v41 }
 0x30c   : > { %9243 = vmatpush1.bf16.msra.mxu1 %v19032_v40  ;;  %7700 = vmatprep.subr.bf16.mxu0 %v19037_v53  ;;  %v22027_v40 = vcombine.low %v457_v49, %v465_v59  ;;  %v19041_v53 = vld [vmem:[%s25655_s1 + $0x14a0] ss:$24 sps:$4 sm:$0xff]   ;;  %v19052_v49 = vld [vmem:[%s25655_s1 + $0x14dc] ss:$24 sps:$4 sm:$0xff]   ;;  %v489_v59 = vld [vmem:[%s19953_s24 + $0x4a8] sm:$0xff] }
 0x30d   : > { %9244 = vmatprep.subr.bf16.mxu1 %v19040_v36  ;;  %26050 = vst [vmem:[#allocation131_spill] sm:$0xff] %v22029_v27  ;;  %v19044_v36 = vld [vmem:[%s25655_s1 + $0x14a8] ss:$24 sps:$4 sm:$0xff]  }
 0x30e   : > { %26049 = vst [vmem:[#allocation130_spill] sm:$0xff] %v22027_v40 }
 0x30f   : > { %7701 = vmatpush1.bf16.msra.mxu0 %v19035_v22  ;;  %v497_v22 = vld [vmem:[%s19953_s24 + $0x4e8] sm:$0xff] }
 0x310   : > { %9245 = vmatpush1.bf16.msra.mxu1 %v19038_v63  ;;  %7702 = vmatprep.subr.bf16.mxu0 %v19043_v34  ;;  %v19047_v63 = vld [vmem:[%s25655_s1 + $0x14d0] ss:$24 sps:$4 sm:$0xff]  }
 0x311   : > { %9246 = vmatprep.subr.bf16.mxu1 %v19046_v26  ;;  %7584 = vmatmul.mubr.bf16.gmra.mrb[28].mxu0 %v22027_v40  ;;  %v19050_v34 = vld [vmem:[%s25655_s1 + $0x14d8] ss:$24 sps:$4 sm:$0xff]   ;;  %v22055_v26 = vcombine.low %v473_v30, %v481_v41  ;;  %v513_v30 = vld [vmem:[%s19953_s24 + $0x568] sm:$0xff]  ;;  %v22071_v41 = vcombine.low %v489_v59, %v497_v22 }
 0x312   : > { %9128 = vmatmul.mubr.bf16.gmra.mrb[28].mxu1 %v22027_v40  ;;  %7593 = vmatprep.mubr.bf16.mxu0 %v22029_v27  ;;  %v22057_v40 = vcombine.high %v489_v59, %v497_v22  ;;  %v537_v59 = vld [vmem:[%s19953_s24 + $0x628] sm:$0xff] }
 0x313   : > { %9137 = vmatprep.mubr.bf16.mxu1 %v22029_v27  ;;  %7703 = vmatpush1.bf16.msra.mxu0 %v19041_v53  ;;  %26051 = vst [vmem:[#allocation132_spill] sm:$0xff] %v22055_v26  ;;  %v19055_v53 = vld [vmem:[%s25655_s1 + $0x1504] ss:$24 sps:$4 sm:$0xff]   ;;  %26053 = vst [vmem:[#allocation134_spill] sm:$0xff] %v22071_v41  ;;  %v545_v22 = vld [vmem:[%s19953_s24 + $0x668] sm:$0xff] }
 0x314   : > { %9247 = vmatpush1.bf16.msra.mxu1 %v19044_v36  ;;  %7704 = vmatprep.subr.bf16.mxu0 %v19049_v50  ;;  %26052 = vst [vmem:[#allocation133_spill] sm:$0xff] %v22057_v40  ;;  %v19058_v36 = vld [vmem:[%s25655_s1 + $0x150c] ss:$24 sps:$4 sm:$0xff]  }
 0x315   : > { %9248 = vmatprep.subr.bf16.mxu1 %v19052_v49  ;;  %v505_v50 = vld [vmem:[%s19953_s24 + $0x528] sm:$0xff] }
 0x316   : > { %v22073_v49 = vcombine.high %v505_v50, %v513_v30  ;;  %v19073_v27 = vld [vmem:[%s25655_s1 + $0x1594] ss:$24 sps:$4 sm:$0xff]  }
 0x317   : > { %7705 = vmatpush1.bf16.msra.mxu0 %v19047_v63  ;;  %v521_v63 = vld [vmem:[%s19953_s24 + $0x5a8] sm:$0xff] }
 0x318   : > { %9249 = vmatpush1.bf16.msra.mxu1 %v19050_v34  ;;  %7867 = vmatprep.subr.bf16.mxu0 %v19055_v53  ;;  %26054 = vst [vmem:[#allocation135_spill] sm:$0xff] %v22073_v49  ;;  %v529_v34 = vld [vmem:[%s19953_s24 + $0x5e8] sm:$0xff]  ;;  %v22081_v53 = vcombine.low %v505_v50, %v513_v30 }
 0x319   : > { %7594 = vmatmul.mubr.bf16.gmra.mrb[32].mxu0 %v22055_v26  ;;  %9411 = vmatprep.subr.bf16.mxu1 %v19058_v36  ;;  %v22083_v36 = vcombine.high %v521_v63, %v529_v34  ;;  %v553_v50 = vld [vmem:[%s19953_s24 + $0x6a8] sm:$0xff] }
 0x31a   : > { %9138 = vmatmul.mubr.bf16.gmra.mrb[32].mxu1 %v22055_v26  ;;  %7603 = vmatprep.mubr.bf16.mxu0 %v22057_v40  ;;  %26055 = vst [vmem:[#allocation136_spill] sm:$0xff] %v22081_v53  ;;  %v561_v30 = vld [vmem:[%s19953_s24 + $0x6e8] sm:$0xff]  ;;  %v19062_v26 = vld [vmem:[%s25655_s1 + $0x1538] ss:$24 sps:$4 sm:$0xff]  }
 0x31b   : > { %9147 = vmatprep.mubr.bf16.mxu1 %v22057_v40  ;;  %26056 = vst [vmem:[#allocation137_spill] sm:$0xff] %v22083_v36  ;;  %v19059_v40 = vld [vmem:[%s25655_s1 + $0x1530] ss:$24 sps:$4 sm:$0xff]  }
 0x321   : > { %7604 = vmatmul.mubr.bf16.gmra.mrb[36].mxu0 %v22071_v41 }
 0x322   : > { %9148 = vmatmul.mubr.bf16.gmra.mrb[36].mxu1 %v22071_v41  ;;  %7613 = vmatprep.mubr.bf16.mxu0 %v22073_v49  ;;  %v22093_v41 = vcombine.high %v537_v59, %v545_v22 }
 0x323   : > { %9157 = vmatprep.mubr.bf16.mxu1 %v22073_v49  ;;  %v22091_v49 = vcombine.low %v521_v63, %v529_v34  ;;  %v569_v63 = vld [vmem:[%s19953_s24 + $0x728] sm:$0xff] }
 0x324   : > { %26058 = vst [vmem:[#allocation139_spill] sm:$0xff] %v22093_v41  ;;  %v577_v34 = vld [vmem:[%s19953_s24 + $0x768] sm:$0xff] }
 0x325   : > { %26057 = vst [vmem:[#allocation138_spill] sm:$0xff] %v22091_v49 }
 0x329   : > { %7614 = vmatmul.mubr.bf16.gmra.mrb[40].mxu0 %v22081_v53 }
 0x32a   : > { %9158 = vmatmul.mubr.bf16.gmra.mrb[40].mxu1 %v22081_v53  ;;  %7623 = vmatprep.mubr.bf16.mxu0 %v22083_v36  ;;  %v22103_v53 = vcombine.high %v553_v50, %v561_v30 }
 0x32b   : > { %9167 = vmatprep.mubr.bf16.mxu1 %v22083_v36  ;;  %v22101_v36 = vcombine.low %v537_v59, %v545_v22  ;;  %v585_v59 = vld [vmem:[%s19953_s24 + $0x7a8] sm:$0xff] }
 0x32c   : > { %26060 = vst [vmem:[#allocation141_spill] sm:$0xff] %v22103_v53  ;;  %v593_v22 = vld [vmem:[%s19953_s24 + $0x7e8] sm:$0xff] }
 0x32d   : > { %26059 = vst [vmem:[#allocation140_spill] sm:$0xff] %v22101_v36 }
 0x331   : > { %7624 = vmatmul.mubr.bf16.gmra.mrb[44].mxu0 %v22091_v49 }
 0x332   : > { %9168 = vmatmul.mubr.bf16.gmra.mrb[44].mxu1 %v22091_v49  ;;  %7633 = vmatprep.mubr.bf16.mxu0 %v22093_v41  ;;  %v22113_v49 = vcombine.high %v569_v63, %v577_v34 }
 0x333   : > { %9177 = vmatprep.mubr.bf16.mxu1 %v22093_v41  ;;  %v22111_v41 = vcombine.low %v553_v50, %v561_v30  ;;  %v346_v50 = vld [vmem:[%s19953_s24 + $0x30] sm:$0xff] }
 0x334   : > { %26062 = vst [vmem:[#allocation143_spill] sm:$0xff] %v22113_v49  ;;  %v354_v30 = vld [vmem:[%s19953_s24 + $0x70] sm:$0xff] }
 0x335   : > { %26061 = vst [vmem:[#allocation142_spill] sm:$0xff] %v22111_v41 }
 0x339   : > { %7634 = vmatmul.mubr.bf16.gmra.mrb[48].mxu0 %v22101_v36 }
 0x33a   : > { %9178 = vmatmul.mubr.bf16.gmra.mrb[48].mxu1 %v22101_v36  ;;  %7643 = vmatprep.mubr.bf16.mxu0 %v22103_v53  ;;  %v22123_v36 = vcombine.high %v585_v59, %v593_v22 }
 0x33b   : > { %9187 = vmatprep.mubr.bf16.mxu1 %v22103_v53  ;;  %v22121_v53 = vcombine.low %v569_v63, %v577_v34  ;;  %v362_v63 = vld [vmem:[%s19953_s24 + $0xb0] sm:$0xff] }
 0x33c   : > { %26064 = vst [vmem:[#allocation145_spill] sm:$0xff] %v22123_v36  ;;  %v370_v34 = vld [vmem:[%s19953_s24 + $0xf0] sm:$0xff] }
 0x33d   : > { %26063 = vst [vmem:[#allocation144_spill] sm:$0xff] %v22121_v53 }
 0x341   : > { %7644 = vmatmul.mubr.bf16.gmra.mrb[52].mxu0 %v22111_v41 }
 0x342   : > { %9188 = vmatmul.mubr.bf16.gmra.mrb[52].mxu1 %v22111_v41  ;;  %7653 = vmatprep.mubr.bf16.mxu0 %v22113_v49  ;;  %v22131_v41 = vcombine.low %v585_v59, %v593_v22  ;;  %v19053_v59 = vld [vmem:[%s25655_s1 + $0x1500] ss:$24 sps:$4 sm:$0xff]  }
 0x343   : > { %9197 = vmatprep.mubr.bf16.mxu1 %v22113_v49  ;;  %v22133_v49 = vcombine.high %v346_v50, %v354_v30  ;;  %v19056_v22 = vld [vmem:[%s25655_s1 + $0x1508] ss:$24 sps:$4 sm:$0xff]  }
 0x344   : > { %26065 = vst [vmem:[#allocation146_spill] sm:$0xff] %v22131_v41 }
 0x345   : > { %26066 = vst [vmem:[#allocation147_spill] sm:$0xff] %v22133_v49 }
 0x349   : > { %7654 = vmatmul.mubr.bf16.gmra.mrb[56].mxu0 %v22121_v53 }
 0x34a   : > { %9198 = vmatmul.mubr.bf16.gmra.mrb[56].mxu1 %v22121_v53  ;;  %7663 = vmatprep.mubr.bf16.mxu0 %v22123_v36  ;;  %v22141_v53 = vcombine.low %v346_v50, %v354_v30  ;;  %v378_v50 = vld [vmem:[%s19953_s24 + $0x130] sm:$0xff] }
 0x34b   : > { %9207 = vmatprep.mubr.bf16.mxu1 %v22123_v36  ;;  %v22143_v36 = vcombine.high %v362_v63, %v370_v34  ;;  %v386_v30 = vld [vmem:[%s19953_s24 + $0x170] sm:$0xff] }
 0x34c   : > { %26067 = vst [vmem:[#allocation148_spill] sm:$0xff] %v22141_v53 }
 0x34d   : > { %26068 = vst [vmem:[#allocation149_spill] sm:$0xff] %v22143_v36 }
 0x351   : > { %7664 = vmatmul.mubr.bf16.gmra.mrb[60].mxu0 %v22131_v41 }
 0x352   : > { %9208 = vmatmul.mubr.bf16.gmra.mrb[60].mxu1 %v22131_v41  ;;  %7706 = vmatprep.mubr.bf16.mxu0 %v22133_v49  ;;  %v19061_v41 = vld [vmem:[%s25655_s1 + $0x1534] ss:$24 sps:$4 sm:$0xff]  }
 0x353   : > { %9250 = vmatprep.mubr.bf16.mxu1 %v22133_v49  ;;  %v19064_v49 = vld [vmem:[%s25655_s1 + $0x153c] ss:$24 sps:$4 sm:$0xff]  }
 0x359   : > { %7707 = vmatmul.mubr.bf16.vlgmr.msra.gmra.mrb[0].mxu0 %v22141_v53 }
 0x35a   : > { %9251 = vmatmul.mubr.bf16.vlgmr.msra.gmra.mrb[0].mxu1 %v22141_v53  ;;  %7716 = vmatprep.mubr.bf16.mxu0 %v22143_v36  ;;  %v19067_v53 = vld [vmem:[%s25655_s1 + $0x1564] ss:$24 sps:$4 sm:$0xff]  }
 0x35b   : > { %9260 = vmatprep.mubr.bf16.mxu1 %v22143_v36  ;;  %7868 = vmatpush1.bf16.msra.mxu0 %v19053_v59  ;;  %v19070_v59 = vld [vmem:[%s25655_s1 + $0x156c] ss:$24 sps:$4 sm:$0xff]   ;;  %v22177_v36 = vcombine.high %v378_v50, %v386_v30 }
 0x35c   : > { %9412 = vmatpush1.bf16.msra.mxu1 %v19056_v22  ;;  %7869 = vmatprep.subr.bf16.mxu0 %v19061_v41  ;;  %v22175_v22 = vcombine.low %v362_v63, %v370_v34  ;;  %v19065_v41 = vld [vmem:[%s25655_s1 + $0x1560] ss:$24 sps:$4 sm:$0xff]   ;;  %v19076_v63 = vld [vmem:[%s25655_s1 + $0x159c] ss:$24 sps:$4 sm:$0xff]  }
 0x35d   : > { %9413 = vmatprep.subr.bf16.mxu1 %v19064_v49  ;;  %26070 = vst [vmem:[#allocation151_spill] sm:$0xff] %v22177_v36  ;;  %v19068_v49 = vld [vmem:[%s25655_s1 + $0x1568] ss:$24 sps:$4 sm:$0xff]   ;;  %v19074_v34 = vld [vmem:[%s25655_s1 + $0x1598] ss:$24 sps:$4 sm:$0xff]  }
 0x35e   : > { %26069 = vst [vmem:[#allocation150_spill] sm:$0xff] %v22175_v22 }
 0x35f   : > { %7870 = vmatpush1.bf16.msra.mxu0 %v19059_v40  ;;  %v394_v40 = vld [vmem:[%s19953_s24 + $0x1b0] sm:$0xff] }
 0x360   : > { %9414 = vmatpush1.bf16.msra.mxu1 %v19062_v26  ;;  %7871 = vmatprep.subr.bf16.mxu0 %v19067_v53  ;;  %v402_v26 = vld [vmem:[%s19953_s24 + $0x1f0] sm:$0xff] }
 0x361   : > { %9415 = vmatprep.subr.bf16.mxu1 %v19070_v59  ;;  %7717 = vmatmul.mubr.bf16.gmra.mrb[4].mxu0 %v22175_v22  ;;  %v19071_v53 = vld [vmem:[%s25655_s1 + $0x1590] ss:$24 sps:$4 sm:$0xff]   ;;  %v19079_v59 = vld [vmem:[%s25655_s1 + $0x15c4] ss:$24 sps:$4 sm:$0xff]  }
 0x362   : > { %9261 = vmatmul.mubr.bf16.gmra.mrb[4].mxu1 %v22175_v22  ;;  %7726 = vmatprep.mubr.bf16.mxu0 %v22177_v36  ;;  %v19085_v22 = vld [vmem:[%s25655_s1 + $0x15f4] ss:$24 sps:$4 sm:$0xff]  }
 0x363   : > { %9270 = vmatprep.mubr.bf16.mxu1 %v22177_v36  ;;  %7872 = vmatpush1.bf16.msra.mxu0 %v19065_v41  ;;  %v19082_v41 = vld [vmem:[%s25655_s1 + $0x15cc] ss:$24 sps:$4 sm:$0xff]   ;;  %v22211_v36 = vcombine.high %v394_v40, %v402_v26 }
 0x364   : > { %9416 = vmatpush1.bf16.msra.mxu1 %v19068_v49  ;;  %7873 = vmatprep.subr.bf16.mxu0 %v19073_v27  ;;  %v22209_v49 = vcombine.low %v378_v50, %v386_v30  ;;  %v19077_v27 = vld [vmem:[%s25655_s1 + $0x15c0] ss:$24 sps:$4 sm:$0xff]   ;;  %v19088_v50 = vld [vmem:[%s25655_s1 + $0x15fc] ss:$24 sps:$4 sm:$0xff]  }
 0x365   : > { %9417 = vmatprep.subr.bf16.mxu1 %v19076_v63  ;;  %26072 = vst [vmem:[#allocation153_spill] sm:$0xff] %v22211_v36  ;;  %v19080_v63 = vld [vmem:[%s25655_s1 + $0x15c8] ss:$24 sps:$4 sm:$0xff]   ;;  %v410_v30 = vld [vmem:[%s19953_s24 + $0x230] sm:$0xff] }
 0x366   : > { %26071 = vst [vmem:[#allocation152_spill] sm:$0xff] %v22209_v49 }
 0x367   : > { %7874 = vmatpush1.bf16.msra.mxu0 %v19071_v53  ;;  %v418_v53 = vld [vmem:[%s19953_s24 + $0x270] sm:$0xff] }
 0x368   : > { %9418 = vmatpush1.bf16.msra.mxu1 %v19074_v34  ;;  %7875 = vmatprep.subr.bf16.mxu0 %v19079_v59  ;;  %v19083_v34 = vld [vmem:[%s25655_s1 + $0x15f0] ss:$24 sps:$4 sm:$0xff]  }
 0x369   : > { %9419 = vmatprep.subr.bf16.mxu1 %v19082_v41  ;;  %7727 = vmatmul.mubr.bf16.gmra.mrb[8].mxu0 %v22209_v49  ;;  %v19086_v59 = vld [vmem:[%s25655_s1 + $0x15f8] ss:$24 sps:$4 sm:$0xff]   ;;  %v19091_v41 = vld [vmem:[%s25655_s1 + $0x1624] ss:$24 sps:$4 sm:$0xff]  }
 0x36a   : > { %9271 = vmatmul.mubr.bf16.gmra.mrb[8].mxu1 %v22209_v49  ;;  %7736 = vmatprep.mubr.bf16.mxu0 %v22211_v36  ;;  %v19097_v49 = vld [vmem:[%s25655_s1 + $0x1654] ss:$24 sps:$4 sm:$0xff]  }
 0x36b   : > { %9280 = vmatprep.mubr.bf16.mxu1 %v22211_v36  ;;  %7876 = vmatpush1.bf16.msra.mxu0 %v19077_v27  ;;  %v19094_v27 = vld [vmem:[%s25655_s1 + $0x162c] ss:$24 sps:$4 sm:$0xff]   ;;  %v22245_v36 = vcombine.high %v410_v30, %v418_v53 }
 0x36c   : > { %9420 = vmatpush1.bf16.msra.mxu1 %v19080_v63  ;;  %7877 = vmatprep.subr.bf16.mxu0 %v19085_v22  ;;  %v22243_v63 = vcombine.low %v394_v40, %v402_v26  ;;  %v19089_v22 = vld [vmem:[%s25655_s1 + $0x1620] ss:$24 sps:$4 sm:$0xff]   ;;  %v19100_v40 = vld [vmem:[%s25655_s1 + $0x165c] ss:$24 sps:$4 sm:$0xff]  }
 0x36d   : > { %9421 = vmatprep.subr.bf16.mxu1 %v19088_v50  ;;  %26074 = vst [vmem:[#allocation155_spill] sm:$0xff] %v22245_v36  ;;  %v19092_v50 = vld [vmem:[%s25655_s1 + $0x1628] ss:$24 sps:$4 sm:$0xff]   ;;  %v426_v26 = vld [vmem:[%s19953_s24 + $0x2b0] sm:$0xff] }
 0x36e   : > { %26073 = vst [vmem:[#allocation154_spill] sm:$0xff] %v22243_v63 }
 0x36f   : > { %7878 = vmatpush1.bf16.msra.mxu0 %v19083_v34  ;;  %v434_v34 = vld [vmem:[%s19953_s24 + $0x2f0] sm:$0xff] }
 0x370   : > { %9422 = vmatpush1.bf16.msra.mxu1 %v19086_v59  ;;  %7879 = vmatprep.subr.bf16.mxu0 %v19091_v41  ;;  %v19095_v59 = vld [vmem:[%s25655_s1 + $0x1650] ss:$24 sps:$4 sm:$0xff]  }
 0x371   : > { %9423 = vmatprep.subr.bf16.mxu1 %v19094_v27  ;;  %7737 = vmatmul.mubr.bf16.gmra.mrb[12].mxu0 %v22243_v63  ;;  %v19098_v41 = vld [vmem:[%s25655_s1 + $0x1658] ss:$24 sps:$4 sm:$0xff]   ;;  %v19103_v27 = vld [vmem:[%s25655_s1 + $0x1684] ss:$24 sps:$4 sm:$0xff]  }
 0x372   : > { %9281 = vmatmul.mubr.bf16.gmra.mrb[12].mxu1 %v22243_v63  ;;  %7746 = vmatprep.mubr.bf16.mxu0 %v22245_v36  ;;  %v19109_v63 = vld [vmem:[%s25655_s1 + $0x16b4] ss:$24 sps:$4 sm:$0xff]  }
 0x373   : > { %9290 = vmatprep.mubr.bf16.mxu1 %v22245_v36  ;;  %7880 = vmatpush1.bf16.msra.mxu0 %v19089_v22  ;;  %v19106_v22 = vld [vmem:[%s25655_s1 + $0x168c] ss:$24 sps:$4 sm:$0xff]   ;;  %v22279_v36 = vcombine.high %v426_v26, %v434_v34 }
 0x374   : > { %9424 = vmatpush1.bf16.msra.mxu1 %v19092_v50  ;;  %7881 = vmatprep.subr.bf16.mxu0 %v19097_v49  ;;  %v22277_v50 = vcombine.low %v410_v30, %v418_v53  ;;  %v19101_v49 = vld [vmem:[%s25655_s1 + $0x1680] ss:$24 sps:$4 sm:$0xff]   ;;  %v19112_v30 = vld [vmem:[%s25655_s1 + $0x16bc] ss:$24 sps:$4 sm:$0xff]  }
 0x375   : > { %9425 = vmatprep.subr.bf16.mxu1 %v19100_v40  ;;  %26076 = vst [vmem:[#allocation157_spill] sm:$0xff] %v22279_v36  ;;  %v19104_v40 = vld [vmem:[%s25655_s1 + $0x1688] ss:$24 sps:$4 sm:$0xff]   ;;  %v442_v53 = vld [vmem:[%s19953_s24 + $0x330] sm:$0xff] }
 0x376   : > { %26075 = vst [vmem:[#allocation156_spill] sm:$0xff] %v22277_v50 }
 0x377   : > { %7882 = vmatpush1.bf16.msra.mxu0 %v19095_v59  ;;  %v450_v59 = vld [vmem:[%s19953_s24 + $0x370] sm:$0xff] }
 0x378   : > { %9426 = vmatpush1.bf16.msra.mxu1 %v19098_v41  ;;  %7883 = vmatprep.subr.bf16.mxu0 %v19103_v27  ;;  %v19107_v41 = vld [vmem:[%s25655_s1 + $0x16b0] ss:$24 sps:$4 sm:$0xff]  }
 0x379   : > { %9427 = vmatprep.subr.bf16.mxu1 %v19106_v22  ;;  %7747 = vmatmul.mubr.bf16.gmra.mrb[16].mxu0 %v22277_v50  ;;  %v19110_v27 = vld [vmem:[%s25655_s1 + $0x16b8] ss:$24 sps:$4 sm:$0xff]   ;;  %v19115_v22 = vld [vmem:[%s25655_s1 + $0x16e4] ss:$24 sps:$4 sm:$0xff]  }
 0x37a   : > { %9291 = vmatmul.mubr.bf16.gmra.mrb[16].mxu1 %v22277_v50  ;;  %7756 = vmatprep.mubr.bf16.mxu0 %v22279_v36  ;;  %v19121_v50 = vld [vmem:[%s25655_s1 + $0x1714] ss:$24 sps:$4 sm:$0xff]  }
 0x37b   : > { %9300 = vmatprep.mubr.bf16.mxu1 %v22279_v36  ;;  %7884 = vmatpush1.bf16.msra.mxu0 %v19101_v49  ;;  %v19118_v49 = vld [vmem:[%s25655_s1 + $0x16ec] ss:$24 sps:$4 sm:$0xff]   ;;  %v22313_v36 = vcombine.high %v442_v53, %v450_v59 }
 0x37c   : > { %9428 = vmatpush1.bf16.msra.mxu1 %v19104_v40  ;;  %7885 = vmatprep.subr.bf16.mxu0 %v19109_v63  ;;  %v22311_v40 = vcombine.low %v426_v26, %v434_v34  ;;  %v19113_v63 = vld [vmem:[%s25655_s1 + $0x16e0] ss:$24 sps:$4 sm:$0xff]   ;;  %v19124_v26 = vld [vmem:[%s25655_s1 + $0x171c] ss:$24 sps:$4 sm:$0xff]  }
 0x37d   : > { %9429 = vmatprep.subr.bf16.mxu1 %v19112_v30  ;;  %26078 = vst [vmem:[#allocation159_spill] sm:$0xff] %v22313_v36  ;;  %v19116_v30 = vld [vmem:[%s25655_s1 + $0x16e8] ss:$24 sps:$4 sm:$0xff]   ;;  %v458_v34 = vld [vmem:[%s19953_s24 + $0x3b0] sm:$0xff] }
 0x37e   : > { %26077 = vst [vmem:[#allocation158_spill] sm:$0xff] %v22311_v40 }
 0x37f   : > { %7886 = vmatpush1.bf16.msra.mxu0 %v19107_v41  ;;  %v466_v41 = vld [vmem:[%s19953_s24 + $0x3f0] sm:$0xff] }
 0x380   : > { %9430 = vmatpush1.bf16.msra.mxu1 %v19110_v27  ;;  %7887 = vmatprep.subr.bf16.mxu0 %v19115_v22  ;;  %v19119_v27 = vld [vmem:[%s25655_s1 + $0x1710] ss:$24 sps:$4 sm:$0xff]  }
 0x381   : > { %9431 = vmatprep.subr.bf16.mxu1 %v19118_v49  ;;  %7757 = vmatmul.mubr.bf16.gmra.mrb[20].mxu0 %v22311_v40  ;;  %v19122_v22 = vld [vmem:[%s25655_s1 + $0x1718] ss:$24 sps:$4 sm:$0xff]   ;;  %v19127_v49 = vld [vmem:[%s25655_s1 + $0x1744] ss:$24 sps:$4 sm:$0xff]  }
 0x382   : > { %9301 = vmatmul.mubr.bf16.gmra.mrb[20].mxu1 %v22311_v40  ;;  %7766 = vmatprep.mubr.bf16.mxu0 %v22313_v36  ;;  %v19133_v40 = vld [vmem:[%s25655_s1 + $0x1774] ss:$24 sps:$4 sm:$0xff]  }
 0x383   : > { %9310 = vmatprep.mubr.bf16.mxu1 %v22313_v36  ;;  %7888 = vmatpush1.bf16.msra.mxu0 %v19113_v63  ;;  %v19130_v63 = vld [vmem:[%s25655_s1 + $0x174c] ss:$24 sps:$4 sm:$0xff]   ;;  %v22347_v36 = vcombine.high %v458_v34, %v466_v41 }
 0x384   : > { %9432 = vmatpush1.bf16.msra.mxu1 %v19116_v30  ;;  %7889 = vmatprep.subr.bf16.mxu0 %v19121_v50  ;;  %v22345_v30 = vcombine.low %v442_v53, %v450_v59  ;;  %v19125_v50 = vld [vmem:[%s25655_s1 + $0x1740] ss:$24 sps:$4 sm:$0xff]   ;;  %v19136_v53 = vld [vmem:[%s25655_s1 + $0x177c] ss:$24 sps:$4 sm:$0xff]  }
 0x385   : > { %9433 = vmatprep.subr.bf16.mxu1 %v19124_v26  ;;  %26080 = vst [vmem:[#allocation161_spill] sm:$0xff] %v22347_v36  ;;  %v19128_v26 = vld [vmem:[%s25655_s1 + $0x1748] ss:$24 sps:$4 sm:$0xff]   ;;  %v474_v59 = vld [vmem:[%s19953_s24 + $0x430] sm:$0xff] }
 0x386   : > { %26079 = vst [vmem:[#allocation160_spill] sm:$0xff] %v22345_v30 }
 0x387   : > { %7890 = vmatpush1.bf16.msra.mxu0 %v19119_v27  ;;  %v482_v27 = vld [vmem:[%s19953_s24 + $0x470] sm:$0xff] }
 0x388   : > { %9434 = vmatpush1.bf16.msra.mxu1 %v19122_v22  ;;  %7891 = vmatprep.subr.bf16.mxu0 %v19127_v49  ;;  %v19131_v22 = vld [vmem:[%s25655_s1 + $0x1770] ss:$24 sps:$4 sm:$0xff]  }
 0x389   : > { %9435 = vmatprep.subr.bf16.mxu1 %v19130_v63  ;;  %7767 = vmatmul.mubr.bf16.gmra.mrb[24].mxu0 %v22345_v30  ;;  %v19134_v49 = vld [vmem:[%s25655_s1 + $0x1778] ss:$24 sps:$4 sm:$0xff]   ;;  %v19139_v63 = vld [vmem:[%s25655_s1 + $0x17a4] ss:$24 sps:$4 sm:$0xff]  }
 0x38a   : > { %9311 = vmatmul.mubr.bf16.gmra.mrb[24].mxu1 %v22345_v30  ;;  %7776 = vmatprep.mubr.bf16.mxu0 %v22347_v36  ;;  %v19145_v30 = vld [vmem:[%s25655_s1 + $0x17d4] ss:$24 sps:$4 sm:$0xff]  }
 0x38b   : > { %9320 = vmatprep.mubr.bf16.mxu1 %v22347_v36  ;;  %7892 = vmatpush1.bf16.msra.mxu0 %v19125_v50  ;;  %v19142_v50 = vld [vmem:[%s25655_s1 + $0x17ac] ss:$24 sps:$4 sm:$0xff]   ;;  %v22381_v36 = vcombine.high %v474_v59, %v482_v27 }
 0x38c   : > { %9436 = vmatpush1.bf16.msra.mxu1 %v19128_v26  ;;  %7893 = vmatprep.subr.bf16.mxu0 %v19133_v40  ;;  %v22379_v26 = vcombine.low %v458_v34, %v466_v41  ;;  %v19137_v40 = vld [vmem:[%s25655_s1 + $0x17a0] ss:$24 sps:$4 sm:$0xff]   ;;  %v19148_v34 = vld [vmem:[%s25655_s1 + $0x17dc] ss:$24 sps:$4 sm:$0xff]  }
 0x38d   : > { %9437 = vmatprep.subr.bf16.mxu1 %v19136_v53  ;;  %v19140_v53 = vld [vmem:[%s25655_s1 + $0x17a8] ss:$24 sps:$4 sm:$0xff]   ;;  %v490_v41 = vld [vmem:[%s19953_s24 + $0x4b0] sm:$0xff] }
 0x38e   : > { %26081 = vst [vmem:[#allocation162_spill] sm:$0xff] %v22379_v26 }
 0x38f   : > { %7894 = vmatpush1.bf16.msra.mxu0 %v19131_v22  ;;  %v498_v22 = vld [vmem:[%s19953_s24 + $0x4f0] sm:$0xff] }
 0x390   : > { %9438 = vmatpush1.bf16.msra.mxu1 %v19134_v49  ;;  %7895 = vmatprep.subr.bf16.mxu0 %v19139_v63  ;;  %v19143_v49 = vld [vmem:[%s25655_s1 + $0x17d0] ss:$24 sps:$4 sm:$0xff]  }
 0x391   : > { %9439 = vmatprep.subr.bf16.mxu1 %v19142_v50  ;;  %7777 = vmatmul.mubr.bf16.gmra.mrb[28].mxu0 %v22379_v26  ;;  %v19146_v63 = vld [vmem:[%s25655_s1 + $0x17d8] ss:$24 sps:$4 sm:$0xff]   ;;  %v22407_v50 = vcombine.low %v474_v59, %v482_v27  ;;  %v22420_v27 = vcombine.low %v490_v41, %v498_v22 }
 0x392   : > { %9321 = vmatmul.mubr.bf16.gmra.mrb[28].mxu1 %v22379_v26  ;;  %7786 = vmatprep.mubr.bf16.mxu0 %v22381_v36  ;;  %v22409_v26 = vcombine.high %v490_v41, %v498_v22  ;;  %v514_v59 = vld [vmem:[%s19953_s24 + $0x570] sm:$0xff] }
 0x393   : > { %9330 = vmatprep.mubr.bf16.mxu1 %v22381_v36  ;;  %7896 = vmatpush1.bf16.msra.mxu0 %v19137_v40  ;;  %26082 = vst [vmem:[#allocation163_spill] sm:$0xff] %v22407_v50  ;;  %v19151_v40 = vld [vmem:[%s25655_s1 + $0x14] ss:$24 sps:$4 sm:$0xff]   ;;  %26084 = vst [vmem:[#allocation165_spill] sm:$0xff] %v22420_v27 }
 0x394   : > { %9440 = vmatpush1.bf16.msra.mxu1 %v19140_v53  ;;  %7897 = vmatprep.subr.bf16.mxu0 %v19145_v30  ;;  %26083 = vst [vmem:[#allocation164_spill] sm:$0xff] %v22409_v26  ;;  %v506_v30 = vld [vmem:[%s19953_s24 + $0x530] sm:$0xff] }
 0x395   : > { %9441 = vmatprep.subr.bf16.mxu1 %v19148_v34  ;;  %v22422_v53 = vcombine.high %v506_v30, %v514_v59  ;;  %v522_v34 = vld [vmem:[%s19953_s24 + $0x5b0] sm:$0xff] }
 0x396   : > { %v538_v41 = vld [vmem:[%s19953_s24 + $0x630] sm:$0xff] }
 0x397   : > { %7898 = vmatpush1.bf16.msra.mxu0 %v19143_v49  ;;  %26085 = vst [vmem:[#allocation166_spill] sm:$0xff] %v22422_v53  ;;  %v530_v49 = vld [vmem:[%s19953_s24 + $0x5f0] sm:$0xff] }
 0x398   : > { %9442 = vmatpush1.bf16.msra.mxu1 %v19146_v63  ;;  %9604 = vmatprep.subr.bf16.mxu0 %v19151_v40  ;;  %v22430_v63 = vcombine.low %v506_v30, %v514_v59  ;;  %v22432_v40 = vcombine.high %v522_v34, %v530_v49  ;;  %v546_v22 = vld [vmem:[%s19953_s24 + $0x670] sm:$0xff] }
 0x399   : > { %7787 = vmatmul.mubr.bf16.gmra.mrb[32].mxu0 %v22407_v50  ;;  %v554_v30 = vld [vmem:[%s19953_s24 + $0x6b0] sm:$0xff] }
 0x39a   : > { %9331 = vmatmul.mubr.bf16.gmra.mrb[32].mxu1 %v22407_v50  ;;  %7796 = vmatprep.mubr.bf16.mxu0 %v22409_v26  ;;  %26086 = vst [vmem:[#allocation167_spill] sm:$0xff] %v22430_v63  ;;  %26087 = vst [vmem:[#allocation168_spill] sm:$0xff] %v22432_v40  ;;  %v562_v59 = vld [vmem:[%s19953_s24 + $0x6f0] sm:$0xff] }
 0x39b   : > { %9340 = vmatprep.mubr.bf16.mxu1 %v22409_v26 }
 0x3a1   : > { %7797 = vmatmul.mubr.bf16.gmra.mrb[36].mxu0 %v22420_v27 }
 0x3a2   : > { %9341 = vmatmul.mubr.bf16.gmra.mrb[36].mxu1 %v22420_v27  ;;  %7806 = vmatprep.mubr.bf16.mxu0 %v22422_v53  ;;  %v22442_v27 = vcombine.high %v538_v41, %v546_v22 }
 0x3a3   : > { %9350 = vmatprep.mubr.bf16.mxu1 %v22422_v53  ;;  %v22440_v53 = vcombine.low %v522_v34, %v530_v49  ;;  %v570_v34 = vld [vmem:[%s19953_s24 + $0x730] sm:$0xff] }
 0x3a4   : > { %26089 = vst [vmem:[#allocation170_spill] sm:$0xff] %v22442_v27  ;;  %v578_v49 = vld [vmem:[%s19953_s24 + $0x770] sm:$0xff] }
 0x3a5   : > { %26088 = vst [vmem:[#allocation169_spill] sm:$0xff] %v22440_v53 }
 0x3a9   : > { %7807 = vmatmul.mubr.bf16.gmra.mrb[40].mxu0 %v22430_v63 }
 0x3aa   : > { %9351 = vmatmul.mubr.bf16.gmra.mrb[40].mxu1 %v22430_v63  ;;  %7816 = vmatprep.mubr.bf16.mxu0 %v22432_v40  ;;  %v22452_v63 = vcombine.high %v554_v30, %v562_v59 }
 0x3ab   : > { %9360 = vmatprep.mubr.bf16.mxu1 %v22432_v40  ;;  %v22450_v40 = vcombine.low %v538_v41, %v546_v22  ;;  %v586_v41 = vld [vmem:[%s19953_s24 + $0x7b0] sm:$0xff] }
 0x3ac   : > { %26091 = vst [vmem:[#allocation172_spill] sm:$0xff] %v22452_v63  ;;  %v594_v22 = vld [vmem:[%s19953_s24 + $0x7f0] sm:$0xff] }
 0x3ad   : > { %26090 = vst [vmem:[#allocation171_spill] sm:$0xff] %v22450_v40 }
 0x3b1   : > { %7817 = vmatmul.mubr.bf16.gmra.mrb[44].mxu0 %v22440_v53 }
 0x3b2   : > { %9361 = vmatmul.mubr.bf16.gmra.mrb[44].mxu1 %v22440_v53  ;;  %7826 = vmatprep.mubr.bf16.mxu0 %v22442_v27  ;;  %v22462_v53 = vcombine.high %v570_v34, %v578_v49 }
 0x3b3   : > { %9370 = vmatprep.mubr.bf16.mxu1 %v22442_v27  ;;  %v22460_v27 = vcombine.low %v554_v30, %v562_v59  ;;  %v347_v30 = vld [vmem:[%s19953_s24 + $0x38] sm:$0xff] }
 0x3b4   : > { %26093 = vst [vmem:[#allocation174_spill] sm:$0xff] %v22462_v53  ;;  %v355_v59 = vld [vmem:[%s19953_s24 + $0x78] sm:$0xff] }
 0x3b5   : > { %26092 = vst [vmem:[#allocation173_spill] sm:$0xff] %v22460_v27 }
 0x3b9   : > { %7827 = vmatmul.mubr.bf16.gmra.mrb[48].mxu0 %v22450_v40 }
 0x3ba   : > { %9371 = vmatmul.mubr.bf16.gmra.mrb[48].mxu1 %v22450_v40  ;;  %7836 = vmatprep.mubr.bf16.mxu0 %v22452_v63  ;;  %v22472_v40 = vcombine.high %v586_v41, %v594_v22 }
 0x3bb   : > { %9380 = vmatprep.mubr.bf16.mxu1 %v22452_v63  ;;  %v22470_v63 = vcombine.low %v570_v34, %v578_v49  ;;  %v363_v34 = vld [vmem:[%s19953_s24 + $0xb8] sm:$0xff] }
 0x3bc   : > { %26095 = vst [vmem:[#allocation176_spill] sm:$0xff] %v22472_v40  ;;  %v371_v49 = vld [vmem:[%s19953_s24 + $0xf8] sm:$0xff] }
 0x3bd   : > { %26094 = vst [vmem:[#allocation175_spill] sm:$0xff] %v22470_v63  ;;  %v22512_v26 = vcombine.low %v363_v34, %v371_v49 }
 0x3bf   : > { %26100 = vst [vmem:[#allocation181_spill] sm:$0xff] %v22512_v26 }
 0x3c1   : > { %7837 = vmatmul.mubr.bf16.gmra.mrb[52].mxu0 %v22460_v27 }
 0x3c2   : > { %9381 = vmatmul.mubr.bf16.gmra.mrb[52].mxu1 %v22460_v27  ;;  %7846 = vmatprep.mubr.bf16.mxu0 %v22462_v53  ;;  %v22480_v27 = vcombine.low %v586_v41, %v594_v22  ;;  %v19149_v41 = vld [vmem:[%s25655_s1 + $0x10] ss:$24 sps:$4 sm:$0xff]   ;;  %v19154_v22 = vld [vmem:[%s25655_s1 + $0x44] ss:$24 sps:$4 sm:$0xff]  }
 0x3c3   : > { %9390 = vmatprep.mubr.bf16.mxu1 %v22462_v53  ;;  %v22482_v53 = vcombine.high %v347_v30, %v355_v59 }
 0x3c4   : > { %26096 = vst [vmem:[#allocation177_spill] sm:$0xff] %v22480_v27 }
 0x3c5   : > { %26097 = vst [vmem:[#allocation178_spill] sm:$0xff] %v22482_v53 }
 0x3c9   : > { %7847 = vmatmul.mubr.bf16.gmra.mrb[56].mxu0 %v22470_v63 }
 0x3ca   : > { %9391 = vmatmul.mubr.bf16.gmra.mrb[56].mxu1 %v22470_v63  ;;  %7856 = vmatprep.mubr.bf16.mxu0 %v22472_v40  ;;  %v22490_v63 = vcombine.low %v347_v30, %v355_v59  ;;  %v379_v30 = vld [vmem:[%s19953_s24 + $0x138] sm:$0xff] }
 0x3cb   : > { %9400 = vmatprep.mubr.bf16.mxu1 %v22472_v40  ;;  %v22492_v40 = vcombine.high %v363_v34, %v371_v49  ;;  %v387_v59 = vld [vmem:[%s19953_s24 + $0x178] sm:$0xff]  ;;  %v19163_v49 = vld [vmem:[%s25655_s1 + $0xd4] ss:$24 sps:$4 sm:$0xff]  }
 0x3cc   : > { %26098 = vst [vmem:[#allocation179_spill] sm:$0xff] %v22490_v63  ;;  %v395_v34 = vld [vmem:[%s19953_s24 + $0x1b8] sm:$0xff] }
 0x3cd   : > { %26099 = vst [vmem:[#allocation180_spill] sm:$0xff] %v22492_v40 }
 0x3d1   : > { %7857 = vmatmul.mubr.bf16.gmra.mrb[60].mxu0 %v22480_v27 }
 0x3d2   : > { %9401 = vmatmul.mubr.bf16.gmra.mrb[60].mxu1 %v22480_v27  ;;  %7899 = vmatprep.mubr.bf16.mxu0 %v22482_v53  ;;  %v19157_v27 = vld [vmem:[%s25655_s1 + $0x74] ss:$24 sps:$4 sm:$0xff]  }
 0x3d3   : > { %9443 = vmatprep.mubr.bf16.mxu1 %v22482_v53  ;;  %v19152_v53 = vld [vmem:[%s25655_s1 + $0x40] ss:$24 sps:$4 sm:$0xff]  }
 0x3d9   : > { %7900 = vmatmul.mubr.bf16.vlgmr.msra.gmra.mrb[0].mxu0 %v22490_v63 }
 0x3da   : > { %9444 = vmatmul.mubr.bf16.vlgmr.msra.gmra.mrb[0].mxu1 %v22490_v63  ;;  %7909 = vmatprep.mubr.bf16.mxu0 %v22492_v40  ;;  %v22514_v63 = vcombine.high %v379_v30, %v387_v59 }
 0x3db   : > { %9453 = vmatprep.mubr.bf16.mxu1 %v22492_v40  ;;  %9605 = vmatpush1.bf16.msra.mxu0 %v19149_v41  ;;  %v19155_v40 = vld [vmem:[%s25655_s1 + $0x70] ss:$24 sps:$4 sm:$0xff]   ;;  %v19160_v41 = vld [vmem:[%s25655_s1 + $0xa4] ss:$24 sps:$4 sm:$0xff]  }
 0x3dc   : > { %9606 = vmatprep.subr.bf16.mxu0 %v19154_v22  ;;  %26101 = vst [vmem:[#allocation182_spill] sm:$0xff] %v22514_v63  ;;  %v22534_v22 = vcombine.low %v379_v30, %v387_v59  ;;  %v411_v30 = vld [vmem:[%s19953_s24 + $0x238] sm:$0xff] }
 0x3dd   : > { %v419_v59 = vld [vmem:[%s19953_s24 + $0x278] sm:$0xff] }
 0x3de   : > { %26102 = vst [vmem:[#allocation183_spill] sm:$0xff] %v22534_v22 }
 0x3df   : > { %9607 = vmatpush1.bf16.msra.mxu0 %v19152_v53  ;;  %v403_v53 = vld [vmem:[%s19953_s24 + $0x1f8] sm:$0xff] }
 0x3e0   : > { %9608 = vmatprep.subr.bf16.mxu0 %v19157_v27  ;;  %v19158_v27 = vld [vmem:[%s25655_s1 + $0xa0] ss:$24 sps:$4 sm:$0xff]  }
 0x3e1   : > { %7910 = vmatmul.mubr.bf16.gmra.mrb[4].mxu0 %v22512_v26 }
 0x3e2   : > { %9454 = vmatmul.mubr.bf16.gmra.mrb[4].mxu1 %v22512_v26  ;;  %7919 = vmatprep.mubr.bf16.mxu0 %v22514_v63  ;;  %v22536_v26 = vcombine.high %v395_v34, %v403_v53 }
 0x3e3   : > { %9463 = vmatprep.mubr.bf16.mxu1 %v22514_v63  ;;  %9609 = vmatpush1.bf16.msra.mxu0 %v19155_v40  ;;  %v19161_v63 = vld [vmem:[%s25655_s1 + $0xd0] ss:$24 sps:$4 sm:$0xff]   ;;  %v19166_v40 = vld [vmem:[%s25655_s1 + $0x104] ss:$24 sps:$4 sm:$0xff]  }
 0x3e4   : > { %9610 = vmatprep.subr.bf16.mxu0 %v19160_v41  ;;  %26103 = vst [vmem:[#allocation184_spill] sm:$0xff] %v22536_v26  ;;  %v19164_v41 = vld [vmem:[%s25655_s1 + $0x100] ss:$24 sps:$4 sm:$0xff]  }
 0x3e7   : > { %9611 = vmatpush1.bf16.msra.mxu0 %v19158_v27  ;;  %v19169_v27 = vld [vmem:[%s25655_s1 + $0x134] ss:$24 sps:$4 sm:$0xff]  }
 0x3e8   : > { %9612 = vmatprep.subr.bf16.mxu0 %v19163_v49  ;;  %v22556_v49 = vcombine.low %v395_v34, %v403_v53  ;;  %v427_v34 = vld [vmem:[%s19953_s24 + $0x2b8] sm:$0xff] }
 0x3e9   : > { %7920 = vmatmul.mubr.bf16.gmra.mrb[8].mxu0 %v22534_v22  ;;  %v435_v53 = vld [vmem:[%s19953_s24 + $0x2f8] sm:$0xff] }
 0x3ea   : > { %9464 = vmatmul.mubr.bf16.gmra.mrb[8].mxu1 %v22534_v22  ;;  %7929 = vmatprep.mubr.bf16.mxu0 %v22536_v26  ;;  %26104 = vst [vmem:[#allocation185_spill] sm:$0xff] %v22556_v49  ;;  %v22558_v22 = vcombine.high %v411_v30, %v419_v59 }
 0x3eb   : > { %9473 = vmatprep.mubr.bf16.mxu1 %v22536_v26  ;;  %9613 = vmatpush1.bf16.msra.mxu0 %v19161_v63  ;;  %v19167_v26 = vld [vmem:[%s25655_s1 + $0x130] ss:$24 sps:$4 sm:$0xff]   ;;  %v19172_v63 = vld [vmem:[%s25655_s1 + $0x164] ss:$24 sps:$4 sm:$0xff]  }
 0x3ec   : > { %9614 = vmatprep.subr.bf16.mxu0 %v19166_v40  ;;  %26105 = vst [vmem:[#allocation186_spill] sm:$0xff] %v22558_v22  ;;  %v19170_v40 = vld [vmem:[%s25655_s1 + $0x160] ss:$24 sps:$4 sm:$0xff]  }
 0x3ef   : > { %9615 = vmatpush1.bf16.msra.mxu0 %v19164_v41  ;;  %v19175_v41 = vld [vmem:[%s25655_s1 + $0x194] ss:$24 sps:$4 sm:$0xff]  }
 0x3f0   : > { %9616 = vmatprep.subr.bf16.mxu0 %v19169_v27  ;;  %v22578_v27 = vcombine.low %v411_v30, %v419_v59  ;;  %v443_v30 = vld [vmem:[%s19953_s24 + $0x338] sm:$0xff] }
 0x3f1   : > { %7930 = vmatmul.mubr.bf16.gmra.mrb[12].mxu0 %v22556_v49  ;;  %v451_v59 = vld [vmem:[%s19953_s24 + $0x378] sm:$0xff] }
 0x3f2   : > { %9474 = vmatmul.mubr.bf16.gmra.mrb[12].mxu1 %v22556_v49  ;;  %7939 = vmatprep.mubr.bf16.mxu0 %v22558_v22  ;;  %26106 = vst [vmem:[#allocation187_spill] sm:$0xff] %v22578_v27  ;;  %v22580_v49 = vcombine.high %v427_v34, %v435_v53 }
 0x3f3   : > { %9483 = vmatprep.mubr.bf16.mxu1 %v22558_v22  ;;  %9617 = vmatpush1.bf16.msra.mxu0 %v19167_v26  ;;  %v19173_v22 = vld [vmem:[%s25655_s1 + $0x190] ss:$24 sps:$4 sm:$0xff]   ;;  %v19178_v26 = vld [vmem:[%s25655_s1 + $0x1c4] ss:$24 sps:$4 sm:$0xff]  }
 0x3f4   : > { %9618 = vmatprep.subr.bf16.mxu0 %v19172_v63  ;;  %26107 = vst [vmem:[#allocation188_spill] sm:$0xff] %v22580_v49  ;;  %v19176_v63 = vld [vmem:[%s25655_s1 + $0x1c0] ss:$24 sps:$4 sm:$0xff]  }
 0x3f7   : > { %9619 = vmatpush1.bf16.msra.mxu0 %v19170_v40  ;;  %v19181_v40 = vld [vmem:[%s25655_s1 + $0x1f4] ss:$24 sps:$4 sm:$0xff]  }
 0x3f8   : > { %9620 = vmatprep.subr.bf16.mxu0 %v19175_v41  ;;  %v22600_v41 = vcombine.low %v427_v34, %v435_v53  ;;  %v459_v34 = vld [vmem:[%s19953_s24 + $0x3b8] sm:$0xff] }
 0x3f9   : > { %7940 = vmatmul.mubr.bf16.gmra.mrb[16].mxu0 %v22578_v27  ;;  %v467_v53 = vld [vmem:[%s19953_s24 + $0x3f8] sm:$0xff] }
 0x3fa   : > { %9484 = vmatmul.mubr.bf16.gmra.mrb[16].mxu1 %v22578_v27  ;;  %7949 = vmatprep.mubr.bf16.mxu0 %v22580_v49  ;;  %26108 = vst [vmem:[#allocation189_spill] sm:$0xff] %v22600_v41  ;;  %v22602_v27 = vcombine.high %v443_v30, %v451_v59 }
 0x3fb   : > { %9493 = vmatprep.mubr.bf16.mxu1 %v22580_v49  ;;  %9621 = vmatpush1.bf16.msra.mxu0 %v19173_v22  ;;  %v19179_v49 = vld [vmem:[%s25655_s1 + $0x1f0] ss:$24 sps:$4 sm:$0xff]   ;;  %v19184_v22 = vld [vmem:[%s25655_s1 + $0x224] ss:$24 sps:$4 sm:$0xff]  }
 0x3fc   : > { %9622 = vmatprep.subr.bf16.mxu0 %v19178_v26  ;;  %26109 = vst [vmem:[#allocation190_spill] sm:$0xff] %v22602_v27  ;;  %v19182_v26 = vld [vmem:[%s25655_s1 + $0x220] ss:$24 sps:$4 sm:$0xff]  }
 0x3ff   : > { %9623 = vmatpush1.bf16.msra.mxu0 %v19176_v63  ;;  %v19187_v63 = vld [vmem:[%s25655_s1 + $0x254] ss:$24 sps:$4 sm:$0xff]  }
 0x400   : > { %9624 = vmatprep.subr.bf16.mxu0 %v19181_v40  ;;  %v22622_v40 = vcombine.low %v443_v30, %v451_v59  ;;  %v475_v30 = vld [vmem:[%s19953_s24 + $0x438] sm:$0xff] }
 0x401   : > { %7950 = vmatmul.mubr.bf16.gmra.mrb[20].mxu0 %v22600_v41  ;;  %v483_v59 = vld [vmem:[%s19953_s24 + $0x478] sm:$0xff] }
 0x402   : > { %9494 = vmatmul.mubr.bf16.gmra.mrb[20].mxu1 %v22600_v41  ;;  %7959 = vmatprep.mubr.bf16.mxu0 %v22602_v27  ;;  %26110 = vst [vmem:[#allocation191_spill] sm:$0xff] %v22622_v40  ;;  %v22624_v41 = vcombine.high %v459_v34, %v467_v53 }
 0x403   : > { %9503 = vmatprep.mubr.bf16.mxu1 %v22602_v27  ;;  %9625 = vmatpush1.bf16.msra.mxu0 %v19179_v49  ;;  %v19185_v27 = vld [vmem:[%s25655_s1 + $0x250] ss:$24 sps:$4 sm:$0xff]   ;;  %v19190_v49 = vld [vmem:[%s25655_s1 + $0x284] ss:$24 sps:$4 sm:$0xff]  }
 0x404   : > { %9626 = vmatprep.subr.bf16.mxu0 %v19184_v22  ;;  %26111 = vst [vmem:[#allocation192_spill] sm:$0xff] %v22624_v41  ;;  %v19188_v22 = vld [vmem:[%s25655_s1 + $0x280] ss:$24 sps:$4 sm:$0xff]  }
 0x407   : > { %9627 = vmatpush1.bf16.msra.mxu0 %v19182_v26  ;;  %v19193_v26 = vld [vmem:[%s25655_s1 + $0x2b4] ss:$24 sps:$4 sm:$0xff]  }
 0x408   : > { %9628 = vmatprep.subr.bf16.mxu0 %v19187_v63  ;;  %v22644_v63 = vcombine.low %v459_v34, %v467_v53  ;;  %v19197_v34 = vld [vmem:[%s25657_s3 + $0x40] sm:$0xff]  }
 0x409   : > { %7960 = vmatmul.mubr.bf16.gmra.mrb[24].mxu0 %v22622_v40  ;;  %v19198_v53 = vld [vmem:[%s25657_s3] sm:$0xff]   ;;  %16416 = vmatprep.subr.bf16.mxu1 %v19197_v34  ;;  %v515_v34 = vld [vmem:[%s19953_s24 + $0x578] sm:$0xff] }
 0x40a   : > { %9504 = vmatmul.mubr.bf16.gmra.mrb[24].mxu1 %v22622_v40  ;;  %7969 = vmatprep.mubr.bf16.mxu0 %v22624_v41  ;;  %26112 = vst [vmem:[#allocation193_spill] sm:$0xff] %v22644_v63  ;;  %v22646_v40 = vcombine.high %v475_v30, %v483_v59 }
 0x40b   : > { %9513 = vmatprep.mubr.bf16.mxu1 %v22624_v41  ;;  %9629 = vmatpush1.bf16.msra.mxu0 %v19185_v27  ;;  %v19191_v27 = vld [vmem:[%s25655_s1 + $0x2b0] ss:$24 sps:$4 sm:$0xff]   ;;  %v19196_v41 = vld [vmem:[%s25655_s1 + $0x2e4] ss:$24 sps:$4 sm:$0xff]  }
 0x40c   : > { %9630 = vmatprep.subr.bf16.mxu0 %v19190_v49  ;;  %26113 = vst [vmem:[#allocation194_spill] sm:$0xff] %v22646_v40  ;;  %v491_v49 = vld [vmem:[%s19953_s24 + $0x4b8] sm:$0xff]  ;;  %16417 = vmatpush3.bf16.msra.mxu1 %v19198_v53  ;;  %v19208_v53 = vld [vmem:[%s25657_s3 + $0x10] sm:$0xff]  }
 0x40f   : > { %9631 = vmatpush1.bf16.msra.mxu0 %v19188_v22  ;;  %v499_v22 = vld [vmem:[%s19953_s24 + $0x4f8] sm:$0xff] }
 0x410   : > { %9632 = vmatprep.subr.bf16.mxu0 %v19193_v26  ;;  %v19194_v26 = vld [vmem:[%s25655_s1 + $0x2e0] ss:$24 sps:$4 sm:$0xff]   ;;  %v22671_v50 = vcombine.high %v491_v49, %v499_v22 }
 0x411   : > { %7970 = vmatmul.mubr.bf16.gmra.mrb[28].mxu0 %v22644_v63 }
 0x412   : > { %9514 = vmatmul.mubr.bf16.gmra.mrb[28].mxu1 %v22644_v63  ;;  %7979 = vmatprep.mubr.bf16.mxu0 %v22646_v40  ;;  %v22669_v63 = vcombine.low %v475_v30, %v483_v59  ;;  %v19207_v30 = vld [vmem:[%s25657_s3 + $0x50] sm:$0xff]   ;;  %v507_v59 = vld [vmem:[%s19953_s24 + $0x538] sm:$0xff] }
 0x413   : > { %9523 = vmatprep.mubr.bf16.mxu1 %v22646_v40  ;;  %9633 = vmatpush1.bf16.msra.mxu0 %v19191_v27  ;;  %v19201_v40 = vld [vmem:[%s25655_s1 + $0x314] ss:$24 sps:$4 sm:$0xff]  }
 0x414   : > { %9634 = vmatprep.subr.bf16.mxu0 %v19196_v41  ;;  %26114 = vst [vmem:[#allocation195_spill] sm:$0xff] %v22669_v63  ;;  %v19202_v27 = vld [vmem:[%s25657_s3 + $0x48] sm:$0xff]  }
 0x415   : > { %v19203_v41 = vld [vmem:[%s25657_s3 + $0x8] sm:$0xff]   ;;  %16418 = vmatprep.subr.bf16.mxu1 %v19202_v27  ;;  %v19213_v27 = vld [vmem:[%s25657_s3 + $0x18] sm:$0xff]  }
 0x416   : > { %16419 = vmatpush3.bf16.msra.mxu1 %v19203_v41  ;;  %v531_v41 = vld [vmem:[%s19953_s24 + $0x5f8] sm:$0xff] }
 0x417   : > { %9635 = vmatpush1.bf16.msra.mxu0 %v19194_v26  ;;  %v22694_v26 = vcombine.low %v491_v49, %v499_v22  ;;  %16420 = vmatprep.subr.bf16.mxu1 %v19207_v30  ;;  %v19217_v49 = vld [vmem:[%s25657_s3 + $0x60] sm:$0xff]   ;;  %v523_v22 = vld [vmem:[%s19953_s24 + $0x5b8] sm:$0xff] }
 0x418   : > { %9797 = vmatprep.subr.bf16.mxu0 %v19201_v40  ;;  %v19212_v40 = vld [vmem:[%s25657_s3 + $0x58] sm:$0xff]   ;;  %v19218_v30 = vld [vmem:[%s25657_s3 + $0x20] sm:$0xff]  }
 0x419   : > { %7980 = vmatmul.mubr.bf16.gmra.mrb[32].mxu0 %v22669_v63  ;;  %26115 = vst [vmem:[#allocation196_spill] sm:$0xff] %v22694_v26 }
 0x41a   : > { %9524 = vmatmul.mubr.bf16.gmra.mrb[32].mxu1 %v22669_v63  ;;  %7989 = vmatprep.mubr.bf16.mxu0 %v22671_v50  ;;  %v22696_v63 = vcombine.high %v507_v59, %v515_v34 }
 0x41b   : > { %9533 = vmatprep.mubr.bf16.mxu1 %v22671_v50  ;;  %16421 = vmatpush3.bf16.msra.mxu1 %v19208_v53  ;;  %v22716_v53 = vcombine.low %v507_v59, %v515_v34  ;;  %v19223_v59 = vld [vmem:[%s25657_s3 + $0x28] sm:$0xff]   ;;  %v539_v34 = vld [vmem:[%s19953_s24 + $0x638] sm:$0xff] }
 0x41c   : > { %26116 = vst [vmem:[#allocation197_spill] sm:$0xff] %v22696_v63  ;;  %16422 = vmatprep.subr.bf16.mxu1 %v19212_v40  ;;  %v547_v40 = vld [vmem:[%s19953_s24 + $0x678] sm:$0xff] }
 0x41d   : > { %26117 = vst [vmem:[#allocation198_spill] sm:$0xff] %v22716_v53 }
 0x41f   : > { %16423 = vmatpush3.bf16.msra.mxu1 %v19213_v27  ;;  %v22732_v27 = vcombine.low %v523_v22, %v531_v41 }
 0x420   : > { %16424 = vmatprep.subr.bf16.mxu1 %v19217_v49  ;;  %v19227_v49 = vld [vmem:[%s25657_s3 + $0x70] sm:$0xff]  }
 0x421   : > { %7990 = vmatmul.mubr.bf16.gmra.mrb[36].mxu0 %v22694_v26  ;;  %26119 = vst [vmem:[#allocation200_spill] sm:$0xff] %v22732_v27 }
 0x422   : > { %9534 = vmatmul.mubr.bf16.gmra.mrb[36].mxu1 %v22694_v26  ;;  %7999 = vmatprep.mubr.bf16.mxu0 %v22696_v63  ;;  %v22718_v26 = vcombine.high %v523_v22, %v531_v41  ;;  %v19233_v22 = vld [vmem:[%s25657_s3 + $0x38] sm:$0xff]  }
 0x423   : > { %9543 = vmatprep.mubr.bf16.mxu1 %v22696_v63  ;;  %16425 = vmatpush3.bf16.msra.mxu1 %v19218_v30  ;;  %v19222_v63 = vld [vmem:[%s25657_s3 + $0x68] sm:$0xff]   ;;  %v22737_v30 = vcombine.high %v539_v34, %v547_v40  ;;  %v555_v41 = vld [vmem:[%s19953_s24 + $0x6b8] sm:$0xff] }
 0x424   : > { %26118 = vst [vmem:[#allocation199_spill] sm:$0xff] %v22718_v26  ;;  %16426 = vmatprep.subr.bf16.mxu1 %v19222_v63  ;;  %v19232_v63 = vld [vmem:[%s25657_s3 + $0x78] sm:$0xff]  }
 0x425   : > { %26120 = vst [vmem:[#allocation201_spill] sm:$0xff] %v22737_v30 }
 0x427   : > { %16427 = vmatpush3.bf16.msra.mxu1 %v19223_v59  ;;  %v22754_v59 = vcombine.low %v539_v34, %v547_v40  ;;  %v587_v34 = vld [vmem:[%s19953_s24 + $0x7b8] sm:$0xff] }
 0x428   : > { %16428 = vmatprep.subr.bf16.mxu1 %v19227_v49  ;;  %v595_v40 = vld [vmem:[%s19953_s24 + $0x7f8] sm:$0xff] }
 0x429   : > { %8000 = vmatmul.mubr.bf16.gmra.mrb[40].mxu0 %v22716_v53  ;;  %26121 = vst [vmem:[#allocation202_spill] sm:$0xff] %v22754_v59 }
 0x42a   : > { %9544 = vmatmul.mubr.bf16.gmra.mrb[40].mxu1 %v22716_v53  ;;  %8009 = vmatprep.mubr.bf16.mxu0 %v22718_v26 }
 0x42b   : > { %9553 = vmatprep.mubr.bf16.mxu1 %v22718_v26  ;;  %v19228_v26 = vld [vmem:[%s25657_s3 + $0x30] sm:$0xff]  }
 0x42c   : > { %16429 = vmatpush3.bf16.msra.mxu1 %v19228_v26  ;;  %v563_v26 = vld [vmem:[%s19953_s24 + $0x6f8] sm:$0xff] }
 0x42d   : > { %16430 = vmatprep.subr.bf16.mxu1 %v19232_v63  ;;  %v22756_v49 = vcombine.high %v555_v41, %v563_v26  ;;  %v22764_v53 = vcombine.low %v555_v41, %v563_v26  ;;  %v22782_v41 = vcombine.low %v587_v34, %v595_v40  ;;  %v19204_v26 = vld [vmem:[%s25655_s1 + $0x340] ss:$24 sps:$4 sm:$0xff]  }
 0x42f   : > { %26125 = vst [vmem:[#allocation206_spill] sm:$0xff] %v22782_v41 }
 0x430   : > { %16431 = vmatpush3.bf16.msra.mxu1 %v19233_v22 }
 0x431   : > { %8010 = vmatmul.mubr.bf16.gmra.mrb[44].mxu0 %v22732_v27 }
 0x432   : > { %9554 = vmatmul.mubr.bf16.gmra.mrb[44].mxu1 %v22732_v27  ;;  %8019 = vmatprep.mubr.bf16.mxu0 %v22737_v30  ;;  %v579_v27 = vld [vmem:[%s19953_s24 + $0x778] sm:$0xff] }
 0x433   : > { %9563 = vmatprep.mubr.bf16.mxu1 %v22737_v30  ;;  %v571_v30 = vld [vmem:[%s19953_s24 + $0x738] sm:$0xff]  ;;  %s15114_s24 = scalar_lea.sflag [#allocation4], %s328_s17 }
 0x434   : > { %v22766_v63 = vcombine.high %v571_v30, %v579_v27  ;;  %v22774_v22 = vcombine.low %v571_v30, %v579_v27  ;;  %v19199_v27 = vld [vmem:[%s25655_s1 + $0x310] ss:$24 sps:$4 sm:$0xff]   ;;  %v19206_v30 = vld [vmem:[%s25655_s1 + $0x344] ss:$24 sps:$4 sm:$0xff]  }
 0x436   : > { %26122 = vst [vmem:[#allocation203_spill] sm:$0xff] %v22766_v63  ;;  %26123 = vst [vmem:[#allocation204_spill] sm:$0xff] %v22774_v22 }
 0x439   : > { %8020 = vmatmul.mubr.bf16.gmra.mrb[48].mxu0 %v22754_v59 }
 0x43a   : > { %9564 = vmatmul.mubr.bf16.gmra.mrb[48].mxu1 %v22754_v59  ;;  %8029 = vmatprep.mubr.bf16.mxu0 %v22756_v49  ;;  %v22776_v59 = vcombine.high %v587_v34, %v595_v40  ;;  %v19209_v34 = vld [vmem:[%s25655_s1 + $0x370] ss:$24 sps:$4 sm:$0xff]   ;;  %v19221_v40 = vld [vmem:[%s25655_s1 + $0x3d4] ss:$24 sps:$4 sm:$0xff]  }
 0x43b   : > { %9573 = vmatprep.mubr.bf16.mxu1 %v22756_v49 }
 0x43c   : > { %26124 = vst [vmem:[#allocation205_spill] sm:$0xff] %v22776_v59 }
 0x441   : > { %8030 = vmatmul.mubr.bf16.gmra.mrb[52].mxu0 %v22764_v53 }
 0x442   : > { %9574 = vmatmul.mubr.bf16.gmra.mrb[52].mxu1 %v22764_v53  ;;  %8039 = vmatprep.mubr.bf16.mxu0 %v22766_v63 }
 0x443   : > { %9583 = vmatprep.mubr.bf16.mxu1 %v22766_v63 }
 0x449   : > { %8040 = vmatmul.mubr.bf16.gmra.mrb[56].mxu0 %v22774_v22 }
 0x44a   : > { %9584 = vmatmul.mubr.bf16.gmra.mrb[56].mxu1 %v22774_v22  ;;  %8049 = vmatprep.mubr.bf16.mxu0 %v22776_v59 }
 0x44b   : > { %9593 = vmatprep.mubr.bf16.mxu1 %v22776_v59 }
 0x451   : > { %8050 = vmatmul.mubr.bf16.gmra.mrb[60].mxu0 %v22782_v41 }
 0x452   : > { %9594 = vmatmul.mubr.bf16.gmra.mrb[60].mxu1 %v22782_v41  ;;  %9636 = vmatprep.mubr.bf16.mxu0 %v19969_v51  ;;  %v19211_v51 = vld [vmem:[%s25655_s1 + $0x374] ss:$24 sps:$4 sm:$0xff]  }
 0x459   : > { %9637 = vmatmul.mubr.bf16.vlgmr.msra.gmra.mrb[64].mxu0 %v20029_v8  ;;  %v19216_v8 = vld [vmem:[%s25655_s1 + $0x3a4] ss:$24 sps:$4 sm:$0xff]  }
 0x45a   : > { %9646 = vmatprep.mubr.bf16.mxu0 %v20031_v9  ;;  %9798 = vmatpush1.bf16.msra.mxu0 %v19199_v27  ;;  %v19214_v9 = vld [vmem:[%s25655_s1 + $0x3a0] ss:$24 sps:$4 sm:$0xff]   ;;  %v19219_v27 = vld [vmem:[%s25655_s1 + $0x3d0] ss:$24 sps:$4 sm:$0xff]  }
 0x45b   : > { %9799 = vmatprep.subr.bf16.mxu0 %v19206_v30  ;;  %v19231_v30 = vld [vmem:[%s25655_s1 + $0x434] ss:$24 sps:$4 sm:$0xff]  }
 0x45e   : > { %9800 = vmatpush1.bf16.msra.mxu0 %v19204_v26  ;;  %v19229_v26 = vld [vmem:[%s25655_s1 + $0x430] ss:$24 sps:$4 sm:$0xff]  }
 0x45f   : > { %9801 = vmatprep.subr.bf16.mxu0 %v19211_v51  ;;  %v19239_v51 = vld [vmem:[%s25655_s1 + $0x494] ss:$24 sps:$4 sm:$0xff]  }
 0x461   : > { %9647 = vmatmul.mubr.bf16.gmra.mrb[68].mxu0 %v20063_v20  ;;  %v19226_v20 = vld [vmem:[%s25655_s1 + $0x404] ss:$24 sps:$4 sm:$0xff]  }
 0x462   : > { %9656 = vmatprep.mubr.bf16.mxu0 %v20065_v21  ;;  %9802 = vmatpush1.bf16.msra.mxu0 %v19209_v34  ;;  %v19224_v21 = vld [vmem:[%s25655_s1 + $0x400] ss:$24 sps:$4 sm:$0xff]   ;;  %v19237_v34 = vld [vmem:[%s25655_s1 + $0x490] ss:$24 sps:$4 sm:$0xff]  }
 0x463   : > { %9803 = vmatprep.subr.bf16.mxu0 %v19216_v8  ;;  %v19245_v8 = vld [vmem:[%s25655_s1 + $0x4f4] ss:$24 sps:$4 sm:$0xff]  }
 0x466   : > { %9804 = vmatpush1.bf16.msra.mxu0 %v19214_v9  ;;  %v19243_v9 = vld [vmem:[%s25655_s1 + $0x4f0] ss:$24 sps:$4 sm:$0xff]  }
 0x467   : > { %9805 = vmatprep.subr.bf16.mxu0 %v19221_v40  ;;  %v19251_v40 = vld [vmem:[%s25655_s1 + $0x554] ss:$24 sps:$4 sm:$0xff]  }
 0x469   : > { %9657 = vmatmul.mubr.bf16.gmra.mrb[72].mxu0 %v20097_v32  ;;  %v19236_v32 = vld [vmem:[%s25655_s1 + $0x464] ss:$24 sps:$4 sm:$0xff]  }
 0x46a   : > { %9666 = vmatprep.mubr.bf16.mxu0 %v20099_v33  ;;  %9806 = vmatpush1.bf16.msra.mxu0 %v19219_v27  ;;  %v19234_v33 = vld [vmem:[%s25655_s1 + $0x460] ss:$24 sps:$4 sm:$0xff]   ;;  %v19249_v27 = vld [vmem:[%s25655_s1 + $0x550] ss:$24 sps:$4 sm:$0xff]  }
 0x46b   : > { %9807 = vmatprep.subr.bf16.mxu0 %v19226_v20  ;;  %v19257_v20 = vld [vmem:[%s25655_s1 + $0x5b4] ss:$24 sps:$4 sm:$0xff]  }
 0x46e   : > { %9808 = vmatpush1.bf16.msra.mxu0 %v19224_v21  ;;  %v19255_v21 = vld [vmem:[%s25655_s1 + $0x5b0] ss:$24 sps:$4 sm:$0xff]  }
 0x46f   : > { %9809 = vmatprep.subr.bf16.mxu0 %v19231_v30  ;;  %v19261_v30 = vld [vmem:[%s25657_s3 + $0xc0] sm:$0xff]  }
 0x470   : > { %16528 = vmatprep.subr.bf16.mxu1 %v19261_v30 }
 0x471   : > { %9667 = vmatmul.mubr.bf16.gmra.mrb[76].mxu0 %v20131_v44  ;;  %v19242_v44 = vld [vmem:[%s25655_s1 + $0x4c4] ss:$24 sps:$4 sm:$0xff]  }
 0x472   : > { %9676 = vmatprep.mubr.bf16.mxu0 %v20133_v45  ;;  %9810 = vmatpush1.bf16.msra.mxu0 %v19229_v26  ;;  %v19240_v45 = vld [vmem:[%s25655_s1 + $0x4c0] ss:$24 sps:$4 sm:$0xff]   ;;  %v19265_v26 = vld [vmem:[%s25655_s1 + $0x614] ss:$24 sps:$4 sm:$0xff]  }
 0x473   : > { %9811 = vmatprep.subr.bf16.mxu0 %v19236_v32 }
 0x476   : > { %9812 = vmatpush1.bf16.msra.mxu0 %v19234_v33 }
 0x477   : > { %9813 = vmatprep.subr.bf16.mxu0 %v19239_v51  ;;  %v1364_v51 = vld [vmem:[%s25656_s2] sm:$0x3f] }
 0x479   : > { %9677 = vmatmul.mubr.bf16.gmra.mrb[80].mxu0 %v20165_v57  ;;  %v19248_v57 = vld [vmem:[%s25655_s1 + $0x524] ss:$24 sps:$4 sm:$0xff]  }
 0x47a   : > { %9686 = vmatprep.mubr.bf16.mxu0 %v20167_v58  ;;  %9814 = vmatpush1.bf16.msra.mxu0 %v19237_v34  ;;  %v19246_v58 = vld [vmem:[%s25655_s1 + $0x520] ss:$24 sps:$4 sm:$0xff]  }
 0x47b   : > { %9815 = vmatprep.subr.bf16.mxu0 %v19242_v44 }
 0x47e   : > { %9816 = vmatpush1.bf16.msra.mxu0 %v19240_v45 }
 0x47f   : > { %9817 = vmatprep.subr.bf16.mxu0 %v19245_v8 }
 0x481   : > { %9687 = vmatmul.mubr.bf16.gmra.mrb[84].mxu0 %v20199_v5  ;;  %v19254_v5 = vld [vmem:[%s25655_s1 + $0x584] ss:$24 sps:$4 sm:$0xff]  }
 0x482   : > { %9696 = vmatprep.mubr.bf16.mxu0 %v20207_v10  ;;  %9818 = vmatpush1.bf16.msra.mxu0 %v19243_v9  ;;  %v19252_v10 = vld [vmem:[%s25655_s1 + $0x580] ss:$24 sps:$4 sm:$0xff]  }
 0x483   : > { %9819 = vmatprep.subr.bf16.mxu0 %v19248_v57 }
 0x486   : > { %9820 = vmatpush1.bf16.msra.mxu0 %v19246_v58 }
 0x487   : > { %9821 = vmatprep.subr.bf16.mxu0 %v19251_v40 }
 0x489   : > { %9697 = vmatmul.mubr.bf16.gmra.mrb[88].mxu0 %v20233_v19  ;;  %v19260_v19 = vld [vmem:[%s25655_s1 + $0x5e4] ss:$24 sps:$4 sm:$0xff]  }
 0x48a   : > { %9706 = vmatprep.mubr.bf16.mxu0 %v20241_v24  ;;  %9822 = vmatpush1.bf16.msra.mxu0 %v19249_v27  ;;  %v19258_v24 = vld [vmem:[%s25655_s1 + $0x5e0] ss:$24 sps:$4 sm:$0xff]  }
 0x48b   : > { %9823 = vmatprep.subr.bf16.mxu0 %v19254_v5 }
 0x48e   : > { %9824 = vmatpush1.bf16.msra.mxu0 %v19252_v10 }
 0x48f   : > { %9825 = vmatprep.subr.bf16.mxu0 %v19257_v20 }
 0x491   : > { %9707 = vmatmul.mubr.bf16.gmra.mrb[92].mxu0 %v20267_v35  ;;  %v25861_v35 = vlaneseq }
 0x492   : > { %9716 = vmatprep.mubr.bf16.mxu0 %v20275_v38  ;;  %9826 = vmatpush1.bf16.msra.mxu0 %v19255_v21 }
 0x493   : > { %9827 = vmatprep.subr.bf16.mxu0 %v19260_v19  ;;  %v22906_v38 = vshrl.u32 %v25861_v35, 7 }
 0x495   : > { %26126 = vst [vmem:[#allocation207_spill] sm:$0xff] %v22906_v38  ;;  %v25862_v32 = vsub.s32 0, %v22906_v38  ;;  %v1376_v33 = vsub.s32 2, %v22906_v38 }
 0x496   : > { %9828 = vmatpush1.bf16.msra.mxu0 %v19258_v24 }
 0x497   : > { %9990 = vmatprep.subr.bf16.mxu0 %v19265_v26  ;;  %v22921_v34 = vrot.slane %v1364_v51, %v1376_v33 }
 0x499   : > { %9717 = vmatmul.mubr.bf16.gmra.mrb[96].mxu0 %v20295_v47  ;;  %v1372_v47 = vsub.s32 1, %v22906_v38 }
 0x49a   : > { %9726 = vmatprep.mubr.bf16.mxu0 %v20297_v48  ;;  %v1380_v48 = vsub.s32 3, %v22906_v38 }
 0x49c   : > { %v22925_v44 = vrot.slane %v1364_v51, %v1380_v48 }
 0x4a1   : > { %9727 = vmatmul.mubr.bf16.gmra.mrb[100].mxu0 %v20311_v54  ;;  %v22919_v54 = vrot.slane %v1364_v51, %v25862_v32 }
 0x4a2   : > { %9736 = vmatprep.mubr.bf16.mxu0 %v20313_v55  ;;  %v22923_v55 = vrot.slane %v1364_v51, %v1372_v47 }
 0x4a9   : > { %9737 = vmatmul.mubr.bf16.gmra.mrb[104].mxu0 %v20321_v60 }
 0x4aa   : > { %9746 = vmatprep.mubr.bf16.mxu0 %v20323_v61 }
 0x4ac   : > { %v7901_v45 = vpop.f32.mrb[0].mxu0 }
 0x4ad   : > { %v9445_v8 = vpop.f32.mrb[0].mxu1  ;;  %v16782_v9 = vadd.f32 %v7901_v45, %v22919_v54  ;;  %v7903_v58 = vpop.f32.mrb[1].mxu0 }
 0x4ae   : > { %v16846_v57 = vadd.f32 %v9445_v8, %v22921_v34  ;;  %v9447_v60 = vpop.f32.mrb[1].mxu1  ;;  %v16783_v40 = vadd.f32 %v7903_v58, %v22923_v55  ;;  %v7905_v5 = vpop.f32.mrb[2].mxu0 }
 0x4af   : > { %v16847_v27 = vadd.f32 %v9447_v60, %v22925_v44  ;;  %v9449_v10 = vpop.f32.mrb[2].mxu1  ;;  %v16784_v20 = vadd.f32 %v7905_v5, %v22919_v54  ;;  %v7907_v19 = vpop.f32.mrb[3].mxu0  ;;  %v11148_v26 = vmax.f32 %v16782_v9, 0.0  ;;  %v19262_v9 = vld [vmem:[%s25657_s3 + $0x80] sm:$0xff]  }
 0x4b0   : > { %v16848_v21 = vadd.f32 %v9449_v10, %v22921_v34  ;;  %v9451_v61 = vpop.f32.mrb[3].mxu1  ;;  %v16785_v24 = vadd.f32 %v7907_v19, %v22923_v55  ;;  %v11150_v33 = vmax.f32 %v16846_v57, 0.0  ;;  %v11149_v48 = vmax.f32 %v16783_v40, 0.0 }
 0x4b1   : > { %v16849_v30 = vadd.f32 %v9451_v61, %v22925_v44  ;;  %v11154_v51 = vmax.f32 %v16784_v20, 0.0  ;;  %9747 = vmatmul.mubr.bf16.gmra.mrb[108].mxu0 %v20331_v0  ;;  %v11151_v45 = vmax.f32 %v16847_v27, 0.0 }
 0x4b2   : > { %v11156_v47 = vmax.f32 %v16848_v21, 0.0  ;;  %v11155_v8 = vmax.f32 %v16785_v24, 0.0  ;;  %9756 = vmatprep.mubr.bf16.mxu0 %v20333_v1  ;;  %v19266_v1 = vld [vmem:[%s25657_s3 + $0xc8] sm:$0xff]  }
 0x4b3   : > { %v11157_v58 = vmax.f32 %v16849_v30, 0.0  ;;  %v11340_v60 = vpack.c.bf16 %v11154_v51, %v11148_v26 }
 0x4b4   : > { %v22938_v5 = vpack.c.bf16 %v11156_v47, %v11150_v33  ;;  %v11341_v10 = vpack.c.bf16 %v11155_v8, %v11149_v48  ;;  %v7911_v35 = vpop.f32.mrb[4].mxu0 }
 0x4b5   : > { %v9455_v19 = vpop.f32.mrb[4].mxu1  ;;  %v22943_v57 = vpack.c.bf16 %v11157_v58, %v11151_v45  ;;  %v16786_v0 = vadd.f32 %v7911_v35, %v22919_v54  ;;  %v7913_v27 = vpop.f32.mrb[5].mxu0  ;;  %v19267_v45 = vld [vmem:[%s25657_s3 + $0x88] sm:$0xff]  }
 0x4b6   : > { %v16850_v40 = vadd.f32 %v9455_v19, %v22921_v34  ;;  %v9457_v20 = vpop.f32.mrb[5].mxu1  ;;  %v16787_v21 = vadd.f32 %v7913_v27, %v22923_v55  ;;  %v7915_v24 = vpop.f32.mrb[6].mxu0  ;;  %11884 = vmatprep.mubr.bf16.mxu1 %v11341_v10 }
 0x4b7   : > { %v16851_v61 = vadd.f32 %v9457_v20, %v22925_v44  ;;  %v9459_v30 = vpop.f32.mrb[6].mxu1  ;;  %v16788_v26 = vadd.f32 %v7915_v24, %v22919_v54  ;;  %v7917_v35 = vpop.f32.mrb[7].mxu0  ;;  %11885 = vmatmul.mubr.bf16.vlgmr.msra.gmra.mrb[64].mxu1 %v11340_v60  ;;  %v11160_v8 = vmax.f32 %v16786_v0, 0.0  ;;  %v19271_v60 = vld [vmem:[%s25657_s3 + $0xd0] sm:$0xff]  }
 0x4b8   : > { %v16852_v33 = vadd.f32 %v9459_v30, %v22921_v34  ;;  %v9461_v51 = vpop.f32.mrb[7].mxu1  ;;  %v16789_v47 = vadd.f32 %v7917_v35, %v22923_v55  ;;  %16529 = vmatpush3.bf16.msra.mxu1 %v19262_v9  ;;  %v11162_v58 = vmax.f32 %v16850_v40, 0.0  ;;  %v11161_v27 = vmax.f32 %v16787_v21, 0.0 }
 0x4b9   : > { %v16853_v48 = vadd.f32 %v9461_v51, %v22925_v44  ;;  %v11166_v19 = vmax.f32 %v16788_v26, 0.0  ;;  %9757 = vmatmul.mubr.bf16.gmra.mrb[112].mxu0 %v20341_v4  ;;  %16530 = vmatprep.subr.bf16.mxu1 %v19266_v1  ;;  %v11163_v20 = vmax.f32 %v16851_v61, 0.0  ;;  %v19272_v4 = vld [vmem:[%s25657_s3 + $0x90] sm:$0xff]  }
 0x4ba   : > { %v11168_v10 = vmax.f32 %v16852_v33, 0.0  ;;  %v11167_v24 = vmax.f32 %v16789_v47, 0.0  ;;  %9766 = vmatprep.mubr.bf16.mxu0 %v20343_v6  ;;  %v19276_v6 = vld [vmem:[%s25657_s3 + $0xd8] sm:$0xff]  }
 0x4bb   : > { %v11169_v30 = vmax.f32 %v16853_v48, 0.0  ;;  %v11346_v9 = vpack.c.bf16 %v11166_v19, %v11160_v8 }
 0x4bc   : > { %v22964_v35 = vpack.c.bf16 %v11168_v10, %v11162_v58  ;;  %v11347_v0 = vpack.c.bf16 %v11167_v24, %v11161_v27  ;;  %v7921_v40 = vpop.f32.mrb[8].mxu0  ;;  %16531 = vmatpush3.bf16.msra.mxu1 %v19267_v45  ;;  %v19277_v24 = vld [vmem:[%s25657_s3 + $0x98] sm:$0xff]  }
 0x4bd   : > { %v9465_v26 = vpop.f32.mrb[8].mxu1  ;;  %v22969_v1 = vpack.c.bf16 %v11169_v30, %v11163_v20  ;;  %v16790_v21 = vadd.f32 %v7921_v40, %v22919_v54  ;;  %v7923_v33 = vpop.f32.mrb[9].mxu0  ;;  %16532 = vmatprep.subr.bf16.mxu1 %v19271_v60 }
 0x4be   : > { %v16854_v61 = vadd.f32 %v9465_v26, %v22921_v34  ;;  %v9467_v51 = vpop.f32.mrb[9].mxu1  ;;  %v16791_v47 = vadd.f32 %v7923_v33, %v22923_v55  ;;  %v7925_v45 = vpop.f32.mrb[10].mxu0  ;;  %11892 = vmatprep.mubr.bf16.mxu1 %v11347_v0 }
 0x4bf   : > { %v16855_v48 = vadd.f32 %v9467_v51, %v22925_v44  ;;  %v9469_v8 = vpop.f32.mrb[10].mxu1  ;;  %v16792_v58 = vadd.f32 %v7925_v45, %v22919_v54  ;;  %v7927_v10 = vpop.f32.mrb[11].mxu0  ;;  %11893 = vmatmul.mubr.bf16.gmra.mrb[68].mxu1 %v11346_v9  ;;  %v11172_v30 = vmax.f32 %v16790_v21, 0.0  ;;  %v19281_v9 = vld [vmem:[%s25657_s3 + $0xe0] sm:$0xff]  }
 0x4c0   : > { %v16856_v19 = vadd.f32 %v9469_v8, %v22921_v34  ;;  %v9471_v27 = vpop.f32.mrb[11].mxu1  ;;  %v16793_v60 = vadd.f32 %v7927_v10, %v22923_v55  ;;  %16533 = vmatpush3.bf16.msra.mxu1 %v19272_v4  ;;  %v11174_v40 = vmax.f32 %v16854_v61, 0.0  ;;  %v11173_v33 = vmax.f32 %v16791_v47, 0.0 }
 0x4c1   : > { %v16857_v20 = vadd.f32 %v9471_v27, %v22925_v44  ;;  %v11178_v26 = vmax.f32 %v16792_v58, 0.0  ;;  %9767 = vmatmul.mubr.bf16.gmra.mrb[116].mxu0 %v20351_v12  ;;  %16534 = vmatprep.subr.bf16.mxu1 %v19276_v6  ;;  %v11175_v51 = vmax.f32 %v16855_v48, 0.0  ;;  %v19282_v12 = vld [vmem:[%s25657_s3 + $0xa0] sm:$0xff]  }
 0x4c2   : > { %v11180_v0 = vmax.f32 %v16856_v19, 0.0  ;;  %v11179_v45 = vmax.f32 %v16793_v60, 0.0  ;;  %9776 = vmatprep.mubr.bf16.mxu0 %v20353_v13  ;;  %v19286_v13 = vld [vmem:[%s25657_s3 + $0xe8] sm:$0xff]  }
 0x4c3   : > { %v11181_v8 = vmax.f32 %v16857_v20, 0.0  ;;  %v11352_v4 = vpack.c.bf16 %v11178_v26, %v11172_v30 }
 0x4c4   : > { %v22990_v10 = vpack.c.bf16 %v11180_v0, %v11174_v40  ;;  %v11353_v21 = vpack.c.bf16 %v11179_v45, %v11173_v33  ;;  %v7931_v61 = vpop.f32.mrb[12].mxu0  ;;  %16535 = vmatpush3.bf16.msra.mxu1 %v19277_v24  ;;  %v19287_v45 = vld [vmem:[%s25657_s3 + $0xa8] sm:$0xff]  }
 0x4c5   : > { %v9475_v58 = vpop.f32.mrb[12].mxu1  ;;  %v22995_v6 = vpack.c.bf16 %v11181_v8, %v11175_v51  ;;  %v16794_v47 = vadd.f32 %v7931_v61, %v22919_v54  ;;  %v7933_v19 = vpop.f32.mrb[13].mxu0  ;;  %16536 = vmatprep.subr.bf16.mxu1 %v19281_v9 }
 0x4c6   : > { %v16858_v48 = vadd.f32 %v9475_v58, %v22921_v34  ;;  %v9477_v27 = vpop.f32.mrb[13].mxu1  ;;  %v16795_v60 = vadd.f32 %v7933_v19, %v22923_v55  ;;  %v7935_v24 = vpop.f32.mrb[14].mxu0  ;;  %11900 = vmatprep.mubr.bf16.mxu1 %v11353_v21 }
 0x4c7   : > { %v16859_v20 = vadd.f32 %v9477_v27, %v22925_v44  ;;  %v9479_v30 = vpop.f32.mrb[14].mxu1  ;;  %v16796_v40 = vadd.f32 %v7935_v24, %v22919_v54  ;;  %v7937_v0 = vpop.f32.mrb[15].mxu0  ;;  %11901 = vmatmul.mubr.bf16.gmra.mrb[72].mxu1 %v11352_v4  ;;  %v11184_v8 = vmax.f32 %v16794_v47, 0.0  ;;  %v19291_v4 = vld [vmem:[%s25657_s3 + $0xf0] sm:$0xff]  }
 0x4c8   : > { %v16860_v26 = vadd.f32 %v9479_v30, %v22921_v34  ;;  %v9481_v33 = vpop.f32.mrb[15].mxu1  ;;  %v16797_v9 = vadd.f32 %v7937_v0, %v22923_v55  ;;  %16537 = vmatpush3.bf16.msra.mxu1 %v19282_v12  ;;  %v11186_v61 = vmax.f32 %v16858_v48, 0.0  ;;  %v11185_v19 = vmax.f32 %v16795_v60, 0.0 }
 0x4c9   : > { %v16861_v51 = vadd.f32 %v9481_v33, %v22925_v44  ;;  %v11190_v58 = vmax.f32 %v16796_v40, 0.0  ;;  %9777 = vmatmul.mubr.bf16.gmra.mrb[120].mxu0 %v20361_v16  ;;  %16538 = vmatprep.subr.bf16.mxu1 %v19286_v13  ;;  %v11187_v27 = vmax.f32 %v16859_v20, 0.0  ;;  %v19292_v16 = vld [vmem:[%s25657_s3 + $0xb0] sm:$0xff]  }
 0x4ca   : > { %v11192_v21 = vmax.f32 %v16860_v26, 0.0  ;;  %v11191_v24 = vmax.f32 %v16797_v9, 0.0  ;;  %9786 = vmatprep.mubr.bf16.mxu0 %v20363_v17  ;;  %v19296_v17 = vld [vmem:[%s25657_s3 + $0xf8] sm:$0xff]  }
 0x4cb   : > { %v11193_v30 = vmax.f32 %v16861_v51, 0.0  ;;  %v11358_v12 = vpack.c.bf16 %v11190_v58, %v11184_v8 }
 0x4cc   : > { %v23016_v0 = vpack.c.bf16 %v11192_v21, %v11186_v61  ;;  %v11359_v47 = vpack.c.bf16 %v11191_v24, %v11185_v19  ;;  %v7941_v48 = vpop.f32.mrb[16].mxu0  ;;  %16539 = vmatpush3.bf16.msra.mxu1 %v19287_v45  ;;  %v19297_v24 = vld [vmem:[%s25657_s3 + $0xb8] sm:$0xff]  }
 0x4cd   : > { %v9485_v40 = vpop.f32.mrb[16].mxu1  ;;  %v23021_v13 = vpack.c.bf16 %v11193_v30, %v11187_v27  ;;  %v16798_v60 = vadd.f32 %v7941_v48, %v22919_v54  ;;  %v7943_v26 = vpop.f32.mrb[17].mxu0  ;;  %16540 = vmatprep.subr.bf16.mxu1 %v19291_v4 }
 0x4ce   : > { %v16862_v20 = vadd.f32 %v9485_v40, %v22921_v34  ;;  %v9487_v33 = vpop.f32.mrb[17].mxu1  ;;  %v16799_v9 = vadd.f32 %v7943_v26, %v22923_v55  ;;  %v7945_v45 = vpop.f32.mrb[18].mxu0  ;;  %11908 = vmatprep.mubr.bf16.mxu1 %v11359_v47 }
 0x4cf   : > { %v16863_v51 = vadd.f32 %v9487_v33, %v22925_v44  ;;  %v9489_v8 = vpop.f32.mrb[18].mxu1  ;;  %v16800_v61 = vadd.f32 %v7945_v45, %v22919_v54  ;;  %v7947_v21 = vpop.f32.mrb[19].mxu0  ;;  %11909 = vmatmul.mubr.bf16.gmra.mrb[76].mxu1 %v11358_v12  ;;  %v11196_v30 = vmax.f32 %v16798_v60, 0.0 }
 0x4d0   : > { %v16864_v58 = vadd.f32 %v9489_v8, %v22921_v34  ;;  %v9491_v19 = vpop.f32.mrb[19].mxu1  ;;  %v16801_v4 = vadd.f32 %v7947_v21, %v22923_v55  ;;  %16541 = vmatpush3.bf16.msra.mxu1 %v19292_v16  ;;  %v11198_v48 = vmax.f32 %v16862_v20, 0.0  ;;  %v11197_v26 = vmax.f32 %v16799_v9, 0.0 }
 0x4d1   : > { %v16865_v27 = vadd.f32 %v9491_v19, %v22925_v44  ;;  %v11202_v40 = vmax.f32 %v16800_v61, 0.0  ;;  %9787 = vmatmul.mubr.bf16.gmra.mrb[124].mxu0 %v20371_v23  ;;  %16542 = vmatprep.subr.bf16.mxu1 %v19296_v17  ;;  %v11199_v33 = vmax.f32 %v16863_v51, 0.0 }
 0x4d2   : > { %v11204_v47 = vmax.f32 %v16864_v58, 0.0  ;;  %v11203_v45 = vmax.f32 %v16801_v4, 0.0  ;;  %9829 = vmatprep.mubr.bf16.mxu0 %v20373_v25  ;;  %v19263_v4 = vld [vmem:[%s25655_s1 + $0x610] ss:$24 sps:$4 sm:$0xff]  }
 0x4d3   : > { %v11205_v12 = vmax.f32 %v16865_v27, 0.0  ;;  %v11364_v8 = vpack.c.bf16 %v11202_v40, %v11196_v30 }
 0x4d4   : > { %v23039_v21 = vpack.c.bf16 %v11204_v47, %v11198_v48  ;;  %v11365_v16 = vpack.c.bf16 %v11203_v45, %v11197_v26  ;;  %v7951_v19 = vpop.f32.mrb[20].mxu0  ;;  %16543 = vmatpush3.bf16.msra.mxu1 %v19297_v24 }
 0x4d5   : > { %v9495_v32 = vpop.f32.mrb[20].mxu1  ;;  %v23041_v60 = vpack.c.bf16 %v11205_v12, %v11199_v33  ;;  %v16802_v20 = vadd.f32 %v7951_v19, %v22919_v54  ;;  %v7953_v17 = vpop.f32.mrb[21].mxu0 }
 0x4d6   : > { %v16866_v23 = vadd.f32 %v9495_v32, %v22921_v34  ;;  %v9497_v9 = vpop.f32.mrb[21].mxu1  ;;  %v16803_v51 = vadd.f32 %v7953_v17, %v22923_v55  ;;  %v7955_v25 = vpop.f32.mrb[22].mxu0  ;;  %11916 = vmatprep.mubr.bf16.mxu1 %v11365_v16  ;;  %v19270_v32 = vld [vmem:[%s25655_s1 + $0x644] ss:$24 sps:$4 sm:$0xff]  }
 0x4d7   : > { %v16867_v61 = vadd.f32 %v9497_v9, %v22925_v44  ;;  %v9499_v58 = vpop.f32.mrb[22].mxu1  ;;  %v16804_v27 = vadd.f32 %v7955_v25, %v22919_v54  ;;  %v7957_v30 = vpop.f32.mrb[23].mxu0  ;;  %11917 = vmatmul.mubr.bf16.gmra.mrb[80].mxu1 %v11364_v8  ;;  %v11208_v26 = vmax.f32 %v16802_v20, 0.0  ;;  %v19268_v8 = vld [vmem:[%s25655_s1 + $0x640] ss:$24 sps:$4 sm:$0xff]  }
 0x4d8   : > { %v16868_v24 = vadd.f32 %v9499_v58, %v22921_v34  ;;  %v9501_v48 = vpop.f32.mrb[23].mxu1  ;;  %v16805_v40 = vadd.f32 %v7957_v30, %v22923_v55  ;;  %v11210_v33 = vmax.f32 %v16866_v23, 0.0  ;;  %v11209_v16 = vmax.f32 %v16803_v51, 0.0  ;;  %v19275_v20 = vld [vmem:[%s25655_s1 + $0x674] ss:$24 sps:$4 sm:$0xff]  }
 0x4d9   : > { %v16869_v47 = vadd.f32 %v9501_v48, %v22925_v44  ;;  %v11214_v45 = vmax.f32 %v16804_v27, 0.0  ;;  %9830 = vmatmul.mubr.bf16.vlgmr.msra.gmra.mrb[64].mxu0 %v20381_v28  ;;  %v11211_v19 = vmax.f32 %v16867_v61, 0.0 }
 0x4da   : > { %v11216_v12 = vmax.f32 %v16868_v24, 0.0  ;;  %v11215_v17 = vmax.f32 %v16805_v40, 0.0  ;;  %9839 = vmatprep.mubr.bf16.mxu0 %v20389_v31  ;;  %9991 = vmatpush1.bf16.msra.mxu0 %v19263_v4 }
 0x4db   : > { %v11217_v9 = vmax.f32 %v16869_v47, 0.0  ;;  %v11370_v25 = vpack.c.bf16 %v11214_v45, %v11208_v26  ;;  %9992 = vmatprep.subr.bf16.mxu0 %v19270_v32  ;;  %v19273_v47 = vld [vmem:[%s25655_s1 + $0x670] ss:$24 sps:$4 sm:$0xff]  }
 0x4dc   : > { %v23065_v23 = vpack.c.bf16 %v11216_v12, %v11210_v33  ;;  %v11371_v28 = vpack.c.bf16 %v11215_v17, %v11209_v16  ;;  %v7961_v51 = vpop.f32.mrb[24].mxu0  ;;  %v19280_v16 = vld [vmem:[%s25655_s1 + $0x6a4] ss:$24 sps:$4 sm:$0xff]  }
 0x4dd   : > { %v9505_v61 = vpop.f32.mrb[24].mxu1  ;;  %v23067_v58 = vpack.c.bf16 %v11217_v9, %v11211_v19  ;;  %v16806_v31 = vadd.f32 %v7961_v51, %v22919_v54  ;;  %v7963_v27 = vpop.f32.mrb[25].mxu0 }
 0x4de   : > { %v16870_v4 = vadd.f32 %v9505_v61, %v22921_v34  ;;  %v9507_v24 = vpop.f32.mrb[25].mxu1  ;;  %v16807_v30 = vadd.f32 %v7963_v27, %v22923_v55  ;;  %v7965_v32 = vpop.f32.mrb[26].mxu0  ;;  %11924 = vmatprep.mubr.bf16.mxu1 %v11371_v28  ;;  %9993 = vmatpush1.bf16.msra.mxu0 %v19268_v8 }
 0x4df   : > { %v16871_v48 = vadd.f32 %v9507_v24, %v22925_v44  ;;  %v9509_v40 = vpop.f32.mrb[26].mxu1  ;;  %v16808_v26 = vadd.f32 %v7965_v32, %v22919_v54  ;;  %v7967_v45 = vpop.f32.mrb[27].mxu0  ;;  %11925 = vmatmul.mubr.bf16.gmra.mrb[84].mxu1 %v11370_v25  ;;  %9994 = vmatprep.subr.bf16.mxu0 %v19275_v20  ;;  %v11220_v9 = vmax.f32 %v16806_v31, 0.0  ;;  %v19278_v25 = vld [vmem:[%s25655_s1 + $0x6a0] ss:$24 sps:$4 sm:$0xff]  }
 0x4e0   : > { %v16872_v33 = vadd.f32 %v9509_v40, %v22921_v34  ;;  %v9511_v12 = vpop.f32.mrb[27].mxu1  ;;  %v16809_v19 = vadd.f32 %v7967_v45, %v22923_v55  ;;  %v11222_v8 = vmax.f32 %v16870_v4, 0.0  ;;  %v11221_v61 = vmax.f32 %v16807_v30, 0.0  ;;  %v19285_v31 = vld [vmem:[%s25655_s1 + $0x6d4] ss:$24 sps:$4 sm:$0xff]  }
 0x4e1   : > { %v16873_v17 = vadd.f32 %v9511_v12, %v22925_v44  ;;  %v11226_v28 = vmax.f32 %v16808_v26, 0.0  ;;  %9840 = vmatmul.mubr.bf16.gmra.mrb[68].mxu0 %v20415_v46  ;;  %v11223_v27 = vmax.f32 %v16871_v48, 0.0 }
 0x4e2   : > { %v11228_v51 = vmax.f32 %v16872_v33, 0.0  ;;  %v11227_v24 = vmax.f32 %v16809_v19, 0.0  ;;  %9849 = vmatprep.mubr.bf16.mxu0 %v20423_v52  ;;  %9995 = vmatpush1.bf16.msra.mxu0 %v19273_v47 }
 0x4e3   : > { %v11229_v32 = vmax.f32 %v16873_v17, 0.0  ;;  %v11376_v20 = vpack.c.bf16 %v11226_v28, %v11220_v9  ;;  %9996 = vmatprep.subr.bf16.mxu0 %v19280_v16  ;;  %v19283_v17 = vld [vmem:[%s25655_s1 + $0x6d0] ss:$24 sps:$4 sm:$0xff]  }
 0x4e4   : > { %v23091_v4 = vpack.c.bf16 %v11228_v51, %v11222_v8  ;;  %v11377_v46 = vpack.c.bf16 %v11227_v24, %v11221_v61  ;;  %v7971_v30 = vpop.f32.mrb[28].mxu0  ;;  %v19290_v61 = vld [vmem:[%s25655_s1 + $0x704] ss:$24 sps:$4 sm:$0xff]  }
 0x4e5   : > { %v9515_v48 = vpop.f32.mrb[28].mxu1  ;;  %v23093_v40 = vpack.c.bf16 %v11229_v32, %v11223_v27  ;;  %v16810_v52 = vadd.f32 %v7971_v30, %v22919_v54  ;;  %v7973_v26 = vpop.f32.mrb[29].mxu0 }
 0x4e6   : > { %v16874_v47 = vadd.f32 %v9515_v48, %v22921_v34  ;;  %v9517_v33 = vpop.f32.mrb[29].mxu1  ;;  %v16811_v45 = vadd.f32 %v7973_v26, %v22923_v55  ;;  %v7975_v16 = vpop.f32.mrb[30].mxu0  ;;  %11932 = vmatprep.mubr.bf16.mxu1 %v11377_v46  ;;  %9997 = vmatpush1.bf16.msra.mxu0 %v19278_v25 }
 0x4e7   : > { %v16875_v12 = vadd.f32 %v9517_v33, %v22925_v44  ;;  %v9519_v19 = vpop.f32.mrb[30].mxu1  ;;  %v16812_v9 = vadd.f32 %v7975_v16, %v22919_v54  ;;  %v7977_v28 = vpop.f32.mrb[31].mxu0  ;;  %11933 = vmatmul.mubr.bf16.gmra.mrb[88].mxu1 %v11376_v20  ;;  %9998 = vmatprep.subr.bf16.mxu0 %v19285_v31  ;;  %v11232_v32 = vmax.f32 %v16810_v52, 0.0  ;;  %v19288_v20 = vld [vmem:[%s25655_s1 + $0x700] ss:$24 sps:$4 sm:$0xff]  }
 0x4e8   : > { %v16876_v8 = vadd.f32 %v9519_v19, %v22921_v34  ;;  %v9521_v51 = vpop.f32.mrb[31].mxu1  ;;  %v16813_v27 = vadd.f32 %v7977_v28, %v22923_v55  ;;  %v11234_v25 = vmax.f32 %v16874_v47, 0.0  ;;  %v11233_v48 = vmax.f32 %v16811_v45, 0.0  ;;  %v19295_v52 = vld [vmem:[%s25655_s1 + $0x734] ss:$24 sps:$4 sm:$0xff]  }
 0x4e9   : > { %v16877_v24 = vadd.f32 %v9521_v51, %v22925_v44  ;;  %v11238_v46 = vmax.f32 %v16812_v9, 0.0  ;;  %9850 = vmatmul.mubr.bf16.gmra.mrb[72].mxu0 %v20449_v11  ;;  %v11235_v26 = vmax.f32 %v16875_v12, 0.0 }
 0x4ea   : > { %v11240_v30 = vmax.f32 %v16876_v8, 0.0  ;;  %v11239_v33 = vmax.f32 %v16813_v27, 0.0  ;;  %9859 = vmatprep.mubr.bf16.mxu0 %v20457_v18  ;;  %9999 = vmatpush1.bf16.msra.mxu0 %v19283_v17 }
 0x4eb   : > { %v11241_v16 = vmax.f32 %v16877_v24, 0.0  ;;  %v11382_v31 = vpack.c.bf16 %v11238_v46, %v11232_v32  ;;  %10000 = vmatprep.subr.bf16.mxu0 %v19290_v61  ;;  %v19293_v24 = vld [vmem:[%s25655_s1 + $0x730] ss:$24 sps:$4 sm:$0xff]  }
 0x4ec   : > { %v23117_v47 = vpack.c.bf16 %v11240_v30, %v11234_v25  ;;  %v11383_v11 = vpack.c.bf16 %v11239_v33, %v11233_v48  ;;  %v7981_v45 = vpop.f32.mrb[32].mxu0  ;;  %v19300_v48 = vld [vmem:[%s25655_s1 + $0x764] ss:$24 sps:$4 sm:$0xff]  }
 0x4ed   : > { %v9525_v12 = vpop.f32.mrb[32].mxu1  ;;  %v23119_v19 = vpack.c.bf16 %v11241_v16, %v11235_v26  ;;  %v16814_v18 = vadd.f32 %v7981_v45, %v22919_v54  ;;  %v7983_v9 = vpop.f32.mrb[33].mxu0 }
 0x4ee   : > { %v16878_v17 = vadd.f32 %v9525_v12, %v22921_v34  ;;  %v9527_v8 = vpop.f32.mrb[33].mxu1  ;;  %v16815_v28 = vadd.f32 %v7983_v9, %v22923_v55  ;;  %v7985_v61 = vpop.f32.mrb[34].mxu0  ;;  %11940 = vmatprep.mubr.bf16.mxu1 %v11383_v11  ;;  %10001 = vmatpush1.bf16.msra.mxu0 %v19288_v20 }
 0x4ef   : > { %v16879_v51 = vadd.f32 %v9527_v8, %v22925_v44  ;;  %v9529_v27 = vpop.f32.mrb[34].mxu1  ;;  %v16816_v32 = vadd.f32 %v7985_v61, %v22919_v54  ;;  %v7987_v46 = vpop.f32.mrb[35].mxu0  ;;  %11941 = vmatmul.mubr.bf16.gmra.mrb[92].mxu1 %v11382_v31  ;;  %10002 = vmatprep.subr.bf16.mxu0 %v19295_v52  ;;  %v11244_v16 = vmax.f32 %v16814_v18, 0.0  ;;  %v19298_v31 = vld [vmem:[%s25655_s1 + $0x760] ss:$24 sps:$4 sm:$0xff]  }
 0x4f0   : > { %v16880_v25 = vadd.f32 %v9529_v27, %v22921_v34  ;;  %v9531_v30 = vpop.f32.mrb[35].mxu1  ;;  %v16817_v26 = vadd.f32 %v7987_v46, %v22923_v55  ;;  %v11246_v20 = vmax.f32 %v16878_v17, 0.0  ;;  %v11245_v12 = vmax.f32 %v16815_v28, 0.0  ;;  %v19303_v18 = vld [vmem:[%s25655_s1 + $0x794] ss:$24 sps:$4 sm:$0xff]  }
 0x4f1   : > { %v16881_v33 = vadd.f32 %v9531_v30, %v22925_v44  ;;  %v11250_v11 = vmax.f32 %v16816_v32, 0.0  ;;  %9860 = vmatmul.mubr.bf16.gmra.mrb[76].mxu0 %v20483_v39  ;;  %v11247_v9 = vmax.f32 %v16879_v51, 0.0 }
 0x4f2   : > { %v11252_v45 = vmax.f32 %v16880_v25, 0.0  ;;  %v11251_v8 = vmax.f32 %v16817_v26, 0.0  ;;  %9869 = vmatprep.mubr.bf16.mxu0 %v20491_v42  ;;  %10003 = vmatpush1.bf16.msra.mxu0 %v19293_v24 }
 0x4f3   : > { %v11253_v61 = vmax.f32 %v16881_v33, 0.0  ;;  %v11388_v52 = vpack.c.bf16 %v11250_v11, %v11244_v16  ;;  %10004 = vmatprep.subr.bf16.mxu0 %v19300_v48  ;;  %v19301_v33 = vld [vmem:[%s25655_s1 + $0x790] ss:$24 sps:$4 sm:$0xff]  }
 0x4f4   : > { %v23143_v17 = vpack.c.bf16 %v11252_v45, %v11246_v20  ;;  %v11389_v39 = vpack.c.bf16 %v11251_v8, %v11245_v12  ;;  %v7991_v28 = vpop.f32.mrb[36].mxu0  ;;  %v19306_v12 = vld [vmem:[%s25655_s1 + $0x7c4] ss:$24 sps:$4 sm:$0xff]  }
 0x4f5   : > { %v9535_v51 = vpop.f32.mrb[36].mxu1  ;;  %v23145_v27 = vpack.c.bf16 %v11253_v61, %v11247_v9  ;;  %v16818_v42 = vadd.f32 %v7991_v28, %v22919_v54  ;;  %v7993_v32 = vpop.f32.mrb[37].mxu0 }
 0x4f6   : > { %v16882_v24 = vadd.f32 %v9535_v51, %v22921_v34  ;;  %v9537_v25 = vpop.f32.mrb[37].mxu1  ;;  %v16819_v46 = vadd.f32 %v7993_v32, %v22923_v55  ;;  %v7995_v48 = vpop.f32.mrb[38].mxu0  ;;  %11948 = vmatprep.mubr.bf16.mxu1 %v11389_v39  ;;  %10005 = vmatpush1.bf16.msra.mxu0 %v19298_v31 }
 0x4f7   : > { %v16883_v30 = vadd.f32 %v9537_v25, %v22925_v44  ;;  %v9539_v26 = vpop.f32.mrb[38].mxu1  ;;  %v16820_v16 = vadd.f32 %v7995_v48, %v22919_v54  ;;  %v7997_v11 = vpop.f32.mrb[39].mxu0  ;;  %11949 = vmatmul.mubr.bf16.gmra.mrb[96].mxu1 %v11388_v52  ;;  %10006 = vmatprep.subr.bf16.mxu0 %v19303_v18  ;;  %v11256_v61 = vmax.f32 %v16818_v42, 0.0  ;;  %v19304_v52 = vld [vmem:[%s25655_s1 + $0x7c0] ss:$24 sps:$4 sm:$0xff]  }
 0x4f8   : > { %v16884_v20 = vadd.f32 %v9539_v26, %v22921_v34  ;;  %v9541_v45 = vpop.f32.mrb[39].mxu1  ;;  %v16821_v9 = vadd.f32 %v7997_v11, %v22923_v55  ;;  %v11258_v31 = vmax.f32 %v16882_v24, 0.0  ;;  %v11257_v51 = vmax.f32 %v16819_v46, 0.0  ;;  %v19309_v42 = vld [vmem:[%s25655_s1 + $0x7f4] ss:$24 sps:$4 sm:$0xff]  }
 0x4f9   : > { %v16885_v8 = vadd.f32 %v9541_v45, %v22925_v44  ;;  %v11262_v39 = vmax.f32 %v16820_v16, 0.0  ;;  %9870 = vmatmul.mubr.bf16.gmra.mrb[80].mxu0 %v20517_v2  ;;  %v11259_v32 = vmax.f32 %v16883_v30, 0.0 }
 0x4fa   : > { %v11264_v28 = vmax.f32 %v16884_v20, 0.0  ;;  %v11263_v25 = vmax.f32 %v16821_v9, 0.0  ;;  %9879 = vmatprep.mubr.bf16.mxu0 %v20525_v14  ;;  %10007 = vmatpush1.bf16.msra.mxu0 %v19301_v33 }
 0x4fb   : > { %v11265_v48 = vmax.f32 %v16885_v8, 0.0  ;;  %v11394_v18 = vpack.c.bf16 %v11262_v39, %v11256_v61  ;;  %10008 = vmatprep.subr.bf16.mxu0 %v19306_v12  ;;  %v19307_v8 = vld [vmem:[%s25655_s1 + $0x7f0] ss:$24 sps:$4 sm:$0xff]  }
 0x4fc   : > { %v23169_v24 = vpack.c.bf16 %v11264_v28, %v11258_v31  ;;  %v11395_v2 = vpack.c.bf16 %v11263_v25, %v11257_v51  ;;  %v8001_v46 = vpop.f32.mrb[40].mxu0  ;;  %v19312_v51 = vld [vmem:[%s25655_s1 + $0x824] ss:$24 sps:$4 sm:$0xff]  }
 0x4fd   : > { %v9545_v30 = vpop.f32.mrb[40].mxu1  ;;  %v23171_v26 = vpack.c.bf16 %v11265_v48, %v11259_v32  ;;  %v16822_v14 = vadd.f32 %v8001_v46, %v22919_v54  ;;  %v8003_v16 = vpop.f32.mrb[41].mxu0 }
 0x4fe   : > { %v16886_v33 = vadd.f32 %v9545_v30, %v22921_v34  ;;  %v9547_v20 = vpop.f32.mrb[41].mxu1  ;;  %v16823_v11 = vadd.f32 %v8003_v16, %v22923_v55  ;;  %v8005_v12 = vpop.f32.mrb[42].mxu0  ;;  %11956 = vmatprep.mubr.bf16.mxu1 %v11395_v2  ;;  %10009 = vmatpush1.bf16.msra.mxu0 %v19304_v52 }
 0x4ff   : > { %v16887_v45 = vadd.f32 %v9547_v20, %v22925_v44  ;;  %v9549_v9 = vpop.f32.mrb[42].mxu1  ;;  %v16824_v61 = vadd.f32 %v8005_v12, %v22919_v54  ;;  %v8007_v39 = vpop.f32.mrb[43].mxu0  ;;  %11957 = vmatmul.mubr.bf16.gmra.mrb[100].mxu1 %v11394_v18  ;;  %10010 = vmatprep.subr.bf16.mxu0 %v19309_v42  ;;  %v11268_v48 = vmax.f32 %v16822_v14, 0.0  ;;  %v19310_v18 = vld [vmem:[%s25655_s1 + $0x820] ss:$24 sps:$4 sm:$0xff]  }
 0x500   : > { %v16888_v31 = vadd.f32 %v9549_v9, %v22921_v34  ;;  %v9551_v28 = vpop.f32.mrb[43].mxu1  ;;  %v16825_v32 = vadd.f32 %v8007_v39, %v22923_v55  ;;  %v11270_v52 = vmax.f32 %v16886_v33, 0.0  ;;  %v11269_v30 = vmax.f32 %v16823_v11, 0.0  ;;  %v19315_v14 = vld [vmem:[%s25655_s1 + $0x854] ss:$24 sps:$4 sm:$0xff]  }
 0x501   : > { %v16889_v25 = vadd.f32 %v9551_v28, %v22925_v44  ;;  %v11274_v2 = vmax.f32 %v16824_v61, 0.0  ;;  %9880 = vmatmul.mubr.bf16.gmra.mrb[84].mxu0 %v20551_v37  ;;  %v11271_v16 = vmax.f32 %v16887_v45, 0.0 }
 0x502   : > { %v11276_v46 = vmax.f32 %v16888_v31, 0.0  ;;  %v11275_v20 = vmax.f32 %v16825_v32, 0.0  ;;  %9889 = vmatprep.mubr.bf16.mxu0 %v20559_v43  ;;  %10011 = vmatpush1.bf16.msra.mxu0 %v19307_v8 }
 0x503   : > { %v11277_v12 = vmax.f32 %v16889_v25, 0.0  ;;  %v11400_v42 = vpack.c.bf16 %v11274_v2, %v11268_v48  ;;  %10012 = vmatprep.subr.bf16.mxu0 %v19312_v51  ;;  %v19313_v25 = vld [vmem:[%s25655_s1 + $0x850] ss:$24 sps:$4 sm:$0xff]  }
 0x504   : > { %v23195_v33 = vpack.c.bf16 %v11276_v46, %v11270_v52  ;;  %v11401_v37 = vpack.c.bf16 %v11275_v20, %v11269_v30  ;;  %v8011_v11 = vpop.f32.mrb[44].mxu0  ;;  %v19318_v30 = vld [vmem:[%s25655_s1 + $0x884] ss:$24 sps:$4 sm:$0xff]  }
 0x505   : > { %v9555_v45 = vpop.f32.mrb[44].mxu1  ;;  %v23197_v9 = vpack.c.bf16 %v11277_v12, %v11271_v16  ;;  %v16826_v43 = vadd.f32 %v8011_v11, %v22919_v54  ;;  %v8013_v61 = vpop.f32.mrb[45].mxu0 }
 0x506   : > { %v16890_v8 = vadd.f32 %v9555_v45, %v22921_v34  ;;  %v9557_v31 = vpop.f32.mrb[45].mxu1  ;;  %v16827_v39 = vadd.f32 %v8013_v61, %v22923_v55  ;;  %v8015_v51 = vpop.f32.mrb[46].mxu0  ;;  %11964 = vmatprep.mubr.bf16.mxu1 %v11401_v37  ;;  %10013 = vmatpush1.bf16.msra.mxu0 %v19310_v18 }
 0x507   : > { %v16891_v28 = vadd.f32 %v9557_v31, %v22925_v44  ;;  %v9559_v32 = vpop.f32.mrb[46].mxu1  ;;  %v16828_v48 = vadd.f32 %v8015_v51, %v22919_v54  ;;  %v8017_v2 = vpop.f32.mrb[47].mxu0  ;;  %11965 = vmatmul.mubr.bf16.gmra.mrb[104].mxu1 %v11400_v42  ;;  %10014 = vmatprep.subr.bf16.mxu0 %v19315_v14  ;;  %v11280_v12 = vmax.f32 %v16826_v43, 0.0  ;;  %v19316_v42 = vld [vmem:[%s25655_s1 + $0x880] ss:$24 sps:$4 sm:$0xff]  }
 0x508   : > { %v16892_v52 = vadd.f32 %v9559_v32, %v22921_v34  ;;  %v9561_v46 = vpop.f32.mrb[47].mxu1  ;;  %v16829_v16 = vadd.f32 %v8017_v2, %v22923_v55  ;;  %v11282_v18 = vmax.f32 %v16890_v8, 0.0  ;;  %v11281_v45 = vmax.f32 %v16827_v39, 0.0  ;;  %v19321_v43 = vld [vmem:[%s25655_s1 + $0x8b4] ss:$24 sps:$4 sm:$0xff]  }
 0x509   : > { %v16893_v20 = vadd.f32 %v9561_v46, %v22925_v44  ;;  %v11286_v37 = vmax.f32 %v16828_v48, 0.0  ;;  %9890 = vmatmul.mubr.bf16.gmra.mrb[88].mxu0 %v20585_v7  ;;  %v11283_v61 = vmax.f32 %v16891_v28, 0.0 }
 0x50a   : > { %v11288_v11 = vmax.f32 %v16892_v52, 0.0  ;;  %v11287_v31 = vmax.f32 %v16829_v16, 0.0  ;;  %9899 = vmatprep.mubr.bf16.mxu0 %v20593_v29  ;;  %10015 = vmatpush1.bf16.msra.mxu0 %v19313_v25 }
 0x50b   : > { %v11289_v51 = vmax.f32 %v16893_v20, 0.0  ;;  %v11406_v14 = vpack.c.bf16 %v11286_v37, %v11280_v12  ;;  %10016 = vmatprep.subr.bf16.mxu0 %v19318_v30  ;;  %v19319_v20 = vld [vmem:[%s25655_s1 + $0x8b0] ss:$24 sps:$4 sm:$0xff]  }
 0x50c   : > { %v23221_v8 = vpack.c.bf16 %v11288_v11, %v11282_v18  ;;  %v11407_v7 = vpack.c.bf16 %v11287_v31, %v11281_v45  ;;  %v8021_v39 = vpop.f32.mrb[48].mxu0  ;;  %v19324_v45 = vld [vmem:[%s25655_s1 + $0x8e4] ss:$24 sps:$4 sm:$0xff]  }
 0x50d   : > { %v9565_v28 = vpop.f32.mrb[48].mxu1  ;;  %v23223_v32 = vpack.c.bf16 %v11289_v51, %v11283_v61  ;;  %v16830_v29 = vadd.f32 %v8021_v39, %v22919_v54  ;;  %v8023_v48 = vpop.f32.mrb[49].mxu0 }
 0x50e   : > { %v16894_v25 = vadd.f32 %v9565_v28, %v22921_v34  ;;  %v9567_v52 = vpop.f32.mrb[49].mxu1  ;;  %v16831_v2 = vadd.f32 %v8023_v48, %v22923_v55  ;;  %v8025_v30 = vpop.f32.mrb[50].mxu0  ;;  %11972 = vmatprep.mubr.bf16.mxu1 %v11407_v7  ;;  %10017 = vmatpush1.bf16.msra.mxu0 %v19316_v42 }
 0x50f   : > { %v16895_v46 = vadd.f32 %v9567_v52, %v22925_v44  ;;  %v9569_v16 = vpop.f32.mrb[50].mxu1  ;;  %v16832_v12 = vadd.f32 %v8025_v30, %v22919_v54  ;;  %v8027_v37 = vpop.f32.mrb[51].mxu0  ;;  %11973 = vmatmul.mubr.bf16.gmra.mrb[108].mxu1 %v11406_v14  ;;  %10018 = vmatprep.subr.bf16.mxu0 %v19321_v43  ;;  %v11292_v51 = vmax.f32 %v16830_v29, 0.0  ;;  %v26127_v14 = vld [vmem:[#allocation6_spill] sm:$0xff]  ;;  %v19322_v43 = vld [vmem:[%s25655_s1 + $0x8e0] ss:$24 sps:$4 sm:$0xff]  }
 0x510   : > { %v16896_v18 = vadd.f32 %v9569_v16, %v22921_v34  ;;  %v9571_v11 = vpop.f32.mrb[51].mxu1  ;;  %v16833_v61 = vadd.f32 %v8027_v37, %v22923_v55  ;;  %v11294_v42 = vmax.f32 %v16894_v25, 0.0  ;;  %v11293_v28 = vmax.f32 %v16831_v2, 0.0 }
 0x511   : > { %v16897_v31 = vadd.f32 %v9571_v11, %v22925_v44  ;;  %v11298_v7 = vmax.f32 %v16832_v12, 0.0  ;;  %9900 = vmatmul.mubr.bf16.gmra.mrb[92].mxu0 %v20619_v56  ;;  %v11295_v48 = vmax.f32 %v16895_v46, 0.0 }
 0x512   : > { %v11300_v39 = vmax.f32 %v16896_v18, 0.0  ;;  %v11299_v52 = vmax.f32 %v16833_v61, 0.0  ;;  %9909 = vmatprep.mubr.bf16.mxu0 %v26127_v14  ;;  %10019 = vmatpush1.bf16.msra.mxu0 %v19319_v20 }
 0x513   : > { %v11301_v30 = vmax.f32 %v16897_v31, 0.0  ;;  %v11412_v16 = vpack.c.bf16 %v11298_v7, %v11292_v51  ;;  %10020 = vmatprep.subr.bf16.mxu0 %v19324_v45 }
 0x514   : > { %v23244_v37 = vpack.c.bf16 %v11300_v39, %v11294_v42  ;;  %v11413_v29 = vpack.c.bf16 %v11299_v52, %v11293_v28  ;;  %v8031_v25 = vpop.f32.mrb[52].mxu0  ;;  %v19327_v28 = vld [vmem:[%s25655_s1 + $0x914] ss:$24 sps:$4 sm:$0xff]  }
 0x515   : > { %v9575_v12 = vpop.f32.mrb[52].mxu1  ;;  %v23246_v18 = vpack.c.bf16 %v11301_v30, %v11295_v48  ;;  %v16834_v56 = vadd.f32 %v8031_v25, %v22919_v54  ;;  %v8033_v46 = vpop.f32.mrb[53].mxu0 }
 0x516   : > { %v16898_v2 = vadd.f32 %v9575_v12, %v22921_v34  ;;  %v9577_v11 = vpop.f32.mrb[53].mxu1  ;;  %v16835_v20 = vadd.f32 %v8033_v46, %v22923_v55  ;;  %v8035_v31 = vpop.f32.mrb[54].mxu0  ;;  %11980 = vmatprep.mubr.bf16.mxu1 %v11413_v29  ;;  %10021 = vmatpush1.bf16.msra.mxu0 %v19322_v43  ;;  %v26128_v43 = vld [vmem:[#allocation7_spill] sm:$0xff] }
 0x517   : > { %v16899_v61 = vadd.f32 %v9577_v11, %v22925_v44  ;;  %v9579_v51 = vpop.f32.mrb[54].mxu1  ;;  %v16836_v45 = vadd.f32 %v8035_v31, %v22919_v54  ;;  %v8037_v7 = vpop.f32.mrb[55].mxu0  ;;  %11981 = vmatmul.mubr.bf16.gmra.mrb[112].mxu1 %v11412_v16  ;;  %v11304_v30 = vmax.f32 %v16834_v56, 0.0  ;;  %10183 = vmatprep.subr.bf16.mxu0 %v19327_v28  ;;  %v26129_v16 = vld [vmem:[#allocation8_spill] sm:$0xff] }
 0x518   : > { %v16900_v42 = vadd.f32 %v9579_v51, %v22921_v34  ;;  %v9581_v39 = vpop.f32.mrb[55].mxu1  ;;  %v16837_v48 = vadd.f32 %v8037_v7, %v22923_v55  ;;  %v11306_v14 = vmax.f32 %v16898_v2, 0.0  ;;  %v11305_v12 = vmax.f32 %v16835_v20, 0.0 }
 0x519   : > { %v16901_v52 = vadd.f32 %v9581_v39, %v22925_v44  ;;  %v11310_v25 = vmax.f32 %v16836_v45, 0.0  ;;  %9910 = vmatmul.mubr.bf16.gmra.mrb[96].mxu0 %v26128_v43  ;;  %v11307_v46 = vmax.f32 %v16899_v61, 0.0 }
 0x51a   : > { %v11312_v29 = vmax.f32 %v16900_v42, 0.0  ;;  %v11311_v11 = vmax.f32 %v16837_v48, 0.0  ;;  %9919 = vmatprep.mubr.bf16.mxu0 %v26129_v16 }
 0x51b   : > { %v11313_v31 = vmax.f32 %v16901_v52, 0.0  ;;  %v11418_v51 = vpack.c.bf16 %v11310_v25, %v11304_v30 }
 0x51c   : > { %v23261_v38 = vpack.c.bf16 %v11312_v29, %v11306_v14  ;;  %v11419_v41 = vpack.c.bf16 %v11311_v11, %v11305_v12  ;;  %v8041_v7 = vpop.f32.mrb[56].mxu0 }
 0x51d   : > { %v9585_v59 = vpop.f32.mrb[56].mxu1  ;;  %v23263_v39 = vpack.c.bf16 %v11313_v31, %v11307_v46  ;;  %v16838_v56 = vadd.f32 %v8041_v7, %v22919_v54  ;;  %v8043_v45 = vpop.f32.mrb[57].mxu0  ;;  %v26130_v31 = vld [vmem:[#allocation9_spill] sm:$0xff] }
 0x51e   : > { %v16902_v2 = vadd.f32 %v9585_v59, %v22921_v34  ;;  %v9587_v42 = vpop.f32.mrb[57].mxu1  ;;  %v16839_v20 = vadd.f32 %v8043_v45, %v22923_v55  ;;  %v8045_v28 = vpop.f32.mrb[58].mxu0  ;;  %11988 = vmatprep.mubr.bf16.mxu1 %v11419_v41 }
 0x51f   : > { %v16903_v61 = vadd.f32 %v9587_v42, %v22925_v44  ;;  %v9589_v48 = vpop.f32.mrb[58].mxu1  ;;  %v16840_v52 = vadd.f32 %v8045_v28, %v22919_v54  ;;  %v8047_v14 = vpop.f32.mrb[59].mxu0  ;;  %11989 = vmatmul.mubr.bf16.gmra.mrb[116].mxu1 %v11418_v51  ;;  %v11316_v43 = vmax.f32 %v16838_v56, 0.0  ;;  %v26131_v42 = vld [vmem:[#allocation10_spill] sm:$0xff] }
 0x520   : > { %v16904_v30 = vadd.f32 %v9589_v48, %v22921_v34  ;;  %v9591_v25 = vpop.f32.mrb[59].mxu1  ;;  %v16841_v29 = vadd.f32 %v8047_v14, %v22923_v55  ;;  %v11318_v12 = vmax.f32 %v16902_v2, 0.0  ;;  %v11317_v16 = vmax.f32 %v16839_v20, 0.0 }
 0x521   : > { %v16905_v59 = vadd.f32 %v9591_v25, %v22925_v44  ;;  %v11322_v46 = vmax.f32 %v16840_v52, 0.0  ;;  %9920 = vmatmul.mubr.bf16.gmra.mrb[100].mxu0 %v26130_v31  ;;  %v11319_v7 = vmax.f32 %v16903_v61, 0.0 }
 0x522   : > { %v11324_v11 = vmax.f32 %v16904_v30, 0.0  ;;  %v11323_v41 = vmax.f32 %v16841_v29, 0.0  ;;  %9929 = vmatprep.mubr.bf16.mxu0 %v26131_v42 }
 0x523   : > { %v11325_v45 = vmax.f32 %v16905_v59, 0.0  ;;  %v11424_v28 = vpack.c.bf16 %v11322_v46, %v11316_v43 }
 0x524   : > { %v23275_v48 = vpack.c.bf16 %v11324_v11, %v11318_v12  ;;  %v11425_v51 = vpack.c.bf16 %v11323_v41, %v11317_v16  ;;  %v8051_v22 = vpop.f32.mrb[60].mxu0 }
 0x525   : > { %v9595_v14 = vpop.f32.mrb[60].mxu1  ;;  %v23277_v63 = vpack.c.bf16 %v11325_v45, %v11319_v7  ;;  %v16842_v56 = vadd.f32 %v8051_v22, %v22919_v54  ;;  %v8053_v52 = vpop.f32.mrb[61].mxu0  ;;  %v26132_v45 = vld [vmem:[#allocation11_spill] sm:$0xff] }
 0x526   : > { %v16906_v2 = vadd.f32 %v9595_v14, %v22921_v34  ;;  %v9597_v30 = vpop.f32.mrb[61].mxu1  ;;  %v16843_v20 = vadd.f32 %v8053_v52, %v22923_v55  ;;  %v8055_v25 = vpop.f32.mrb[62].mxu0  ;;  %11996 = vmatprep.mubr.bf16.mxu1 %v11425_v51 }
 0x527   : > { %v16907_v61 = vadd.f32 %v9597_v30, %v22925_v44  ;;  %v9599_v29 = vpop.f32.mrb[62].mxu1  ;;  %v16844_v59 = vadd.f32 %v8055_v25, %v22919_v54  ;;  %v8057_v12 = vpop.f32.mrb[63].mxu0  ;;  %11997 = vmatmul.mubr.bf16.gmra.mrb[120].mxu1 %v11424_v28  ;;  %v11328_v31 = vmax.f32 %v16842_v56, 0.0  ;;  %v26133_v54 = vld [vmem:[#allocation12_spill] sm:$0xff]  ;;  %v26136_v56 = vld [vmem:[#allocation15_spill] sm:$0xff] }
 0x528   : > { %v16908_v43 = vadd.f32 %v9599_v29, %v22921_v34  ;;  %v9601_v46 = vpop.f32.mrb[63].mxu1  ;;  %v16845_v22 = vadd.f32 %v8057_v12, %v22923_v55  ;;  %v11330_v16 = vmax.f32 %v16906_v2, 0.0  ;;  %v11329_v42 = vmax.f32 %v16843_v20, 0.0  ;;  %v26134_v55 = vld [vmem:[#allocation13_spill] sm:$0xff]  ;;  %v26137_v2 = vld [vmem:[#allocation16_spill] sm:$0xff] }
 0x529   : > { %v16909_v11 = vadd.f32 %v9601_v46, %v22925_v44  ;;  %v11334_v7 = vmax.f32 %v16844_v59, 0.0  ;;  %9930 = vmatmul.mubr.bf16.gmra.mrb[104].mxu0 %v26132_v45  ;;  %v11331_v14 = vmax.f32 %v16907_v61, 0.0  ;;  %v26135_v44 = vld [vmem:[#allocation14_spill] sm:$0xff]  ;;  %v26138_v20 = vld [vmem:[#allocation17_spill] sm:$0xff] }
 0x52a   : > { %v11336_v41 = vmax.f32 %v16908_v43, 0.0  ;;  %v11335_v51 = vmax.f32 %v16845_v22, 0.0  ;;  %9939 = vmatprep.mubr.bf16.mxu0 %v26133_v54  ;;  %v26139_v61 = vld [vmem:[#allocation18_spill] sm:$0xff]  ;;  %v26146_v59 = vld [vmem:[#allocation25_spill] sm:$0xff]  ;;  %v26148_v22 = vld [vmem:[#allocation27_spill] sm:$0xff] }
 0x52b   : > { %v11337_v52 = vmax.f32 %v16909_v11, 0.0  ;;  %v11430_v34 = vpack.c.bf16 %v11334_v7, %v11328_v31  ;;  %v19331_v29 = vld [vmem:[%s25655_s1 + $0x970] ss:$24 sps:$4 sm:$0xff]   ;;  %v19334_v12 = vld [vmem:[%s25655_s1 + $0x9a0] ss:$24 sps:$4 sm:$0xff]  }
 0x52c   : > { %v23289_v30 = vpack.c.bf16 %v11336_v41, %v11330_v16  ;;  %v11431_v28 = vpack.c.bf16 %v11335_v51, %v11329_v42  ;;  %v26147_v43 = vld [vmem:[#allocation26_spill] sm:$0xff]  ;;  %v26149_v11 = vld [vmem:[#allocation28_spill] sm:$0xff]  ;;  %v26150_v7 = vld [vmem:[#allocation29_spill] sm:$0xff] }
 0x52d   : > { %v23291_v25 = vpack.c.bf16 %v11337_v52, %v11331_v14  ;;  %v19337_v46 = vld [vmem:[%s25655_s1 + $0x9d0] ss:$24 sps:$4 sm:$0xff]   ;;  %v19340_v31 = vld [vmem:[%s25655_s1 + $0xa00] ss:$24 sps:$4 sm:$0xff]  }
 0x52e   : > { %12004 = vmatprep.mubr.bf16.mxu1 %v11431_v28  ;;  %v19343_v16 = vld [vmem:[%s25655_s1 + $0xa30] ss:$24 sps:$4 sm:$0xff]   ;;  %v19346_v45 = vld [vmem:[%s25655_s1 + $0xa60] ss:$24 sps:$4 sm:$0xff]  }
 0x52f   : > { %12005 = vmatmul.mubr.bf16.gmra.mrb[124].mxu1 %v11430_v34  ;;  %v26151_v41 = vld [vmem:[#allocation30_spill] sm:$0xff]  ;;  %v26152_v14 = vld [vmem:[#allocation31_spill] sm:$0xff]  ;;  %v26153_v51 = vld [vmem:[#allocation32_spill] sm:$0xff] }
 0x530   : > { %12045 = vmatprep.mubr.bf16.mxu1 %v22943_v57  ;;  %v26140_v57 = vld [vmem:[#allocation19_spill] sm:$0xff]  ;;  %v19352_v52 = vld [vmem:[%s25655_s1 + $0xac0] ss:$24 sps:$4 sm:$0xff]   ;;  %v26155_v28 = vld [vmem:[#allocation34_spill] sm:$0xff] }
 0x531   : > { %9940 = vmatmul.mubr.bf16.gmra.mrb[108].mxu0 %v26134_v55  ;;  %v19349_v42 = vld [vmem:[%s25655_s1 + $0xa90] ss:$24 sps:$4 sm:$0xff]   ;;  %v26154_v34 = vld [vmem:[#allocation33_spill] sm:$0xff] }
 0x532   : > { %9949 = vmatprep.mubr.bf16.mxu0 %v26135_v44  ;;  %v19355_v54 = vld [vmem:[%s25655_s1 + $0xaf0] ss:$24 sps:$4 sm:$0xff]   ;;  %v19358_v55 = vld [vmem:[%s25655_s1 + $0xb20] ss:$24 sps:$4 sm:$0xff]  }
 0x533   : > { %v19361_v44 = vld [vmem:[%s25655_s1 + $0xb50] ss:$24 sps:$4 sm:$0xff]  }
 0x537   : > { %12046 = vmatmul.mubr.bf16.vlgmr.msra.gmra.mrb[128].mxu1 %v22938_v5  ;;  %v26141_v5 = vld [vmem:[#allocation20_spill] sm:$0xff] }
 0x538   : > { %12053 = vmatprep.mubr.bf16.mxu1 %v22969_v1  ;;  %v26142_v1 = vld [vmem:[#allocation21_spill] sm:$0xff] }
 0x539   : > { %9950 = vmatmul.mubr.bf16.gmra.mrb[112].mxu0 %v26136_v56  ;;  %v26156_v56 = vld [vmem:[#allocation35_spill] sm:$0xff] }
 0x53a   : > { %9959 = vmatprep.mubr.bf16.mxu0 %v26137_v2 }
 0x53f   : > { %12054 = vmatmul.mubr.bf16.gmra.mrb[132].mxu1 %v22964_v35  ;;  %v26143_v35 = vld [vmem:[#allocation22_spill] sm:$0xff] }
 0x540   : > { %12061 = vmatprep.mubr.bf16.mxu1 %v22995_v6  ;;  %v19325_v6 = vld [vmem:[%s25655_s1 + $0x910] ss:$24 sps:$4 sm:$0xff]  }
 0x541   : > { %9960 = vmatmul.mubr.bf16.gmra.mrb[116].mxu0 %v26138_v20  ;;  %v26157_v20 = vld [vmem:[#allocation36_spill] sm:$0xff] }
 0x542   : > { %9969 = vmatprep.mubr.bf16.mxu0 %v26139_v61  ;;  %v19364_v61 = vld [vmem:[%s25655_s1 + $0xb80] ss:$24 sps:$4 sm:$0xff]  }
 0x547   : > { %12062 = vmatmul.mubr.bf16.gmra.mrb[136].mxu1 %v22990_v10  ;;  %v19330_v10 = vld [vmem:[%s25655_s1 + $0x944] ss:$24 sps:$4 sm:$0xff]  }
 0x548   : > { %12069 = vmatprep.mubr.bf16.mxu1 %v23021_v13  ;;  %v26144_v13 = vld [vmem:[#allocation23_spill] sm:$0xff] }
 0x549   : > { %9970 = vmatmul.mubr.bf16.gmra.mrb[120].mxu0 %v26140_v57 }
 0x54a   : > { %9979 = vmatprep.mubr.bf16.mxu0 %v26141_v5 }
 0x54f   : > { %12070 = vmatmul.mubr.bf16.gmra.mrb[140].mxu1 %v23016_v0  ;;  %v26145_v0 = vld [vmem:[#allocation24_spill] sm:$0xff] }
 0x550   : > { %12077 = vmatprep.mubr.bf16.mxu1 %v23041_v60  ;;  %v19328_v60 = vld [vmem:[%s25655_s1 + $0x940] ss:$24 sps:$4 sm:$0xff]  }
 0x551   : > { %9980 = vmatmul.mubr.bf16.gmra.mrb[124].mxu0 %v26142_v1 }
 0x552   : > { %10022 = vmatprep.mubr.bf16.mxu0 %v26143_v35 }
 0x557   : > { %12078 = vmatmul.mubr.bf16.gmra.mrb[144].mxu1 %v23039_v21  ;;  %v19333_v21 = vld [vmem:[%s25655_s1 + $0x974] ss:$24 sps:$4 sm:$0xff]  }
 0x558   : > { %12085 = vmatprep.mubr.bf16.mxu1 %v23067_v58  ;;  %v19336_v58 = vld [vmem:[%s25655_s1 + $0x9a4] ss:$24 sps:$4 sm:$0xff]  }
 0x559   : > { %10023 = vmatmul.mubr.bf16.vlgmr.msra.gmra.mrb[64].mxu0 %v26144_v13  ;;  %v26158_v13 = vld [vmem:[#allocation37_spill] sm:$0xff] }
 0x55a   : > { %10032 = vmatprep.mubr.bf16.mxu0 %v26145_v0  ;;  %10184 = vmatpush1.bf16.msra.mxu0 %v19325_v6  ;;  %v19367_v6 = vld [vmem:[%s25655_s1 + $0xbb0] ss:$24 sps:$4 sm:$0xff]  }
 0x55b   : > { %10185 = vmatprep.subr.bf16.mxu0 %v19330_v10  ;;  %v19372_v10 = vld [vmem:[%s25655_s1 + $0xbe4] ss:$24 sps:$4 sm:$0xff]  }
 0x55e   : > { %10186 = vmatpush1.bf16.msra.mxu0 %v19328_v60  ;;  %v26159_v60 = vld [vmem:[#allocation38_spill] sm:$0xff] }
 0x55f   : > { %12086 = vmatmul.mubr.bf16.gmra.mrb[148].mxu1 %v23065_v23  ;;  %10187 = vmatprep.subr.bf16.mxu0 %v19333_v21  ;;  %v19339_v23 = vld [vmem:[%s25655_s1 + $0x9d4] ss:$24 sps:$4 sm:$0xff]   ;;  %v19370_v21 = vld [vmem:[%s25655_s1 + $0xbe0] ss:$24 sps:$4 sm:$0xff]  }
 0x560   : > { %12093 = vmatprep.mubr.bf16.mxu1 %v23093_v40  ;;  %v19342_v40 = vld [vmem:[%s25655_s1 + $0xa04] ss:$24 sps:$4 sm:$0xff]  }
 0x561   : > { %10033 = vmatmul.mubr.bf16.gmra.mrb[68].mxu0 %v26146_v59 }
 0x562   : > { %10042 = vmatprep.mubr.bf16.mxu0 %v26147_v43  ;;  %10188 = vmatpush1.bf16.msra.mxu0 %v19331_v29 }
 0x563   : > { %10189 = vmatprep.subr.bf16.mxu0 %v19336_v58 }
 0x566   : > { %10190 = vmatpush1.bf16.msra.mxu0 %v19334_v12  ;;  %v26160_v12 = vld [vmem:[#allocation39_spill] sm:$0xff] }
 0x567   : > { %12094 = vmatmul.mubr.bf16.gmra.mrb[152].mxu1 %v23091_v4  ;;  %10191 = vmatprep.subr.bf16.mxu0 %v19339_v23  ;;  %v19345_v4 = vld [vmem:[%s25655_s1 + $0xa34] ss:$24 sps:$4 sm:$0xff]  }
 0x568   : > { %12101 = vmatprep.mubr.bf16.mxu1 %v23119_v19  ;;  %v19348_v19 = vld [vmem:[%s25655_s1 + $0xa64] ss:$24 sps:$4 sm:$0xff]  }
 0x569   : > { %10043 = vmatmul.mubr.bf16.gmra.mrb[72].mxu0 %v26148_v22 }
 0x56a   : > { %10052 = vmatprep.mubr.bf16.mxu0 %v26149_v11  ;;  %10192 = vmatpush1.bf16.msra.mxu0 %v19337_v46  ;;  %v26161_v46 = vld [vmem:[#allocation40_spill] sm:$0xff] }
 0x56b   : > { %10193 = vmatprep.subr.bf16.mxu0 %v19342_v40 }
 0x56e   : > { %10194 = vmatpush1.bf16.msra.mxu0 %v19340_v31 }
 0x56f   : > { %12102 = vmatmul.mubr.bf16.gmra.mrb[156].mxu1 %v23117_v47  ;;  %10195 = vmatprep.subr.bf16.mxu0 %v19345_v4  ;;  %v19351_v47 = vld [vmem:[%s25655_s1 + $0xa94] ss:$24 sps:$4 sm:$0xff]  }
 0x570   : > { %12109 = vmatprep.mubr.bf16.mxu1 %v23145_v27  ;;  %v19354_v27 = vld [vmem:[%s25655_s1 + $0xac4] ss:$24 sps:$4 sm:$0xff]  }
 0x571   : > { %10053 = vmatmul.mubr.bf16.gmra.mrb[76].mxu0 %v26150_v7 }
 0x572   : > { %10062 = vmatprep.mubr.bf16.mxu0 %v26151_v41  ;;  %10196 = vmatpush1.bf16.msra.mxu0 %v19343_v16  ;;  %v26163_v16 = vld [vmem:[#allocation42_spill] sm:$0xff] }
 0x573   : > { %10197 = vmatprep.subr.bf16.mxu0 %v19348_v19 }
 0x576   : > { %10198 = vmatpush1.bf16.msra.mxu0 %v19346_v45 }
 0x577   : > { %12110 = vmatmul.mubr.bf16.gmra.mrb[160].mxu1 %v23143_v17  ;;  %10199 = vmatprep.subr.bf16.mxu0 %v19351_v47  ;;  %v19357_v17 = vld [vmem:[%s25655_s1 + $0xaf4] ss:$24 sps:$4 sm:$0xff]  }
 0x578   : > { %12117 = vmatprep.mubr.bf16.mxu1 %v23171_v26  ;;  %v19360_v26 = vld [vmem:[%s25655_s1 + $0xb24] ss:$24 sps:$4 sm:$0xff]  }
 0x579   : > { %10063 = vmatmul.mubr.bf16.gmra.mrb[80].mxu0 %v26152_v14 }
 0x57a   : > { %10072 = vmatprep.mubr.bf16.mxu0 %v26153_v51  ;;  %10200 = vmatpush1.bf16.msra.mxu0 %v19349_v42  ;;  %v26164_v42 = vld [vmem:[#allocation43_spill] sm:$0xff] }
 0x57b   : > { %10201 = vmatprep.subr.bf16.mxu0 %v19354_v27 }
 0x57e   : > { %10202 = vmatpush1.bf16.msra.mxu0 %v19352_v52 }
 0x57f   : > { %12118 = vmatmul.mubr.bf16.gmra.mrb[164].mxu1 %v23169_v24  ;;  %10203 = vmatprep.subr.bf16.mxu0 %v19357_v17  ;;  %v19363_v24 = vld [vmem:[%s25655_s1 + $0xb54] ss:$24 sps:$4 sm:$0xff]  }
 0x580   : > { %12125 = vmatprep.mubr.bf16.mxu1 %v23197_v9  ;;  %v19366_v9 = vld [vmem:[%s25655_s1 + $0xb84] ss:$24 sps:$4 sm:$0xff]  }
 0x581   : > { %10073 = vmatmul.mubr.bf16.gmra.mrb[84].mxu0 %v26154_v34 }
 0x582   : > { %10082 = vmatprep.mubr.bf16.mxu0 %v26155_v28  ;;  %10204 = vmatpush1.bf16.msra.mxu0 %v19355_v54  ;;  %v26166_v54 = vld [vmem:[#allocation45_spill] sm:$0xff] }
 0x583   : > { %10205 = vmatprep.subr.bf16.mxu0 %v19360_v26 }
 0x586   : > { %10206 = vmatpush1.bf16.msra.mxu0 %v19358_v55 }
 0x587   : > { %12126 = vmatmul.mubr.bf16.gmra.mrb[168].mxu1 %v23195_v33  ;;  %10207 = vmatprep.subr.bf16.mxu0 %v19363_v24  ;;  %v19369_v33 = vld [vmem:[%s25655_s1 + $0xbb4] ss:$24 sps:$4 sm:$0xff]  }
 0x588   : > { %12133 = vmatprep.mubr.bf16.mxu1 %v23223_v32 }
 0x589   : > { %10083 = vmatmul.mubr.bf16.gmra.mrb[88].mxu0 %v26156_v56  ;;  %v26169_v56 = vld [vmem:[#allocation48_spill] sm:$0xff] }
 0x58a   : > { %v16432_v2 = vpop.f32.mrb[64].mxu1  ;;  %10092 = vmatprep.mubr.bf16.mxu0 %v26157_v20  ;;  %10208 = vmatpush1.bf16.msra.mxu0 %v19361_v44  ;;  %v26168_v44 = vld [vmem:[#allocation47_spill] sm:$0xff] }
 0x58b   : > { %v16433_v57 = vpop.f32.mrb[65].mxu1  ;;  %10209 = vmatprep.subr.bf16.mxu0 %v19366_v9 }
 0x58c   : > { %v23424_v5 = vadd.f32 %v16433_v57, %v16432_v2  ;;  %v16435_v1 = vpop.f32.mrb[66].mxu1 }
 0x58d   : > { %v16436_v32 = vpop.f32.mrb[67].mxu1 }
 0x58e   : > { %v23426_v35 = vadd.f32 %v16436_v32, %v16435_v1  ;;  %10210 = vmatpush1.bf16.msra.mxu0 %v19364_v61  ;;  %v26171_v32 = vld [vmem:[#allocation50_spill] sm:$0xff] }
 0x58f   : > { %12134 = vmatmul.mubr.bf16.gmra.mrb[172].mxu1 %v23221_v8  ;;  %10211 = vmatprep.subr.bf16.mxu0 %v19369_v33  ;;  %v26170_v33 = vld [vmem:[#allocation49_spill] sm:$0xff] }
 0x590   : > { %12141 = vmatprep.mubr.bf16.mxu1 %v23246_v18  ;;  %v19375_v18 = vld [vmem:[%s25655_s1 + $0xc14] ss:$24 sps:$4 sm:$0xff]  }
 0x591   : > { %10093 = vmatmul.mubr.bf16.gmra.mrb[92].mxu0 %v26158_v13 }
 0x592   : > { %v16438_v0 = vpop.f32.mrb[68].mxu1  ;;  %10102 = vmatprep.mubr.bf16.mxu0 %v26159_v60  ;;  %10212 = vmatpush1.bf16.msra.mxu0 %v19367_v6 }
 0x593   : > { %v16439_v29 = vpop.f32.mrb[69].mxu1  ;;  %10213 = vmatprep.subr.bf16.mxu0 %v19372_v10 }
 0x594   : > { %v23441_v8 = vadd.f32 %v16439_v29, %v16438_v0  ;;  %v16441_v58 = vpop.f32.mrb[70].mxu1 }
 0x595   : > { %v16442_v59 = vpop.f32.mrb[71].mxu1 }
 0x596   : > { %v23443_v43 = vadd.f32 %v16442_v59, %v16441_v58  ;;  %10214 = vmatpush1.bf16.msra.mxu0 %v19370_v21  ;;  %v26172_v21 = vld [vmem:[#allocation51_spill] sm:$0xff]  ;;  %v26173_v58 = vld [vmem:[#allocation52_spill] sm:$0xff] }
 0x597   : > { %12142 = vmatmul.mubr.bf16.gmra.mrb[176].mxu1 %v23244_v37  ;;  %10376 = vmatprep.subr.bf16.mxu0 %v19375_v18  ;;  %v26162_v37 = vld [vmem:[#allocation41_spill] sm:$0xff] }
 0x598   : > { %12149 = vmatprep.mubr.bf16.mxu1 %v23263_v39 }
 0x599   : > { %10103 = vmatmul.mubr.bf16.gmra.mrb[96].mxu0 %v26160_v12 }
 0x59a   : > { %v16444_v23 = vpop.f32.mrb[72].mxu1  ;;  %10112 = vmatprep.mubr.bf16.mxu0 %v26161_v46 }
 0x59b   : > { %v16445_v40 = vpop.f32.mrb[73].mxu1 }
 0x59c   : > { %v23452_v22 = vadd.f32 %v16445_v40, %v16444_v23  ;;  %v16447_v11 = vpop.f32.mrb[74].mxu1  ;;  %v26174_v40 = vld [vmem:[#allocation53_spill] sm:$0xff] }
 0x59d   : > { %v16448_v31 = vpop.f32.mrb[75].mxu1 }
 0x59e   : > { %v23454_v4 = vadd.f32 %v16448_v31, %v16447_v11  ;;  %v26175_v31 = vld [vmem:[#allocation54_spill] sm:$0xff] }
 0x59f   : > { %12150 = vmatmul.mubr.bf16.gmra.mrb[180].mxu1 %v23261_v38 }
 0x5a0   : > { %12157 = vmatprep.mubr.bf16.mxu1 %v23277_v63  ;;  %v26165_v63 = vld [vmem:[#allocation44_spill] sm:$0xff] }
 0x5a1   : > { %10113 = vmatmul.mubr.bf16.gmra.mrb[100].mxu0 %v26162_v37 }
 0x5a2   : > { %v16450_v39 = vpop.f32.mrb[76].mxu1  ;;  %10122 = vmatprep.mubr.bf16.mxu0 %v26163_v16 }
 0x5a3   : > { %v16451_v19 = vpop.f32.mrb[77].mxu1 }
 0x5a4   : > { %v23460_v7 = vadd.f32 %v16451_v19, %v16450_v39  ;;  %v16453_v41 = vpop.f32.mrb[78].mxu1 }
 0x5a5   : > { %v16454_v45 = vpop.f32.mrb[79].mxu1 }
 0x5a6   : > { %v23462_v47 = vadd.f32 %v16454_v45, %v16453_v41  ;;  %v19373_v45 = vld [vmem:[%s25655_s1 + $0xc10] ss:$24 sps:$4 sm:$0xff]  }
 0x5a7   : > { %12158 = vmatmul.mubr.bf16.gmra.mrb[184].mxu1 %v23275_v48  ;;  %v26167_v48 = vld [vmem:[#allocation46_spill] sm:$0xff] }
 0x5a8   : > { %12165 = vmatprep.mubr.bf16.mxu1 %v23291_v25 }
 0x5a9   : > { %10123 = vmatmul.mubr.bf16.gmra.mrb[104].mxu0 %v26164_v42  ;;  %v19378_v42 = vld [vmem:[%s25655_s1 + $0xc44] ss:$24 sps:$4 sm:$0xff]  }
 0x5aa   : > { %v16456_v38 = vpop.f32.mrb[80].mxu1  ;;  %10132 = vmatprep.mubr.bf16.mxu0 %v26165_v63 }
 0x5ab   : > { %v16457_v27 = vpop.f32.mrb[81].mxu1 }
 0x5ac   : > { %v23468_v14 = vadd.f32 %v16457_v27, %v16456_v38  ;;  %v16459_v51 = vpop.f32.mrb[82].mxu1  ;;  %v26176_v38 = vld [vmem:[#allocation55_spill] sm:$0xff]  ;;  %v26177_v27 = vld [vmem:[#allocation56_spill] sm:$0xff] }
 0x5ad   : > { %v16460_v52 = vpop.f32.mrb[83].mxu1 }
 0x5ae   : > { %v23470_v17 = vadd.f32 %v16460_v52, %v16459_v51  ;;  %v19376_v51 = vld [vmem:[%s25655_s1 + $0xc40] ss:$24 sps:$4 sm:$0xff]  }
 0x5af   : > { %12166 = vmatmul.mubr.bf16.gmra.mrb[188].mxu1 %v23289_v30 }
 0x5b1   : > { %10133 = vmatmul.mubr.bf16.gmra.mrb[108].mxu0 %v26166_v54  ;;  %v19381_v54 = vld [vmem:[%s25655_s1 + $0xc74] ss:$24 sps:$4 sm:$0xff]  }
 0x5b2   : > { %v16462_v26 = vpop.f32.mrb[84].mxu1  ;;  %10142 = vmatprep.mubr.bf16.mxu0 %v26167_v48 }
 0x5b3   : > { %v16463_v25 = vpop.f32.mrb[85].mxu1 }
 0x5b4   : > { %v23475_v34 = vadd.f32 %v16463_v25, %v16462_v26  ;;  %v16465_v28 = vpop.f32.mrb[86].mxu1 }
 0x5b5   : > { %v16466_v55 = vpop.f32.mrb[87].mxu1 }
 0x5b6   : > { %v23477_v24 = vadd.f32 %v16466_v55, %v16465_v28  ;;  %v19379_v55 = vld [vmem:[%s25655_s1 + $0xc70] ss:$24 sps:$4 sm:$0xff]  }
 0x5b9   : > { %10143 = vmatmul.mubr.bf16.gmra.mrb[112].mxu0 %v26168_v44  ;;  %v19384_v44 = vld [vmem:[%s25655_s1 + $0xca4] ss:$24 sps:$4 sm:$0xff]  }
 0x5ba   : > { %v16468_v9 = vpop.f32.mrb[88].mxu1  ;;  %10152 = vmatprep.mubr.bf16.mxu0 %v26169_v56 }
 0x5bb   : > { %v16469_v2 = vpop.f32.mrb[89].mxu1 }
 0x5bc   : > { %v23481_v20 = vadd.f32 %v16469_v2, %v16468_v9  ;;  %v16471_v30 = vpop.f32.mrb[90].mxu1  ;;  %v26178_v9 = vld [vmem:[#allocation57_spill] sm:$0xff]  ;;  %v26179_v2 = vld [vmem:[#allocation58_spill] sm:$0xff] }
 0x5bd   : > { %v16472_v61 = vpop.f32.mrb[91].mxu1 }
 0x5be   : > { %v23483_v57 = vadd.f32 %v16472_v61, %v16471_v30  ;;  %v19382_v30 = vld [vmem:[%s25655_s1 + $0xca0] ss:$24 sps:$4 sm:$0xff]  }
 0x5c1   : > { %10153 = vmatmul.mubr.bf16.gmra.mrb[116].mxu0 %v26170_v33  ;;  %v19387_v33 = vld [vmem:[%s25655_s1 + $0xcd4] ss:$24 sps:$4 sm:$0xff]  }
 0x5c2   : > { %v16474_v1 = vpop.f32.mrb[92].mxu1  ;;  %10162 = vmatprep.mubr.bf16.mxu0 %v26171_v32 }
 0x5c3   : > { %v16475_v6 = vpop.f32.mrb[93].mxu1 }
 0x5c4   : > { %v23487_v10 = vadd.f32 %v16475_v6, %v16474_v1  ;;  %v16477_v13 = vpop.f32.mrb[94].mxu1 }
 0x5c5   : > { %v16478_v0 = vpop.f32.mrb[95].mxu1 }
 0x5c6   : > { %v23489_v60 = vadd.f32 %v16478_v0, %v16477_v13  ;;  %v19385_v0 = vld [vmem:[%s25655_s1 + $0xcd0] ss:$24 sps:$4 sm:$0xff]  }
 0x5c9   : > { %10163 = vmatmul.mubr.bf16.gmra.mrb[120].mxu0 %v26172_v21  ;;  %v19390_v21 = vld [vmem:[%s25655_s1 + $0xd04] ss:$24 sps:$4 sm:$0xff]  }
 0x5ca   : > { %v16480_v29 = vpop.f32.mrb[96].mxu1  ;;  %10172 = vmatprep.mubr.bf16.mxu0 %v26173_v58 }
 0x5cb   : > { %v16481_v59 = vpop.f32.mrb[97].mxu1 }
 0x5cc   : > { %v23493_v18 = vadd.f32 %v16481_v59, %v16480_v29  ;;  %v16483_v12 = vpop.f32.mrb[98].mxu1  ;;  %v26180_v29 = vld [vmem:[#allocation59_spill] sm:$0xff]  ;;  %v26181_v59 = vld [vmem:[#allocation60_spill] sm:$0xff] }
 0x5cd   : > { %v16484_v23 = vpop.f32.mrb[99].mxu1 }
 0x5ce   : > { %v23495_v46 = vadd.f32 %v16484_v23, %v16483_v12  ;;  %v19388_v12 = vld [vmem:[%s25655_s1 + $0xd00] ss:$24 sps:$4 sm:$0xff]  }
 0x5d1   : > { %10173 = vmatmul.mubr.bf16.gmra.mrb[124].mxu0 %v26174_v40  ;;  %v19393_v40 = vld [vmem:[%s25655_s1 + $0xd34] ss:$24 sps:$4 sm:$0xff]  }
 0x5d2   : > { %v16486_v11 = vpop.f32.mrb[100].mxu1  ;;  %10215 = vmatprep.mubr.bf16.mxu0 %v26175_v31 }
 0x5d3   : > { %v16487_v37 = vpop.f32.mrb[101].mxu1 }
 0x5d4   : > { %v23499_v39 = vadd.f32 %v16487_v37, %v16486_v11  ;;  %v16489_v16 = vpop.f32.mrb[102].mxu1 }
 0x5d5   : > { %v16490_v19 = vpop.f32.mrb[103].mxu1 }
 0x5d6   : > { %v23501_v41 = vadd.f32 %v16490_v19, %v16489_v16  ;;  %v19391_v19 = vld [vmem:[%s25655_s1 + $0xd30] ss:$24 sps:$4 sm:$0xff]  }
 0x5d9   : > { %10216 = vmatmul.mubr.bf16.vlgmr.msra.gmra.mrb[64].mxu0 %v26176_v38 }
 0x5da   : > { %v16492_v63 = vpop.f32.mrb[104].mxu1  ;;  %10225 = vmatprep.mubr.bf16.mxu0 %v26177_v27  ;;  %10377 = vmatpush1.bf16.msra.mxu0 %v19373_v45  ;;  %v19396_v45 = vld [vmem:[%s25655_s1 + $0xd64] ss:$24 sps:$4 sm:$0xff]   ;;  %v19394_v27 = vld [vmem:[%s25655_s1 + $0xd60] ss:$24 sps:$4 sm:$0xff]  }
 0x5db   : > { %v16493_v52 = vpop.f32.mrb[105].mxu1  ;;  %10378 = vmatprep.subr.bf16.mxu0 %v19378_v42  ;;  %v26182_v42 = vld [vmem:[#allocation61_spill] sm:$0xff] }
 0x5dc   : > { %v23517_v26 = vadd.f32 %v16493_v52, %v16492_v63  ;;  %v16495_v48 = vpop.f32.mrb[106].mxu1  ;;  %v26183_v63 = vld [vmem:[#allocation62_spill] sm:$0xff] }
 0x5dd   : > { %v16496_v25 = vpop.f32.mrb[107].mxu1  ;;  %v19399_v52 = vld [vmem:[%s25655_s1 + $0xd94] ss:$24 sps:$4 sm:$0xff]  }
 0x5de   : > { %v23519_v28 = vadd.f32 %v16496_v25, %v16495_v48  ;;  %10379 = vmatpush1.bf16.msra.mxu0 %v19376_v51 }
 0x5df   : > { %10380 = vmatprep.subr.bf16.mxu0 %v19381_v54 }
 0x5e1   : > { %10226 = vmatmul.mubr.bf16.gmra.mrb[68].mxu0 %v26178_v9  ;;  %v19402_v9 = vld [vmem:[%s25655_s1 + $0xdc4] ss:$24 sps:$4 sm:$0xff]  }
 0x5e2   : > { %v16498_v56 = vpop.f32.mrb[108].mxu1  ;;  %10235 = vmatprep.mubr.bf16.mxu0 %v26179_v2  ;;  %10381 = vmatpush1.bf16.msra.mxu0 %v19379_v55  ;;  %v19400_v2 = vld [vmem:[%s25655_s1 + $0xdc0] ss:$24 sps:$4 sm:$0xff]  }
 0x5e3   : > { %v16499_v61 = vpop.f32.mrb[109].mxu1  ;;  %10382 = vmatprep.subr.bf16.mxu0 %v19384_v44  ;;  %v19397_v44 = vld [vmem:[%s25655_s1 + $0xd90] ss:$24 sps:$4 sm:$0xff]  }
 0x5e4   : > { %v23535_v1 = vadd.f32 %v16499_v61, %v16498_v56  ;;  %v16501_v32 = vpop.f32.mrb[110].mxu1  ;;  %v19405_v61 = vld [vmem:[%s25655_s1 + $0xdf4] ss:$24 sps:$4 sm:$0xff]  }
 0x5e5   : > { %v16502_v6 = vpop.f32.mrb[111].mxu1 }
 0x5e6   : > { %v23537_v13 = vadd.f32 %v16502_v6, %v16501_v32  ;;  %10383 = vmatpush1.bf16.msra.mxu0 %v19382_v30 }
 0x5e7   : > { %10384 = vmatprep.subr.bf16.mxu0 %v19387_v33 }
 0x5e9   : > { %10236 = vmatmul.mubr.bf16.gmra.mrb[72].mxu0 %v26180_v29  ;;  %v26184_v29 = vld [vmem:[#allocation63_spill] sm:$0xff] }
 0x5ea   : > { %v16504_v58 = vpop.f32.mrb[112].mxu1  ;;  %10245 = vmatprep.mubr.bf16.mxu0 %v26181_v59  ;;  %10385 = vmatpush1.bf16.msra.mxu0 %v19385_v0 }
 0x5eb   : > { %v16505_v23 = vpop.f32.mrb[113].mxu1  ;;  %10386 = vmatprep.subr.bf16.mxu0 %v19390_v21 }
 0x5ec   : > { %v23553_v11 = vadd.f32 %v16505_v23, %v16504_v58  ;;  %v16507_v31 = vpop.f32.mrb[114].mxu1  ;;  %v19406_v58 = vld [vmem:[%s25655_s1 + $0xe20] ss:$24 sps:$4 sm:$0xff]  }
 0x5ed   : > { %v16508_v37 = vpop.f32.mrb[115].mxu1 }
 0x5ee   : > { %v23555_v16 = vadd.f32 %v16508_v37, %v16507_v31  ;;  %10387 = vmatpush1.bf16.msra.mxu0 %v19388_v12  ;;  %v19411_v12 = vld [vmem:[%s25655_s1 + $0xe54] ss:$24 sps:$4 sm:$0xff]  }
 0x5ef   : > { %10388 = vmatprep.subr.bf16.mxu0 %v19393_v40 }
 0x5f1   : > { %10246 = vmatmul.mubr.bf16.gmra.mrb[76].mxu0 %v26182_v42  ;;  %v26185_v42 = vld [vmem:[#allocation64_spill] sm:$0xff] }
 0x5f2   : > { %v16510_v38 = vpop.f32.mrb[116].mxu1  ;;  %10255 = vmatprep.mubr.bf16.mxu0 %v26183_v63  ;;  %10389 = vmatpush1.bf16.msra.mxu0 %v19391_v19  ;;  %v19414_v19 = vld [vmem:[%s25655_s1 + $0xe84] ss:$24 sps:$4 sm:$0xff]  }
 0x5f3   : > { %v16511_v51 = vpop.f32.mrb[117].mxu1  ;;  %10390 = vmatprep.subr.bf16.mxu0 %v19396_v45  ;;  %v23620_v45 = vld [vmem:[%s25658_s4] ss:$0 sm:$0xff] }
 0x5f4   : > { %v23571_v54 = vadd.f32 %v16511_v51, %v16510_v38  ;;  %v16513_v48 = vpop.f32.mrb[118].mxu1  ;;  %v26186_v63 = vld [vmem:[#allocation65_spill] sm:$0xff] }
 0x5f5   : > { %v16514_v25 = vpop.f32.mrb[119].mxu1 }
 0x5f6   : > { %v23573_v55 = vadd.f32 %v16514_v25, %v16513_v48  ;;  %10391 = vmatpush1.bf16.msra.mxu0 %v19394_v27  ;;  %v19412_v27 = vld [vmem:[%s25655_s1 + $0xe80] ss:$24 sps:$4 sm:$0xff]   ;;  %v11887_v48 = vadd.f32 %v23424_v5, %v23620_v45 }
 0x5f7   : > { %10392 = vmatprep.subr.bf16.mxu0 %v19399_v52  ;;  %v19417_v52 = vld [vmem:[%s25655_s1 + $0xeb4] ss:$24 sps:$4 sm:$0xff]  }
 0x5f9   : > { %10256 = vmatmul.mubr.bf16.gmra.mrb[80].mxu0 %v21221_v3  ;;  %v19403_v3 = vld [vmem:[%s25655_s1 + $0xdf0] ss:$24 sps:$4 sm:$0xff]  }
 0x5fa   : > { %v16516_v56 = vpop.f32.mrb[120].mxu1  ;;  %10265 = vmatprep.mubr.bf16.mxu0 %v21223_v62  ;;  %10393 = vmatpush1.bf16.msra.mxu0 %v19397_v44  ;;  %v19408_v62 = vld [vmem:[%s25655_s1 + $0xe24] ss:$24 sps:$4 sm:$0xff]  }
 0x5fb   : > { %v16517_v30 = vpop.f32.mrb[121].mxu1  ;;  %10394 = vmatprep.subr.bf16.mxu0 %v19402_v9 }
 0x5fc   : > { %v23589_v33 = vadd.f32 %v16517_v30, %v16516_v56  ;;  %v16519_v32 = vpop.f32.mrb[122].mxu1  ;;  %v11890_v56 = vadd.f32 %v23426_v35, %v23620_v45  ;;  %v19415_v30 = vld [vmem:[%s25655_s1 + $0xeb0] ss:$24 sps:$4 sm:$0xff]   ;;  %v19418_v35 = vld [vmem:[%s25655_s1 + $0xee0] ss:$24 sps:$4 sm:$0xff]  }
 0x5fd   : > { %v16520_v6 = vpop.f32.mrb[123].mxu1 }
 0x5fe   : > { %v23591_v0 = vadd.f32 %v16520_v6, %v16519_v32  ;;  %10395 = vmatpush1.bf16.msra.mxu0 %v19400_v2  ;;  %v19420_v32 = vld [vmem:[%s25655_s1 + $0xee4] ss:$24 sps:$4 sm:$0xff]  }
 0x5ff   : > { %10396 = vmatprep.subr.bf16.mxu0 %v19405_v61  ;;  %v26187_v6 = vld [vmem:[#allocation66_spill] sm:$0xff] }
 0x601   : > { %10266 = vmatmul.mubr.bf16.gmra.mrb[84].mxu0 %v21255_v15  ;;  %v19409_v15 = vld [vmem:[%s25655_s1 + $0xe50] ss:$24 sps:$4 sm:$0xff]  }
 0x602   : > { %v16522_v21 = vpop.f32.mrb[124].mxu1  ;;  %10275 = vmatprep.mubr.bf16.mxu0 %v26184_v29  ;;  %10397 = vmatpush1.bf16.msra.mxu0 %v19403_v3  ;;  %v11895_v29 = vadd.f32 %v23441_v8, %v23620_v45 }
 0x603   : > { %v16523_v59 = vpop.f32.mrb[125].mxu1  ;;  %10398 = vmatprep.subr.bf16.mxu0 %v19408_v62  ;;  %v26188_v62 = vld [vmem:[#allocation67_spill] sm:$0xff] }
 0x604   : > { %v23607_v23 = vadd.f32 %v16523_v59, %v16522_v21  ;;  %v16525_v40 = vpop.f32.mrb[126].mxu1 }
 0x605   : > { %v16526_v31 = vpop.f32.mrb[127].mxu1 }
 0x606   : > { %v23609_v37 = vadd.f32 %v16526_v31, %v16525_v40  ;;  %10399 = vmatpush1.bf16.msra.mxu0 %v19406_v58  ;;  %v11898_v40 = vadd.f32 %v23443_v43, %v23620_v45  ;;  %v11903_v43 = vadd.f32 %v23452_v22, %v23620_v45  ;;  %v11911_v22 = vadd.f32 %v23460_v7, %v23620_v45 }
 0x607   : > { %10400 = vmatprep.subr.bf16.mxu0 %v19411_v12  ;;  %v11919_v7 = vadd.f32 %v23468_v14, %v23620_v45  ;;  %v11927_v14 = vadd.f32 %v23475_v34, %v23620_v45  ;;  %v11935_v34 = vadd.f32 %v23481_v20, %v23620_v45  ;;  %v11943_v20 = vadd.f32 %v23487_v10, %v23620_v45 }
 0x608   : > { %v11951_v10 = vadd.f32 %v23493_v18, %v23620_v45  ;;  %v11959_v18 = vadd.f32 %v23499_v39, %v23620_v45  ;;  %v26205_v39 = vld [vmem:[#allocation84_spill] sm:$0xff] }
 0x609   : > { %10276 = vmatmul.mubr.bf16.gmra.mrb[88].mxu0 %v26185_v42 }
 0x60a   : > { %v16544_v38 = vpop.f32.mrb[128].mxu1  ;;  %10285 = vmatprep.mubr.bf16.mxu0 %v26186_v63  ;;  %10401 = vmatpush1.bf16.msra.mxu0 %v19409_v15  ;;  %v26190_v63 = vld [vmem:[#allocation69_spill] sm:$0xff] }
 0x60b   : > { %v16545_v51 = vpop.f32.mrb[129].mxu1  ;;  %10402 = vmatprep.subr.bf16.mxu0 %v19414_v19  ;;  %v19423_v19 = vld [vmem:[%s25655_s1 + $0xf14] ss:$24 sps:$4 sm:$0xff]  }
 0x60c   : > { %v16546_v25 = vadd.f32 %v16545_v51, %v16544_v38  ;;  %v16547_v44 = vpop.f32.mrb[130].mxu1  ;;  %v26189_v38 = vld [vmem:[#allocation68_spill] sm:$0xff] }
 0x60d   : > { %v16548_v9 = vpop.f32.mrb[131].mxu1 }
 0x60e   : > { %v16549_v2 = vadd.f32 %v16548_v9, %v16547_v44  ;;  %10403 = vmatpush1.bf16.msra.mxu0 %v19412_v27  ;;  %v23637_v61 = vadd.f32 %v16546_v25, %v11887_v48  ;;  %v11906_v25 = vadd.f32 %v23454_v4, %v23620_v45  ;;  %v11914_v4 = vadd.f32 %v23462_v47, %v23620_v45 }
 0x60f   : > { %10404 = vmatprep.subr.bf16.mxu0 %v19417_v52  ;;  %v11922_v47 = vadd.f32 %v23470_v17, %v23620_v45  ;;  %v11930_v17 = vadd.f32 %v23477_v24, %v23620_v45  ;;  %v11938_v24 = vadd.f32 %v23483_v57, %v23620_v45  ;;  %v11946_v57 = vadd.f32 %v23489_v60, %v23620_v45 }
 0x610   : > { %v23642_v5 = vadd.f32 %v16549_v2, %v11890_v56  ;;  %v26191_v2 = vld [vmem:[#allocation70_spill] sm:$0xff]  ;;  %v11954_v60 = vadd.f32 %v23495_v46, %v23620_v45  ;;  %v11962_v46 = vadd.f32 %v23501_v41, %v23620_v45  ;;  %v19424_v41 = vld [vmem:[%s25655_s1 + $0xf40] ss:$24 sps:$4 sm:$0xff]  }
 0x611   : > { %10286 = vmatmul.mubr.bf16.gmra.mrb[92].mxu0 %v26187_v6 }
 0x612   : > { %v16550_v3 = vpop.f32.mrb[132].mxu1  ;;  %10295 = vmatprep.mubr.bf16.mxu0 %v26188_v62  ;;  %10405 = vmatpush1.bf16.msra.mxu0 %v19415_v30 }
 0x613   : > { %v16551_v21 = vpop.f32.mrb[133].mxu1  ;;  %10406 = vmatprep.subr.bf16.mxu0 %v19420_v32  ;;  %v26192_v32 = vld [vmem:[#allocation71_spill] sm:$0xff] }
 0x614   : > { %v16552_v58 = vadd.f32 %v16551_v21, %v16550_v3  ;;  %v16553_v59 = vpop.f32.mrb[134].mxu1 }
 0x615   : > { %v16554_v12 = vpop.f32.mrb[135].mxu1 }
 0x616   : > { %v16555_v31 = vadd.f32 %v16554_v12, %v16553_v59  ;;  %10407 = vmatpush1.bf16.msra.mxu0 %v19418_v35  ;;  %v23653_v15 = vadd.f32 %v16552_v58, %v11895_v29  ;;  %v26193_v59 = vld [vmem:[#allocation72_spill] sm:$0xff] }
 0x617   : > { %10569 = vmatprep.subr.bf16.mxu0 %v19423_v19 }
 0x618   : > { %v23658_v42 = vadd.f32 %v16555_v31, %v11898_v40  ;;  %v26194_v40 = vld [vmem:[#allocation73_spill] sm:$0xff] }
 0x619   : > { %10296 = vmatmul.mubr.bf16.gmra.mrb[96].mxu0 %v26189_v38 }
 0x61a   : > { %v16556_v8 = vpop.f32.mrb[136].mxu1  ;;  %10305 = vmatprep.mubr.bf16.mxu0 %v26190_v63 }
 0x61b   : > { %v16557_v27 = vpop.f32.mrb[137].mxu1 }
 0x61c   : > { %v16558_v51 = vadd.f32 %v16557_v27, %v16556_v8  ;;  %v16559_v52 = vpop.f32.mrb[138].mxu1 }
 0x61d   : > { %v16560_v48 = vpop.f32.mrb[139].mxu1 }
 0x61e   : > { %v16561_v44 = vadd.f32 %v16560_v48, %v16559_v52  ;;  %v23666_v9 = vadd.f32 %v16558_v51, %v11903_v43  ;;  %v26195_v51 = vld [vmem:[#allocation74_spill] sm:$0xff]  ;;  %v26196_v48 = vld [vmem:[#allocation75_spill] sm:$0xff] }
 0x620   : > { %v23668_v56 = vadd.f32 %v16561_v44, %v11906_v25 }
 0x621   : > { %10306 = vmatmul.mubr.bf16.gmra.mrb[100].mxu0 %v26191_v2 }
 0x622   : > { %v16562_v30 = vpop.f32.mrb[140].mxu1  ;;  %10315 = vmatprep.mubr.bf16.mxu0 %v26192_v32 }
 0x623   : > { %v16563_v6 = vpop.f32.mrb[141].mxu1 }
 0x624   : > { %v16564_v3 = vadd.f32 %v16563_v6, %v16562_v30  ;;  %v16565_v62 = vpop.f32.mrb[142].mxu1 }
 0x625   : > { %v16566_v35 = vpop.f32.mrb[143].mxu1 }
 0x626   : > { %v16567_v21 = vadd.f32 %v16566_v35, %v16565_v62  ;;  %v23676_v29 = vadd.f32 %v16564_v3, %v11911_v22  ;;  %v26197_v3 = vld [vmem:[#allocation76_spill] sm:$0xff]  ;;  %v26198_v35 = vld [vmem:[#allocation77_spill] sm:$0xff] }
 0x628   : > { %v23678_v58 = vadd.f32 %v16567_v21, %v11914_v4 }
 0x629   : > { %10316 = vmatmul.mubr.bf16.gmra.mrb[104].mxu0 %v26193_v59 }
 0x62a   : > { %v16568_v12 = vpop.f32.mrb[144].mxu1  ;;  %10325 = vmatprep.mubr.bf16.mxu0 %v26194_v40 }
 0x62b   : > { %v16569_v31 = vpop.f32.mrb[145].mxu1 }
 0x62c   : > { %v16570_v19 = vadd.f32 %v16569_v31, %v16568_v12  ;;  %v16571_v38 = vpop.f32.mrb[146].mxu1 }
 0x62d   : > { %v16572_v8 = vpop.f32.mrb[147].mxu1 }
 0x62e   : > { %v16573_v63 = vadd.f32 %v16572_v8, %v16571_v38  ;;  %v23686_v27 = vadd.f32 %v16570_v19, %v11919_v7  ;;  %v26199_v19 = vld [vmem:[#allocation78_spill] sm:$0xff]  ;;  %v26200_v8 = vld [vmem:[#allocation79_spill] sm:$0xff] }
 0x630   : > { %v23688_v43 = vadd.f32 %v16573_v63, %v11922_v47 }
 0x631   : > { %10326 = vmatmul.mubr.bf16.gmra.mrb[108].mxu0 %v26195_v51 }
 0x632   : > { %v16574_v52 = vpop.f32.mrb[148].mxu1  ;;  %10335 = vmatprep.mubr.bf16.mxu0 %v26196_v48 }
 0x633   : > { %v16575_v25 = vpop.f32.mrb[149].mxu1 }
 0x634   : > { %v16576_v44 = vadd.f32 %v16575_v25, %v16574_v52  ;;  %v16577_v2 = vpop.f32.mrb[150].mxu1 }
 0x635   : > { %v16578_v30 = vpop.f32.mrb[151].mxu1 }
 0x636   : > { %v16579_v32 = vadd.f32 %v16578_v30, %v16577_v2  ;;  %v23696_v6 = vadd.f32 %v16576_v44, %v11927_v14  ;;  %v26201_v44 = vld [vmem:[#allocation80_spill] sm:$0xff]  ;;  %v26202_v30 = vld [vmem:[#allocation81_spill] sm:$0xff] }
 0x638   : > { %v23698_v22 = vadd.f32 %v16579_v32, %v11930_v17 }
 0x639   : > { %10336 = vmatmul.mubr.bf16.gmra.mrb[112].mxu0 %v26197_v3 }
 0x63a   : > { %v16580_v62 = vpop.f32.mrb[152].mxu1  ;;  %10345 = vmatprep.mubr.bf16.mxu0 %v26198_v35 }
 0x63b   : > { %v16581_v4 = vpop.f32.mrb[153].mxu1 }
 0x63c   : > { %v16582_v21 = vadd.f32 %v16581_v4, %v16580_v62  ;;  %v16583_v59 = vpop.f32.mrb[154].mxu1 }
 0x63d   : > { %v16584_v12 = vpop.f32.mrb[155].mxu1 }
 0x63e   : > { %v16585_v40 = vadd.f32 %v16584_v12, %v16583_v59  ;;  %v23706_v31 = vadd.f32 %v16582_v21, %v11935_v34  ;;  %v26203_v21 = vld [vmem:[#allocation82_spill] sm:$0xff]  ;;  %v26204_v12 = vld [vmem:[#allocation83_spill] sm:$0xff] }
 0x640   : > { %v23708_v7 = vadd.f32 %v16585_v40, %v11938_v24 }
 0x641   : > { %10346 = vmatmul.mubr.bf16.gmra.mrb[116].mxu0 %v26199_v19 }
 0x642   : > { %v16586_v38 = vpop.f32.mrb[156].mxu1  ;;  %10355 = vmatprep.mubr.bf16.mxu0 %v26200_v8 }
 0x643   : > { %v16587_v47 = vpop.f32.mrb[157].mxu1 }
 0x644   : > { %v16588_v63 = vadd.f32 %v16587_v47, %v16586_v38  ;;  %v16589_v51 = vpop.f32.mrb[158].mxu1  ;;  %v19421_v47 = vld [vmem:[%s25655_s1 + $0xf10] ss:$24 sps:$4 sm:$0xff]  }
 0x645   : > { %v16590_v52 = vpop.f32.mrb[159].mxu1 }
 0x646   : > { %v16591_v48 = vadd.f32 %v16590_v52, %v16589_v51  ;;  %v23716_v25 = vadd.f32 %v16588_v63, %v11943_v20  ;;  %v19426_v63 = vld [vmem:[%s25655_s1 + $0xf44] ss:$24 sps:$4 sm:$0xff]  }
 0x648   : > { %v23718_v14 = vadd.f32 %v16591_v48, %v11946_v57  ;;  %v26206_v57 = vld [vmem:[#allocation85_spill] sm:$0xff] }
 0x649   : > { %10356 = vmatmul.mubr.bf16.gmra.mrb[120].mxu0 %v26201_v44  ;;  %v19429_v44 = vld [vmem:[%s25655_s1 + $0xf74] ss:$24 sps:$4 sm:$0xff]  }
 0x64a   : > { %v16592_v2 = vpop.f32.mrb[160].mxu1  ;;  %10365 = vmatprep.mubr.bf16.mxu0 %v26202_v30 }
 0x64b   : > { %v16593_v17 = vpop.f32.mrb[161].mxu1 }
 0x64c   : > { %v16594_v32 = vadd.f32 %v16593_v17, %v16592_v2  ;;  %v16595_v3 = vpop.f32.mrb[162].mxu1  ;;  %v11967_v2 = vadd.f32 %v23517_v26, %v23620_v45 }
 0x64d   : > { %v16596_v62 = vpop.f32.mrb[163].mxu1 }
 0x64e   : > { %v16597_v35 = vadd.f32 %v16596_v62, %v16595_v3  ;;  %v23726_v4 = vadd.f32 %v16594_v32, %v11951_v10  ;;  %v11970_v32 = vadd.f32 %v23519_v28, %v23620_v45  ;;  %v19427_v62 = vld [vmem:[%s25655_s1 + $0xf70] ss:$24 sps:$4 sm:$0xff]   ;;  %v19430_v28 = vld [vmem:[%s25655_s1 + $0xfa0] ss:$24 sps:$4 sm:$0xff]  }
 0x650   : > { %v23728_v34 = vadd.f32 %v16597_v35, %v11954_v60  ;;  %v19432_v35 = vld [vmem:[%s25655_s1 + $0xfa4] ss:$24 sps:$4 sm:$0xff]  }
 0x651   : > { %10366 = vmatmul.mubr.bf16.gmra.mrb[124].mxu0 %v26203_v21  ;;  %v26207_v21 = vld [vmem:[#allocation86_spill] sm:$0xff] }
 0x652   : > { %v16598_v59 = vpop.f32.mrb[164].mxu1  ;;  %10408 = vmatprep.mubr.bf16.mxu0 %v26204_v12  ;;  %v26208_v12 = vld [vmem:[#allocation87_spill] sm:$0xff] }
 0x653   : > { %v16599_v24 = vpop.f32.mrb[165].mxu1 }
 0x654   : > { %v16600_v40 = vadd.f32 %v16599_v24, %v16598_v59  ;;  %v16601_v19 = vpop.f32.mrb[166].mxu1 }
 0x655   : > { %v16602_v38 = vpop.f32.mrb[167].mxu1 }
 0x656   : > { %v16603_v8 = vadd.f32 %v16602_v38, %v16601_v19  ;;  %v23739_v20 = vadd.f32 %v16600_v40, %v11959_v18  ;;  %v19435_v18 = vld [vmem:[%s25655_s1 + $0xfd4] ss:$24 sps:$4 sm:$0xff]   ;;  %v11975_v40 = vadd.f32 %v23535_v1, %v23620_v45 }
 0x658   : > { %v23744_v51 = vadd.f32 %v16603_v8, %v11962_v46  ;;  %v11978_v8 = vadd.f32 %v23537_v13, %v23620_v45  ;;  %v19436_v13 = vld [vmem:[%s25655_s1 + $0x1000] ss:$24 sps:$4 sm:$0xff]  }
 0x659   : > { %10409 = vmatmul.mubr.bf16.vlgmr.msra.gmra.mrb[64].mxu0 %v26205_v39 }
 0x65a   : > { %v16604_v52 = vpop.f32.mrb[168].mxu1  ;;  %10418 = vmatprep.mubr.bf16.mxu0 %v26206_v57  ;;  %10570 = vmatpush1.bf16.msra.mxu0 %v19421_v47  ;;  %v26209_v57 = vld [vmem:[#allocation88_spill] sm:$0xff] }
 0x65b   : > { %v16605_v48 = vpop.f32.mrb[169].mxu1  ;;  %10571 = vmatprep.subr.bf16.mxu0 %v19426_v63  ;;  %v19433_v63 = vld [vmem:[%s25655_s1 + $0xfd0] ss:$24 sps:$4 sm:$0xff]  }
 0x65c   : > { %v16606_v30 = vadd.f32 %v16605_v48, %v16604_v52  ;;  %v16607_v17 = vpop.f32.mrb[170].mxu1  ;;  %v19438_v52 = vld [vmem:[%s25655_s1 + $0x1004] ss:$24 sps:$4 sm:$0xff]  }
 0x65d   : > { %v16608_v10 = vpop.f32.mrb[171].mxu1  ;;  %v26210_v48 = vld [vmem:[#allocation89_spill] sm:$0xff] }
 0x65e   : > { %v16609_v3 = vadd.f32 %v16608_v10, %v16607_v17  ;;  %10572 = vmatpush1.bf16.msra.mxu0 %v19424_v41  ;;  %v23761_v60 = vadd.f32 %v16606_v30, %v11967_v2  ;;  %v19441_v2 = vld [vmem:[%s25655_s1 + $0x1034] ss:$24 sps:$4 sm:$0xff]   ;;  %v11983_v30 = vadd.f32 %v23553_v11, %v23620_v45 }
 0x65f   : > { %10573 = vmatprep.subr.bf16.mxu0 %v19429_v44 }
 0x660   : > { %v23766_v26 = vadd.f32 %v16609_v3, %v11970_v32  ;;  %v11986_v3 = vadd.f32 %v23555_v16, %v23620_v45  ;;  %v19442_v16 = vld [vmem:[%s25655_s1 + $0x1060] ss:$24 sps:$4 sm:$0xff]  }
 0x661   : > { %10419 = vmatmul.mubr.bf16.gmra.mrb[68].mxu0 %v26207_v21 }
 0x662   : > { %v16610_v59 = vpop.f32.mrb[172].mxu1  ;;  %10428 = vmatprep.mubr.bf16.mxu0 %v26208_v12  ;;  %10574 = vmatpush1.bf16.msra.mxu0 %v19427_v62  ;;  %v26211_v12 = vld [vmem:[#allocation90_spill] sm:$0xff] }
 0x663   : > { %v16611_v24 = vpop.f32.mrb[173].mxu1  ;;  %10575 = vmatprep.subr.bf16.mxu0 %v19432_v35  ;;  %v19439_v35 = vld [vmem:[%s25655_s1 + $0x1030] ss:$24 sps:$4 sm:$0xff]  }
 0x664   : > { %v16612_v19 = vadd.f32 %v16611_v24, %v16610_v59  ;;  %v16613_v38 = vpop.f32.mrb[174].mxu1  ;;  %v19444_v59 = vld [vmem:[%s25655_s1 + $0x1064] ss:$24 sps:$4 sm:$0xff]   ;;  %v26212_v24 = vld [vmem:[#allocation91_spill] sm:$0xff] }
 0x665   : > { %v16614_v46 = vpop.f32.mrb[175].mxu1 }
 0x666   : > { %v16615_v47 = vadd.f32 %v16614_v46, %v16613_v38  ;;  %10576 = vmatpush1.bf16.msra.mxu0 %v19430_v28  ;;  %v23783_v39 = vadd.f32 %v16612_v19, %v11975_v40  ;;  %v19447_v40 = vld [vmem:[%s25655_s1 + $0x1094] ss:$24 sps:$4 sm:$0xff]   ;;  %v11991_v19 = vadd.f32 %v23571_v54, %v23620_v45 }
 0x667   : > { %10577 = vmatprep.subr.bf16.mxu0 %v19435_v18 }
 0x668   : > { %v23788_v1 = vadd.f32 %v16615_v47, %v11978_v8  ;;  %v11994_v47 = vadd.f32 %v23573_v55, %v23620_v45  ;;  %v19448_v55 = vld [vmem:[%s25655_s1 + $0x10c0] ss:$24 sps:$4 sm:$0xff]  }
 0x669   : > { %10429 = vmatmul.mubr.bf16.gmra.mrb[72].mxu0 %v26209_v57 }
 0x66a   : > { %v16616_v41 = vpop.f32.mrb[176].mxu1  ;;  %10438 = vmatprep.mubr.bf16.mxu0 %v26210_v48  ;;  %10578 = vmatpush1.bf16.msra.mxu0 %v19433_v63  ;;  %v26213_v48 = vld [vmem:[#allocation92_spill] sm:$0xff] }
 0x66b   : > { %v16617_v44 = vpop.f32.mrb[177].mxu1  ;;  %10579 = vmatprep.subr.bf16.mxu0 %v19438_v52  ;;  %v19445_v52 = vld [vmem:[%s25655_s1 + $0x1090] ss:$24 sps:$4 sm:$0xff]  }
 0x66c   : > { %v16618_v17 = vadd.f32 %v16617_v44, %v16616_v41  ;;  %v16619_v10 = vpop.f32.mrb[178].mxu1  ;;  %v19450_v41 = vld [vmem:[%s25655_s1 + $0x10c4] ss:$24 sps:$4 sm:$0xff]  }
 0x66d   : > { %v16620_v32 = vpop.f32.mrb[179].mxu1  ;;  %v26214_v44 = vld [vmem:[#allocation93_spill] sm:$0xff] }
 0x66e   : > { %v16621_v62 = vadd.f32 %v16620_v32, %v16619_v10  ;;  %10580 = vmatpush1.bf16.msra.mxu0 %v19436_v13  ;;  %v23805_v21 = vadd.f32 %v16618_v17, %v11983_v30  ;;  %v19453_v30 = vld [vmem:[%s25655_s1 + $0x10f4] ss:$24 sps:$4 sm:$0xff]   ;;  %v11999_v17 = vadd.f32 %v23589_v33, %v23620_v45 }
 0x66f   : > { %10581 = vmatprep.subr.bf16.mxu0 %v19441_v2 }
 0x670   : > { %v23810_v11 = vadd.f32 %v16621_v62, %v11986_v3  ;;  %v12002_v62 = vadd.f32 %v23591_v0, %v23620_v45  ;;  %v19454_v0 = vld [vmem:[%s25655_s1 + $0x1120] ss:$24 sps:$4 sm:$0xff]  }
 0x671   : > { %10439 = vmatmul.mubr.bf16.gmra.mrb[76].mxu0 %v26211_v12 }
 0x672   : > { %v16622_v28 = vpop.f32.mrb[180].mxu1  ;;  %10448 = vmatprep.mubr.bf16.mxu0 %v26212_v24  ;;  %10582 = vmatpush1.bf16.msra.mxu0 %v19439_v35  ;;  %v26215_v24 = vld [vmem:[#allocation94_spill] sm:$0xff] }
 0x673   : > { %v16623_v18 = vpop.f32.mrb[181].mxu1  ;;  %10583 = vmatprep.subr.bf16.mxu0 %v19444_v59  ;;  %v19451_v59 = vld [vmem:[%s25655_s1 + $0x10f0] ss:$24 sps:$4 sm:$0xff]  }
 0x674   : > { %v16624_v38 = vadd.f32 %v16623_v18, %v16622_v28  ;;  %v16625_v46 = vpop.f32.mrb[182].mxu1  ;;  %v19456_v28 = vld [vmem:[%s25655_s1 + $0x1124] ss:$24 sps:$4 sm:$0xff]   ;;  %v26216_v18 = vld [vmem:[#allocation95_spill] sm:$0xff] }
 0x675   : > { %v16626_v8 = vpop.f32.mrb[183].mxu1 }
 0x676   : > { %v16627_v63 = vadd.f32 %v16626_v8, %v16625_v46  ;;  %10584 = vmatpush1.bf16.msra.mxu0 %v19442_v16  ;;  %v23827_v57 = vadd.f32 %v16624_v38, %v11991_v19  ;;  %v19459_v19 = vld [vmem:[%s25655_s1 + $0x1154] ss:$24 sps:$4 sm:$0xff]   ;;  %v12007_v38 = vadd.f32 %v23607_v23, %v23620_v45 }
 0x677   : > { %10585 = vmatprep.subr.bf16.mxu0 %v19447_v40 }
 0x678   : > { %v23832_v54 = vadd.f32 %v16627_v63, %v11994_v47  ;;  %v12010_v63 = vadd.f32 %v23609_v37, %v23620_v45  ;;  %v19460_v37 = vld [vmem:[%s25655_s1 + $0x1180] ss:$24 sps:$4 sm:$0xff]   ;;  %v19465_v45 = vld [vmem:[%s25655_s1 + $0x11b4] ss:$24 sps:$4 sm:$0xff]  }
 0x679   : > { %10449 = vmatmul.mubr.bf16.gmra.mrb[80].mxu0 %v26213_v48  ;;  %v19457_v48 = vld [vmem:[%s25655_s1 + $0x1150] ss:$24 sps:$4 sm:$0xff]  }
 0x67a   : > { %v16628_v13 = vpop.f32.mrb[184].mxu1  ;;  %10458 = vmatprep.mubr.bf16.mxu0 %v26214_v44  ;;  %10586 = vmatpush1.bf16.msra.mxu0 %v19445_v52  ;;  %v26217_v44 = vld [vmem:[#allocation96_spill] sm:$0xff] }
 0x67b   : > { %v16629_v2 = vpop.f32.mrb[185].mxu1  ;;  %10587 = vmatprep.subr.bf16.mxu0 %v19450_v41 }
 0x67c   : > { %v16630_v10 = vadd.f32 %v16629_v2, %v16628_v13  ;;  %v16631_v32 = vpop.f32.mrb[186].mxu1  ;;  %v19462_v13 = vld [vmem:[%s25655_s1 + $0x1184] ss:$24 sps:$4 sm:$0xff]   ;;  %v19463_v2 = vld [vmem:[%s25655_s1 + $0x11b0] ss:$24 sps:$4 sm:$0xff]  }
 0x67d   : > { %v16632_v3 = vpop.f32.mrb[187].mxu1 }
 0x67e   : > { %v16633_v35 = vadd.f32 %v16632_v3, %v16631_v32  ;;  %10588 = vmatpush1.bf16.msra.mxu0 %v19448_v55  ;;  %v23849_v12 = vadd.f32 %v16630_v10, %v11999_v17  ;;  %v26218_v55 = vld [vmem:[#allocation97_spill] sm:$0xff]  ;;  %v26219_v17 = vld [vmem:[#allocation98_spill] sm:$0xff]  ;;  %v26220_v10 = vld [vmem:[#allocation99_spill] sm:$0xff] }
 0x67f   : > { %10589 = vmatprep.subr.bf16.mxu0 %v19453_v30  ;;  %v19468_v30 = vld [vmem:[%s25655_s1 + $0x11e4] ss:$24 sps:$4 sm:$0xff]   ;;  %v19466_v32 = vld [vmem:[%s25655_s1 + $0x11e0] ss:$24 sps:$4 sm:$0xff]   ;;  %v19471_v3 = vld [vmem:[%s25655_s1 + $0x1214] ss:$24 sps:$4 sm:$0xff]  }
 0x680   : > { %v23854_v33 = vadd.f32 %v16633_v35, %v12002_v62  ;;  %v26221_v62 = vld [vmem:[#allocation100_spill] sm:$0xff]  ;;  %v26222_v35 = vld [vmem:[#allocation101_spill] sm:$0xff] }
 0x681   : > { %10459 = vmatmul.mubr.bf16.gmra.mrb[84].mxu0 %v26215_v24  ;;  %v26225_v24 = vld [vmem:[#allocation104_spill] sm:$0xff] }
 0x682   : > { %v16634_v16 = vpop.f32.mrb[188].mxu1  ;;  %10468 = vmatprep.mubr.bf16.mxu0 %v26216_v18  ;;  %10590 = vmatpush1.bf16.msra.mxu0 %v19451_v59  ;;  %v26223_v59 = vld [vmem:[#allocation102_spill] sm:$0xff] }
 0x683   : > { %v16635_v40 = vpop.f32.mrb[189].mxu1  ;;  %10591 = vmatprep.subr.bf16.mxu0 %v19456_v28  ;;  %v26224_v28 = vld [vmem:[#allocation103_spill] sm:$0xff]  ;;  %v26227_v18 = vld [vmem:[#allocation106_spill] sm:$0xff] }
 0x684   : > { %v16636_v46 = vadd.f32 %v16635_v40, %v16634_v16  ;;  %v16637_v8 = vpop.f32.mrb[190].mxu1  ;;  %v26226_v16 = vld [vmem:[#allocation105_spill] sm:$0xff]  ;;  %v26229_v40 = vld [vmem:[#allocation108_spill] sm:$0xff] }
 0x685   : > { %v16638_v47 = vpop.f32.mrb[191].mxu1 }
 0x686   : > { %v23868_v52 = vadd.f32 %v16636_v46, %v12007_v38  ;;  %v16639_v41 = vadd.f32 %v16638_v47, %v16637_v8  ;;  %10592 = vmatpush1.bf16.msra.mxu0 %v19454_v0  ;;  %v26228_v0 = vld [vmem:[#allocation107_spill] sm:$0xff]  ;;  %v26231_v38 = vld [vmem:[#allocation110_spill] sm:$0xff]  ;;  %v26233_v8 = vld [vmem:[#allocation112_spill] sm:$0xff] }
 0x687   : > { %10593 = vmatprep.subr.bf16.mxu0 %v19459_v19  ;;  %v26230_v19 = vld [vmem:[#allocation109_spill] sm:$0xff]  ;;  %v26232_v46 = vld [vmem:[#allocation111_spill] sm:$0xff] }
 0x688   : > { %v23876_v23 = vadd.f32 %v16639_v41, %v12010_v63  ;;  %v26234_v47 = vld [vmem:[#allocation113_spill] sm:$0xff]  ;;  %v26235_v63 = vld [vmem:[#allocation114_spill] sm:$0xff]  ;;  %v26236_v41 = vld [vmem:[#allocation115_spill] sm:$0xff] }
 0x689   : > { %10469 = vmatmul.mubr.bf16.gmra.mrb[88].mxu0 %v26217_v44  ;;  %v26237_v44 = vld [vmem:[#allocation116_spill] sm:$0xff] }
 0x68a   : > { %10478 = vmatprep.mubr.bf16.mxu0 %v26218_v55  ;;  %10594 = vmatpush1.bf16.msra.mxu0 %v19457_v48  ;;  %v19469_v48 = vld [vmem:[%s25655_s1 + $0x1210] ss:$24 sps:$4 sm:$0xff]   ;;  %v26238_v55 = vld [vmem:[#allocation117_spill] sm:$0xff] }
 0x68b   : > { %10595 = vmatprep.subr.bf16.mxu0 %v19462_v13  ;;  %v19474_v13 = vld [vmem:[%s25655_s1 + $0x1244] ss:$24 sps:$4 sm:$0xff]  }
 0x68e   : > { %10596 = vmatpush1.bf16.msra.mxu0 %v19460_v37  ;;  %v19472_v37 = vld [vmem:[%s25655_s1 + $0x1240] ss:$24 sps:$4 sm:$0xff]  }
 0x68f   : > { %10597 = vmatprep.subr.bf16.mxu0 %v19465_v45  ;;  %v19477_v45 = vld [vmem:[%s25655_s1 + $0x1274] ss:$24 sps:$4 sm:$0xff]  }
 0x691   : > { %10479 = vmatmul.mubr.bf16.gmra.mrb[92].mxu0 %v26219_v17  ;;  %v26239_v17 = vld [vmem:[#allocation118_spill] sm:$0xff] }
 0x692   : > { %10488 = vmatprep.mubr.bf16.mxu0 %v26220_v10  ;;  %10598 = vmatpush1.bf16.msra.mxu0 %v19463_v2  ;;  %v19475_v2 = vld [vmem:[%s25655_s1 + $0x1270] ss:$24 sps:$4 sm:$0xff]  }
 0x693   : > { %10599 = vmatprep.subr.bf16.mxu0 %v19468_v30  ;;  %v19480_v30 = vld [vmem:[%s25655_s1 + $0x12a4] ss:$24 sps:$4 sm:$0xff]   ;;  %v26240_v10 = vld [vmem:[#allocation119_spill] sm:$0xff] }
 0x696   : > { %10600 = vmatpush1.bf16.msra.mxu0 %v19466_v32  ;;  %v19478_v32 = vld [vmem:[%s25655_s1 + $0x12a0] ss:$24 sps:$4 sm:$0xff]  }
 0x697   : > { %10762 = vmatprep.subr.bf16.mxu0 %v19471_v3  ;;  %v19483_v3 = vld [vmem:[%s25655_s1 + $0x12d4] ss:$24 sps:$4 sm:$0xff]  }
 0x699   : > { %10489 = vmatmul.mubr.bf16.gmra.mrb[96].mxu0 %v26221_v62  ;;  %v19481_v62 = vld [vmem:[%s25655_s1 + $0x12d0] ss:$24 sps:$4 sm:$0xff]  }
 0x69a   : > { %10498 = vmatprep.mubr.bf16.mxu0 %v26222_v35  ;;  %v19486_v35 = vld [vmem:[%s25655_s1 + $0x1304] ss:$24 sps:$4 sm:$0xff]  }
 0x6a1   : > { %10499 = vmatmul.mubr.bf16.gmra.mrb[100].mxu0 %v26223_v59  ;;  %v26241_v59 = vld [vmem:[#allocation120_spill] sm:$0xff] }
 0x6a2   : > { %10508 = vmatprep.mubr.bf16.mxu0 %v26224_v28  ;;  %v26242_v28 = vld [vmem:[#allocation121_spill] sm:$0xff] }
 0x6a9   : > { %10509 = vmatmul.mubr.bf16.gmra.mrb[104].mxu0 %v26225_v24  ;;  %v19484_v24 = vld [vmem:[%s25655_s1 + $0x1300] ss:$24 sps:$4 sm:$0xff]  }
 0x6aa   : > { %10518 = vmatprep.mubr.bf16.mxu0 %v26226_v16  ;;  %v19489_v16 = vld [vmem:[%s25655_s1 + $0x1334] ss:$24 sps:$4 sm:$0xff]  }
 0x6b1   : > { %10519 = vmatmul.mubr.bf16.gmra.mrb[108].mxu0 %v26227_v18  ;;  %v19487_v18 = vld [vmem:[%s25655_s1 + $0x1330] ss:$24 sps:$4 sm:$0xff]  }
 0x6b2   : > { %10528 = vmatprep.mubr.bf16.mxu0 %v26228_v0  ;;  %v19492_v0 = vld [vmem:[%s25655_s1 + $0x1364] ss:$24 sps:$4 sm:$0xff]  }
 0x6b9   : > { %10529 = vmatmul.mubr.bf16.gmra.mrb[112].mxu0 %v26229_v40  ;;  %v26243_v40 = vld [vmem:[#allocation122_spill] sm:$0xff] }
 0x6ba   : > { %10538 = vmatprep.mubr.bf16.mxu0 %v26230_v19  ;;  %v26244_v19 = vld [vmem:[#allocation123_spill] sm:$0xff] }
 0x6c1   : > { %10539 = vmatmul.mubr.bf16.gmra.mrb[116].mxu0 %v26231_v38  ;;  %v19490_v38 = vld [vmem:[%s25655_s1 + $0x1360] ss:$24 sps:$4 sm:$0xff]  }
 0x6c2   : > { %10548 = vmatprep.mubr.bf16.mxu0 %v26232_v46  ;;  %v19495_v46 = vld [vmem:[%s25655_s1 + $0x1394] ss:$24 sps:$4 sm:$0xff]  }
 0x6c9   : > { %10549 = vmatmul.mubr.bf16.gmra.mrb[120].mxu0 %v26233_v8  ;;  %v19493_v8 = vld [vmem:[%s25655_s1 + $0x1390] ss:$24 sps:$4 sm:$0xff]  }
 0x6ca   : > { %10558 = vmatprep.mubr.bf16.mxu0 %v26234_v47  ;;  %v19498_v47 = vld [vmem:[%s25655_s1 + $0x13c4] ss:$24 sps:$4 sm:$0xff]  }
 0x6d1   : > { %10559 = vmatmul.mubr.bf16.gmra.mrb[124].mxu0 %v26235_v63  ;;  %v26245_v63 = vld [vmem:[#allocation124_spill] sm:$0xff] }
 0x6d2   : > { %10601 = vmatprep.mubr.bf16.mxu0 %v26236_v41  ;;  %v26246_v41 = vld [vmem:[#allocation125_spill] sm:$0xff] }
 0x6d9   : > { %10602 = vmatmul.mubr.bf16.vlgmr.msra.gmra.mrb[64].mxu0 %v26237_v44  ;;  %v19499_v44 = vld [vmem:[%s25655_s1 + $0x13f0] ss:$24 sps:$4 sm:$0xff]  }
 0x6da   : > { %10611 = vmatprep.mubr.bf16.mxu0 %v26238_v55  ;;  %10763 = vmatpush1.bf16.msra.mxu0 %v19469_v48  ;;  %v19496_v48 = vld [vmem:[%s25655_s1 + $0x13c0] ss:$24 sps:$4 sm:$0xff]   ;;  %v19504_v55 = vld [vmem:[%s25655_s1 + $0x1424] ss:$24 sps:$4 sm:$0xff]  }
 0x6db   : > { %10764 = vmatprep.subr.bf16.mxu0 %v19474_v13  ;;  %v19501_v13 = vld [vmem:[%s25655_s1 + $0x13f4] ss:$24 sps:$4 sm:$0xff]  }
 0x6de   : > { %10765 = vmatpush1.bf16.msra.mxu0 %v19472_v37  ;;  %v26247_v37 = vld [vmem:[#allocation126_spill] sm:$0xff] }
 0x6df   : > { %10766 = vmatprep.subr.bf16.mxu0 %v19477_v45  ;;  %v26248_v45 = vld [vmem:[#allocation127_spill] sm:$0xff] }
 0x6e1   : > { %10612 = vmatmul.mubr.bf16.gmra.mrb[68].mxu0 %v26239_v17  ;;  %v19505_v17 = vld [vmem:[%s25655_s1 + $0x1450] ss:$24 sps:$4 sm:$0xff]  }
 0x6e2   : > { %10621 = vmatprep.mubr.bf16.mxu0 %v26240_v10  ;;  %10767 = vmatpush1.bf16.msra.mxu0 %v19475_v2  ;;  %v19502_v2 = vld [vmem:[%s25655_s1 + $0x1420] ss:$24 sps:$4 sm:$0xff]   ;;  %v19510_v10 = vld [vmem:[%s25655_s1 + $0x1484] ss:$24 sps:$4 sm:$0xff]  }
 0x6e3   : > { %10768 = vmatprep.subr.bf16.mxu0 %v19480_v30  ;;  %v19507_v30 = vld [vmem:[%s25655_s1 + $0x1454] ss:$24 sps:$4 sm:$0xff]  }
 0x6e6   : > { %10769 = vmatpush1.bf16.msra.mxu0 %v19478_v32  ;;  %v26249_v32 = vld [vmem:[#allocation128_spill] sm:$0xff] }
 0x6e7   : > { %10770 = vmatprep.subr.bf16.mxu0 %v19483_v3  ;;  %v26250_v3 = vld [vmem:[#allocation129_spill] sm:$0xff] }
 0x6e9   : > { %10622 = vmatmul.mubr.bf16.gmra.mrb[72].mxu0 %v26241_v59  ;;  %v19511_v59 = vld [vmem:[%s25655_s1 + $0x14b0] ss:$24 sps:$4 sm:$0xff]  }
 0x6ea   : > { %10631 = vmatprep.mubr.bf16.mxu0 %v26242_v28  ;;  %10771 = vmatpush1.bf16.msra.mxu0 %v19481_v62  ;;  %v19508_v62 = vld [vmem:[%s25655_s1 + $0x1480] ss:$24 sps:$4 sm:$0xff]   ;;  %v19516_v28 = vld [vmem:[%s25655_s1 + $0x14e4] ss:$24 sps:$4 sm:$0xff]  }
 0x6eb   : > { %10772 = vmatprep.subr.bf16.mxu0 %v19486_v35  ;;  %v19513_v35 = vld [vmem:[%s25655_s1 + $0x14b4] ss:$24 sps:$4 sm:$0xff]  }
 0x6ee   : > { %10773 = vmatpush1.bf16.msra.mxu0 %v19484_v24  ;;  %v26251_v24 = vld [vmem:[#allocation130_spill] sm:$0xff] }
 0x6ef   : > { %10774 = vmatprep.subr.bf16.mxu0 %v19489_v16  ;;  %v26252_v16 = vld [vmem:[#allocation131_spill] sm:$0xff] }
 0x6f1   : > { %10632 = vmatmul.mubr.bf16.gmra.mrb[76].mxu0 %v26243_v40  ;;  %v26253_v40 = vld [vmem:[#allocation132_spill] sm:$0xff] }
 0x6f2   : > { %10641 = vmatprep.mubr.bf16.mxu0 %v26244_v19  ;;  %10775 = vmatpush1.bf16.msra.mxu0 %v19487_v18  ;;  %v19514_v18 = vld [vmem:[%s25655_s1 + $0x14e0] ss:$24 sps:$4 sm:$0xff]  }
 0x6f3   : > { %10776 = vmatprep.subr.bf16.mxu0 %v19492_v0  ;;  %v19519_v0 = vld [vmem:[%s25655_s1 + $0x1514] ss:$24 sps:$4 sm:$0xff]   ;;  %v26254_v19 = vld [vmem:[#allocation133_spill] sm:$0xff] }
 0x6f6   : > { %10777 = vmatpush1.bf16.msra.mxu0 %v19490_v38  ;;  %v26255_v38 = vld [vmem:[#allocation134_spill] sm:$0xff] }
 0x6f7   : > { %10778 = vmatprep.subr.bf16.mxu0 %v19495_v46  ;;  %v26256_v46 = vld [vmem:[#allocation135_spill] sm:$0xff] }
 0x6f9   : > { %10642 = vmatmul.mubr.bf16.gmra.mrb[80].mxu0 %v26245_v63  ;;  %v26259_v63 = vld [vmem:[#allocation138_spill] sm:$0xff] }
 0x6fa   : > { %10651 = vmatprep.mubr.bf16.mxu0 %v26246_v41  ;;  %10779 = vmatpush1.bf16.msra.mxu0 %v19493_v8  ;;  %v26257_v8 = vld [vmem:[#allocation136_spill] sm:$0xff]  ;;  %v26260_v41 = vld [vmem:[#allocation139_spill] sm:$0xff] }
 0x6fb   : > { %10780 = vmatprep.subr.bf16.mxu0 %v19498_v47  ;;  %v26258_v47 = vld [vmem:[#allocation137_spill] sm:$0xff] }
 0x6fe   : > { %10781 = vmatpush1.bf16.msra.mxu0 %v19496_v48  ;;  %v26261_v48 = vld [vmem:[#allocation140_spill] sm:$0xff] }
 0x6ff   : > { %10782 = vmatprep.subr.bf16.mxu0 %v19501_v13  ;;  %v26262_v13 = vld [vmem:[#allocation141_spill] sm:$0xff] }
 0x701   : > { %10652 = vmatmul.mubr.bf16.gmra.mrb[84].mxu0 %v26247_v37  ;;  %v26265_v37 = vld [vmem:[#allocation144_spill] sm:$0xff] }
 0x702   : > { %10661 = vmatprep.mubr.bf16.mxu0 %v26248_v45  ;;  %10783 = vmatpush1.bf16.msra.mxu0 %v19499_v44  ;;  %v26263_v44 = vld [vmem:[#allocation142_spill] sm:$0xff]  ;;  %v26266_v45 = vld [vmem:[#allocation145_spill] sm:$0xff] }
 0x703   : > { %10784 = vmatprep.subr.bf16.mxu0 %v19504_v55  ;;  %v26264_v55 = vld [vmem:[#allocation143_spill] sm:$0xff] }
 0x706   : > { %10785 = vmatpush1.bf16.msra.mxu0 %v19502_v2  ;;  %v26267_v2 = vld [vmem:[#allocation146_spill] sm:$0xff] }
 0x707   : > { %10786 = vmatprep.subr.bf16.mxu0 %v19507_v30  ;;  %v26268_v30 = vld [vmem:[#allocation147_spill] sm:$0xff] }
 0x709   : > { %10662 = vmatmul.mubr.bf16.gmra.mrb[88].mxu0 %v26249_v32  ;;  %v26269_v32 = vld [vmem:[#allocation148_spill] sm:$0xff] }
 0x70a   : > { %10671 = vmatprep.mubr.bf16.mxu0 %v26250_v3  ;;  %10787 = vmatpush1.bf16.msra.mxu0 %v19505_v17  ;;  %v19517_v17 = vld [vmem:[%s25655_s1 + $0x1510] ss:$24 sps:$4 sm:$0xff]   ;;  %v26270_v3 = vld [vmem:[#allocation149_spill] sm:$0xff] }
 0x70b   : > { %10788 = vmatprep.subr.bf16.mxu0 %v19510_v10  ;;  %v19522_v10 = vld [vmem:[%s25655_s1 + $0x1544] ss:$24 sps:$4 sm:$0xff]  }
 0x70e   : > { %10789 = vmatpush1.bf16.msra.mxu0 %v19508_v62  ;;  %v19520_v62 = vld [vmem:[%s25655_s1 + $0x1540] ss:$24 sps:$4 sm:$0xff]  }
 0x70f   : > { %10790 = vmatprep.subr.bf16.mxu0 %v19513_v35  ;;  %v19525_v35 = vld [vmem:[%s25655_s1 + $0x1574] ss:$24 sps:$4 sm:$0xff]  }
 0x711   : > { %10672 = vmatmul.mubr.bf16.gmra.mrb[92].mxu0 %v26251_v24  ;;  %v26271_v24 = vld [vmem:[#allocation150_spill] sm:$0xff] }
 0x712   : > { %10681 = vmatprep.mubr.bf16.mxu0 %v26252_v16  ;;  %10791 = vmatpush1.bf16.msra.mxu0 %v19511_v59  ;;  %v19523_v59 = vld [vmem:[%s25655_s1 + $0x1570] ss:$24 sps:$4 sm:$0xff]  }
 0x713   : > { %10792 = vmatprep.subr.bf16.mxu0 %v19516_v28  ;;  %v19528_v28 = vld [vmem:[%s25655_s1 + $0x15a4] ss:$24 sps:$4 sm:$0xff]   ;;  %v26272_v16 = vld [vmem:[#allocation151_spill] sm:$0xff] }
 0x716   : > { %10793 = vmatpush1.bf16.msra.mxu0 %v19514_v18  ;;  %v19526_v18 = vld [vmem:[%s25655_s1 + $0x15a0] ss:$24 sps:$4 sm:$0xff]  }
 0x717   : > { %10955 = vmatprep.subr.bf16.mxu0 %v19519_v0  ;;  %v19531_v0 = vld [vmem:[%s25655_s1 + $0x15d4] ss:$24 sps:$4 sm:$0xff]  }
 0x719   : > { %10682 = vmatmul.mubr.bf16.gmra.mrb[96].mxu0 %v26253_v40  ;;  %v19529_v40 = vld [vmem:[%s25655_s1 + $0x15d0] ss:$24 sps:$4 sm:$0xff]  }
 0x71a   : > { %10691 = vmatprep.mubr.bf16.mxu0 %v26254_v19  ;;  %v19534_v19 = vld [vmem:[%s25655_s1 + $0x1604] ss:$24 sps:$4 sm:$0xff]  }
 0x721   : > { %10692 = vmatmul.mubr.bf16.gmra.mrb[100].mxu0 %v26255_v38  ;;  %v26273_v38 = vld [vmem:[#allocation152_spill] sm:$0xff] }
 0x722   : > { %10701 = vmatprep.mubr.bf16.mxu0 %v26256_v46  ;;  %v26274_v46 = vld [vmem:[#allocation153_spill] sm:$0xff] }
 0x729   : > { %10702 = vmatmul.mubr.bf16.gmra.mrb[104].mxu0 %v26257_v8  ;;  %v19532_v8 = vld [vmem:[%s25655_s1 + $0x1600] ss:$24 sps:$4 sm:$0xff]  }
 0x72a   : > { %10711 = vmatprep.mubr.bf16.mxu0 %v26258_v47  ;;  %v19537_v47 = vld [vmem:[%s25655_s1 + $0x1634] ss:$24 sps:$4 sm:$0xff]  }
 0x731   : > { %10712 = vmatmul.mubr.bf16.gmra.mrb[108].mxu0 %v26259_v63  ;;  %v19535_v63 = vld [vmem:[%s25655_s1 + $0x1630] ss:$24 sps:$4 sm:$0xff]  }
 0x732   : > { %10721 = vmatprep.mubr.bf16.mxu0 %v26260_v41  ;;  %v19540_v41 = vld [vmem:[%s25655_s1 + $0x1664] ss:$24 sps:$4 sm:$0xff]  }
 0x739   : > { %10722 = vmatmul.mubr.bf16.gmra.mrb[112].mxu0 %v26261_v48  ;;  %v26275_v48 = vld [vmem:[#allocation154_spill] sm:$0xff] }
 0x73a   : > { %10731 = vmatprep.mubr.bf16.mxu0 %v26262_v13  ;;  %v26276_v13 = vld [vmem:[#allocation155_spill] sm:$0xff] }
 0x741   : > { %10732 = vmatmul.mubr.bf16.gmra.mrb[116].mxu0 %v26263_v44  ;;  %v19538_v44 = vld [vmem:[%s25655_s1 + $0x1660] ss:$24 sps:$4 sm:$0xff]  }
 0x742   : > { %10741 = vmatprep.mubr.bf16.mxu0 %v26264_v55  ;;  %v19543_v55 = vld [vmem:[%s25655_s1 + $0x1694] ss:$24 sps:$4 sm:$0xff]  }
 0x749   : > { %10742 = vmatmul.mubr.bf16.gmra.mrb[120].mxu0 %v26265_v37  ;;  %v19541_v37 = vld [vmem:[%s25655_s1 + $0x1690] ss:$24 sps:$4 sm:$0xff]  }
 0x74a   : > { %10751 = vmatprep.mubr.bf16.mxu0 %v26266_v45  ;;  %v19546_v45 = vld [vmem:[%s25655_s1 + $0x16c4] ss:$24 sps:$4 sm:$0xff]  }
 0x751   : > { %10752 = vmatmul.mubr.bf16.gmra.mrb[124].mxu0 %v26267_v2  ;;  %v26277_v2 = vld [vmem:[#allocation156_spill] sm:$0xff] }
 0x752   : > { %10794 = vmatprep.mubr.bf16.mxu0 %v26268_v30  ;;  %v26278_v30 = vld [vmem:[#allocation157_spill] sm:$0xff] }
 0x759   : > { %10795 = vmatmul.mubr.bf16.vlgmr.msra.gmra.mrb[64].mxu0 %v26269_v32  ;;  %v19547_v32 = vld [vmem:[%s25655_s1 + $0x16f0] ss:$24 sps:$4 sm:$0xff]  }
 0x75a   : > { %10804 = vmatprep.mubr.bf16.mxu0 %v26270_v3  ;;  %10956 = vmatpush1.bf16.msra.mxu0 %v19517_v17  ;;  %v19544_v17 = vld [vmem:[%s25655_s1 + $0x16c0] ss:$24 sps:$4 sm:$0xff]   ;;  %v19552_v3 = vld [vmem:[%s25655_s1 + $0x1724] ss:$24 sps:$4 sm:$0xff]  }
 0x75b   : > { %10957 = vmatprep.subr.bf16.mxu0 %v19522_v10  ;;  %v19549_v10 = vld [vmem:[%s25655_s1 + $0x16f4] ss:$24 sps:$4 sm:$0xff]  }
 0x75e   : > { %10958 = vmatpush1.bf16.msra.mxu0 %v19520_v62  ;;  %v26279_v62 = vld [vmem:[#allocation158_spill] sm:$0xff] }
 0x75f   : > { %10959 = vmatprep.subr.bf16.mxu0 %v19525_v35  ;;  %v26280_v35 = vld [vmem:[#allocation159_spill] sm:$0xff] }
 0x761   : > { %10805 = vmatmul.mubr.bf16.gmra.mrb[68].mxu0 %v26271_v24  ;;  %v19553_v24 = vld [vmem:[%s25655_s1 + $0x1750] ss:$24 sps:$4 sm:$0xff]  }
 0x762   : > { %10814 = vmatprep.mubr.bf16.mxu0 %v26272_v16  ;;  %10960 = vmatpush1.bf16.msra.mxu0 %v19523_v59  ;;  %v19550_v59 = vld [vmem:[%s25655_s1 + $0x1720] ss:$24 sps:$4 sm:$0xff]   ;;  %v19558_v16 = vld [vmem:[%s25655_s1 + $0x1784] ss:$24 sps:$4 sm:$0xff]  }
 0x763   : > { %10961 = vmatprep.subr.bf16.mxu0 %v19528_v28  ;;  %v19555_v28 = vld [vmem:[%s25655_s1 + $0x1754] ss:$24 sps:$4 sm:$0xff]  }
 0x766   : > { %10962 = vmatpush1.bf16.msra.mxu0 %v19526_v18  ;;  %v26281_v18 = vld [vmem:[#allocation160_spill] sm:$0xff] }
 0x767   : > { %10963 = vmatprep.subr.bf16.mxu0 %v19531_v0  ;;  %v26282_v0 = vld [vmem:[#allocation161_spill] sm:$0xff] }
 0x769   : > { %10815 = vmatmul.mubr.bf16.gmra.mrb[72].mxu0 %v26273_v38  ;;  %v19559_v38 = vld [vmem:[%s25655_s1 + $0x17b0] ss:$24 sps:$4 sm:$0xff]  }
 0x76a   : > { %10824 = vmatprep.mubr.bf16.mxu0 %v26274_v46  ;;  %10964 = vmatpush1.bf16.msra.mxu0 %v19529_v40  ;;  %v19556_v40 = vld [vmem:[%s25655_s1 + $0x1780] ss:$24 sps:$4 sm:$0xff]   ;;  %v19564_v46 = vld [vmem:[%s25655_s1 + $0x17e4] ss:$24 sps:$4 sm:$0xff]  }
 0x76b   : > { %10965 = vmatprep.subr.bf16.mxu0 %v19534_v19  ;;  %v19561_v19 = vld [vmem:[%s25655_s1 + $0x17b4] ss:$24 sps:$4 sm:$0xff]  }
 0x76e   : > { %10966 = vmatpush1.bf16.msra.mxu0 %v19532_v8  ;;  %v26283_v8 = vld [vmem:[#allocation162_spill] sm:$0xff] }
 0x76f   : > { %10967 = vmatprep.subr.bf16.mxu0 %v19537_v47  ;;  %v19562_v47 = vld [vmem:[%s25655_s1 + $0x17e0] ss:$24 sps:$4 sm:$0xff]  }
 0x771   : > { %10825 = vmatmul.mubr.bf16.gmra.mrb[76].mxu0 %v26275_v48  ;;  %v26286_v48 = vld [vmem:[#allocation165_spill] sm:$0xff] }
 0x772   : > { %10834 = vmatprep.mubr.bf16.mxu0 %v26276_v13  ;;  %10968 = vmatpush1.bf16.msra.mxu0 %v19535_v63  ;;  %v26284_v63 = vld [vmem:[#allocation163_spill] sm:$0xff]  ;;  %v26287_v13 = vld [vmem:[#allocation166_spill] sm:$0xff] }
 0x773   : > { %10969 = vmatprep.subr.bf16.mxu0 %v19540_v41  ;;  %v26285_v41 = vld [vmem:[#allocation164_spill] sm:$0xff] }
 0x776   : > { %10970 = vmatpush1.bf16.msra.mxu0 %v19538_v44  ;;  %v26288_v44 = vld [vmem:[#allocation167_spill] sm:$0xff] }
 0x777   : > { %10971 = vmatprep.subr.bf16.mxu0 %v19543_v55  ;;  %v26289_v55 = vld [vmem:[#allocation168_spill] sm:$0xff] }
 0x779   : > { %10835 = vmatmul.mubr.bf16.gmra.mrb[80].mxu0 %v26277_v2  ;;  %v26293_v2 = vld [vmem:[#allocation172_spill] sm:$0xff] }
 0x77a   : > { %10844 = vmatprep.mubr.bf16.mxu0 %v26278_v30  ;;  %10972 = vmatpush1.bf16.msra.mxu0 %v19541_v37  ;;  %v26291_v37 = vld [vmem:[#allocation170_spill] sm:$0xff]  ;;  %v26294_v30 = vld [vmem:[#allocation173_spill] sm:$0xff] }
 0x77b   : > { %10973 = vmatprep.subr.bf16.mxu0 %v19546_v45  ;;  %v26292_v45 = vld [vmem:[#allocation171_spill] sm:$0xff] }
 0x77e   : > { %10974 = vmatpush1.bf16.msra.mxu0 %v19544_v17  ;;  %v26295_v17 = vld [vmem:[#allocation174_spill] sm:$0xff] }
 0x77f   : > { %10975 = vmatprep.subr.bf16.mxu0 %v19549_v10  ;;  %v26296_v10 = vld [vmem:[#allocation175_spill] sm:$0xff] }
 0x781   : > { %10845 = vmatmul.mubr.bf16.gmra.mrb[84].mxu0 %v26279_v62  ;;  %v19565_v62 = vld [vmem:[%s25657_s3 + $0x100] sm:$0xff]  }
 0x782   : > { %10854 = vmatprep.mubr.bf16.mxu0 %v26280_v35  ;;  %10976 = vmatpush1.bf16.msra.mxu0 %v19547_v32  ;;  %v26297_v32 = vld [vmem:[#allocation176_spill] sm:$0xff]  ;;  %v26299_v35 = vld [vmem:[#allocation178_spill] sm:$0xff] }
 0x783   : > { %10977 = vmatprep.subr.bf16.mxu0 %v19552_v3  ;;  %v26298_v3 = vld [vmem:[#allocation177_spill] sm:$0xff] }
 0x786   : > { %10978 = vmatpush1.bf16.msra.mxu0 %v19550_v59  ;;  %v19709_v59 = vmov 0  }
 0x787   : > { %10979 = vmatprep.subr.bf16.mxu0 %v19555_v28  ;;  %12174 = vmatprep.subr.bf16.mxu1 %v19709_v59  ;;  %v19566_v28 = vld [vmem:[%s25657_s3 + $0x108] sm:$0xff]  }
 0x788   : > { %12175 = vmatpush1.bf16.msra.mxu1 %v19565_v62  ;;  %18380 = vset.pattern.permute.xlu1 %v19709_v59  ;;  %v26317_v62 = vld [vmem:[#allocation196_spill] sm:$0xff] }
 0x789   : > { %10855 = vmatmul.mubr.bf16.gmra.mrb[88].mxu0 %v26281_v18  ;;  %12176 = vmatprep.subr.bf16.mxu1 %v19709_v59  ;;  %v26301_v18 = vld [vmem:[#allocation180_spill] sm:$0xff] }
 0x78a   : > { %10864 = vmatprep.mubr.bf16.mxu0 %v26282_v0  ;;  %10980 = vmatpush1.bf16.msra.mxu0 %v19553_v24  ;;  %v19567_v24 = vld [vmem:[%s25657_s3 + $0x110] sm:$0xff]   ;;  %v19568_v0 = vld [vmem:[%s25657_s3 + $0x118] sm:$0xff]  }
 0x78b   : > { %10981 = vmatprep.subr.bf16.mxu0 %v19558_v16  ;;  %18379 = vset.pattern.permute.xlu0 %v19709_v59  ;;  %v26300_v16 = vld [vmem:[#allocation179_spill] sm:$0xff] }
 0x78c   : > { %12177 = vmatpush1.bf16.msra.mxu1 %v19566_v28  ;;  %v26319_v28 = vld [vmem:[#allocation198_spill] sm:$0xff] }
 0x78d   : > { %12178 = vmatprep.subr.bf16.mxu1 %v19709_v59 }
 0x78e   : > { %10982 = vmatpush1.bf16.msra.mxu0 %v19556_v40  ;;  %v19569_v40 = vld [vmem:[%s25657_s3 + $0x120] sm:$0xff]  }
 0x78f   : > { %10983 = vmatprep.subr.bf16.mxu0 %v19561_v19  ;;  %v26302_v19 = vld [vmem:[#allocation181_spill] sm:$0xff] }
 0x790   : > { %12179 = vmatpush1.bf16.msra.mxu1 %v19567_v24  ;;  %v26320_v24 = vld [vmem:[#allocation199_spill] sm:$0xff] }
 0x791   : > { %10865 = vmatmul.mubr.bf16.gmra.mrb[92].mxu0 %v26283_v8  ;;  %12180 = vmatprep.subr.bf16.mxu1 %v19709_v59  ;;  %v19571_v8 = vld [vmem:[%s25657_s3 + $0x130] sm:$0xff]  }
 0x792   : > { %10874 = vmatprep.mubr.bf16.mxu0 %v22381_v36  ;;  %10984 = vmatpush1.bf16.msra.mxu0 %v19559_v38  ;;  %v26290_v36 = vld [vmem:[#allocation169_spill] sm:$0xff]  ;;  %v26303_v38 = vld [vmem:[#allocation182_spill] sm:$0xff] }
 0x793   : > { %10985 = vmatprep.subr.bf16.mxu0 %v19564_v46  ;;  %v19570_v46 = vld [vmem:[%s25657_s3 + $0x128] sm:$0xff]  }
 0x794   : > { %12181 = vmatpush1.bf16.msra.mxu1 %v19568_v0  ;;  %v26322_v0 = vld [vmem:[#allocation201_spill] sm:$0xff] }
 0x795   : > { %12182 = vmatprep.subr.bf16.mxu1 %v19709_v59 }
 0x796   : > { %10986 = vmatpush1.bf16.msra.mxu0 %v19562_v47  ;;  %v26304_v47 = vld [vmem:[#allocation183_spill] sm:$0xff] }
 0x798   : > { %12183 = vmatpush1.bf16.msra.mxu1 %v19569_v40  ;;  %v19577_v40 = vld [vmem:[%s25657_s3 + $0x160] sm:$0xff]  }
 0x799   : > { %10875 = vmatmul.mubr.bf16.gmra.mrb[96].mxu0 %v26284_v63  ;;  %12184 = vmatprep.subr.bf16.mxu1 %v19709_v59  ;;  %v26305_v63 = vld [vmem:[#allocation184_spill] sm:$0xff] }
 0x79a   : > { %10884 = vmatprep.mubr.bf16.mxu0 %v26285_v41  ;;  %v19572_v41 = vld [vmem:[%s25657_s3 + $0x138] sm:$0xff]  }
 0x79c   : > { %12185 = vmatpush1.bf16.msra.mxu1 %v19570_v46  ;;  %v26325_v46 = vld [vmem:[#allocation204_spill] sm:$0xff] }
 0x79d   : > { %12186 = vmatprep.subr.bf16.mxu1 %v19709_v59 }
 0x7a0   : > { %12187 = vmatpush1.bf16.msra.mxu1 %v19571_v8  ;;  %v26326_v8 = vld [vmem:[#allocation205_spill] sm:$0xff] }
 0x7a1   : > { %10885 = vmatmul.mubr.bf16.gmra.mrb[100].mxu0 %v26286_v48  ;;  %12188 = vmatprep.subr.bf16.mxu1 %v19709_v59  ;;  %v19573_v48 = vld [vmem:[%s25657_s3 + $0x140] sm:$0xff]  }
 0x7a2   : > { %10894 = vmatprep.mubr.bf16.mxu0 %v26287_v13  ;;  %v26306_v13 = vld [vmem:[#allocation185_spill] sm:$0xff] }
 0x7a4   : > { %12189 = vmatpush1.bf16.msra.mxu1 %v19572_v41 }
 0x7a5   : > { %12190 = vmatprep.subr.bf16.mxu1 %v19709_v59 }
 0x7a8   : > { %12191 = vmatpush1.bf16.msra.mxu1 %v19573_v48  ;;  %v19642_v48 = vld [vmem:[%s25656_s2] sm:$0x3f] }
 0x7a9   : > { %10895 = vmatmul.mubr.bf16.gmra.mrb[104].mxu0 %v26288_v44  ;;  %v26307_v44 = vld [vmem:[#allocation186_spill] sm:$0xff]  ;;  %12192 = vmatprep.subr.bf16.mxu1 %v19709_v59 }
 0x7aa   : > { %10904 = vmatprep.mubr.bf16.mxu0 %v26289_v55  ;;  %v19574_v55 = vld [vmem:[%s25657_s3 + $0x148] sm:$0xff]  }
 0x7ac   : > { %12193 = vmatpush1.bf16.msra.mxu1 %v19574_v55 }
 0x7ad   : > { %12194 = vmatprep.subr.bf16.mxu1 %v19709_v59 }
 0x7b1   : > { %10905 = vmatmul.mubr.bf16.gmra.mrb[108].mxu0 %v26290_v36  ;;  %v26308_v36 = vld [vmem:[#allocation187_spill] sm:$0xff] }
 0x7b2   : > { %10914 = vmatprep.mubr.bf16.mxu0 %v26291_v37  ;;  %v26309_v37 = vld [vmem:[#allocation188_spill] sm:$0xff] }
 0x7b9   : > { %10915 = vmatmul.mubr.bf16.gmra.mrb[112].mxu0 %v26292_v45  ;;  %v26310_v45 = vld [vmem:[#allocation189_spill] sm:$0xff] }
 0x7ba   : > { %10924 = vmatprep.mubr.bf16.mxu0 %v26293_v2  ;;  %v26311_v2 = vld [vmem:[#allocation190_spill] sm:$0xff] }
 0x7c1   : > { %10925 = vmatmul.mubr.bf16.gmra.mrb[116].mxu0 %v26294_v30  ;;  %v26312_v30 = vld [vmem:[#allocation191_spill] sm:$0xff] }
 0x7c2   : > { %10934 = vmatprep.mubr.bf16.mxu0 %v26295_v17  ;;  %v26313_v17 = vld [vmem:[#allocation192_spill] sm:$0xff] }
 0x7c9   : > { %10935 = vmatmul.mubr.bf16.gmra.mrb[120].mxu0 %v26296_v10  ;;  %v26314_v10 = vld [vmem:[#allocation193_spill] sm:$0xff] }
 0x7ca   : > { %10944 = vmatprep.mubr.bf16.mxu0 %v26297_v32  ;;  %v26315_v32 = vld [vmem:[#allocation194_spill] sm:$0xff] }
 0x7d1   : > { %10945 = vmatmul.mubr.bf16.gmra.mrb[124].mxu0 %v26298_v3  ;;  %v26316_v3 = vld [vmem:[#allocation195_spill] sm:$0xff] }
 0x7d2   : > { %10987 = vmatprep.mubr.bf16.mxu0 %v26299_v35  ;;  %v26318_v35 = vld [vmem:[#allocation197_spill] sm:$0xff] }
 0x7d9   : > { %10988 = vmatmul.mubr.bf16.vlgmr.msra.gmra.mrb[64].mxu0 %v26300_v16  ;;  %v19575_v16 = vld [vmem:[%s25657_s3 + $0x150] sm:$0xff]  }
 0x7da   : > { %10997 = vmatprep.mubr.bf16.mxu0 %v26301_v18  ;;  %12195 = vmatpush1.bf16.msra.mxu1 %v19575_v16  ;;  %v19576_v18 = vld [vmem:[%s25657_s3 + $0x158] sm:$0xff]  }
 0x7db   : > { %12196 = vmatprep.subr.bf16.mxu1 %v19709_v59 }
 0x7de   : > { %12197 = vmatpush1.bf16.msra.mxu1 %v19576_v18 }
 0x7df   : > { %12198 = vmatprep.subr.bf16.mxu1 %v19709_v59  ;;  %v26327_v59 = vld [vmem:[#allocation206_spill] sm:$0xff] }
 0x7e1   : > { %10998 = vmatmul.mubr.bf16.gmra.mrb[68].mxu0 %v26302_v19  ;;  %v26323_v19 = vld [vmem:[#allocation202_spill] sm:$0xff] }
 0x7e2   : > { %11007 = vmatprep.mubr.bf16.mxu0 %v26303_v38  ;;  %12199 = vmatpush1.bf16.msra.mxu1 %v19577_v40  ;;  %v26324_v38 = vld [vmem:[#allocation203_spill] sm:$0xff] }
 0x7e9   : > { %11008 = vmatmul.mubr.bf16.gmra.mrb[72].mxu0 %v26304_v47  ;;  %v26328_v47 = vld [vmem:[#allocation207_spill] sm:$0xff] }
 0x7ea   : > { %11017 = vmatprep.mubr.bf16.mxu0 %v26305_v63  ;;  %v1384_v63 = vsub.s32 4, %v26328_v47  ;;  %v1388_v41 = vsub.s32 5, %v26328_v47 }
 0x7f1   : > { %11018 = vmatmul.mubr.bf16.gmra.mrb[76].mxu0 %v26306_v13  ;;  %v24244_v13 = vrot.slane %v19642_v48, %v1384_v63 }
 0x7f2   : > { %11027 = vmatprep.mubr.bf16.mxu0 %v26307_v44 }
 0x7f9   : > { %11028 = vmatmul.mubr.bf16.gmra.mrb[80].mxu0 %v26308_v36 }
 0x7fa   : > { %11037 = vmatprep.mubr.bf16.mxu0 %v26309_v37 }
 0x801   : > { %11038 = vmatmul.mubr.bf16.gmra.mrb[84].mxu0 %v26310_v45 }
 0x802   : > { %11047 = vmatprep.mubr.bf16.mxu0 %v26311_v2 }
 0x809   : > { %11048 = vmatmul.mubr.bf16.gmra.mrb[88].mxu0 %v26312_v30 }
 0x80a   : > { %11057 = vmatprep.mubr.bf16.mxu0 %v26313_v17 }
 0x811   : > { %11058 = vmatmul.mubr.bf16.gmra.mrb[92].mxu0 %v26314_v10 }
 0x812   : > { %11067 = vmatprep.mubr.bf16.mxu0 %v26315_v32 }
 0x819   : > { %11068 = vmatmul.mubr.bf16.gmra.mrb[96].mxu0 %v26316_v3 }
 0x81a   : > { %11077 = vmatprep.mubr.bf16.mxu0 %v22671_v50  ;;  %v26321_v50 = vld [vmem:[#allocation200_spill] sm:$0xff] }
 0x821   : > { %11078 = vmatmul.mubr.bf16.gmra.mrb[100].mxu0 %v26317_v62 }
 0x822   : > { %11087 = vmatprep.mubr.bf16.mxu0 %v26318_v35 }
 0x829   : > { %11088 = vmatmul.mubr.bf16.gmra.mrb[104].mxu0 %v26319_v28 }
 0x82a   : > { %11097 = vmatprep.mubr.bf16.mxu0 %v26320_v24 }
 0x831   : > { %11098 = vmatmul.mubr.bf16.gmra.mrb[108].mxu0 %v26321_v50 }
 0x832   : > { %11107 = vmatprep.mubr.bf16.mxu0 %v26322_v0 }
 0x839   : > { %11108 = vmatmul.mubr.bf16.gmra.mrb[112].mxu0 %v26323_v19 }
 0x83a   : > { %11117 = vmatprep.mubr.bf16.mxu0 %v22756_v49  ;;  %v24246_v49 = vrot.slane %v19642_v48, %v1388_v41 }
 0x841   : > { %11118 = vmatmul.mubr.bf16.gmra.mrb[116].mxu0 %v22764_v53 }
 0x842   : > { %11127 = vmatprep.mubr.bf16.mxu0 %v26324_v38 }
 0x849   : > { %11128 = vmatmul.mubr.bf16.gmra.mrb[120].mxu0 %v26325_v46 }
 0x84a   : > { %11137 = vmatprep.mubr.bf16.mxu0 %v26326_v8 }
 0x851   : > { %11138 = vmatmul.mubr.bf16.gmra.mrb[124].mxu0 %v26327_v59 }
 0x8ac   : > { %v10989_v53 = vpop.f32.mrb[64].mxu0 }
 0x8ad   : > { %v16910_v44 = vadd.f32 %v10989_v53, %v24244_v13  ;;  %v10991_v55 = vpop.f32.mrb[65].mxu0 }
 0x8ae   : > { %v16911_v36 = vadd.f32 %v10991_v55, %v24246_v49  ;;  %v10993_v37 = vpop.f32.mrb[66].mxu0 }
 0x8af   : > { %v16912_v45 = vadd.f32 %v10993_v37, %v24244_v13  ;;  %v10995_v2 = vpop.f32.mrb[67].mxu0  ;;  %v11152_v17 = vmax.f32 %v16910_v44, 0.0 }
 0x8b0   : > { %v16913_v30 = vadd.f32 %v10995_v2, %v24246_v49  ;;  %v11153_v32 = vmax.f32 %v16911_v36, 0.0 }
 0x8b1   : > { %v11158_v10 = vmax.f32 %v16912_v45, 0.0 }
 0x8b2   : > { %v11159_v3 = vmax.f32 %v16913_v30, 0.0 }
 0x8b3   : > { %v11344_v62 = vpack.c.bf16 %v11158_v10, %v11152_v17 }
 0x8b4   : > { %v11345_v35 = vpack.c.bf16 %v11159_v3, %v11153_v32  ;;  %v10999_v28 = vpop.f32.mrb[68].mxu0 }
 0x8b5   : > { %v16914_v24 = vadd.f32 %v10999_v28, %v24244_v13  ;;  %v11001_v16 = vpop.f32.mrb[69].mxu0 }
 0x8b6   : > { %v16915_v18 = vadd.f32 %v11001_v16, %v24246_v49  ;;  %v11003_v50 = vpop.f32.mrb[70].mxu0  ;;  %16265 = vmatprep.mubr.msk.bf16.mxu1 %vm11803_vm0, %v11345_v35 }
 0x8b7   : > { %v16916_v0 = vadd.f32 %v11003_v50, %v24244_v13  ;;  %v11005_v40 = vpop.f32.mrb[71].mxu0  ;;  %12207 = vmatmul.mubr.bf16.vlgmr.msra.gmra.mrb[192].mxu1 %v11344_v62  ;;  %v11164_v38 = vmax.f32 %v16914_v24, 0.0 }
 0x8b8   : > { %v16917_v19 = vadd.f32 %v11005_v40, %v24246_v49  ;;  %v11165_v8 = vmax.f32 %v16915_v18, 0.0 }
 0x8b9   : > { %v11170_v46 = vmax.f32 %v16916_v0, 0.0 }
 0x8ba   : > { %v11171_v59 = vmax.f32 %v16917_v19, 0.0 }
 0x8bb   : > { %v11350_v63 = vpack.c.bf16 %v11170_v46, %v11164_v38 }
 0x8bc   : > { %v11351_v41 = vpack.c.bf16 %v11171_v59, %v11165_v8  ;;  %v11009_v48 = vpop.f32.mrb[72].mxu0 }
 0x8bd   : > { %v16918_v53 = vadd.f32 %v11009_v48, %v24244_v13  ;;  %v11011_v44 = vpop.f32.mrb[73].mxu0 }
 0x8be   : > { %v16919_v55 = vadd.f32 %v11011_v44, %v24246_v49  ;;  %v11013_v36 = vpop.f32.mrb[74].mxu0  ;;  %16266 = vmatprep.mubr.msk.bf16.mxu1 %vm11803_vm0, %v11351_v41 }
 0x8bf   : > { %v16920_v37 = vadd.f32 %v11013_v36, %v24244_v13  ;;  %v11015_v45 = vpop.f32.mrb[75].mxu0  ;;  %12215 = vmatmul.mubr.bf16.gmra.mrb[196].mxu1 %v11350_v63  ;;  %v11176_v30 = vmax.f32 %v16918_v53, 0.0 }
 0x8c0   : > { %v16921_v2 = vadd.f32 %v11015_v45, %v24246_v49  ;;  %v11177_v10 = vmax.f32 %v16919_v55, 0.0 }
 0x8c1   : > { %v11182_v17 = vmax.f32 %v16920_v37, 0.0 }
 0x8c2   : > { %v11183_v32 = vmax.f32 %v16921_v2, 0.0 }
 0x8c3   : > { %v11356_v3 = vpack.c.bf16 %v11182_v17, %v11176_v30 }
 0x8c4   : > { %v11357_v62 = vpack.c.bf16 %v11183_v32, %v11177_v10  ;;  %v11019_v35 = vpop.f32.mrb[76].mxu0 }
 0x8c5   : > { %v16922_v28 = vadd.f32 %v11019_v35, %v24244_v13  ;;  %v11021_v24 = vpop.f32.mrb[77].mxu0 }
 0x8c6   : > { %v16923_v16 = vadd.f32 %v11021_v24, %v24246_v49  ;;  %v11023_v18 = vpop.f32.mrb[78].mxu0  ;;  %16267 = vmatprep.mubr.msk.bf16.mxu1 %vm11803_vm0, %v11357_v62 }
 0x8c7   : > { %v16924_v50 = vadd.f32 %v11023_v18, %v24244_v13  ;;  %v11025_v0 = vpop.f32.mrb[79].mxu0  ;;  %12223 = vmatmul.mubr.bf16.gmra.mrb[200].mxu1 %v11356_v3  ;;  %v11188_v19 = vmax.f32 %v16922_v28, 0.0 }
 0x8c8   : > { %v16925_v40 = vadd.f32 %v11025_v0, %v24246_v49  ;;  %v11189_v46 = vmax.f32 %v16923_v16, 0.0 }
 0x8c9   : > { %v11194_v38 = vmax.f32 %v16924_v50, 0.0 }
 0x8ca   : > { %v11195_v8 = vmax.f32 %v16925_v40, 0.0 }
 0x8cb   : > { %v11362_v59 = vpack.c.bf16 %v11194_v38, %v11188_v19 }
 0x8cc   : > { %v11363_v63 = vpack.c.bf16 %v11195_v8, %v11189_v46  ;;  %v11029_v41 = vpop.f32.mrb[80].mxu0 }
 0x8cd   : > { %v16926_v48 = vadd.f32 %v11029_v41, %v24244_v13  ;;  %v11031_v53 = vpop.f32.mrb[81].mxu0 }
 0x8ce   : > { %v16927_v44 = vadd.f32 %v11031_v53, %v24246_v49  ;;  %v11033_v55 = vpop.f32.mrb[82].mxu0  ;;  %16268 = vmatprep.mubr.msk.bf16.mxu1 %vm11803_vm0, %v11363_v63 }
 0x8cf   : > { %v16928_v36 = vadd.f32 %v11033_v55, %v24244_v13  ;;  %v11035_v37 = vpop.f32.mrb[83].mxu0  ;;  %12231 = vmatmul.mubr.bf16.gmra.mrb[204].mxu1 %v11362_v59  ;;  %v11200_v2 = vmax.f32 %v16926_v48, 0.0 }
 0x8d0   : > { %v16929_v45 = vadd.f32 %v11035_v37, %v24246_v49  ;;  %v11201_v17 = vmax.f32 %v16927_v44, 0.0 }
 0x8d1   : > { %v11206_v30 = vmax.f32 %v16928_v36, 0.0 }
 0x8d2   : > { %v11207_v10 = vmax.f32 %v16929_v45, 0.0 }
 0x8d3   : > { %v11368_v32 = vpack.c.bf16 %v11206_v30, %v11200_v2 }
 0x8d4   : > { %v11369_v3 = vpack.c.bf16 %v11207_v10, %v11201_v17  ;;  %v11039_v62 = vpop.f32.mrb[84].mxu0 }
 0x8d5   : > { %v16930_v35 = vadd.f32 %v11039_v62, %v24244_v13  ;;  %v11041_v28 = vpop.f32.mrb[85].mxu0 }
 0x8d6   : > { %v16931_v24 = vadd.f32 %v11041_v28, %v24246_v49  ;;  %v11043_v16 = vpop.f32.mrb[86].mxu0  ;;  %16269 = vmatprep.mubr.msk.bf16.mxu1 %vm11803_vm0, %v11369_v3 }
 0x8d7   : > { %v16932_v18 = vadd.f32 %v11043_v16, %v24244_v13  ;;  %v11045_v50 = vpop.f32.mrb[87].mxu0  ;;  %12239 = vmatmul.mubr.bf16.gmra.mrb[208].mxu1 %v11368_v32  ;;  %v11212_v40 = vmax.f32 %v16930_v35, 0.0 }
 0x8d8   : > { %v16933_v0 = vadd.f32 %v11045_v50, %v24246_v49  ;;  %v11213_v38 = vmax.f32 %v16931_v24, 0.0 }
 0x8d9   : > { %v11218_v19 = vmax.f32 %v16932_v18, 0.0 }
 0x8da   : > { %v11219_v46 = vmax.f32 %v16933_v0, 0.0 }
 0x8db   : > { %v11374_v8 = vpack.c.bf16 %v11218_v19, %v11212_v40 }
 0x8dc   : > { %v11375_v59 = vpack.c.bf16 %v11219_v46, %v11213_v38  ;;  %v11049_v63 = vpop.f32.mrb[88].mxu0 }
 0x8dd   : > { %v16934_v41 = vadd.f32 %v11049_v63, %v24244_v13  ;;  %v11051_v48 = vpop.f32.mrb[89].mxu0 }
 0x8de   : > { %v16935_v53 = vadd.f32 %v11051_v48, %v24246_v49  ;;  %v11053_v44 = vpop.f32.mrb[90].mxu0  ;;  %16270 = vmatprep.mubr.msk.bf16.mxu1 %vm11803_vm0, %v11375_v59 }
 0x8df   : > { %v16936_v55 = vadd.f32 %v11053_v44, %v24244_v13  ;;  %v11055_v36 = vpop.f32.mrb[91].mxu0  ;;  %12247 = vmatmul.mubr.bf16.gmra.mrb[212].mxu1 %v11374_v8  ;;  %v11224_v45 = vmax.f32 %v16934_v41, 0.0 }
 0x8e0   : > { %v16937_v37 = vadd.f32 %v11055_v36, %v24246_v49  ;;  %v11225_v30 = vmax.f32 %v16935_v53, 0.0 }
 0x8e1   : > { %v11230_v2 = vmax.f32 %v16936_v55, 0.0 }
 0x8e2   : > { %v11231_v17 = vmax.f32 %v16937_v37, 0.0 }
 0x8e3   : > { %v11380_v10 = vpack.c.bf16 %v11230_v2, %v11224_v45 }
 0x8e4   : > { %v11381_v32 = vpack.c.bf16 %v11231_v17, %v11225_v30  ;;  %v11059_v3 = vpop.f32.mrb[92].mxu0 }
 0x8e5   : > { %v16938_v62 = vadd.f32 %v11059_v3, %v24244_v13  ;;  %v11061_v35 = vpop.f32.mrb[93].mxu0 }
 0x8e6   : > { %v16939_v28 = vadd.f32 %v11061_v35, %v24246_v49  ;;  %v11063_v24 = vpop.f32.mrb[94].mxu0  ;;  %16271 = vmatprep.mubr.msk.bf16.mxu1 %vm11803_vm0, %v11381_v32 }
 0x8e7   : > { %v16940_v16 = vadd.f32 %v11063_v24, %v24244_v13  ;;  %v11065_v18 = vpop.f32.mrb[95].mxu0  ;;  %12255 = vmatmul.mubr.bf16.gmra.mrb[216].mxu1 %v11380_v10  ;;  %v11236_v0 = vmax.f32 %v16938_v62, 0.0 }
 0x8e8   : > { %v16941_v50 = vadd.f32 %v11065_v18, %v24246_v49  ;;  %v11237_v19 = vmax.f32 %v16939_v28, 0.0 }
 0x8e9   : > { %v11242_v40 = vmax.f32 %v16940_v16, 0.0 }
 0x8ea   : > { %v11243_v38 = vmax.f32 %v16941_v50, 0.0 }
 0x8eb   : > { %v11386_v46 = vpack.c.bf16 %v11242_v40, %v11236_v0 }
 0x8ec   : > { %v11387_v8 = vpack.c.bf16 %v11243_v38, %v11237_v19  ;;  %v11069_v59 = vpop.f32.mrb[96].mxu0 }
 0x8ed   : > { %v16942_v63 = vadd.f32 %v11069_v59, %v24244_v13  ;;  %v11071_v41 = vpop.f32.mrb[97].mxu0 }
 0x8ee   : > { %v16943_v48 = vadd.f32 %v11071_v41, %v24246_v49  ;;  %v11073_v53 = vpop.f32.mrb[98].mxu0  ;;  %16272 = vmatprep.mubr.msk.bf16.mxu1 %vm11803_vm0, %v11387_v8 }
 0x8ef   : > { %v16944_v44 = vadd.f32 %v11073_v53, %v24244_v13  ;;  %v11075_v55 = vpop.f32.mrb[99].mxu0  ;;  %12263 = vmatmul.mubr.bf16.gmra.mrb[220].mxu1 %v11386_v46  ;;  %v11248_v37 = vmax.f32 %v16942_v63, 0.0 }
 0x8f0   : > { %v16945_v36 = vadd.f32 %v11075_v55, %v24246_v49  ;;  %v11249_v2 = vmax.f32 %v16943_v48, 0.0 }
 0x8f1   : > { %v11254_v45 = vmax.f32 %v16944_v44, 0.0 }
 0x8f2   : > { %v11255_v30 = vmax.f32 %v16945_v36, 0.0 }
 0x8f3   : > { %v11392_v17 = vpack.c.bf16 %v11254_v45, %v11248_v37 }
 0x8f4   : > { %v11393_v10 = vpack.c.bf16 %v11255_v30, %v11249_v2  ;;  %v11079_v32 = vpop.f32.mrb[100].mxu0 }
 0x8f5   : > { %v16946_v3 = vadd.f32 %v11079_v32, %v24244_v13  ;;  %v11081_v62 = vpop.f32.mrb[101].mxu0 }
 0x8f6   : > { %v16947_v35 = vadd.f32 %v11081_v62, %v24246_v49  ;;  %v11083_v28 = vpop.f32.mrb[102].mxu0  ;;  %16273 = vmatprep.mubr.msk.bf16.mxu1 %vm11803_vm0, %v11393_v10 }
 0x8f7   : > { %v16948_v24 = vadd.f32 %v11083_v28, %v24244_v13  ;;  %v11085_v16 = vpop.f32.mrb[103].mxu0  ;;  %12271 = vmatmul.mubr.bf16.gmra.mrb[224].mxu1 %v11392_v17  ;;  %v11260_v50 = vmax.f32 %v16946_v3, 0.0 }
 0x8f8   : > { %v16949_v18 = vadd.f32 %v11085_v16, %v24246_v49  ;;  %v11261_v40 = vmax.f32 %v16947_v35, 0.0 }
 0x8f9   : > { %v11266_v0 = vmax.f32 %v16948_v24, 0.0 }
 0x8fa   : > { %v11267_v19 = vmax.f32 %v16949_v18, 0.0 }
 0x8fb   : > { %v11398_v38 = vpack.c.bf16 %v11266_v0, %v11260_v50 }
 0x8fc   : > { %v11399_v46 = vpack.c.bf16 %v11267_v19, %v11261_v40  ;;  %v11089_v8 = vpop.f32.mrb[104].mxu0 }
 0x8fd   : > { %v16950_v59 = vadd.f32 %v11089_v8, %v24244_v13  ;;  %v11091_v63 = vpop.f32.mrb[105].mxu0 }
 0x8fe   : > { %v16951_v41 = vadd.f32 %v11091_v63, %v24246_v49  ;;  %v11093_v48 = vpop.f32.mrb[106].mxu0  ;;  %16274 = vmatprep.mubr.msk.bf16.mxu1 %vm11803_vm0, %v11399_v46 }
 0x8ff   : > { %v16952_v53 = vadd.f32 %v11093_v48, %v24244_v13  ;;  %v11095_v44 = vpop.f32.mrb[107].mxu0  ;;  %12279 = vmatmul.mubr.bf16.gmra.mrb[228].mxu1 %v11398_v38  ;;  %v11272_v36 = vmax.f32 %v16950_v59, 0.0 }
 0x900   : > { %v16953_v55 = vadd.f32 %v11095_v44, %v24246_v49  ;;  %v11273_v45 = vmax.f32 %v16951_v41, 0.0 }
 0x901   : > { %v11278_v37 = vmax.f32 %v16952_v53, 0.0 }
 0x902   : > { %v11279_v2 = vmax.f32 %v16953_v55, 0.0 }
 0x903   : > { %v11404_v30 = vpack.c.bf16 %v11278_v37, %v11272_v36 }
 0x904   : > { %v11405_v17 = vpack.c.bf16 %v11279_v2, %v11273_v45  ;;  %v11099_v10 = vpop.f32.mrb[108].mxu0 }
 0x905   : > { %v16954_v32 = vadd.f32 %v11099_v10, %v24244_v13  ;;  %v11101_v3 = vpop.f32.mrb[109].mxu0 }
 0x906   : > { %v16955_v62 = vadd.f32 %v11101_v3, %v24246_v49  ;;  %v11103_v35 = vpop.f32.mrb[110].mxu0  ;;  %16275 = vmatprep.mubr.msk.bf16.mxu1 %vm11803_vm0, %v11405_v17 }
 0x907   : > { %v16956_v28 = vadd.f32 %v11103_v35, %v24244_v13  ;;  %v11105_v24 = vpop.f32.mrb[111].mxu0  ;;  %12287 = vmatmul.mubr.bf16.gmra.mrb[232].mxu1 %v11404_v30  ;;  %v11284_v18 = vmax.f32 %v16954_v32, 0.0 }
 0x908   : > { %v16957_v16 = vadd.f32 %v11105_v24, %v24246_v49  ;;  %v11285_v0 = vmax.f32 %v16955_v62, 0.0 }
 0x909   : > { %v11290_v50 = vmax.f32 %v16956_v28, 0.0 }
 0x90a   : > { %v11291_v40 = vmax.f32 %v16957_v16, 0.0 }
 0x90b   : > { %v11410_v19 = vpack.c.bf16 %v11290_v50, %v11284_v18 }
 0x90c   : > { %v11411_v38 = vpack.c.bf16 %v11291_v40, %v11285_v0  ;;  %v11109_v46 = vpop.f32.mrb[112].mxu0 }
 0x90d   : > { %v16958_v8 = vadd.f32 %v11109_v46, %v24244_v13  ;;  %v11111_v59 = vpop.f32.mrb[113].mxu0 }
 0x90e   : > { %v16959_v63 = vadd.f32 %v11111_v59, %v24246_v49  ;;  %v11113_v41 = vpop.f32.mrb[114].mxu0  ;;  %16276 = vmatprep.mubr.msk.bf16.mxu1 %vm11803_vm0, %v11411_v38 }
 0x90f   : > { %v16960_v48 = vadd.f32 %v11113_v41, %v24244_v13  ;;  %v11115_v53 = vpop.f32.mrb[115].mxu0  ;;  %12295 = vmatmul.mubr.bf16.gmra.mrb[236].mxu1 %v11410_v19  ;;  %v11296_v55 = vmax.f32 %v16958_v8, 0.0 }
 0x910   : > { %v16961_v44 = vadd.f32 %v11115_v53, %v24246_v49  ;;  %v11297_v37 = vmax.f32 %v16959_v63, 0.0 }
 0x911   : > { %v11302_v36 = vmax.f32 %v16960_v48, 0.0 }
 0x912   : > { %v11303_v45 = vmax.f32 %v16961_v44, 0.0 }
 0x913   : > { %v11416_v2 = vpack.c.bf16 %v11302_v36, %v11296_v55 }
 0x914   : > { %v11417_v30 = vpack.c.bf16 %v11303_v45, %v11297_v37  ;;  %v11119_v17 = vpop.f32.mrb[116].mxu0 }
 0x915   : > { %v16962_v10 = vadd.f32 %v11119_v17, %v24244_v13  ;;  %v11121_v32 = vpop.f32.mrb[117].mxu0 }
 0x916   : > { %v16963_v3 = vadd.f32 %v11121_v32, %v24246_v49  ;;  %v11123_v62 = vpop.f32.mrb[118].mxu0  ;;  %16277 = vmatprep.mubr.msk.bf16.mxu1 %vm11803_vm0, %v11417_v30 }
 0x917   : > { %v16964_v35 = vadd.f32 %v11123_v62, %v24244_v13  ;;  %v11125_v28 = vpop.f32.mrb[119].mxu0  ;;  %12303 = vmatmul.mubr.bf16.gmra.mrb[240].mxu1 %v11416_v2  ;;  %v11308_v16 = vmax.f32 %v16962_v10, 0.0 }
 0x918   : > { %v16965_v24 = vadd.f32 %v11125_v28, %v24246_v49  ;;  %v11309_v50 = vmax.f32 %v16963_v3, 0.0 }
 0x919   : > { %v11314_v18 = vmax.f32 %v16964_v35, 0.0 }
 0x91a   : > { %v11315_v0 = vmax.f32 %v16965_v24, 0.0 }
 0x91b   : > { %v11422_v40 = vpack.c.bf16 %v11314_v18, %v11308_v16 }
 0x91c   : > { %v11423_v19 = vpack.c.bf16 %v11315_v0, %v11309_v50  ;;  %v11129_v38 = vpop.f32.mrb[120].mxu0 }
 0x91d   : > { %v16966_v46 = vadd.f32 %v11129_v38, %v24244_v13  ;;  %v11131_v8 = vpop.f32.mrb[121].mxu0  ;;  %v12509_v38 = vld [vmem:[%s25660_s6 + $0x8] sm:$0xff] }
 0x91e   : > { %v16967_v59 = vadd.f32 %v11131_v8, %v24246_v49  ;;  %v11133_v63 = vpop.f32.mrb[122].mxu0  ;;  %16278 = vmatprep.mubr.msk.bf16.mxu1 %vm11803_vm0, %v11423_v19  ;;  %v12510_v19 = vld [vmem:[%s25660_s6 + $0x10] sm:$0xff]  ;;  %v12512_v8 = vld [vmem:[%s25660_s6 + $0x20] sm:$0xff] }
 0x91f   : > { %v16968_v41 = vadd.f32 %v11133_v63, %v24244_v13  ;;  %v11135_v48 = vpop.f32.mrb[123].mxu0  ;;  %12311 = vmatmul.mubr.bf16.gmra.mrb[244].mxu1 %v11422_v40  ;;  %v11320_v44 = vmax.f32 %v16966_v46, 0.0  ;;  %12645 = vperm.xlu1 %18380, %v12510_v19   ;;  %v12513_v46 = vld [vmem:[%s25660_s6 + $0x28] sm:$0xff]  ;;  %v12540_v63 = vld [vmem:[%s25660_s6 + $0x100] sm:$0xff] }
 0x920   : > { %v16969_v53 = vadd.f32 %v11135_v48, %v24246_v49  ;;  %v11321_v36 = vmax.f32 %v16967_v59, 0.0  ;;  %v12541_v59 = vld [vmem:[%s25660_s6 + $0x108] sm:$0xff]  ;;  %v12542_v48 = vld [vmem:[%s25660_s6 + $0x110] sm:$0xff] }
 0x921   : > { %v11326_v55 = vmax.f32 %v16968_v41, 0.0  ;;  %v12543_v41 = vld [vmem:[%s25660_s6 + $0x118] sm:$0xff] }
 0x922   : > { %v11327_v37 = vmax.f32 %v16969_v53, 0.0  ;;  %v12545_v53 = vld [vmem:[%s25660_s6 + $0x128] sm:$0xff] }
 0x923   : > { %v11428_v45 = vpack.c.bf16 %v11326_v55, %v11320_v44  ;;  %v12544_v44 = vld [vmem:[%s25660_s6 + $0x120] sm:$0xff]  ;;  %v12547_v55 = vld [vmem:[%s25660_s6 + $0x138] sm:$0xff] }
 0x924   : > { %v11429_v2 = vpack.c.bf16 %v11327_v37, %v11321_v36  ;;  %v11139_v30 = vpop.f32.mrb[124].mxu0  ;;  %v12546_v36 = vld [vmem:[%s25660_s6 + $0x130] sm:$0xff]  ;;  %v12549_v37 = vld [vmem:[%s25660_s6 + $0x148] sm:$0xff] }
 0x925   : > { %v16970_v17 = vadd.f32 %v11139_v30, %v24244_v13  ;;  %v11141_v10 = vpop.f32.mrb[125].mxu0  ;;  %v12550_v30 = vld [vmem:[%s25660_s6 + $0x150] sm:$0xff] }
 0x926   : > { %v16971_v32 = vadd.f32 %v11141_v10, %v24246_v49  ;;  %v11143_v3 = vpop.f32.mrb[126].mxu0  ;;  %16279 = vmatprep.mubr.msk.bf16.mxu1 %vm11803_vm0, %v11429_v2  ;;  %v12551_v2 = vld [vmem:[%s25660_s6 + $0x158] sm:$0xff] }
 0x927   : > { %v16972_v62 = vadd.f32 %v11143_v3, %v24244_v13  ;;  %v11145_v35 = vpop.f32.mrb[127].mxu0  ;;  %12319 = vmatmul.mubr.bf16.gmra.mrb[248].mxu1 %v11428_v45  ;;  %v11332_v24 = vmax.f32 %v16970_v17, 0.0  ;;  %v12508_v13 = vld [vmem:[%s25660_s6] sm:$0xff]  ;;  %v12553_v3 = vld [vmem:[%s25660_s6 + $0x168] sm:$0xff] }
 0x928   : > { %v16973_v28 = vadd.f32 %v11145_v35, %v24246_v49  ;;  %v11333_v18 = vmax.f32 %v16971_v32, 0.0  ;;  %12635 = vperm.xlu0 %18379, %v12508_v13   ;;  %v12511_v49 = vld [vmem:[%s25660_s6 + $0x18] sm:$0xff]  ;;  %v12548_v45 = vld [vmem:[%s25660_s6 + $0x140] sm:$0xff] }
 0x929   : > { %v11338_v16 = vmax.f32 %v16972_v62, 0.0  ;;  %12650 = vperm.xlu1 %18380, %v12511_v49   ;;  %v12552_v62 = vld [vmem:[%s25660_s6 + $0x160] sm:$0xff]  ;;  %v12557_v49 = vld [vmem:[%s25660_s6 + $0x188] sm:$0xff] }
 0x92a   : > { %v11339_v50 = vmax.f32 %v16973_v28, 0.0 }
 0x92b   : > { %v11434_v0 = vpack.c.bf16 %v11338_v16, %v11332_v24  ;;  %v24393_v16 = vld [vmem:[%s25659_s5] sm:$0xff]  }
 0x92c   : > { %v11435_v40 = vpack.c.bf16 %v11339_v50, %v11333_v18  ;;  %12640 = vperm.xlu0 %18379, %v12509_v38   ;;  %v12555_v50 = vld [vmem:[%s25660_s6 + $0x178] sm:$0xff]  ;;  %v12556_v38 = vld [vmem:[%s25660_s6 + $0x180] sm:$0xff] }
 0x92d   : > { %12660 = vperm.xlu1 %18380, %v12513_v46  }
 0x92e   : > { %16280 = vmatprep.mubr.msk.bf16.mxu1 %vm11803_vm0, %v11435_v40 }
 0x92f   : > { %12327 = vmatmul.mubr.bf16.gmra.mrb[252].mxu1 %v11434_v0  ;;  %v12554_v0 = vld [vmem:[%s25660_s6 + $0x170] sm:$0xff] }
 0x930   : > { %12655 = vperm.xlu0 %18379, %v12512_v8   ;;  %16656 = vmatprep.mubr.msk.bf16.mxu1 %vm11803_vm0, %v24393_v16 }
 0x931   : > { %12800 = vperm.xlu1 %18380, %v12541_v59  }
 0x934   : > { %12795 = vperm.xlu0 %18379, %v12540_v63  }
 0x935   : > { %12810 = vperm.xlu1 %18380, %v12543_v41  }
 0x938   : > { %12805 = vperm.xlu0 %18379, %v12542_v48   ;;  %v12558_v48 = vld [vmem:[%s25660_s6 + $0x190] sm:$0xff] }
 0x939   : > { %12820 = vperm.xlu1 %18380, %v12545_v53  }
 0x93c   : > { %12815 = vperm.xlu0 %18379, %v12544_v44  }
 0x93d   : > { %12830 = vperm.xlu1 %18380, %v12547_v55  }
 0x940   : > { %12825 = vperm.xlu0 %18379, %v12546_v36   ;;  %v12561_v36 = vld [vmem:[%s25660_s6 + $0x1a8] sm:$0xff] }
 0x941   : > { %12840 = vperm.xlu1 %18380, %v12549_v37   ;;  %v12560_v37 = vld [vmem:[%s25660_s6 + $0x1a0] sm:$0xff] }
 0x944   : > { %12835 = vperm.xlu0 %18379, %v12548_v45  }
 0x945   : > { %12850 = vperm.xlu1 %18380, %v12551_v2  }
 0x948   : > { %12845 = vperm.xlu0 %18379, %v12550_v30  }
 0x949   : > { %12860 = vperm.xlu1 %18380, %v12553_v3  }
 0x94c   : > { %12855 = vperm.xlu0 %18379, %v12552_v62  }
 0x94d   : > { %12870 = vperm.xlu1 %18380, %v12555_v50  }
 0x950   : > { %12865 = vperm.xlu0 %18379, %v12554_v0  }
 0x951   : > { %12880 = vperm.xlu1 %18380, %v12557_v49  }
 0x954   : > { %12875 = vperm.xlu0 %18379, %v12556_v38  }
 0x958   : > { %12885 = vperm.xlu0 %18379, %v12558_v48  }
 0x95c   : > { %12895 = vperm.xlu0 %18379, %v12560_v37   ;;  %v12573_v37 = vld [vmem:[%s25660_s6 + $0x208] sm:$0xff] }
 0x98a   : > { %v12208_v17 = vpop.f32.mrb[192].mxu1 }
 0x98b   : > { %v12209_v10 = vadd.f32 %v12208_v17, %v23637_v61  ;;  %v12210_v32 = vpop.f32.mrb[193].mxu1 }
 0x98c   : > { %v12211_v35 = vpop.f32.mrb[194].mxu1  ;;  %v12562_v32 = vld [vmem:[%s25660_s6 + $0x1b0] sm:$0xff] }
 0x98d   : > { %v12212_v28 = vadd.f32 %v12211_v35, %v23642_v5  ;;  %v12213_v24 = vpop.f32.mrb[195].mxu1  ;;  %v12335_v61 = vmax.f32 %v12209_v10, 0.0  ;;  %12905 = vperm.xlu0 %18379, %v12562_v32   ;;  %v12574_v32 = vld [vmem:[%s25660_s6 + $0x210] sm:$0xff] }
 0x98e   : > { %v12564_v24 = vld [vmem:[%s25660_s6 + $0x1c0] sm:$0xff] }
 0x98f   : > { %v12336_v18 = vmax.f32 %v12212_v28, 0.0  ;;  %v12565_v28 = vld [vmem:[%s25660_s6 + $0x1c8] sm:$0xff] }
 0x991   : > { %v24403_v5 = vpack.c.bf16 %v12336_v18, %v12335_v61  ;;  %12915 = vperm.xlu0 %18379, %v12564_v24   ;;  %v12576_v24 = vld [vmem:[%s25660_s6 + $0x220] sm:$0xff] }
 0x992   : > { %v12216_v40 = vpop.f32.mrb[196].mxu1 }
 0x993   : > { %v12217_v19 = vadd.f32 %v12216_v40, %v23653_v15  ;;  %v12218_v13 = vpop.f32.mrb[197].mxu1  ;;  %v12559_v15 = vld [vmem:[%s25660_s6 + $0x198] sm:$0xff] }
 0x994   : > { %v12219_v46 = vpop.f32.mrb[198].mxu1  ;;  %12890 = vperm.xlu1 %18380, %v12559_v15  }
 0x995   : > { %v12220_v8 = vadd.f32 %v12219_v46, %v23658_v42  ;;  %v12221_v59 = vpop.f32.mrb[199].mxu1  ;;  %v12337_v63 = vmax.f32 %v12217_v19, 0.0  ;;  %v12566_v19 = vld [vmem:[%s25660_s6 + $0x1d0] sm:$0xff]  ;;  %v12569_v46 = vld [vmem:[%s25660_s6 + $0x1e8] sm:$0xff] }
 0x996   : > { %12925 = vperm.xlu0 %18379, %v12566_v19  }
 0x997   : > { %v12338_v41 = vmax.f32 %v12220_v8, 0.0  ;;  %v12568_v8 = vld [vmem:[%s25660_s6 + $0x1e0] sm:$0xff] }
 0x998   : > { %12900 = vperm.xlu1 %18380, %v12561_v36  }
 0x999   : > { %v24419_v53 = vpack.c.bf16 %v12338_v41, %v12337_v63 }
 0x99a   : > { %v12224_v44 = vpop.f32.mrb[200].mxu1  ;;  %12935 = vperm.xlu0 %18379, %v12568_v8  }
 0x99b   : > { %v12225_v42 = vadd.f32 %v12224_v44, %v23666_v9  ;;  %v12226_v55 = vpop.f32.mrb[201].mxu1  ;;  %v12563_v9 = vld [vmem:[%s25660_s6 + $0x1b8] sm:$0xff]  ;;  %v12570_v44 = vld [vmem:[%s25660_s6 + $0x1f0] sm:$0xff] }
 0x99c   : > { %v12227_v45 = vpop.f32.mrb[202].mxu1  ;;  %12910 = vperm.xlu1 %18380, %v12563_v9  }
 0x99d   : > { %v12228_v2 = vadd.f32 %v12227_v45, %v23668_v56  ;;  %v12229_v30 = vpop.f32.mrb[203].mxu1  ;;  %v12339_v17 = vmax.f32 %v12225_v42, 0.0  ;;  %v12572_v45 = vld [vmem:[%s25660_s6 + $0x200] sm:$0xff] }
 0x99e   : > { %12945 = vperm.xlu0 %18379, %v12570_v44  }
 0x99f   : > { %v12340_v10 = vmax.f32 %v12228_v2, 0.0 }
 0x9a0   : > { %12920 = vperm.xlu1 %18380, %v12565_v28   ;;  %v12577_v28 = vld [vmem:[%s25660_s6 + $0x228] sm:$0xff] }
 0x9a1   : > { %v24435_v3 = vpack.c.bf16 %v12340_v10, %v12339_v17 }
 0x9a2   : > { %v12232_v62 = vpop.f32.mrb[204].mxu1  ;;  %12955 = vperm.xlu0 %18379, %v12572_v45  }
 0x9a3   : > { %v12233_v56 = vadd.f32 %v12232_v62, %v23676_v29  ;;  %v12234_v35 = vpop.f32.mrb[205].mxu1  ;;  %v12567_v29 = vld [vmem:[%s25660_s6 + $0x1d8] sm:$0xff] }
 0x9a4   : > { %v12235_v61 = vpop.f32.mrb[206].mxu1  ;;  %12930 = vperm.xlu1 %18380, %v12567_v29   ;;  %v12578_v29 = vld [vmem:[%s25660_s6 + $0x230] sm:$0xff] }
 0x9a5   : > { %v12236_v18 = vadd.f32 %v12235_v61, %v23678_v58  ;;  %v12237_v50 = vpop.f32.mrb[207].mxu1  ;;  %v12341_v0 = vmax.f32 %v12233_v56, 0.0 }
 0x9a6   : > { %12965 = vperm.xlu0 %18379, %v12574_v32  }
 0x9a7   : > { %v12342_v40 = vmax.f32 %v12236_v18, 0.0 }
 0x9a8   : > { %12940 = vperm.xlu1 %18380, %v12569_v46   ;;  %v12580_v46 = vld [vmem:[%s25660_s6 + $0x240] sm:$0xff] }
 0x9a9   : > { %v24451_v13 = vpack.c.bf16 %v12342_v40, %v12341_v0 }
 0x9aa   : > { %v12240_v49 = vpop.f32.mrb[208].mxu1  ;;  %12975 = vperm.xlu0 %18379, %v12576_v24  }
 0x9ab   : > { %v12241_v58 = vadd.f32 %v12240_v49, %v23686_v27  ;;  %v12242_v38 = vpop.f32.mrb[209].mxu1  ;;  %v12571_v27 = vld [vmem:[%s25660_s6 + $0x1f8] sm:$0xff] }
 0x9ac   : > { %v12243_v59 = vpop.f32.mrb[210].mxu1  ;;  %12950 = vperm.xlu1 %18380, %v12571_v27   ;;  %v12581_v38 = vld [vmem:[%s25660_s6 + $0x248] sm:$0xff] }
 0x9ad   : > { %v12244_v63 = vadd.f32 %v12243_v59, %v23688_v43  ;;  %v12245_v41 = vpop.f32.mrb[211].mxu1  ;;  %v12343_v15 = vmax.f32 %v12241_v58, 0.0 }
 0x9ae   : > { %12985 = vperm.xlu0 %18379, %v12578_v29   ;;  %v13764_v29 = vsel %vm11803_vm0, %v24419_v53, 0  ;;  %v12595_v53 = vld [vmem:[%s25660_s6 + $0x2b8] sm:$0xff] }
 0x9af   : > { %v12344_v48 = vmax.f32 %v12244_v63, 0.0 }
 0x9b0   : > { %12960 = vperm.xlu1 %18380, %v12573_v37  }
 0x9b1   : > { %v24467_v42 = vpack.c.bf16 %v12344_v48, %v12343_v15  ;;  %v12582_v48 = vld [vmem:[%s25660_s6 + $0x250] sm:$0xff] }
 0x9b2   : > { %v12248_v55 = vpop.f32.mrb[212].mxu1  ;;  %12995 = vperm.xlu0 %18379, %v12580_v46  }
 0x9b3   : > { %v12249_v43 = vadd.f32 %v12248_v55, %v23696_v6  ;;  %v12250_v36 = vpop.f32.mrb[213].mxu1  ;;  %v12575_v6 = vld [vmem:[%s25660_s6 + $0x218] sm:$0xff] }
 0x9b4   : > { %v12251_v2 = vpop.f32.mrb[214].mxu1  ;;  %12970 = vperm.xlu1 %18380, %v12575_v6   ;;  %v12584_v36 = vld [vmem:[%s25660_s6 + $0x260] sm:$0xff] }
 0x9b5   : > { %v12252_v30 = vadd.f32 %v12251_v2, %v23698_v22  ;;  %v12253_v17 = vpop.f32.mrb[215].mxu1  ;;  %v12345_v10 = vmax.f32 %v12249_v43, 0.0  ;;  %v12585_v43 = vld [vmem:[%s25660_s6 + $0x268] sm:$0xff] }
 0x9b6   : > { %13005 = vperm.xlu0 %18379, %v12582_v48   ;;  %v12597_v48 = vld [vmem:[%s25660_s6 + $0x2c8] sm:$0xff] }
 0x9b7   : > { %v12346_v9 = vmax.f32 %v12252_v30, 0.0 }
 0x9b8   : > { %12980 = vperm.xlu1 %18380, %v12577_v28  }
 0x9b9   : > { %v24483_v62 = vpack.c.bf16 %v12346_v9, %v12345_v10  ;;  %v12586_v10 = vld [vmem:[%s25660_s6 + $0x270] sm:$0xff] }
 0x9ba   : > { %v12256_v56 = vpop.f32.mrb[216].mxu1  ;;  %13015 = vperm.xlu0 %18379, %v12584_v36  }
 0x9bb   : > { %v12257_v22 = vadd.f32 %v12256_v56, %v23706_v31  ;;  %v12258_v35 = vpop.f32.mrb[217].mxu1  ;;  %v12579_v31 = vld [vmem:[%s25660_s6 + $0x238] sm:$0xff]  ;;  %v13761_v56 = vsel %vm11803_vm0, %v24403_v5, 0 }
 0x9bc   : > { %v12259_v61 = vpop.f32.mrb[218].mxu1  ;;  %12990 = vperm.xlu1 %18380, %v12579_v31   ;;  %v12588_v35 = vld [vmem:[%s25660_s6 + $0x280] sm:$0xff]  ;;  %v12591_v5 = vld [vmem:[%s25660_s6 + $0x298] sm:$0xff] }
 0x9bd   : > { %v12260_v18 = vadd.f32 %v12259_v61, %v23708_v7  ;;  %v12261_v50 = vpop.f32.mrb[219].mxu1  ;;  %v12347_v0 = vmax.f32 %v12257_v22, 0.0  ;;  %v12589_v22 = vld [vmem:[%s25660_s6 + $0x288] sm:$0xff] }
 0x9be   : > { %13025 = vperm.xlu0 %18379, %v12586_v10   ;;  %v12590_v50 = vld [vmem:[%s25660_s6 + $0x290] sm:$0xff]  ;;  %v12600_v10 = vld [vmem:[%s25660_s6 + $0x2e0] sm:$0xff] }
 0x9bf   : > { %v12348_v40 = vmax.f32 %v12260_v18, 0.0 }
 0x9c0   : > { %13000 = vperm.xlu1 %18380, %v12581_v38  }
 0x9c1   : > { %v24499_v19 = vpack.c.bf16 %v12348_v40, %v12347_v0 }
 0x9c2   : > { %v12264_v49 = vpop.f32.mrb[220].mxu1  ;;  %13035 = vperm.xlu0 %18379, %v12588_v35   ;;  %v24601_v35 = vpop.permute.xlu1 %12645 }
 0x9c3   : > { %v12265_v7 = vadd.f32 %v12264_v49, %v23716_v25  ;;  %v12266_v58 = vpop.f32.mrb[221].mxu1  ;;  %v12583_v25 = vld [vmem:[%s25660_s6 + $0x258] sm:$0xff]  ;;  %v12593_v49 = vld [vmem:[%s25660_s6 + $0x2a8] sm:$0xff] }
 0x9c4   : > { %v12267_v8 = vpop.f32.mrb[222].mxu1  ;;  %13010 = vperm.xlu1 %18380, %v12583_v25   ;;  %v13767_v25 = vsel %vm11803_vm0, %v24435_v3, 0  ;;  %v12599_v3 = vld [vmem:[%s25660_s6 + $0x2d8] sm:$0xff] }
 0x9c5   : > { %v12268_v59 = vadd.f32 %v12267_v8, %v23718_v14  ;;  %v12269_v63 = vpop.f32.mrb[223].mxu1  ;;  %v12349_v41 = vmax.f32 %v12265_v7, 0.0  ;;  %v12592_v7 = vld [vmem:[%s25660_s6 + $0x2a0] sm:$0xff] }
 0x9c6   : > { %13045 = vperm.xlu0 %18379, %v12590_v50  }
 0x9c7   : > { %v12350_v15 = vmax.f32 %v12268_v59, 0.0  ;;  %v12594_v59 = vld [vmem:[%s25660_s6 + $0x2b0] sm:$0xff] }
 0x9c8   : > { %13020 = vperm.xlu1 %18380, %v12585_v43  }
 0x9c9   : > { %v24515_v27 = vpack.c.bf16 %v12350_v15, %v12349_v41 }
 0x9ca   : > { %v12272_v44 = vpop.f32.mrb[224].mxu1  ;;  %13055 = vperm.xlu0 %18379, %v12592_v7  }
 0x9cb   : > { %v12273_v14 = vadd.f32 %v12272_v44, %v23726_v4  ;;  %v12274_v55 = vpop.f32.mrb[225].mxu1  ;;  %v12587_v4 = vld [vmem:[%s25660_s6 + $0x278] sm:$0xff]  ;;  %v12596_v44 = vld [vmem:[%s25660_s6 + $0x2c0] sm:$0xff] }
 0x9cc   : > { %v12275_v37 = vpop.f32.mrb[226].mxu1  ;;  %13030 = vperm.xlu1 %18380, %v12587_v4   ;;  %v12601_v4 = vld [vmem:[%s25660_s6 + $0x2e8] sm:$0xff] }
 0x9cd   : > { %v12276_v45 = vadd.f32 %v12275_v37, %v23728_v34  ;;  %v12277_v2 = vpop.f32.mrb[227].mxu1  ;;  %v12351_v30 = vmax.f32 %v12273_v14, 0.0  ;;  %v12598_v37 = vld [vmem:[%s25660_s6 + $0x2d0] sm:$0xff] }
 0x9ce   : > { %13065 = vperm.xlu0 %18379, %v12594_v59  }
 0x9cf   : > { %v12352_v17 = vmax.f32 %v12276_v45, 0.0 }
 0x9d0   : > { %13040 = vperm.xlu1 %18380, %v12589_v22   ;;  %v12602_v22 = vld [vmem:[%s25660_s6 + $0x2f0] sm:$0xff] }
 0x9d1   : > { %v12500_v9 = vpack.c.bf16 %v12352_v17, %v12351_v30  ;;  %v13770_v17 = vsel %vm11803_vm0, %v24451_v13, 0  ;;  %v12603_v13 = vld [vmem:[%s25660_s6 + $0x2f8] sm:$0xff] }
 0x9d2   : > { %v12280_v6 = vpop.f32.mrb[228].mxu1  ;;  %13075 = vperm.xlu0 %18379, %v12596_v44  }
 0x9d3   : > { %v12281_v32 = vadd.f32 %v12280_v6, %v23739_v20  ;;  %v12282_v34 = vpop.f32.mrb[229].mxu1  ;;  %18330 = vmatprep.subr.msk.bf16.mxu1 %vm11803_vm0, %v12500_v9 }
 0x9d4   : > { %v12283_v28 = vpop.f32.mrb[230].mxu1  ;;  %16641 = vmatpush3.bf16.xpose.msra.mxu1 %v13761_v56  ;;  %13050 = vperm.xlu1 %18380, %v12591_v5   ;;  %v12604_v5 = vld [vmem:[%s25660_s6 + $0x300] sm:$0xff] }
 0x9d5   : > { %v12284_v24 = vadd.f32 %v12283_v28, %v23744_v51  ;;  %v12285_v61 = vpop.f32.mrb[231].mxu1  ;;  %v12353_v20 = vmax.f32 %v12281_v32, 0.0 }
 0x9d6   : > { %13085 = vperm.xlu0 %18379, %v12598_v37  }
 0x9d7   : > { %v12354_v18 = vmax.f32 %v12284_v24, 0.0 }
 0x9d8   : > { %13060 = vperm.xlu1 %18380, %v12593_v49   ;;  %v12606_v49 = vld [vmem:[%s25660_s6 + $0x310] sm:$0xff] }
 0x9d9   : > { %v12501_v0 = vpack.c.bf16 %v12354_v18, %v12353_v20  ;;  %v13773_v20 = vsel %vm11803_vm0, %v24467_v42, 0  ;;  %v12605_v18 = vld [vmem:[%s25660_s6 + $0x308] sm:$0xff] }
 0x9da   : > { %v12288_v40 = vpop.f32.mrb[232].mxu1  ;;  %13095 = vperm.xlu0 %18379, %v12600_v10  }
 0x9db   : > { %v12289_v31 = vadd.f32 %v12288_v40, %v23761_v60  ;;  %v12290_v51 = vpop.f32.mrb[233].mxu1  ;;  %18331 = vmatprep.subr.msk.bf16.mxu1 %vm11803_vm0, %v12501_v0 }
 0x9dc   : > { %v12291_v58 = vpop.f32.mrb[234].mxu1  ;;  %16643 = vmatpush3.bf16.xpose.msra.mxu1 %v13764_v29  ;;  %13070 = vperm.xlu1 %18380, %v12595_v53   ;;  %v12607_v29 = vld [vmem:[%s25660_s6 + $0x318] sm:$0xff]  ;;  %v12514_v53 = vld [vmem:[%s25660_s6 + $0x30] sm:$0xff] }
 0x9dd   : > { %v12292_v38 = vadd.f32 %v12291_v58, %v23766_v26  ;;  %v12293_v46 = vpop.f32.mrb[235].mxu1  ;;  %v12355_v60 = vmax.f32 %v12289_v31, 0.0  ;;  %v24616_v31 = vpop.permute.xlu1 %12650 }
 0x9de   : > { %13105 = vperm.xlu0 %18379, %v12602_v22  }
 0x9df   : > { %v12356_v8 = vmax.f32 %v12292_v38, 0.0 }
 0x9e0   : > { %13080 = vperm.xlu1 %18380, %v12597_v48  }
 0x9e1   : > { %v12502_v63 = vpack.c.bf16 %v12356_v8, %v12355_v60  ;;  %v13776_v60 = vsel %vm11803_vm0, %v24483_v62, 0  ;;  %v12515_v8 = vld [vmem:[%s25660_s6 + $0x38] sm:$0xff]  ;;  %v12609_v62 = vld [vmem:[%s25660_s6 + $0x328] sm:$0xff] }
 0x9e2   : > { %v12296_v41 = vpop.f32.mrb[236].mxu1  ;;  %13115 = vperm.xlu0 %18379, %v12604_v5  }
 0x9e3   : > { %v12297_v15 = vadd.f32 %v12296_v41, %v23783_v39  ;;  %v12298_v26 = vpop.f32.mrb[237].mxu1  ;;  %18332 = vmatprep.subr.msk.bf16.mxu1 %vm11803_vm0, %v12502_v63  ;;  %v24636_v63 = vpop.permute.xlu1 %12660 }
 0x9e4   : > { %v12299_v14 = vpop.f32.mrb[238].mxu1  ;;  %16645 = vmatpush3.bf16.xpose.msra.mxu1 %v13767_v25  ;;  %13090 = vperm.xlu1 %18380, %v12599_v3   ;;  %v12608_v25 = vld [vmem:[%s25660_s6 + $0x320] sm:$0xff] }
 0x9e5   : > { %v12300_v55 = vadd.f32 %v12299_v14, %v23788_v1  ;;  %v12301_v43 = vpop.f32.mrb[239].mxu1  ;;  %v12357_v39 = vmax.f32 %v12297_v15, 0.0  ;;  %v12516_v3 = vld [vmem:[%s25660_s6 + $0x40] sm:$0xff] }
 0x9e6   : > { %13125 = vperm.xlu0 %18379, %v12606_v49  }
 0x9e7   : > { %v12358_v36 = vmax.f32 %v12300_v55, 0.0  ;;  %v24647_v55 = vpop.permute.xlu1 %12800 }
 0x9e8   : > { %13100 = vperm.xlu1 %18380, %v12601_v4  }
 0x9e9   : > { %v12503_v45 = vpack.c.bf16 %v12358_v36, %v12357_v39  ;;  %v13779_v39 = vsel %vm11803_vm0, %v24499_v19, 0  ;;  %v12517_v36 = vld [vmem:[%s25660_s6 + $0x48] sm:$0xff]  ;;  %v12611_v19 = vld [vmem:[%s25660_s6 + $0x338] sm:$0xff] }
 0x9ea   : > { %v12304_v2 = vpop.f32.mrb[240].mxu1  ;;  %12665 = vperm.xlu0 %18379, %v12514_v53   ;;  %v19582_v53 = vld [vmem:[%s25659_s5 + $0x20] sm:$0xff]  }
 0x9eb   : > { %v12305_v30 = vadd.f32 %v12304_v2, %v23805_v21  ;;  %v12306_v1 = vpop.f32.mrb[241].mxu1  ;;  %18333 = vmatprep.subr.msk.bf16.mxu1 %vm11803_vm0, %v12503_v45  ;;  %v24593_v21 = vpop.permute.xlu0 %12635 }
 0x9ec   : > { %v12307_v9 = vpop.f32.mrb[242].mxu1  ;;  %16647 = vmatpush3.bf16.xpose.msra.mxu1 %v13770_v17  ;;  %13110 = vperm.xlu1 %18380, %v12603_v13   ;;  %v12610_v17 = vld [vmem:[%s25660_s6 + $0x330] sm:$0xff]  ;;  %v24668_v4 = vpop.permute.xlu1 %12810  ;;  %v19579_v13 = vld [vmem:[%s25659_s5 + $0x8] sm:$0xff]  }
 0x9ed   : > { %v12308_v6 = vadd.f32 %v12307_v9, %v23810_v11  ;;  %v12309_v32 = vpop.f32.mrb[243].mxu1  ;;  %v12359_v34 = vmax.f32 %v12305_v30, 0.0  ;;  %v12519_v9 = vld [vmem:[%s25660_s6 + $0x58] sm:$0xff] }
 0x9ee   : > { %13135 = vperm.xlu0 %18379, %v12608_v25   ;;  %v19583_v25 = vld [vmem:[%s25659_s5 + $0x28] sm:$0xff]  }
 0x9ef   : > { %v12360_v56 = vmax.f32 %v12308_v6, 0.0  ;;  %v24613_v0 = vpop.permute.xlu0 %12640  ;;  %v12518_v6 = vld [vmem:[%s25660_s6 + $0x50] sm:$0xff] }
 0x9f0   : > { %13120 = vperm.xlu1 %18380, %v12605_v18  }
 0x9f1   : > { %v12504_v28 = vpack.c.bf16 %v12360_v56, %v12359_v34  ;;  %v24681_v34 = vpop.permute.xlu1 %12820  ;;  %v12613_v56 = vld [vmem:[%s25660_s6 + $0x348] sm:$0xff] }
 0x9f2   : > { %v12312_v24 = vpop.f32.mrb[244].mxu1  ;;  %12675 = vperm.xlu0 %18379, %v12516_v3   ;;  %v12622_v3 = vld [vmem:[%s25660_s6 + $0x390] sm:$0xff] }
 0x9f3   : > { %v12313_v11 = vadd.f32 %v12312_v24, %v23827_v57  ;;  %v12314_v61 = vpop.f32.mrb[245].mxu1  ;;  %18334 = vmatprep.subr.msk.bf16.mxu1 %vm11803_vm0, %v12504_v28  ;;  %v24624_v38 = vpop.permute.xlu0 %12655  ;;  %v12521_v28 = vld [vmem:[%s25660_s6 + $0x68] sm:$0xff]  ;;  %v12520_v24 = vld [vmem:[%s25660_s6 + $0x60] sm:$0xff] }
 0x9f4   : > { %v12315_v50 = vpop.f32.mrb[246].mxu1  ;;  %16649 = vmatpush3.bf16.xpose.msra.mxu1 %v13773_v20  ;;  %13130 = vperm.xlu1 %18380, %v12607_v29   ;;  %v12615_v61 = vld [vmem:[%s25660_s6 + $0x358] sm:$0xff]  ;;  %v19580_v20 = vld [vmem:[%s25659_s5 + $0x10] sm:$0xff]  }
 0x9f5   : > { %v12316_v57 = vadd.f32 %v12315_v50, %v23832_v54  ;;  %v12317_v40 = vpop.f32.mrb[247].mxu1  ;;  %v12361_v42 = vmax.f32 %v12313_v11, 0.0  ;;  %v24703_v11 = vpop.permute.xlu1 %12830  ;;  %v12523_v50 = vld [vmem:[%s25660_s6 + $0x78] sm:$0xff] }
 0x9f6   : > { %13145 = vperm.xlu0 %18379, %v12610_v17   ;;  %v19581_v29 = vld [vmem:[%s25659_s5 + $0x18] sm:$0xff]   ;;  %v12625_v17 = vld [vmem:[%s25660_s6 + $0x3a8] sm:$0xff] }
 0x9f7   : > { %v12362_v51 = vmax.f32 %v12316_v57, 0.0  ;;  %v24645_v48 = vpop.permute.xlu0 %12795  ;;  %v12522_v57 = vld [vmem:[%s25660_s6 + $0x70] sm:$0xff] }
 0x9f8   : > { %12670 = vperm.xlu1 %18380, %v12515_v8   ;;  %v12618_v8 = vld [vmem:[%s25660_s6 + $0x370] sm:$0xff] }
 0x9f9   : > { %v12505_v7 = vpack.c.bf16 %v12362_v51, %v12361_v42  ;;  %v24716_v5 = vpop.permute.xlu1 %12840  ;;  %v12617_v42 = vld [vmem:[%s25660_s6 + $0x368] sm:$0xff]  ;;  %v12616_v51 = vld [vmem:[%s25660_s6 + $0x360] sm:$0xff] }
 0x9fa   : > { %v12320_v58 = vpop.f32.mrb[248].mxu1  ;;  %12685 = vperm.xlu0 %18379, %v12518_v6   ;;  %v12533_v6 = vld [vmem:[%s25660_s6 + $0xc8] sm:$0xff] }
 0x9fb   : > { %v12321_v54 = vadd.f32 %v12320_v58, %v23849_v12  ;;  %v12322_v46 = vpop.f32.mrb[249].mxu1  ;;  %18335 = vmatprep.subr.msk.bf16.mxu1 %vm11803_vm0, %v12505_v7  ;;  %v12525_v7 = vld [vmem:[%s25660_s6 + $0x88] sm:$0xff]  ;;  %v12524_v58 = vld [vmem:[%s25660_s6 + $0x80] sm:$0xff] }
 0x9fc   : > { %v12323_v59 = vpop.f32.mrb[250].mxu1  ;;  %16651 = vmatpush3.bf16.xpose.msra.mxu1 %v13776_v60  ;;  %13140 = vperm.xlu1 %18380, %v12609_v62   ;;  %v12619_v60 = vld [vmem:[%s25660_s6 + $0x378] sm:$0xff]  ;;  %v12620_v62 = vld [vmem:[%s25660_s6 + $0x380] sm:$0xff] }
 0x9fd   : > { %v12324_v12 = vadd.f32 %v12323_v59, %v23854_v33  ;;  %v12325_v41 = vpop.f32.mrb[251].mxu1  ;;  %v12363_v15 = vmax.f32 %v12321_v54, 0.0  ;;  %v24737_v49 = vpop.permute.xlu1 %12850 }
 0x9fe   : > { %v12526_v41 = vld [vmem:[%s25660_s6 + $0x90] sm:$0xff] }
 0x9ff   : > { %v12364_v26 = vmax.f32 %v12324_v12, 0.0  ;;  %v12527_v12 = vld [vmem:[%s25660_s6 + $0x98] sm:$0xff] }
 0xa00   : > { %12680 = vperm.xlu1 %18380, %v12517_v36   ;;  %v12623_v36 = vld [vmem:[%s25660_s6 + $0x398] sm:$0xff] }
 0xa01   : > { %v12506_v44 = vpack.c.bf16 %v12364_v26, %v12363_v15  ;;  %v24749_v46 = vpop.permute.xlu1 %12860  ;;  %v12621_v26 = vld [vmem:[%s25660_s6 + $0x388] sm:$0xff] }
 0xa02   : > { %v12328_v14 = vpop.f32.mrb[252].mxu1 }
 0xa03   : > { %v12329_v33 = vadd.f32 %v12328_v14, %v23868_v52  ;;  %v12330_v43 = vpop.f32.mrb[253].mxu1  ;;  %18336 = vmatprep.subr.msk.bf16.mxu1 %vm11803_vm0, %v12506_v44  ;;  %v24660_v52 = vpop.permute.xlu0 %12805 }
 0xa04   : > { %v12331_v37 = vpop.f32.mrb[254].mxu1  ;;  %16653 = vmatpush3.bf16.xpose.msra.mxu1 %v13779_v39  ;;  %13150 = vperm.xlu1 %18380, %v12611_v19   ;;  %v12528_v43 = vld [vmem:[%s25660_s6 + $0xa0] sm:$0xff] }
 0xa05   : > { %v12332_v45 = vadd.f32 %v12331_v37, %v23876_v23  ;;  %v12333_v2 = vpop.f32.mrb[255].mxu1  ;;  %v12365_v30 = vmax.f32 %v12329_v33, 0.0  ;;  %v13782_v23 = vsel %vm11803_vm0, %v24515_v27, 0  ;;  %v12612_v27 = vld [vmem:[%s25660_s6 + $0x340] sm:$0xff]  ;;  %v24770_v15 = vpop.permute.xlu1 %12870  ;;  %v12529_v33 = vld [vmem:[%s25660_s6 + $0xa8] sm:$0xff]  ;;  %v19584_v37 = vld [vmem:[%s25659_s5 + $0x30] sm:$0xff]  }
 0xa06   : > { %13155 = vperm.xlu0 %18379, %v12612_v27   ;;  %v12531_v2 = vld [vmem:[%s25660_s6 + $0xb8] sm:$0xff] }
 0xa07   : > { %v12366_v1 = vmax.f32 %v12332_v45, 0.0  ;;  %v24679_v32 = vpop.permute.xlu0 %12815 }
 0xa08   : > { %12690 = vperm.xlu1 %18380, %v12519_v9  }
 0xa09   : > { %v12507_v10 = vpack.c.bf16 %v12366_v1, %v12365_v30  ;;  %v24783_v14 = vpop.permute.xlu1 %12880  ;;  %v12530_v30 = vld [vmem:[%s25660_s6 + $0xb0] sm:$0xff] }
 0xa0a   : > { %12695 = vperm.xlu0 %18379, %v12520_v24   ;;  %v19586_v24 = vld [vmem:[%s25659_s5 + $0x40] sm:$0xff]  }
 0xa0b   : > { %18337 = vmatprep.subr.msk.bf16.mxu1 %vm11803_vm0, %v12507_v10  ;;  %v24692_v22 = vpop.permute.xlu0 %12825  ;;  %v12624_v10 = vld [vmem:[%s25660_s6 + $0x3a0] sm:$0xff] }
 0xa0c   : > { %16655 = vmatpush3.bf16.xpose.msra.mxu1 %v13782_v23  ;;  %13160 = vperm.xlu1 %18380, %v12613_v56   ;;  %v19585_v23 = vld [vmem:[%s25659_s5 + $0x38] sm:$0xff]   ;;  %v12532_v56 = vld [vmem:[%s25660_s6 + $0xc0] sm:$0xff] }
 0xa0f   : > { %v24714_v18 = vpop.permute.xlu0 %12835 }
 0xa10   : > { %12700 = vperm.xlu1 %18380, %v12521_v28   ;;  %v12626_v28 = vld [vmem:[%s25660_s6 + $0x3b0] sm:$0xff] }
 0xa13   : > { %16657 = vmatmul.mubr.msk.bf16.vlgmr.msra.gmra.mrb[0].mxu1 %vm11803_vm0, %v24393_v16  ;;  %v12614_v16 = vld [vmem:[%s25660_s6 + $0x350] sm:$0xff]  ;;  %v24726_v40 = vpop.permute.xlu0 %12845  ;;  %v24804_v45 = vpop.permute.xlu1 %12890 }
 0xa14   : > { %16658 = vmatprep.mubr.msk.bf16.mxu1 %vm11803_vm0, %v19579_v13  ;;  %13170 = vperm.xlu1 %18380, %v12615_v61  }
 0xa15   : > { %13165 = vperm.xlu0 %18379, %v12614_v16  }
 0xa17   : > { %v24747_v54 = vpop.permute.xlu0 %12855  ;;  %v24816_v19 = vpop.permute.xlu1 %12900 }
 0xa18   : > { %12710 = vperm.xlu1 %18380, %v12523_v50   ;;  %v12534_v50 = vld [vmem:[%s25660_s6 + $0xd0] sm:$0xff] }
 0xa19   : > { %12705 = vperm.xlu0 %18379, %v12522_v57  }
 0xa1b   : > { %16659 = vmatmul.mubr.msk.bf16.gmra.mrb[4].mxu1 %vm11803_vm0, %v19579_v13  ;;  %v24760_v59 = vpop.permute.xlu0 %12865  ;;  %v24837_v27 = vpop.permute.xlu1 %12910  ;;  %v12627_v13 = vld [vmem:[%s25660_s6 + $0x3b8] sm:$0xff] }
 0xa1c   : > { %16660 = vmatprep.mubr.msk.bf16.mxu1 %vm11803_vm0, %v19580_v20  ;;  %13180 = vperm.xlu1 %18380, %v12617_v42   ;;  %v12629_v42 = vld [vmem:[%s25660_s6 + $0x3c8] sm:$0xff] }
 0xa1d   : > { %13175 = vperm.xlu0 %18379, %v12616_v51   ;;  %v12628_v51 = vld [vmem:[%s25660_s6 + $0x3c0] sm:$0xff] }
 0xa1f   : > { %v24781_v44 = vpop.permute.xlu0 %12875  ;;  %v24850_v16 = vpop.permute.xlu1 %12920 }
 0xa20   : > { %12720 = vperm.xlu1 %18380, %v12525_v7  }
 0xa21   : > { %12715 = vperm.xlu0 %18379, %v12524_v58   ;;  %v12537_v58 = vld [vmem:[%s25660_s6 + $0xe8] sm:$0xff] }
 0xa23   : > { %16661 = vmatmul.mubr.msk.bf16.gmra.mrb[8].mxu1 %vm11803_vm0, %v19580_v20  ;;  %v24793_v39 = vpop.permute.xlu0 %12885  ;;  %v12535_v20 = vld [vmem:[%s25660_s6 + $0xd8] sm:$0xff]  ;;  %v24871_v7 = vpop.permute.xlu1 %12930 }
 0xa24   : > { %16662 = vmatprep.mubr.msk.bf16.mxu1 %vm11803_vm0, %v19581_v29  ;;  %13190 = vperm.xlu1 %18380, %v12619_v60   ;;  %v12536_v60 = vld [vmem:[%s25660_s6 + $0xe0] sm:$0xff] }
 0xa25   : > { %13185 = vperm.xlu0 %18379, %v12618_v8  }
 0xa27   : > { %v24814_v1 = vpop.permute.xlu0 %12895 }
 0xa28   : > { %12730 = vperm.xlu1 %18380, %v12527_v12   ;;  %v12631_v12 = vld [vmem:[%s25660_s6 + $0x3d8] sm:$0xff] }
 0xa29   : > { %12725 = vperm.xlu0 %18379, %v12526_v41   ;;  %v12630_v41 = vld [vmem:[%s25660_s6 + $0x3d0] sm:$0xff] }
 0xa2b   : > { %16663 = vmatmul.mubr.msk.bf16.gmra.mrb[12].mxu1 %vm11803_vm0, %v19581_v29  ;;  %v24827_v9 = vpop.permute.xlu0 %12905  ;;  %v19587_v29 = vld [vmem:[%s25659_s5 + $0x48] sm:$0xff]  }
 0xa2c   : > { %16664 = vmatprep.mubr.msk.bf16.mxu1 %vm11803_vm0, %v19582_v53  ;;  %13200 = vperm.xlu1 %18380, %v12621_v26   ;;  %v19588_v26 = vld [vmem:[%s25659_s5 + $0x50] sm:$0xff]  }
 0xa2d   : > { %13195 = vperm.xlu0 %18379, %v12620_v62  }
 0xa2f   : > { %v24848_v61 = vpop.permute.xlu0 %12915 }
 0xa30   : > { %12740 = vperm.xlu1 %18380, %v12529_v33   ;;  %v12538_v33 = vld [vmem:[%s25660_s6 + $0xf0] sm:$0xff] }
 0xa31   : > { %12735 = vperm.xlu0 %18379, %v12528_v43  }
 0xa33   : > { %16665 = vmatmul.mubr.msk.bf16.gmra.mrb[16].mxu1 %vm11803_vm0, %v19582_v53  ;;  %v24860_v57 = vpop.permute.xlu0 %12925  ;;  %v24883_v53 = vpop.permute.xlu1 %12940 }
 0xa34   : > { %16666 = vmatprep.mubr.msk.bf16.mxu1 %vm11803_vm0, %v19583_v25  ;;  %13210 = vperm.xlu1 %18380, %v12623_v36   ;;  %v14846_v36 = vld [vmem:[#allocation2] sm:$0x1] }
 0xa35   : > { %13205 = vperm.xlu0 %18379, %v12622_v3   ;;  %v12632_v3 = vld [vmem:[%s25660_s6 + $0x3e0] sm:$0xff] }
 0xa37   : > { %v24881_v8 = vpop.permute.xlu0 %12935  ;;  %v24904_v43 = vpop.permute.xlu1 %12950 }
 0xa38   : > { %12750 = vperm.xlu1 %18380, %v12531_v2  }
 0xa39   : > { %12745 = vperm.xlu0 %18379, %v12530_v30  }
 0xa3b   : > { %16667 = vmatmul.mubr.msk.bf16.gmra.mrb[20].mxu1 %vm11803_vm0, %v19583_v25  ;;  %v24894_v62 = vpop.permute.xlu0 %12945  ;;  %v12539_v25 = vld [vmem:[%s25660_s6 + $0xf8] sm:$0xff]  ;;  %v24914_v30 = vpop.permute.xlu1 %12960 }
 0xa3c   : > { %16668 = vmatprep.mubr.msk.bf16.mxu1 %vm11803_vm0, %v19584_v37  ;;  %13220 = vperm.xlu1 %18380, %v12625_v17   ;;  %26329 = vst [vmem:[#allocation6_spill] sm:$0xff] %v24914_v30 }
 0xa3d   : > { %13215 = vperm.xlu0 %18379, %v12624_v10   ;;  %v19590_v10 = vld [vmem:[%s25659_s5 + $0x60] sm:$0xff]  }
 0xa3f   : > { %v24912_v2 = vpop.permute.xlu0 %12955 }
 0xa40   : > { %12760 = vperm.xlu1 %18380, %v12533_v6  }
 0xa41   : > { %12755 = vperm.xlu0 %18379, %v12532_v56  }
 0xa43   : > { %16669 = vmatmul.mubr.msk.bf16.gmra.mrb[24].mxu1 %vm11803_vm0, %v19584_v37  ;;  %v19589_v37 = vld [vmem:[%s25659_s5 + $0x58] sm:$0xff]   ;;  %v24918_v17 = vpop.permute.xlu0 %12965 }
 0xa44   : > { %16670 = vmatprep.mubr.msk.bf16.mxu1 %vm11803_vm0, %v19585_v23  ;;  %13230 = vperm.xlu1 %18380, %v12627_v13   ;;  %26330 = vst [vmem:[#allocation7_spill] sm:$0xff] %v24918_v17  ;;  %v19591_v13 = vld [vmem:[%s25659_s5 + $0x68] sm:$0xff]  }
 0xa45   : > { %13225 = vperm.xlu0 %18379, %v12626_v28  }
 0xa47   : > { %v24927_v6 = vpop.permute.xlu0 %12975 }
 0xa48   : > { %12770 = vperm.xlu1 %18380, %v12535_v20   ;;  %26332 = vst [vmem:[#allocation9_spill] sm:$0xff] %v24927_v6  ;;  %v19592_v20 = vld [vmem:[%s25659_s5 + $0x70] sm:$0xff]  }
 0xa49   : > { %12765 = vperm.xlu0 %18379, %v12534_v50  }
 0xa4b   : > { %16671 = vmatmul.mubr.msk.bf16.gmra.mrb[28].mxu1 %vm11803_vm0, %v19585_v23  ;;  %v24923_v23 = vpop.permute.xlu1 %12970  ;;  %v24934_v28 = vpop.permute.xlu0 %12985 }
 0xa4c   : > { %16672 = vmatprep.mubr.msk.bf16.mxu1 %vm11803_vm0, %v19586_v24  ;;  %13240 = vperm.xlu1 %18380, %v12629_v42   ;;  %26331 = vst [vmem:[#allocation8_spill] sm:$0xff] %v24923_v23  ;;  %26334 = vst [vmem:[#allocation11_spill] sm:$0xff] %v24934_v28 }
 0xa4d   : > { %13235 = vperm.xlu0 %18379, %v12628_v51  }
 0xa4f   : > { %v24929_v56 = vpop.permute.xlu1 %12980  ;;  %v24943_v50 = vpop.permute.xlu0 %12995 }
 0xa50   : > { %12780 = vperm.xlu1 %18380, %v12537_v58   ;;  %26333 = vst [vmem:[#allocation10_spill] sm:$0xff] %v24929_v56  ;;  %26336 = vst [vmem:[#allocation13_spill] sm:$0xff] %v24943_v50 }
 0xa51   : > { %12775 = vperm.xlu0 %18379, %v12536_v60  }
 0xa53   : > { %16673 = vmatmul.mubr.msk.bf16.gmra.mrb[32].mxu1 %vm11803_vm0, %v19586_v24  ;;  %v24938_v24 = vpop.permute.xlu1 %12990  ;;  %v24949_v51 = vpop.permute.xlu0 %13005 }
 0xa54   : > { %16674 = vmatprep.mubr.msk.bf16.mxu1 %vm11803_vm0, %v19587_v29  ;;  %13250 = vperm.xlu1 %18380, %v12631_v12   ;;  %26335 = vst [vmem:[#allocation12_spill] sm:$0xff] %v24938_v24  ;;  %26338 = vst [vmem:[#allocation15_spill] sm:$0xff] %v24949_v51  ;;  %v19606_v51 = vld [vmem:[%s25659_s5 + $0xe0] sm:$0xff]  }
 0xa55   : > { %13245 = vperm.xlu0 %18379, %v12630_v41   ;;  %v19594_v41 = vld [vmem:[%s25659_s5 + $0x80] sm:$0xff]  }
 0xa57   : > { %v24945_v42 = vpop.permute.xlu1 %13000  ;;  %v24958_v60 = vpop.permute.xlu0 %13015 }
 0xa58   : > { %12790 = vperm.xlu1 %18380, %v12539_v25   ;;  %26337 = vst [vmem:[#allocation14_spill] sm:$0xff] %v24945_v42  ;;  %26340 = vst [vmem:[#allocation17_spill] sm:$0xff] %v24958_v60 }
 0xa59   : > { %12785 = vperm.xlu0 %18379, %v12538_v33   ;;  %v19595_v33 = vld [vmem:[%s25659_s5 + $0x88] sm:$0xff]  }
 0xa5b   : > { %16675 = vmatmul.mubr.msk.bf16.gmra.mrb[36].mxu1 %vm11803_vm0, %v19587_v29  ;;  %v19593_v29 = vld [vmem:[%s25659_s5 + $0x78] sm:$0xff]   ;;  %v24954_v58 = vpop.permute.xlu1 %13010 }
 0xa5c   : > { %16676 = vmatprep.mubr.msk.bf16.mxu1 %vm11803_vm0, %v19588_v26  ;;  %14849 = vperm.xlu1 %18380, %v14846_v36   ;;  %26339 = vst [vmem:[#allocation16_spill] sm:$0xff] %v24954_v58 }
 0xa5d   : > { %13255 = vperm.xlu0 %18379, %v12632_v3  }
 0xa5f   : > { %v24960_v12 = vpop.permute.xlu1 %13020 }
 0xa60   : > { %26341 = vst [vmem:[#allocation18_spill] sm:$0xff] %v24960_v12 }
 0xa63   : > { %16677 = vmatmul.mubr.msk.bf16.gmra.mrb[40].mxu1 %vm11803_vm0, %v19588_v26  ;;  %v24965_v26 = vpop.permute.xlu0 %13025  ;;  %v24969_v25 = vpop.permute.xlu1 %13030 }
 0xa64   : > { %16678 = vmatprep.mubr.msk.bf16.mxu1 %vm11803_vm0, %v19589_v37  ;;  %26342 = vst [vmem:[#allocation19_spill] sm:$0xff] %v24965_v26  ;;  %26343 = vst [vmem:[#allocation20_spill] sm:$0xff] %v24969_v25 }
 0xa67   : > { %v24974_v36 = vpop.permute.xlu0 %13035  ;;  %v24976_v3 = vpop.permute.xlu1 %13040 }
 0xa68   : > { %26344 = vst [vmem:[#allocation21_spill] sm:$0xff] %v24974_v36  ;;  %26345 = vst [vmem:[#allocation22_spill] sm:$0xff] %v24976_v3 }
 0xa6b   : > { %16679 = vmatmul.mubr.msk.bf16.gmra.mrb[44].mxu1 %vm11803_vm0, %v19589_v37  ;;  %v24980_v37 = vpop.permute.xlu0 %13045 }
 0xa6c   : > { %16680 = vmatprep.mubr.msk.bf16.mxu1 %vm11803_vm0, %v19590_v10  ;;  %26346 = vst [vmem:[#allocation23_spill] sm:$0xff] %v24980_v37 }
 0xa73   : > { %16681 = vmatmul.mubr.msk.bf16.gmra.mrb[48].mxu1 %vm11803_vm0, %v19590_v10  ;;  %v19596_v10 = vld [vmem:[%s25659_s5 + $0x90] sm:$0xff]  }
 0xa74   : > { %16682 = vmatprep.mubr.msk.bf16.mxu1 %vm11803_vm0, %v19591_v13 }
 0xa7b   : > { %16683 = vmatmul.mubr.msk.bf16.gmra.mrb[52].mxu1 %vm11803_vm0, %v19591_v13  ;;  %v24985_v13 = vpop.permute.xlu1 %13050 }
 0xa7c   : > { %16684 = vmatprep.mubr.msk.bf16.mxu1 %vm11803_vm0, %v19592_v20  ;;  %26347 = vst [vmem:[#allocation24_spill] sm:$0xff] %v24985_v13 }
 0xa83   : > { %16685 = vmatmul.mubr.msk.bf16.gmra.mrb[56].mxu1 %vm11803_vm0, %v19592_v20  ;;  %v24989_v20 = vpop.permute.xlu0 %13055 }
 0xa84   : > { %16686 = vmatprep.mubr.msk.bf16.mxu1 %vm11803_vm0, %v19593_v29  ;;  %26348 = vst [vmem:[#allocation25_spill] sm:$0xff] %v24989_v20 }
 0xa87   : > { %v24996_v3 = vpop.permute.xlu0 %13065 }
 0xa88   : > { %26350 = vst [vmem:[#allocation27_spill] sm:$0xff] %v24996_v3 }
 0xa8b   : > { %16687 = vmatmul.mubr.msk.bf16.gmra.mrb[60].mxu1 %vm11803_vm0, %v19593_v29  ;;  %v24991_v29 = vpop.permute.xlu1 %13060  ;;  %v25005_v13 = vpop.permute.xlu0 %13075 }
 0xa8c   : > { %16688 = vmatprep.mubr.msk.bf16.mxu1 %vm11803_vm0, %v19594_v41  ;;  %26349 = vst [vmem:[#allocation26_spill] sm:$0xff] %v24991_v29  ;;  %26352 = vst [vmem:[#allocation29_spill] sm:$0xff] %v25005_v13 }
 0xa8f   : > { %v25000_v37 = vpop.permute.xlu1 %13070  ;;  %v25011_v29 = vpop.permute.xlu0 %13085 }
 0xa90   : > { %26351 = vst [vmem:[#allocation28_spill] sm:$0xff] %v25000_v37  ;;  %26354 = vst [vmem:[#allocation31_spill] sm:$0xff] %v25011_v29 }
 0xa93   : > { %16689 = vmatmul.mubr.msk.bf16.gmra.mrb[64].mxu1 %vm11803_vm0, %v19594_v41  ;;  %v19597_v41 = vld [vmem:[%s25659_s5 + $0x98] sm:$0xff]   ;;  %v25007_v20 = vpop.permute.xlu1 %13080  ;;  %v25020_v37 = vpop.permute.xlu0 %13095 }
 0xa94   : > { %16690 = vmatprep.mubr.msk.bf16.mxu1 %vm11803_vm0, %v19595_v33  ;;  %26353 = vst [vmem:[#allocation30_spill] sm:$0xff] %v25007_v20  ;;  %26356 = vst [vmem:[#allocation33_spill] sm:$0xff] %v25020_v37 }
 0xa97   : > { %v25016_v3 = vpop.permute.xlu1 %13090  ;;  %v25027_v20 = vpop.permute.xlu0 %13105 }
 0xa98   : > { %26355 = vst [vmem:[#allocation32_spill] sm:$0xff] %v25016_v3  ;;  %26358 = vst [vmem:[#allocation35_spill] sm:$0xff] %v25027_v20 }
 0xa9b   : > { %16691 = vmatmul.mubr.msk.bf16.gmra.mrb[68].mxu1 %vm11803_vm0, %v19595_v33  ;;  %v19598_v33 = vld [vmem:[%s25659_s5 + $0xa0] sm:$0xff]   ;;  %v25022_v13 = vpop.permute.xlu1 %13100  ;;  %v25036_v3 = vpop.permute.xlu0 %13115 }
 0xa9c   : > { %16692 = vmatprep.mubr.msk.bf16.mxu1 %vm11803_vm0, %v19596_v10  ;;  %26357 = vst [vmem:[#allocation34_spill] sm:$0xff] %v25022_v13  ;;  %26360 = vst [vmem:[#allocation37_spill] sm:$0xff] %v25036_v3 }
 0xa9f   : > { %v25031_v29 = vpop.permute.xlu1 %13110  ;;  %v25042_v13 = vpop.permute.xlu0 %13125 }
 0xaa0   : > { %26359 = vst [vmem:[#allocation36_spill] sm:$0xff] %v25031_v29  ;;  %26362 = vst [vmem:[#allocation39_spill] sm:$0xff] %v25042_v13 }
 0xaa3   : > { %16693 = vmatmul.mubr.msk.bf16.gmra.mrb[72].mxu1 %vm11803_vm0, %v19596_v10  ;;  %v19599_v10 = vld [vmem:[%s25659_s5 + $0xa8] sm:$0xff]   ;;  %v25038_v37 = vpop.permute.xlu1 %13120  ;;  %v25051_v29 = vpop.permute.xlu0 %12665 }
 0xaa4   : > { %16694 = vmatprep.mubr.msk.bf16.mxu1 %vm11803_vm0, %v19597_v41  ;;  %26361 = vst [vmem:[#allocation38_spill] sm:$0xff] %v25038_v37 }
 0xaa7   : > { %v25047_v20 = vpop.permute.xlu1 %13130  ;;  %v25058_v37 = vpop.permute.xlu0 %13135 }
 0xaa8   : > { %26363 = vst [vmem:[#allocation40_spill] sm:$0xff] %v25047_v20  ;;  %26364 = vst [vmem:[#allocation41_spill] sm:$0xff] %v25058_v37  ;;  %v19710_v37 = vmov 1966171168  }
 0xaab   : > { %16695 = vmatmul.mubr.msk.bf16.gmra.mrb[76].mxu1 %vm11803_vm0, %v19597_v41  ;;  %v19600_v41 = vld [vmem:[%s25659_s5 + $0xb0] sm:$0xff]   ;;  %v25053_v3 = vpop.permute.xlu1 %12670  ;;  %v25067_v20 = vpop.permute.xlu0 %12675 }
 0xaac   : > { %16696 = vmatprep.mubr.msk.bf16.mxu1 %vm11803_vm0, %v19598_v33 }
 0xaaf   : > { %v25062_v13 = vpop.permute.xlu1 %13140  ;;  %v25073_v25 = vpop.permute.xlu0 %13145 }
 0xab0   : > { %26365 = vst [vmem:[#allocation42_spill] sm:$0xff] %v25062_v13  ;;  %26366 = vst [vmem:[#allocation43_spill] sm:$0xff] %v25073_v25  ;;  %v19605_v13 = vld [vmem:[%s25659_s5 + $0xd8] sm:$0xff]  }
 0xab3   : > { %16697 = vmatmul.mubr.msk.bf16.gmra.mrb[80].mxu1 %vm11803_vm0, %v19598_v33  ;;  %v19601_v33 = vld [vmem:[%s25659_s5 + $0xb8] sm:$0xff]   ;;  %v25069_v36 = vpop.permute.xlu1 %12680 }
 0xab4   : > { %16698 = vmatprep.mubr.msk.bf16.mxu1 %vm11803_vm0, %v19599_v10 }
 0xab7   : > { %v25078_v26 = vpop.permute.xlu1 %13150 }
 0xab8   : > { %26367 = vst [vmem:[#allocation44_spill] sm:$0xff] %v25078_v26 }
 0xabb   : > { %16699 = vmatmul.mubr.msk.bf16.gmra.mrb[84].mxu1 %vm11803_vm0, %v19599_v10  ;;  %v19602_v10 = vld [vmem:[%s25659_s5 + $0xc0] sm:$0xff]   ;;  %v25092_v58 = vpop.permute.xlu1 %12690 }
 0xabc   : > { %16700 = vmatprep.mubr.msk.bf16.mxu1 %vm11803_vm0, %v19600_v41 }
 0xabf   : > { %v25111_v23 = vpop.permute.xlu1 %13160 }
 0xac0   : > { %26369 = vst [vmem:[#allocation46_spill] sm:$0xff] %v25111_v23 }
 0xac3   : > { %16701 = vmatmul.mubr.msk.bf16.gmra.mrb[88].mxu1 %vm11803_vm0, %v19600_v41  ;;  %v19603_v41 = vld [vmem:[%s25659_s5 + $0xc8] sm:$0xff]  }
 0xac4   : > { %16702 = vmatprep.mubr.msk.bf16.mxu1 %vm11803_vm0, %v19601_v33 }
 0xacb   : > { %16703 = vmatmul.mubr.msk.bf16.gmra.mrb[92].mxu1 %vm11803_vm0, %v19601_v33  ;;  %v19604_v33 = vld [vmem:[%s25659_s5 + $0xd0] sm:$0xff]  }
 0xacc   : > { %16704 = vmatprep.mubr.msk.bf16.mxu1 %vm11803_vm0, %v19602_v10 }
 0xad3   : > { %16705 = vmatmul.mubr.msk.bf16.gmra.mrb[96].mxu1 %vm11803_vm0, %v19602_v10  ;;  %v14859_v10 = vunpack.c.l.s4 %v19710_v37  ;;  %v25090_v37 = vld.sshfl [vmem:[%s25661_s7] sm:$0xff pattern:$0x75316420] }
 0xad4   : > { %16706 = vmatprep.mubr.msk.bf16.mxu1 %vm11803_vm0, %v19603_v41 }
 0xad5   : > { %v14860_v12 = vunpack.c.0.s8 %v14859_v10 }
 0xad7   : > { %v25082_v60 = vsub.s32 %v14860_v12, %v26328_v47 }
 0xadb   : > { %16707 = vmatmul.mubr.msk.bf16.gmra.mrb[100].mxu1 %vm11803_vm0, %v19603_v41  ;;  %v25085_v41 = vpop.permute.xlu0 %12685 }
 0xadc   : > { %16708 = vmatprep.mubr.msk.bf16.mxu1 %vm11803_vm0, %v19604_v33 }
 0xae3   : > { %16709 = vmatmul.mubr.msk.bf16.gmra.mrb[104].mxu1 %vm11803_vm0, %v19604_v33  ;;  %v14872_v33 = vcombine.high %v25090_v37, %v25090_v37 }
 0xae4   : > { %16710 = vmatprep.mubr.msk.bf16.mxu1 %vm11803_vm0, %v19605_v13 }
 0xae5   : > { %v25103_v24 = vrot.slane %v14872_v33, %v25082_v60 }
 0xae6   : > { %v13842_v25 = vpop.f32.mrb[0].mxu1 }
 0xae7   : > { %v13843_v26 = vadd.f32 %v13842_v25, %v24593_v21  ;;  %v13844_v10 = vpop.f32.mrb[1].mxu1  ;;  %v25106_v25 = vpop.permute.xlu0 %13155  ;;  %14956 = vmatprep.mubr.bf16.mxu0 %v25103_v24 }
 0xae8   : > { %v13845_v12 = vadd.f32 %v13844_v10, %v24593_v21  ;;  %v13846_v47 = vpop.f32.mrb[2].mxu1  ;;  %26368 = vst [vmem:[#allocation45_spill] sm:$0xff] %v25106_v25 }
 0xae9   : > { %v13847_v42 = vadd.f32 %v13846_v47, %v24613_v0  ;;  %v13848_v50 = vpop.f32.mrb[3].mxu1  ;;  %v14469_v56 = vmax.f32 %v13843_v26, 0.0 }
 0xaea   : > { %v13849_v28 = vadd.f32 %v13848_v50, %v24613_v0  ;;  %v14470_v21 = vmax.f32 %v13845_v12, 0.0 }
 0xaeb   : > { %v14471_v6 = vmax.f32 %v13847_v42, 0.0  ;;  %16711 = vmatmul.mubr.msk.bf16.gmra.mrb[108].mxu1 %vm11803_vm0, %v19605_v13  ;;  %v19607_v42 = vld [vmem:[%s25659_s5 + $0xe8] sm:$0xff]   ;;  %v25118_v13 = vpop.permute.xlu0 %12695 }
 0xaec   : > { %v14472_v10 = vmax.f32 %v13849_v28, 0.0  ;;  %16712 = vmatprep.mubr.msk.bf16.mxu1 %vm11803_vm0, %v19606_v51 }
 0xaed   : > { %v14720_v47 = vpack.c.bf16 %v14471_v6, %v14469_v56  ;;  %v25122_v56 = vpop.permute.xlu1 %12700 }
 0xaee   : > { %v14721_v17 = vpack.c.bf16 %v14472_v10, %v14470_v21  ;;  %v13852_v33 = vpop.f32.mrb[4].mxu1 }
 0xaef   : > { %v13853_v30 = vadd.f32 %v13852_v33, %v24601_v35  ;;  %v13854_v0 = vpop.f32.mrb[5].mxu1  ;;  %v25126_v25 = vpop.permute.xlu0 %13165 }
 0xaf0   : > { %v13855_v50 = vadd.f32 %v13854_v0, %v24601_v35  ;;  %v13856_v26 = vpop.f32.mrb[6].mxu1  ;;  %14924 = vmatprep.subr.bf16.mxu0 %v14721_v17 }
 0xaf1   : > { %v13857_v28 = vadd.f32 %v13856_v26, %v24616_v31  ;;  %v13858_v12 = vpop.f32.mrb[7].mxu1  ;;  %14925 = vmatpush1.bf16.msra.mxu0 %v14720_v47  ;;  %v14473_v21 = vmax.f32 %v13853_v30, 0.0  ;;  %v19608_v30 = vld [vmem:[%s25659_s5 + $0xf0] sm:$0xff]  }
 0xaf2   : > { %v13859_v6 = vadd.f32 %v13858_v12, %v24616_v31  ;;  %v14474_v35 = vmax.f32 %v13855_v50, 0.0 }
 0xaf3   : > { %v14475_v10 = vmax.f32 %v13857_v28, 0.0  ;;  %16713 = vmatmul.mubr.msk.bf16.gmra.mrb[112].mxu1 %vm11803_vm0, %v19606_v51  ;;  %v25133_v51 = vpop.permute.xlu1 %13170 }
 0xaf4   : > { %v14476_v17 = vmax.f32 %v13859_v6, 0.0  ;;  %16714 = vmatprep.mubr.msk.bf16.mxu1 %vm11803_vm0, %v19607_v42  ;;  %26370 = vst [vmem:[#allocation47_spill] sm:$0xff] %v25133_v51 }
 0xaf5   : > { %v14722_v33 = vpack.c.bf16 %v14475_v10, %v14473_v21 }
 0xaf6   : > { %v14723_v0 = vpack.c.bf16 %v14476_v17, %v14474_v35  ;;  %v13862_v23 = vpop.f32.mrb[8].mxu1  ;;  %v25139_v35 = vpop.permute.xlu0 %12705 }
 0xaf7   : > { %v13863_v26 = vadd.f32 %v13862_v23, %v24624_v38  ;;  %v13864_v47 = vpop.f32.mrb[9].mxu1  ;;  %v25141_v51 = vpop.permute.xlu1 %12710 }
 0xaf8   : > { %v13865_v31 = vadd.f32 %v13864_v47, %v24624_v38  ;;  %v13866_v12 = vpop.f32.mrb[10].mxu1  ;;  %14926 = vmatprep.subr.bf16.mxu0 %v14723_v0 }
 0xaf9   : > { %v13867_v50 = vadd.f32 %v13866_v12, %v24636_v63  ;;  %v13868_v28 = vpop.f32.mrb[11].mxu1  ;;  %14927 = vmatpush1.bf16.msra.mxu0 %v14722_v33  ;;  %v14477_v21 = vmax.f32 %v13863_v26, 0.0 }
 0xafa   : > { %v13869_v6 = vadd.f32 %v13868_v28, %v24636_v63  ;;  %v14478_v23 = vmax.f32 %v13865_v31, 0.0 }
 0xafb   : > { %v14479_v10 = vmax.f32 %v13867_v50, 0.0  ;;  %16715 = vmatmul.mubr.msk.bf16.gmra.mrb[116].mxu1 %vm11803_vm0, %v19607_v42  ;;  %v19609_v42 = vld [vmem:[%s25659_s5 + $0xf8] sm:$0xff]  }
 0xafc   : > { %v14480_v38 = vmax.f32 %v13869_v6, 0.0  ;;  %16716 = vmatprep.mubr.msk.bf16.mxu1 %vm11803_vm0, %v19608_v30  ;;  %v25150_v6 = vpop.permute.xlu0 %13175 }
 0xafd   : > { %v14724_v17 = vpack.c.bf16 %v14479_v10, %v14477_v21 }
 0xafe   : > { %v14725_v0 = vpack.c.bf16 %v14480_v38, %v14478_v23  ;;  %v13872_v47 = vpop.f32.mrb[12].mxu1  ;;  %v25154_v38 = vpop.permute.xlu1 %13180 }
 0xaff   : > { %v13873_v12 = vadd.f32 %v13872_v47, %v25051_v29  ;;  %v13874_v33 = vpop.f32.mrb[13].mxu1  ;;  %26371 = vst [vmem:[#allocation48_spill] sm:$0xff] %v25154_v38 }
 0xb00   : > { %v13875_v63 = vadd.f32 %v13874_v33, %v25051_v29  ;;  %v13876_v26 = vpop.f32.mrb[14].mxu1  ;;  %14928 = vmatprep.subr.bf16.mxu0 %v14725_v0 }
 0xb01   : > { %v13877_v31 = vadd.f32 %v13876_v26, %v25053_v3  ;;  %v13878_v50 = vpop.f32.mrb[15].mxu1  ;;  %14929 = vmatpush1.bf16.msra.mxu0 %v14724_v17  ;;  %v14481_v21 = vmax.f32 %v13873_v12, 0.0  ;;  %v25161_v12 = vpop.permute.xlu0 %12715 }
 0xb02   : > { %v13879_v28 = vadd.f32 %v13878_v50, %v25053_v3  ;;  %v14482_v23 = vmax.f32 %v13875_v63, 0.0 }
 0xb03   : > { %v14483_v10 = vmax.f32 %v13877_v31, 0.0  ;;  %16717 = vmatmul.mubr.msk.bf16.gmra.mrb[120].mxu1 %vm11803_vm0, %v19608_v30  ;;  %v19610_v30 = vld [vmem:[%s25659_s5 + $0x100] sm:$0xff]  }
 0xb04   : > { %v14484_v29 = vmax.f32 %v13879_v28, 0.0  ;;  %16718 = vmatprep.mubr.msk.bf16.mxu1 %vm11803_vm0, %v19609_v42 }
 0xb05   : > { %v14726_v0 = vpack.c.bf16 %v14483_v10, %v14481_v21  ;;  %v25165_v21 = vpop.permute.xlu1 %12720  ;;  %v25169_v38 = vpop.permute.xlu0 %13185 }
 0xb06   : > { %v14727_v47 = vpack.c.bf16 %v14484_v29, %v14482_v23  ;;  %v13882_v33 = vpop.f32.mrb[16].mxu1 }
 0xb07   : > { %v13883_v26 = vadd.f32 %v13882_v33, %v25067_v20  ;;  %v13884_v17 = vpop.f32.mrb[17].mxu1 }
 0xb08   : > { %v13885_v3 = vadd.f32 %v13884_v17, %v25067_v20  ;;  %v13886_v50 = vpop.f32.mrb[18].mxu1  ;;  %14930 = vmatprep.subr.bf16.mxu0 %v14727_v47 }
 0xb09   : > { %v13887_v63 = vadd.f32 %v13886_v50, %v25069_v36  ;;  %v13888_v31 = vpop.f32.mrb[19].mxu1  ;;  %14931 = vmatpush1.bf16.msra.mxu0 %v14726_v0  ;;  %v14485_v10 = vmax.f32 %v13883_v26, 0.0  ;;  %v25176_v26 = vpop.permute.xlu1 %13190 }
 0xb0a   : > { %v13889_v28 = vadd.f32 %v13888_v31, %v25069_v36  ;;  %v14486_v20 = vmax.f32 %v13885_v3, 0.0  ;;  %26372 = vst [vmem:[#allocation49_spill] sm:$0xff] %v25176_v26 }
 0xb0b   : > { %v14487_v23 = vmax.f32 %v13887_v63, 0.0  ;;  %16719 = vmatmul.mubr.msk.bf16.gmra.mrb[124].mxu1 %vm11803_vm0, %v19609_v42  ;;  %v19611_v42 = vld [vmem:[%s25659_s5 + $0x108] sm:$0xff]  }
 0xb0c   : > { %v14488_v29 = vmax.f32 %v13889_v28, 0.0  ;;  %16720 = vmatprep.mubr.msk.bf16.mxu1 %vm11803_vm0, %v19610_v30 }
 0xb0d   : > { %v14728_v47 = vpack.c.bf16 %v14487_v23, %v14485_v10  ;;  %v25184_v26 = vpop.permute.xlu1 %12730 }
 0xb0e   : > { %v14729_v33 = vpack.c.bf16 %v14488_v29, %v14486_v20  ;;  %v13892_v17 = vpop.f32.mrb[20].mxu1  ;;  %v25182_v29 = vpop.permute.xlu0 %12725 }
 0xb0f   : > { %v13893_v50 = vadd.f32 %v13892_v17, %v25085_v41  ;;  %v13894_v0 = vpop.f32.mrb[21].mxu1 }
 0xb10   : > { %v13895_v36 = vadd.f32 %v13894_v0, %v25085_v41  ;;  %v13896_v31 = vpop.f32.mrb[22].mxu1  ;;  %14932 = vmatprep.subr.bf16.mxu0 %v14729_v33 }
 0xb11   : > { %v13897_v3 = vadd.f32 %v13896_v31, %v25092_v58  ;;  %v13898_v63 = vpop.f32.mrb[23].mxu1  ;;  %14933 = vmatpush1.bf16.msra.mxu0 %v14728_v47  ;;  %v14489_v10 = vmax.f32 %v13893_v50, 0.0 }
 0xb12   : > { %v13899_v28 = vadd.f32 %v13898_v63, %v25092_v58  ;;  %v14490_v20 = vmax.f32 %v13895_v36, 0.0 }
 0xb13   : > { %v14491_v23 = vmax.f32 %v13897_v3, 0.0  ;;  %16721 = vmatmul.mubr.msk.bf16.gmra.mrb[128].mxu1 %vm11803_vm0, %v19610_v30  ;;  %v19612_v30 = vld [vmem:[%s25659_s5 + $0x110] sm:$0xff]  }
 0xb14   : > { %v14492_v41 = vmax.f32 %v13899_v28, 0.0  ;;  %16722 = vmatprep.mubr.msk.bf16.mxu1 %vm11803_vm0, %v19611_v42  ;;  %v25193_v28 = vpop.permute.xlu0 %13195 }
 0xb15   : > { %v14730_v33 = vpack.c.bf16 %v14491_v23, %v14489_v10  ;;  %26373 = vst [vmem:[#allocation50_spill] sm:$0xff] %v25193_v28 }
 0xb16   : > { %v14731_v17 = vpack.c.bf16 %v14492_v41, %v14490_v20  ;;  %v13902_v0 = vpop.f32.mrb[24].mxu1  ;;  %v25197_v41 = vpop.permute.xlu1 %13200 }
 0xb17   : > { %v13903_v31 = vadd.f32 %v13902_v0, %v25118_v13  ;;  %v13904_v47 = vpop.f32.mrb[25].mxu1  ;;  %26374 = vst [vmem:[#allocation51_spill] sm:$0xff] %v25197_v41 }
 0xb18   : > { %v13905_v58 = vadd.f32 %v13904_v47, %v25118_v13  ;;  %v13906_v50 = vpop.f32.mrb[26].mxu1  ;;  %14934 = vmatprep.subr.bf16.mxu0 %v14731_v17 }
 0xb19   : > { %v13907_v36 = vadd.f32 %v13906_v50, %v25122_v56  ;;  %v13908_v3 = vpop.f32.mrb[27].mxu1  ;;  %14935 = vmatpush1.bf16.msra.mxu0 %v14730_v33  ;;  %v14493_v10 = vmax.f32 %v13903_v31, 0.0  ;;  %v12736_v31 = vpop.permute.xlu0 %12735 }
 0xb1a   : > { %v13909_v63 = vadd.f32 %v13908_v3, %v25122_v56  ;;  %v14494_v20 = vmax.f32 %v13905_v58, 0.0 }
 0xb1b   : > { %v14495_v23 = vmax.f32 %v13907_v36, 0.0  ;;  %16723 = vmatmul.mubr.msk.bf16.gmra.mrb[132].mxu1 %vm11803_vm0, %v19611_v42  ;;  %v19613_v42 = vld [vmem:[%s25659_s5 + $0x118] sm:$0xff]  }
 0xb1c   : > { %v14496_v13 = vmax.f32 %v13909_v63, 0.0  ;;  %16724 = vmatprep.mubr.msk.bf16.mxu1 %vm11803_vm0, %v19612_v30 }
 0xb1d   : > { %v14732_v17 = vpack.c.bf16 %v14495_v23, %v14493_v10  ;;  %v25206_v10 = vpop.permute.xlu1 %12740  ;;  %v25210_v41 = vpop.permute.xlu0 %13205 }
 0xb1e   : > { %v14733_v0 = vpack.c.bf16 %v14496_v13, %v14494_v20  ;;  %v13912_v47 = vpop.f32.mrb[28].mxu1  ;;  %26375 = vst [vmem:[#allocation52_spill] sm:$0xff] %v25210_v41 }
 0xb1f   : > { %v13913_v50 = vadd.f32 %v13912_v47, %v25139_v35  ;;  %v13914_v33 = vpop.f32.mrb[29].mxu1 }
 0xb20   : > { %v13915_v56 = vadd.f32 %v13914_v33, %v25139_v35  ;;  %v13916_v3 = vpop.f32.mrb[30].mxu1  ;;  %14936 = vmatprep.subr.bf16.mxu0 %v14733_v0 }
 0xb21   : > { %v13917_v58 = vadd.f32 %v13916_v3, %v25141_v51  ;;  %v13918_v36 = vpop.f32.mrb[31].mxu1  ;;  %14937 = vmatpush1.bf16.msra.mxu0 %v14732_v17  ;;  %v14497_v23 = vmax.f32 %v13913_v50, 0.0  ;;  %v25217_v50 = vpop.permute.xlu1 %13210 }
 0xb22   : > { %v13919_v63 = vadd.f32 %v13918_v36, %v25141_v51  ;;  %v14498_v35 = vmax.f32 %v13915_v56, 0.0  ;;  %26376 = vst [vmem:[#allocation53_spill] sm:$0xff] %v25217_v50 }
 0xb23   : > { %v14499_v20 = vmax.f32 %v13917_v58, 0.0  ;;  %16725 = vmatmul.mubr.msk.bf16.gmra.mrb[136].mxu1 %vm11803_vm0, %v19612_v30  ;;  %v19614_v30 = vld [vmem:[%s25659_s5 + $0x120] sm:$0xff]  }
 0xb24   : > { %v14500_v13 = vmax.f32 %v13919_v63, 0.0  ;;  %16726 = vmatprep.mubr.msk.bf16.mxu1 %vm11803_vm0, %v19613_v42 }
 0xb25   : > { %v14734_v0 = vpack.c.bf16 %v14499_v20, %v14497_v23  ;;  %v12751_v41 = vpop.permute.xlu1 %12750 }
 0xb26   : > { %v14735_v47 = vpack.c.bf16 %v14500_v13, %v14498_v35  ;;  %v13922_v33 = vpop.f32.mrb[32].mxu1  ;;  %v12746_v13 = vpop.permute.xlu0 %12745 }
 0xb27   : > { %v13923_v3 = vadd.f32 %v13922_v33, %v25161_v12  ;;  %v13924_v17 = vpop.f32.mrb[33].mxu1 }
 0xb28   : > { %v13925_v51 = vadd.f32 %v13924_v17, %v25161_v12  ;;  %v13926_v36 = vpop.f32.mrb[34].mxu1  ;;  %14938 = vmatprep.subr.bf16.mxu0 %v14735_v47 }
 0xb29   : > { %v13927_v56 = vadd.f32 %v13926_v36, %v25165_v21  ;;  %v13928_v58 = vpop.f32.mrb[35].mxu1  ;;  %14939 = vmatpush1.bf16.msra.mxu0 %v14734_v0  ;;  %v14501_v23 = vmax.f32 %v13923_v3, 0.0 }
 0xb2a   : > { %v13929_v63 = vadd.f32 %v13928_v58, %v25165_v21  ;;  %v14502_v35 = vmax.f32 %v13925_v51, 0.0  ;;  %v19615_v21 = vld [vmem:[%s25659_s5 + $0x128] sm:$0xff]  }
 0xb2b   : > { %v14503_v20 = vmax.f32 %v13927_v56, 0.0  ;;  %16727 = vmatmul.mubr.msk.bf16.gmra.mrb[140].mxu1 %vm11803_vm0, %v19613_v42  ;;  %v25230_v56 = vpop.permute.xlu0 %13215 }
 0xb2c   : > { %v14504_v12 = vmax.f32 %v13929_v63, 0.0  ;;  %16728 = vmatprep.mubr.msk.bf16.mxu1 %vm11803_vm0, %v19614_v30 }
 0xb2d   : > { %v14736_v47 = vpack.c.bf16 %v14503_v20, %v14501_v23  ;;  %v25234_v20 = vpop.permute.xlu1 %13220 }
 0xb2e   : > { %v14737_v33 = vpack.c.bf16 %v14504_v12, %v14502_v35  ;;  %v13932_v17 = vpop.f32.mrb[36].mxu1  ;;  %26377 = vst [vmem:[#allocation54_spill] sm:$0xff] %v25234_v20 }
 0xb2f   : > { %v13933_v50 = vadd.f32 %v13932_v17, %v25182_v29  ;;  %v13934_v36 = vpop.f32.mrb[37].mxu1 }
 0xb30   : > { %v13935_v0 = vadd.f32 %v13934_v36, %v25182_v29  ;;  %v13936_v28 = vpop.f32.mrb[38].mxu1  ;;  %14940 = vmatprep.subr.bf16.mxu0 %v14737_v33 }
 0xb31   : > { %v13937_v42 = vadd.f32 %v13936_v28, %v25184_v26  ;;  %v13938_v3 = vpop.f32.mrb[39].mxu1  ;;  %14941 = vmatpush1.bf16.msra.mxu0 %v14736_v47  ;;  %v14505_v58 = vmax.f32 %v13933_v50, 0.0  ;;  %v19616_v50 = vld [vmem:[%s25659_s5 + $0x130] sm:$0xff]  }
 0xb32   : > { %v13939_v51 = vadd.f32 %v13938_v3, %v25184_v26  ;;  %v14506_v23 = vmax.f32 %v13935_v0, 0.0  ;;  %v12756_v26 = vpop.permute.xlu0 %12755  ;;  %v12761_v3 = vpop.permute.xlu1 %12760 }
 0xb33   : > { %v14507_v63 = vmax.f32 %v13937_v42, 0.0  ;;  %16729 = vmatmul.mubr.msk.bf16.gmra.mrb[144].mxu1 %vm11803_vm0, %v19614_v30 }
 0xb34   : > { %v14508_v29 = vmax.f32 %v13939_v51, 0.0  ;;  %16730 = vmatprep.mubr.msk.bf16.mxu1 %vm11803_vm0, %v19615_v21 }
 0xb35   : > { %v14738_v35 = vpack.c.bf16 %v14507_v63, %v14505_v58 }
 0xb36   : > { %v14739_v12 = vpack.c.bf16 %v14508_v29, %v14506_v23  ;;  %v13942_v33 = vpop.f32.mrb[40].mxu1 }
 0xb37   : > { %v13943_v28 = vadd.f32 %v13942_v33, %v12736_v31  ;;  %v13944_v17 = vpop.f32.mrb[41].mxu1  ;;  %v25243_v33 = vpop.permute.xlu0 %13225 }
 0xb38   : > { %v13945_v47 = vadd.f32 %v13944_v17, %v12736_v31  ;;  %v13946_v36 = vpop.f32.mrb[42].mxu1  ;;  %14942 = vmatprep.subr.bf16.mxu0 %v14739_v12  ;;  %26378 = vst [vmem:[#allocation55_spill] sm:$0xff] %v25243_v33 }
 0xb39   : > { %v13947_v30 = vadd.f32 %v13946_v36, %v25206_v10  ;;  %v13948_v0 = vpop.f32.mrb[43].mxu1  ;;  %14943 = vmatpush1.bf16.msra.mxu0 %v14738_v35  ;;  %v14509_v51 = vmax.f32 %v13943_v28, 0.0 }
 0xb3a   : > { %v13949_v42 = vadd.f32 %v13948_v0, %v25206_v10  ;;  %v14510_v63 = vmax.f32 %v13945_v47, 0.0  ;;  %v25245_v10 = vpop.permute.xlu1 %13230 }
 0xb3b   : > { %v14511_v58 = vmax.f32 %v13947_v30, 0.0  ;;  %16731 = vmatmul.mubr.msk.bf16.gmra.mrb[148].mxu1 %vm11803_vm0, %v19615_v21  ;;  %26379 = vst [vmem:[#allocation56_spill] sm:$0xff] %v25245_v10  ;;  %v19617_v21 = vld [vmem:[%s25659_s5 + $0x138] sm:$0xff]  }
 0xb3c   : > { %v14512_v31 = vmax.f32 %v13949_v42, 0.0  ;;  %16732 = vmatprep.mubr.msk.bf16.mxu1 %vm11803_vm0, %v19616_v50 }
 0xb3d   : > { %v14740_v23 = vpack.c.bf16 %v14511_v58, %v14509_v51 }
 0xb3e   : > { %v14741_v29 = vpack.c.bf16 %v14512_v31, %v14510_v63  ;;  %v13952_v12 = vpop.f32.mrb[44].mxu1  ;;  %v12766_v63 = vpop.permute.xlu0 %12765 }
 0xb3f   : > { %v13953_v17 = vadd.f32 %v13952_v12, %v12746_v13  ;;  %v13954_v36 = vpop.f32.mrb[45].mxu1  ;;  %v12771_v12 = vpop.permute.xlu1 %12770 }
 0xb40   : > { %v13955_v20 = vadd.f32 %v13954_v36, %v12746_v13  ;;  %v13956_v35 = vpop.f32.mrb[46].mxu1  ;;  %14944 = vmatprep.subr.bf16.mxu0 %v14741_v29 }
 0xb41   : > { %v13957_v28 = vadd.f32 %v13956_v35, %v12751_v41  ;;  %v13958_v47 = vpop.f32.mrb[47].mxu1  ;;  %14945 = vmatpush1.bf16.msra.mxu0 %v14740_v23  ;;  %v14513_v0 = vmax.f32 %v13953_v17, 0.0 }
 0xb42   : > { %v13959_v30 = vadd.f32 %v13958_v47, %v12751_v41  ;;  %v14514_v51 = vmax.f32 %v13955_v20, 0.0  ;;  %v19618_v41 = vld [vmem:[%s25659_s5 + $0x140] sm:$0xff]   ;;  %v25255_v17 = vpop.permute.xlu0 %13235 }
 0xb43   : > { %v14515_v42 = vmax.f32 %v13957_v28, 0.0  ;;  %16733 = vmatmul.mubr.msk.bf16.gmra.mrb[152].mxu1 %vm11803_vm0, %v19616_v50 }
 0xb44   : > { %v14516_v58 = vmax.f32 %v13959_v30, 0.0  ;;  %16734 = vmatprep.mubr.msk.bf16.mxu1 %vm11803_vm0, %v19617_v21 }
 0xb45   : > { %v14742_v13 = vpack.c.bf16 %v14515_v42, %v14513_v0  ;;  %v25258_v42 = vpop.permute.xlu1 %13240 }
 0xb46   : > { %v14743_v31 = vpack.c.bf16 %v14516_v58, %v14514_v51  ;;  %v13962_v29 = vpop.f32.mrb[48].mxu1  ;;  %26380 = vst [vmem:[#allocation57_spill] sm:$0xff] %v25258_v42 }
 0xb47   : > { %v13963_v36 = vadd.f32 %v13962_v29, %v12756_v26  ;;  %v13964_v10 = vpop.f32.mrb[49].mxu1 }
 0xb48   : > { %v13965_v33 = vadd.f32 %v13964_v10, %v12756_v26  ;;  %v13966_v35 = vpop.f32.mrb[50].mxu1  ;;  %14946 = vmatprep.subr.bf16.mxu0 %v14743_v31 }
 0xb49   : > { %v13967_v23 = vadd.f32 %v13966_v35, %v12761_v3  ;;  %v13968_v50 = vpop.f32.mrb[51].mxu1  ;;  %14947 = vmatpush1.bf16.msra.mxu0 %v14742_v13  ;;  %v14517_v28 = vmax.f32 %v13963_v36, 0.0  ;;  %v19619_v36 = vld [vmem:[%s25659_s5 + $0x148] sm:$0xff]   ;;  %v12781_v35 = vpop.permute.xlu1 %12780 }
 0xb4a   : > { %v13969_v20 = vadd.f32 %v13968_v50, %v12761_v3  ;;  %v14518_v30 = vmax.f32 %v13965_v33, 0.0  ;;  %v12776_v3 = vpop.permute.xlu0 %12775 }
 0xb4b   : > { %v14519_v47 = vmax.f32 %v13967_v23, 0.0  ;;  %16735 = vmatmul.mubr.msk.bf16.gmra.mrb[156].mxu1 %vm11803_vm0, %v19617_v21 }
 0xb4c   : > { %v14520_v0 = vmax.f32 %v13969_v20, 0.0  ;;  %16736 = vmatprep.mubr.msk.bf16.mxu1 %vm11803_vm0, %v19618_v41 }
 0xb4d   : > { %v14744_v26 = vpack.c.bf16 %v14519_v47, %v14517_v28 }
 0xb4e   : > { %v14745_v10 = vpack.c.bf16 %v14520_v0, %v14518_v30  ;;  %v13972_v51 = vpop.f32.mrb[52].mxu1  ;;  %v25266_v0 = vpop.permute.xlu0 %13245 }
 0xb4f   : > { %v13973_v58 = vadd.f32 %v13972_v51, %v12766_v63  ;;  %v13974_v31 = vpop.f32.mrb[53].mxu1 }
 0xb50   : > { %v13975_v29 = vadd.f32 %v13974_v31, %v12766_v63  ;;  %v13976_v13 = vpop.f32.mrb[54].mxu1  ;;  %14948 = vmatprep.subr.bf16.mxu0 %v14745_v10 }
 0xb51   : > { %v13977_v21 = vadd.f32 %v13976_v13, %v12771_v12  ;;  %v13978_v33 = vpop.f32.mrb[55].mxu1  ;;  %14949 = vmatpush1.bf16.msra.mxu0 %v14744_v26  ;;  %v14521_v50 = vmax.f32 %v13973_v58, 0.0  ;;  %v25268_v13 = vpop.permute.xlu1 %13250 }
 0xb52   : > { %v13979_v23 = vadd.f32 %v13978_v33, %v12771_v12  ;;  %v14522_v28 = vmax.f32 %v13975_v29, 0.0  ;;  %26381 = vst [vmem:[#allocation58_spill] sm:$0xff] %v25268_v13  ;;  %v19620_v12 = vld [vmem:[%s25659_s5 + $0x150] sm:$0xff]  }
 0xb53   : > { %v14523_v20 = vmax.f32 %v13977_v21, 0.0  ;;  %16737 = vmatmul.mubr.msk.bf16.gmra.mrb[160].mxu1 %vm11803_vm0, %v19618_v41 }
 0xb54   : > { %v14524_v47 = vmax.f32 %v13979_v23, 0.0  ;;  %16738 = vmatprep.mubr.msk.bf16.mxu1 %vm11803_vm0, %v19619_v36 }
 0xb55   : > { %v14746_v63 = vpack.c.bf16 %v14523_v20, %v14521_v50  ;;  %v12786_v50 = vpop.permute.xlu0 %12785 }
 0xb56   : > { %v14747_v30 = vpack.c.bf16 %v14524_v47, %v14522_v28  ;;  %v13982_v10 = vpop.f32.mrb[56].mxu1  ;;  %v12791_v28 = vpop.permute.xlu1 %12790 }
 0xb57   : > { %v13983_v51 = vadd.f32 %v13982_v10, %v12776_v3  ;;  %v13984_v31 = vpop.f32.mrb[57].mxu1 }
 0xb58   : > { %v13985_v26 = vadd.f32 %v13984_v31, %v12776_v3  ;;  %v13986_v42 = vpop.f32.mrb[58].mxu1  ;;  %14950 = vmatprep.subr.bf16.mxu0 %v14747_v30 }
 0xb59   : > { %v13987_v41 = vadd.f32 %v13986_v42, %v12781_v35  ;;  %v13988_v58 = vpop.f32.mrb[59].mxu1  ;;  %14951 = vmatpush1.bf16.msra.mxu0 %v14746_v63  ;;  %v14525_v21 = vmax.f32 %v13983_v51, 0.0 }
 0xb5a   : > { %v13989_v29 = vadd.f32 %v13988_v58, %v12781_v35  ;;  %v14526_v23 = vmax.f32 %v13985_v26, 0.0  ;;  %v19621_v35 = vld [vmem:[%s25659_s5 + $0x158] sm:$0xff]  }
 0xb5b   : > { %v14527_v33 = vmax.f32 %v13987_v41, 0.0  ;;  %16739 = vmatmul.mubr.msk.bf16.gmra.mrb[164].mxu1 %vm11803_vm0, %v19619_v36 }
 0xb5c   : > { %v14528_v20 = vmax.f32 %v13989_v29, 0.0  ;;  %16740 = vmatprep.mubr.msk.bf16.mxu1 %vm11803_vm0, %v19620_v12 }
 0xb5d   : > { %v14748_v3 = vpack.c.bf16 %v14527_v33, %v14525_v21 }
 0xb5e   : > { %v14749_v47 = vpack.c.bf16 %v14528_v20, %v14526_v23  ;;  %v13992_v30 = vpop.f32.mrb[60].mxu1 }
 0xb5f   : > { %v13993_v10 = vadd.f32 %v13992_v30, %v12786_v50  ;;  %v13994_v31 = vpop.f32.mrb[61].mxu1 }
 0xb60   : > { %v13995_v13 = vadd.f32 %v13994_v31, %v12786_v50  ;;  %v13996_v42 = vpop.f32.mrb[62].mxu1  ;;  %14952 = vmatprep.subr.bf16.mxu0 %v14749_v47 }
 0xb61   : > { %v13997_v63 = vadd.f32 %v13996_v42, %v12791_v28  ;;  %v13998_v36 = vpop.f32.mrb[63].mxu1  ;;  %14953 = vmatpush1.bf16.msra.mxu0 %v14748_v3  ;;  %v14529_v26 = vmax.f32 %v13993_v10, 0.0  ;;  %v25284_v3 = vrot.slane %v25090_v37, %v25082_v60 }
 0xb62   : > { %v13999_v51 = vadd.f32 %v13998_v36, %v12791_v28  ;;  %v14530_v58 = vmax.f32 %v13995_v13, 0.0  ;;  %v19622_v13 = vld [vmem:[%s25659_s5 + $0x160] sm:$0xff]  }
 0xb63   : > { %v14531_v41 = vmax.f32 %v13997_v63, 0.0  ;;  %16741 = vmatmul.mubr.msk.bf16.gmra.mrb[168].mxu1 %vm11803_vm0, %v19620_v12 }
 0xb64   : > { %v14532_v29 = vmax.f32 %v13999_v51, 0.0  ;;  %16742 = vmatprep.mubr.msk.bf16.mxu1 %vm11803_vm0, %v19621_v35 }
 0xb65   : > { %v14750_v21 = vpack.c.bf16 %v14531_v41, %v14529_v26 }
 0xb66   : > { %v14751_v33 = vpack.c.bf16 %v14532_v29, %v14530_v58  ;;  %v14002_v23 = vpop.f32.mrb[64].mxu1 }
 0xb67   : > { %v14003_v50 = vadd.f32 %v14002_v23, %v24645_v48  ;;  %v14004_v20 = vpop.f32.mrb[65].mxu1 }
 0xb68   : > { %v14005_v47 = vadd.f32 %v14004_v20, %v24645_v48  ;;  %v14006_v30 = vpop.f32.mrb[66].mxu1  ;;  %14954 = vmatprep.subr.bf16.mxu0 %v14751_v33 }
 0xb69   : > { %v14007_v12 = vadd.f32 %v14006_v30, %v24647_v55  ;;  %v14008_v28 = vpop.f32.mrb[67].mxu1  ;;  %14955 = vmatpush1.bf16.msra.mxu0 %v14750_v21  ;;  %v14533_v31 = vmax.f32 %v14003_v50, 0.0 }
 0xb6a   : > { %v14009_v10 = vadd.f32 %v14008_v28, %v24647_v55  ;;  %v14534_v48 = vmax.f32 %v14005_v47, 0.0  ;;  %v19623_v55 = vld [vmem:[%s25659_s5 + $0x168] sm:$0xff]  }
 0xb6b   : > { %v14535_v42 = vmax.f32 %v14007_v12, 0.0  ;;  %16743 = vmatmul.mubr.msk.bf16.gmra.mrb[172].mxu1 %vm11803_vm0, %v19621_v35 }
 0xb6c   : > { %v14536_v63 = vmax.f32 %v14009_v10, 0.0  ;;  %14957 = vmatmul.mubr.bf16.vlgmr.msra.gmra.mrb[128].mxu0 %v25284_v3  ;;  %16744 = vmatprep.mubr.msk.bf16.mxu1 %vm11803_vm0, %v19622_v13 }
 0xb6d   : > { %v14752_v37 = vpack.c.bf16 %v14535_v42, %v14533_v31 }
 0xb6e   : > { %v14753_v36 = vpack.c.bf16 %v14536_v63, %v14534_v48  ;;  %v14012_v51 = vpop.f32.mrb[68].mxu1 }
 0xb6f   : > { %v14013_v26 = vadd.f32 %v14012_v51, %v24660_v52  ;;  %v14014_v41 = vpop.f32.mrb[69].mxu1 }
 0xb70   : > { %v14015_v58 = vadd.f32 %v14014_v41, %v24660_v52  ;;  %v14016_v29 = vpop.f32.mrb[70].mxu1  ;;  %14965 = vmatprep.subr.bf16.mxu1 %v14753_v36 }
 0xb71   : > { %v14017_v35 = vadd.f32 %v14016_v29, %v24668_v4  ;;  %v14018_v21 = vpop.f32.mrb[71].mxu1  ;;  %14966 = vmatpush1.bf16.msra.mxu1 %v14752_v37  ;;  %v14537_v23 = vmax.f32 %v14013_v26, 0.0 }
 0xb72   : > { %v14019_v33 = vadd.f32 %v14018_v21, %v24668_v4  ;;  %v14538_v20 = vmax.f32 %v14015_v58, 0.0  ;;  %v19624_v4 = vld [vmem:[%s25659_s5 + $0x170] sm:$0xff]  }
 0xb73   : > { %v14539_v50 = vmax.f32 %v14017_v35, 0.0  ;;  %16745 = vmatmul.mubr.msk.bf16.gmra.mrb[176].mxu1 %vm11803_vm0, %v19622_v13 }
 0xb74   : > { %v14540_v47 = vmax.f32 %v14019_v33, 0.0  ;;  %16746 = vmatprep.mubr.msk.bf16.mxu1 %vm11803_vm0, %v19623_v55 }
 0xb75   : > { %v14754_v52 = vpack.c.bf16 %v14539_v50, %v14537_v23 }
 0xb76   : > { %v14755_v30 = vpack.c.bf16 %v14540_v47, %v14538_v20  ;;  %v14022_v12 = vpop.f32.mrb[72].mxu1 }
 0xb77   : > { %v14023_v28 = vadd.f32 %v14022_v12, %v24679_v32  ;;  %v14024_v10 = vpop.f32.mrb[73].mxu1 }
 0xb78   : > { %v14025_v31 = vadd.f32 %v14024_v10, %v24679_v32  ;;  %v14026_v42 = vpop.f32.mrb[74].mxu1  ;;  %14967 = vmatprep.subr.bf16.mxu1 %v14755_v30 }
 0xb79   : > { %v14027_v13 = vadd.f32 %v14026_v42, %v24681_v34  ;;  %v14028_v48 = vpop.f32.mrb[75].mxu1  ;;  %14968 = vmatpush1.bf16.msra.mxu1 %v14754_v52  ;;  %v14541_v37 = vmax.f32 %v14023_v28, 0.0 }
 0xb7a   : > { %v14029_v63 = vadd.f32 %v14028_v48, %v24681_v34  ;;  %v14542_v51 = vmax.f32 %v14025_v31, 0.0  ;;  %v19625_v34 = vld [vmem:[%s25659_s5 + $0x178] sm:$0xff]  }
 0xb7b   : > { %v14543_v36 = vmax.f32 %v14027_v13, 0.0  ;;  %16747 = vmatmul.mubr.msk.bf16.gmra.mrb[180].mxu1 %vm11803_vm0, %v19623_v55 }
 0xb7c   : > { %v14544_v26 = vmax.f32 %v14029_v63, 0.0  ;;  %16748 = vmatprep.mubr.msk.bf16.mxu1 %vm11803_vm0, %v19624_v4 }
 0xb7d   : > { %v14756_v32 = vpack.c.bf16 %v14543_v36, %v14541_v37 }
 0xb7e   : > { %v14757_v41 = vpack.c.bf16 %v14544_v26, %v14542_v51  ;;  %v14032_v58 = vpop.f32.mrb[76].mxu1 }
 0xb7f   : > { %v14033_v29 = vadd.f32 %v14032_v58, %v24692_v22  ;;  %v14034_v35 = vpop.f32.mrb[77].mxu1 }
 0xb80   : > { %v14035_v21 = vadd.f32 %v14034_v35, %v24692_v22  ;;  %v14036_v33 = vpop.f32.mrb[78].mxu1  ;;  %14969 = vmatprep.subr.bf16.mxu1 %v14757_v41 }
 0xb81   : > { %v14037_v55 = vadd.f32 %v14036_v33, %v24703_v11  ;;  %v14038_v23 = vpop.f32.mrb[79].mxu1  ;;  %14970 = vmatpush1.bf16.msra.mxu1 %v14756_v32  ;;  %v14545_v20 = vmax.f32 %v14033_v29, 0.0 }
 0xb82   : > { %v14039_v50 = vadd.f32 %v14038_v23, %v24703_v11  ;;  %v14546_v52 = vmax.f32 %v14035_v21, 0.0  ;;  %v19626_v11 = vld [vmem:[%s25659_s5 + $0x180] sm:$0xff]  }
 0xb83   : > { %v14547_v47 = vmax.f32 %v14037_v55, 0.0  ;;  %16749 = vmatmul.mubr.msk.bf16.gmra.mrb[184].mxu1 %vm11803_vm0, %v19624_v4 }
 0xb84   : > { %v14548_v30 = vmax.f32 %v14039_v50, 0.0  ;;  %16750 = vmatprep.mubr.msk.bf16.mxu1 %vm11803_vm0, %v19625_v34 }
 0xb85   : > { %v14758_v22 = vpack.c.bf16 %v14547_v47, %v14545_v20 }
 0xb86   : > { %v14759_v12 = vpack.c.bf16 %v14548_v30, %v14546_v52  ;;  %v14042_v28 = vpop.f32.mrb[80].mxu1 }
 0xb87   : > { %v14043_v10 = vadd.f32 %v14042_v28, %v24714_v18  ;;  %v14044_v31 = vpop.f32.mrb[81].mxu1 }
 0xb88   : > { %v14045_v42 = vadd.f32 %v14044_v31, %v24714_v18  ;;  %v14046_v13 = vpop.f32.mrb[82].mxu1  ;;  %14971 = vmatprep.subr.bf16.mxu1 %v14759_v12 }
 0xb89   : > { %v14047_v4 = vadd.f32 %v14046_v13, %v24716_v5  ;;  %v14048_v48 = vpop.f32.mrb[83].mxu1  ;;  %14972 = vmatpush1.bf16.msra.mxu1 %v14758_v22  ;;  %v14549_v37 = vmax.f32 %v14043_v10, 0.0 }
 0xb8a   : > { %v14049_v63 = vadd.f32 %v14048_v48, %v24716_v5  ;;  %v14550_v51 = vmax.f32 %v14045_v42, 0.0  ;;  %v19627_v5 = vld [vmem:[%s25659_s5 + $0x188] sm:$0xff]  }
 0xb8b   : > { %v14551_v36 = vmax.f32 %v14047_v4, 0.0  ;;  %16751 = vmatmul.mubr.msk.bf16.gmra.mrb[188].mxu1 %vm11803_vm0, %v19625_v34 }
 0xb8c   : > { %v14552_v26 = vmax.f32 %v14049_v63, 0.0  ;;  %16752 = vmatprep.mubr.msk.bf16.mxu1 %vm11803_vm0, %v19626_v11 }
 0xb8d   : > { %v14760_v18 = vpack.c.bf16 %v14551_v36, %v14549_v37 }
 0xb8e   : > { %v14761_v32 = vpack.c.bf16 %v14552_v26, %v14550_v51  ;;  %v14052_v41 = vpop.f32.mrb[84].mxu1 }
 0xb8f   : > { %v14053_v58 = vadd.f32 %v14052_v41, %v24726_v40  ;;  %v14054_v29 = vpop.f32.mrb[85].mxu1 }
 0xb90   : > { %v14055_v35 = vadd.f32 %v14054_v29, %v24726_v40  ;;  %v14056_v21 = vpop.f32.mrb[86].mxu1  ;;  %14973 = vmatprep.subr.bf16.mxu1 %v14761_v32 }
 0xb91   : > { %v14057_v33 = vadd.f32 %v14056_v21, %v24737_v49  ;;  %v14058_v34 = vpop.f32.mrb[87].mxu1  ;;  %14974 = vmatpush1.bf16.msra.mxu1 %v14760_v18  ;;  %v14553_v23 = vmax.f32 %v14053_v58, 0.0 }
 0xb92   : > { %v14059_v55 = vadd.f32 %v14058_v34, %v24737_v49  ;;  %v14554_v20 = vmax.f32 %v14055_v35, 0.0  ;;  %v19628_v49 = vld [vmem:[%s25659_s5 + $0x190] sm:$0xff]  }
 0xb93   : > { %v14555_v50 = vmax.f32 %v14057_v33, 0.0  ;;  %16753 = vmatmul.mubr.msk.bf16.gmra.mrb[192].mxu1 %vm11803_vm0, %v19626_v11 }
 0xb94   : > { %v14556_v47 = vmax.f32 %v14059_v55, 0.0  ;;  %16754 = vmatprep.mubr.msk.bf16.mxu1 %vm11803_vm0, %v19627_v5 }
 0xb95   : > { %v14762_v40 = vpack.c.bf16 %v14555_v50, %v14553_v23 }
 0xb96   : > { %v14763_v52 = vpack.c.bf16 %v14556_v47, %v14554_v20  ;;  %v14062_v30 = vpop.f32.mrb[88].mxu1 }
 0xb97   : > { %v14063_v22 = vadd.f32 %v14062_v30, %v24747_v54  ;;  %v14064_v12 = vpop.f32.mrb[89].mxu1 }
 0xb98   : > { %v14065_v28 = vadd.f32 %v14064_v12, %v24747_v54  ;;  %v14066_v10 = vpop.f32.mrb[90].mxu1  ;;  %14975 = vmatprep.subr.bf16.mxu1 %v14763_v52 }
 0xb99   : > { %v14067_v31 = vadd.f32 %v14066_v10, %v24749_v46  ;;  %v14068_v42 = vpop.f32.mrb[91].mxu1  ;;  %14976 = vmatpush1.bf16.msra.mxu1 %v14762_v40  ;;  %v14557_v11 = vmax.f32 %v14063_v22, 0.0 }
 0xb9a   : > { %v14069_v13 = vadd.f32 %v14068_v42, %v24749_v46  ;;  %v14558_v48 = vmax.f32 %v14065_v28, 0.0  ;;  %v19629_v46 = vld [vmem:[%s25659_s5 + $0x198] sm:$0xff]  }
 0xb9b   : > { %v14559_v4 = vmax.f32 %v14067_v31, 0.0  ;;  %16755 = vmatmul.mubr.msk.bf16.gmra.mrb[196].mxu1 %vm11803_vm0, %v19627_v5 }
 0xb9c   : > { %v14560_v63 = vmax.f32 %v14069_v13, 0.0  ;;  %16756 = vmatprep.mubr.msk.bf16.mxu1 %vm11803_vm0, %v19628_v49 }
 0xb9d   : > { %v14764_v54 = vpack.c.bf16 %v14559_v4, %v14557_v11 }
 0xb9e   : > { %v14765_v37 = vpack.c.bf16 %v14560_v63, %v14558_v48  ;;  %v14072_v36 = vpop.f32.mrb[92].mxu1 }
 0xb9f   : > { %v14073_v51 = vadd.f32 %v14072_v36, %v24760_v59  ;;  %v14074_v26 = vpop.f32.mrb[93].mxu1 }
 0xba0   : > { %v14075_v18 = vadd.f32 %v14074_v26, %v24760_v59  ;;  %v14076_v32 = vpop.f32.mrb[94].mxu1  ;;  %14977 = vmatprep.subr.bf16.mxu1 %v14765_v37 }
 0xba1   : > { %v14077_v41 = vadd.f32 %v14076_v32, %v24770_v15  ;;  %v14078_v58 = vpop.f32.mrb[95].mxu1  ;;  %14978 = vmatpush1.bf16.msra.mxu1 %v14764_v54  ;;  %v14561_v35 = vmax.f32 %v14073_v51, 0.0 }
 0xba2   : > { %v14079_v29 = vadd.f32 %v14078_v58, %v24770_v15  ;;  %v14562_v5 = vmax.f32 %v14075_v18, 0.0  ;;  %v19630_v15 = vld [vmem:[%s25659_s5 + $0x1a0] sm:$0xff]  }
 0xba3   : > { %v14563_v21 = vmax.f32 %v14077_v41, 0.0  ;;  %16757 = vmatmul.mubr.msk.bf16.gmra.mrb[200].mxu1 %vm11803_vm0, %v19628_v49 }
 0xba4   : > { %v14564_v33 = vmax.f32 %v14079_v29, 0.0  ;;  %16758 = vmatprep.mubr.msk.bf16.mxu1 %vm11803_vm0, %v19629_v46 }
 0xba5   : > { %v14766_v59 = vpack.c.bf16 %v14563_v21, %v14561_v35 }
 0xba6   : > { %v14767_v34 = vpack.c.bf16 %v14564_v33, %v14562_v5  ;;  %v14082_v55 = vpop.f32.mrb[96].mxu1 }
 0xba7   : > { %v14083_v23 = vadd.f32 %v14082_v55, %v24781_v44  ;;  %v14084_v50 = vpop.f32.mrb[97].mxu1 }
 0xba8   : > { %v14085_v20 = vadd.f32 %v14084_v50, %v24781_v44  ;;  %v14086_v47 = vpop.f32.mrb[98].mxu1  ;;  %14979 = vmatprep.subr.bf16.mxu1 %v14767_v34 }
 0xba9   : > { %v14087_v40 = vadd.f32 %v14086_v47, %v24783_v14  ;;  %v14088_v52 = vpop.f32.mrb[99].mxu1  ;;  %14980 = vmatpush1.bf16.msra.mxu1 %v14766_v59  ;;  %v14565_v22 = vmax.f32 %v14083_v23, 0.0 }
 0xbaa   : > { %v14089_v30 = vadd.f32 %v14088_v52, %v24783_v14  ;;  %v14566_v28 = vmax.f32 %v14085_v20, 0.0  ;;  %v19631_v14 = vld [vmem:[%s25659_s5 + $0x1a8] sm:$0xff]  }
 0xbab   : > { %v14567_v12 = vmax.f32 %v14087_v40, 0.0  ;;  %16759 = vmatmul.mubr.msk.bf16.gmra.mrb[204].mxu1 %vm11803_vm0, %v19629_v46 }
 0xbac   : > { %v14568_v10 = vmax.f32 %v14089_v30, 0.0  ;;  %16760 = vmatprep.mubr.msk.bf16.mxu1 %vm11803_vm0, %v19630_v15 }
 0xbad   : > { %v14768_v44 = vpack.c.bf16 %v14567_v12, %v14565_v22 }
 0xbae   : > { %v14769_v49 = vpack.c.bf16 %v14568_v10, %v14566_v28  ;;  %v14092_v31 = vpop.f32.mrb[100].mxu1 }
 0xbaf   : > { %v14093_v42 = vadd.f32 %v14092_v31, %v24793_v39  ;;  %v14094_v13 = vpop.f32.mrb[101].mxu1 }
 0xbb0   : > { %v14095_v11 = vadd.f32 %v14094_v13, %v24793_v39  ;;  %v14096_v4 = vpop.f32.mrb[102].mxu1  ;;  %14981 = vmatprep.subr.bf16.mxu1 %v14769_v49 }
 0xbb1   : > { %v14097_v48 = vadd.f32 %v14096_v4, %v24804_v45  ;;  %v14098_v63 = vpop.f32.mrb[103].mxu1  ;;  %14982 = vmatpush1.bf16.msra.mxu1 %v14768_v44  ;;  %v14569_v37 = vmax.f32 %v14093_v42, 0.0 }
 0xbb2   : > { %v14099_v54 = vadd.f32 %v14098_v63, %v24804_v45  ;;  %v14570_v51 = vmax.f32 %v14095_v11, 0.0  ;;  %v19632_v45 = vld [vmem:[%s25659_s5 + $0x1b0] sm:$0xff]  }
 0xbb3   : > { %v14571_v36 = vmax.f32 %v14097_v48, 0.0  ;;  %16761 = vmatmul.mubr.msk.bf16.gmra.mrb[208].mxu1 %vm11803_vm0, %v19630_v15 }
 0xbb4   : > { %v14572_v26 = vmax.f32 %v14099_v54, 0.0  ;;  %16762 = vmatprep.mubr.msk.bf16.mxu1 %vm11803_vm0, %v19631_v14 }
 0xbb5   : > { %v14770_v39 = vpack.c.bf16 %v14571_v36, %v14569_v37 }
 0xbb6   : > { %v14771_v18 = vpack.c.bf16 %v14572_v26, %v14570_v51  ;;  %v14102_v32 = vpop.f32.mrb[104].mxu1 }
 0xbb7   : > { %v14103_v46 = vadd.f32 %v14102_v32, %v24814_v1  ;;  %v14104_v41 = vpop.f32.mrb[105].mxu1 }
 0xbb8   : > { %v14105_v58 = vadd.f32 %v14104_v41, %v24814_v1  ;;  %v14106_v29 = vpop.f32.mrb[106].mxu1  ;;  %14983 = vmatprep.subr.bf16.mxu1 %v14771_v18 }
 0xbb9   : > { %v14107_v35 = vadd.f32 %v14106_v29, %v24816_v19  ;;  %v14108_v21 = vpop.f32.mrb[107].mxu1  ;;  %14984 = vmatpush1.bf16.msra.mxu1 %v14770_v39  ;;  %v14573_v33 = vmax.f32 %v14103_v46, 0.0 }
 0xbba   : > { %v14109_v5 = vadd.f32 %v14108_v21, %v24816_v19  ;;  %v14574_v34 = vmax.f32 %v14105_v58, 0.0  ;;  %v19633_v19 = vld [vmem:[%s25659_s5 + $0x1b8] sm:$0xff]  }
 0xbbb   : > { %v14575_v59 = vmax.f32 %v14107_v35, 0.0  ;;  %16763 = vmatmul.mubr.msk.bf16.gmra.mrb[212].mxu1 %vm11803_vm0, %v19631_v14 }
 0xbbc   : > { %v14576_v55 = vmax.f32 %v14109_v5, 0.0  ;;  %16764 = vmatprep.mubr.msk.bf16.mxu1 %vm11803_vm0, %v19632_v45 }
 0xbbd   : > { %v14772_v1 = vpack.c.bf16 %v14575_v59, %v14573_v33 }
 0xbbe   : > { %v14773_v23 = vpack.c.bf16 %v14576_v55, %v14574_v34  ;;  %v14112_v50 = vpop.f32.mrb[108].mxu1 }
 0xbbf   : > { %v14113_v20 = vadd.f32 %v14112_v50, %v24827_v9  ;;  %v14114_v47 = vpop.f32.mrb[109].mxu1 }
 0xbc0   : > { %v14115_v15 = vadd.f32 %v14114_v47, %v24827_v9  ;;  %v14116_v40 = vpop.f32.mrb[110].mxu1  ;;  %14985 = vmatprep.subr.bf16.mxu1 %v14773_v23 }
 0xbc1   : > { %v14117_v52 = vadd.f32 %v14116_v40, %v24837_v27  ;;  %v14118_v30 = vpop.f32.mrb[111].mxu1  ;;  %14986 = vmatpush1.bf16.msra.mxu1 %v14772_v1  ;;  %v14577_v12 = vmax.f32 %v14113_v20, 0.0 }
 0xbc2   : > { %v14119_v22 = vadd.f32 %v14118_v30, %v24837_v27  ;;  %v14578_v10 = vmax.f32 %v14115_v15, 0.0  ;;  %v19634_v27 = vld [vmem:[%s25659_s5 + $0x1c0] sm:$0xff]  }
 0xbc3   : > { %v14579_v28 = vmax.f32 %v14117_v52, 0.0  ;;  %16765 = vmatmul.mubr.msk.bf16.gmra.mrb[216].mxu1 %vm11803_vm0, %v19632_v45 }
 0xbc4   : > { %v14580_v44 = vmax.f32 %v14119_v22, 0.0  ;;  %16766 = vmatprep.mubr.msk.bf16.mxu1 %vm11803_vm0, %v19633_v19 }
 0xbc5   : > { %v14774_v9 = vpack.c.bf16 %v14579_v28, %v14577_v12 }
 0xbc6   : > { %v14775_v49 = vpack.c.bf16 %v14580_v44, %v14578_v10  ;;  %v14122_v31 = vpop.f32.mrb[112].mxu1 }
 0xbc7   : > { %v14123_v42 = vadd.f32 %v14122_v31, %v24848_v61  ;;  %v14124_v13 = vpop.f32.mrb[113].mxu1 }
 0xbc8   : > { %v14125_v11 = vadd.f32 %v14124_v13, %v24848_v61  ;;  %v14126_v4 = vpop.f32.mrb[114].mxu1  ;;  %14987 = vmatprep.subr.bf16.mxu1 %v14775_v49 }
 0xbc9   : > { %v14127_v14 = vadd.f32 %v14126_v4, %v24850_v16  ;;  %v14128_v48 = vpop.f32.mrb[115].mxu1  ;;  %14988 = vmatpush1.bf16.msra.mxu1 %v14774_v9  ;;  %v14581_v54 = vmax.f32 %v14123_v42, 0.0 }
 0xbca   : > { %v14129_v63 = vadd.f32 %v14128_v48, %v24850_v16  ;;  %v14582_v36 = vmax.f32 %v14125_v11, 0.0  ;;  %v19635_v16 = vld [vmem:[%s25659_s5 + $0x1c8] sm:$0xff]  }
 0xbcb   : > { %v14583_v37 = vmax.f32 %v14127_v14, 0.0  ;;  %16767 = vmatmul.mubr.msk.bf16.gmra.mrb[220].mxu1 %vm11803_vm0, %v19633_v19 }
 0xbcc   : > { %v14584_v51 = vmax.f32 %v14129_v63, 0.0  ;;  %16768 = vmatprep.mubr.msk.bf16.mxu1 %vm11803_vm0, %v19634_v27 }
 0xbcd   : > { %v14776_v61 = vpack.c.bf16 %v14583_v37, %v14581_v54 }
 0xbce   : > { %v14777_v26 = vpack.c.bf16 %v14584_v51, %v14582_v36  ;;  %v14132_v39 = vpop.f32.mrb[116].mxu1  ;;  %v26382_v51 = vld [vmem:[#allocation6_spill] sm:$0xff] }
 0xbcf   : > { %v14133_v18 = vadd.f32 %v14132_v39, %v24860_v57  ;;  %v14134_v32 = vpop.f32.mrb[117].mxu1 }
 0xbd0   : > { %v14135_v46 = vadd.f32 %v14134_v32, %v24860_v57  ;;  %v14136_v41 = vpop.f32.mrb[118].mxu1  ;;  %14989 = vmatprep.subr.bf16.mxu1 %v14777_v26 }
 0xbd1   : > { %v14137_v58 = vadd.f32 %v14136_v41, %v24871_v7  ;;  %v14138_v29 = vpop.f32.mrb[119].mxu1  ;;  %14990 = vmatpush1.bf16.msra.mxu1 %v14776_v61  ;;  %v14585_v35 = vmax.f32 %v14133_v18, 0.0 }
 0xbd2   : > { %v14139_v45 = vadd.f32 %v14138_v29, %v24871_v7  ;;  %v14586_v5 = vmax.f32 %v14135_v46, 0.0  ;;  %v19636_v7 = vld [vmem:[%s25659_s5 + $0x1d0] sm:$0xff]  }
 0xbd3   : > { %v14587_v21 = vmax.f32 %v14137_v58, 0.0  ;;  %16769 = vmatmul.mubr.msk.bf16.gmra.mrb[224].mxu1 %vm11803_vm0, %v19634_v27  ;;  %v26383_v29 = vld [vmem:[#allocation7_spill] sm:$0xff] }
 0xbd4   : > { %v14588_v33 = vmax.f32 %v14139_v45, 0.0  ;;  %16770 = vmatprep.mubr.msk.bf16.mxu1 %vm11803_vm0, %v19635_v16 }
 0xbd5   : > { %v14778_v57 = vpack.c.bf16 %v14587_v21, %v14585_v35 }
 0xbd6   : > { %v14779_v59 = vpack.c.bf16 %v14588_v33, %v14586_v5  ;;  %v14142_v34 = vpop.f32.mrb[120].mxu1  ;;  %v19639_v33 = vld [vmem:[%s25659_s5 + $0x1e8] sm:$0xff]  }
 0xbd7   : > { %v14143_v55 = vadd.f32 %v14142_v34, %v24881_v8  ;;  %v14144_v1 = vpop.f32.mrb[121].mxu1 }
 0xbd8   : > { %v14145_v23 = vadd.f32 %v14144_v1, %v24881_v8  ;;  %v14146_v50 = vpop.f32.mrb[122].mxu1  ;;  %14991 = vmatprep.subr.bf16.mxu1 %v14779_v59 }
 0xbd9   : > { %v14147_v20 = vadd.f32 %v14146_v50, %v24883_v53  ;;  %v14148_v47 = vpop.f32.mrb[123].mxu1  ;;  %14992 = vmatpush1.bf16.msra.mxu1 %v14778_v57  ;;  %v14589_v40 = vmax.f32 %v14143_v55, 0.0  ;;  %v26384_v57 = vld [vmem:[#allocation8_spill] sm:$0xff] }
 0xbda   : > { %v14149_v15 = vadd.f32 %v14148_v47, %v24883_v53  ;;  %v14590_v52 = vmax.f32 %v14145_v23, 0.0  ;;  %v19637_v53 = vld [vmem:[%s25659_s5 + $0x1d8] sm:$0xff]  }
 0xbdb   : > { %v14591_v19 = vmax.f32 %v14147_v20, 0.0  ;;  %16771 = vmatmul.mubr.msk.bf16.gmra.mrb[228].mxu1 %vm11803_vm0, %v19635_v16 }
 0xbdc   : > { %v14592_v30 = vmax.f32 %v14149_v15, 0.0  ;;  %16772 = vmatprep.mubr.msk.bf16.mxu1 %vm11803_vm0, %v19636_v7 }
 0xbdd   : > { %v14780_v8 = vpack.c.bf16 %v14591_v19, %v14589_v40  ;;  %v26385_v40 = vld [vmem:[#allocation9_spill] sm:$0xff] }
 0xbde   : > { %v14781_v22 = vpack.c.bf16 %v14592_v30, %v14590_v52  ;;  %v14152_v12 = vpop.f32.mrb[124].mxu1 }
 0xbdf   : > { %v14153_v28 = vadd.f32 %v14152_v12, %v24894_v62  ;;  %v14154_v10 = vpop.f32.mrb[125].mxu1  ;;  %v26386_v12 = vld [vmem:[#allocation10_spill] sm:$0xff] }
 0xbe0   : > { %v14155_v44 = vadd.f32 %v14154_v10, %v24894_v62  ;;  %v14156_v9 = vpop.f32.mrb[126].mxu1  ;;  %14993 = vmatprep.subr.bf16.mxu1 %v14781_v22  ;;  %v19640_v22 = vld [vmem:[%s25659_s5 + $0x1f0] ss:$0 sps:$4 sm:$0xff]  }
 0xbe1   : > { %v14157_v49 = vadd.f32 %v14156_v9, %v24904_v43  ;;  %v14158_v31 = vpop.f32.mrb[127].mxu1  ;;  %14994 = vmatpush1.bf16.msra.mxu1 %v14780_v8  ;;  %v14593_v13 = vmax.f32 %v14153_v28, 0.0 }
 0xbe2   : > { %v14159_v42 = vadd.f32 %v14158_v31, %v24904_v43  ;;  %v14594_v4 = vmax.f32 %v14155_v44, 0.0  ;;  %v19638_v43 = vld [vmem:[%s25659_s5 + $0x1e0] sm:$0xff]  }
 0xbe3   : > { %v14595_v11 = vmax.f32 %v14157_v49, 0.0  ;;  %16773 = vmatmul.mubr.msk.bf16.gmra.mrb[232].mxu1 %vm11803_vm0, %v19636_v7 }
 0xbe4   : > { %v14596_v27 = vmax.f32 %v14159_v42, 0.0  ;;  %16774 = vmatprep.mubr.msk.bf16.mxu1 %vm11803_vm0, %v19637_v53  ;;  %v19643_v42 = vld [vmem:[%s25661_s7] sm:$0xff] }
 0xbe5   : > { %v14782_v62 = vpack.c.bf16 %v14595_v11, %v14593_v13  ;;  %v14857_v13 = vcombine.high %v19643_v42, %v19643_v42 }
 0xbe6   : > { %v14783_v14 = vpack.c.bf16 %v14596_v27, %v14594_v4  ;;  %v14162_v48 = vpop.f32.mrb[128].mxu1 }
 0xbe7   : > { %v14163_v63 = vadd.f32 %v14162_v48, %v24912_v2  ;;  %v14164_v54 = vpop.f32.mrb[129].mxu1 }
 0xbe8   : > { %v14165_v37 = vadd.f32 %v14164_v54, %v24912_v2  ;;  %v14166_v36 = vpop.f32.mrb[130].mxu1  ;;  %14995 = vmatprep.subr.bf16.mxu1 %v14783_v14 }
 0xbe9   : > { %v14167_v61 = vadd.f32 %v14166_v36, %v26382_v51  ;;  %v14168_v26 = vpop.f32.mrb[131].mxu1  ;;  %14996 = vmatpush1.bf16.msra.mxu1 %v14782_v62  ;;  %v14597_v18 = vmax.f32 %v14163_v63, 0.0  ;;  %v26387_v62 = vld [vmem:[#allocation11_spill] sm:$0xff]  ;;  %v25468_v36 = vrot.slane %v14857_v13, %v25082_v60 }
 0xbea   : > { %v14169_v39 = vadd.f32 %v14168_v26, %v26382_v51  ;;  %v14598_v46 = vmax.f32 %v14165_v37, 0.0  ;;  %v14904_v37 = vcombine.high %v25103_v24, %v25103_v24 }
 0xbeb   : > { %v14599_v32 = vmax.f32 %v14167_v61, 0.0  ;;  %16775 = vmatmul.mubr.msk.bf16.gmra.mrb[236].mxu1 %vm11803_vm0, %v19637_v53 }
 0xbec   : > { %v14600_v41 = vmax.f32 %v14169_v39, 0.0  ;;  %16776 = vmatprep.mubr.msk.bf16.mxu1 %vm11803_vm0, %v19638_v43 }
 0xbed   : > { %v25438_v2 = vpack.c.bf16 %v14599_v32, %v14597_v18 }
 0xbee   : > { %v14785_v16 = vpack.c.bf16 %v14600_v41, %v14598_v46  ;;  %v14172_v58 = vpop.f32.mrb[132].mxu1  ;;  %v14873_v41 = vcombine.high %v25468_v36, %v25468_v36 }
 0xbef   : > { %v14173_v45 = vadd.f32 %v14172_v58, %v26383_v29  ;;  %v14174_v35 = vpop.f32.mrb[133].mxu1 }
 0xbf0   : > { %v14175_v21 = vadd.f32 %v14174_v35, %v26383_v29  ;;  %v14176_v5 = vpop.f32.mrb[134].mxu1  ;;  %15006 = vmatprep.subr.bf16.mxu1 %v14785_v16  ;;  %v14902_v29 = vcombine.high %v25284_v3, %v25284_v3 }
 0xbf1   : > { %v14177_v59 = vadd.f32 %v14176_v5, %v26384_v57  ;;  %v14178_v34 = vpop.f32.mrb[135].mxu1  ;;  %v14601_v1 = vmax.f32 %v14173_v45, 0.0  ;;  %v26389_v45 = vld [vmem:[#allocation13_spill] sm:$0xff] }
 0xbf2   : > { %v14179_v55 = vadd.f32 %v14178_v34, %v26384_v57  ;;  %v14602_v50 = vmax.f32 %v14175_v21, 0.0  ;;  %v25480_v57 = vrot.slane %v14873_v41, %v25082_v60 }
 0xbf3   : > { %v14603_v23 = vmax.f32 %v14177_v59, 0.0  ;;  %16777 = vmatmul.mubr.msk.bf16.gmra.mrb[240].mxu1 %vm11803_vm0, %v19638_v43  ;;  %v26388_v43 = vld [vmem:[#allocation12_spill] sm:$0xff]  ;;  %v26390_v59 = vld [vmem:[#allocation14_spill] sm:$0xff] }
 0xbf4   : > { %v14604_v7 = vmax.f32 %v14179_v55, 0.0  ;;  %16778 = vmatprep.mubr.msk.bf16.mxu1 %vm11803_vm0, %v19639_v33 }
 0xbf5   : > { %v25449_v20 = vpack.c.bf16 %v14603_v23, %v14601_v1 }
 0xbf6   : > { %v14787_v47 = vpack.c.bf16 %v14604_v7, %v14602_v50  ;;  %v14182_v15 = vpop.f32.mrb[136].mxu1 }
 0xbf7   : > { %v14183_v19 = vadd.f32 %v14182_v15, %v26385_v40  ;;  %v14184_v52 = vpop.f32.mrb[137].mxu1 }
 0xbf8   : > { %v14185_v30 = vadd.f32 %v14184_v52, %v26385_v40  ;;  %v14186_v8 = vpop.f32.mrb[138].mxu1  ;;  %v26391_v52 = vld [vmem:[#allocation15_spill] sm:$0xff] }
 0xbf9   : > { %v14187_v28 = vadd.f32 %v14186_v8, %v26386_v12  ;;  %v14188_v10 = vpop.f32.mrb[139].mxu1  ;;  %v14605_v9 = vmax.f32 %v14183_v19, 0.0 }
 0xbfa   : > { %v14189_v44 = vadd.f32 %v14188_v10, %v26386_v12  ;;  %v14606_v49 = vmax.f32 %v14185_v30, 0.0 }
 0xbfb   : > { %v14607_v53 = vmax.f32 %v14187_v28, 0.0  ;;  %16779 = vmatmul.mubr.msk.bf16.gmra.mrb[244].mxu1 %vm11803_vm0, %v19639_v33  ;;  %v26392_v28 = vld [vmem:[#allocation16_spill] sm:$0xff] }
 0xbfc   : > { %v14608_v31 = vmax.f32 %v14189_v44, 0.0  ;;  %16780 = vmatprep.mubr.msk.bf16.mxu1 %vm11803_vm0, %v19640_v22 }
 0xbfd   : > { %v14788_v11 = vpack.c.bf16 %v14607_v53, %v14605_v9 }
 0xbfe   : > { %v14789_v4 = vpack.c.bf16 %v14608_v31, %v14606_v49  ;;  %v14192_v27 = vpop.f32.mrb[140].mxu1 }
 0xbff   : > { %v14193_v14 = vadd.f32 %v14192_v27, %v26387_v62  ;;  %v14194_v48 = vpop.f32.mrb[141].mxu1  ;;  %v26393_v27 = vld [vmem:[#allocation17_spill] sm:$0xff] }
 0xc00   : > { %v14195_v63 = vadd.f32 %v14194_v48, %v26387_v62  ;;  %v14196_v54 = vpop.f32.mrb[142].mxu1 }
 0xc01   : > { %v14197_v51 = vadd.f32 %v14196_v54, %v26388_v43  ;;  %v14198_v61 = vpop.f32.mrb[143].mxu1  ;;  %v14609_v39 = vmax.f32 %v14193_v14, 0.0 }
 0xc02   : > { %v14199_v26 = vadd.f32 %v14198_v61, %v26388_v43  ;;  %v14610_v32 = vmax.f32 %v14195_v63, 0.0 }
 0xc03   : > { %v14611_v18 = vmax.f32 %v14197_v51, 0.0  ;;  %16781 = vmatmul.mubr.msk.bf16.gmra.mrb[248].mxu1 %vm11803_vm0, %v19640_v22 }
 0xc04   : > { %v14612_v46 = vmax.f32 %v14199_v26, 0.0  ;;  %14997 = vmatprep.mubr.bf16.mxu1 %v14904_v37 }
 0xc05   : > { %v14790_v16 = vpack.c.bf16 %v14611_v18, %v14609_v39 }
 0xc06   : > { %v14791_v24 = vpack.c.bf16 %v14612_v46, %v14610_v32  ;;  %v14202_v58 = vpop.f32.mrb[144].mxu1  ;;  %v26395_v32 = vld [vmem:[#allocation19_spill] sm:$0xff] }
 0xc07   : > { %v14203_v35 = vadd.f32 %v14202_v58, %v26389_v45  ;;  %v14204_v21 = vpop.f32.mrb[145].mxu1  ;;  %v26396_v58 = vld [vmem:[#allocation20_spill] sm:$0xff] }
 0xc08   : > { %v14205_v5 = vadd.f32 %v14204_v21, %v26389_v45  ;;  %v14206_v33 = vpop.f32.mrb[146].mxu1 }
 0xc09   : > { %v14207_v34 = vadd.f32 %v14206_v33, %v26390_v59  ;;  %v14208_v55 = vpop.f32.mrb[147].mxu1  ;;  %v14613_v23 = vmax.f32 %v14203_v35, 0.0 }
 0xc0a   : > { %v14209_v1 = vadd.f32 %v14208_v55, %v26390_v59  ;;  %v14614_v7 = vmax.f32 %v14205_v5, 0.0 }
 0xc0b   : > { %v14615_v50 = vmax.f32 %v14207_v34, 0.0  ;;  %14998 = vmatmul.mubr.bf16.vlgmr.msra.gmra.mrb[252].mxu1 %v14902_v29 }
 0xc0c   : > { %v14616_v15 = vmax.f32 %v14209_v1, 0.0  ;;  %15007 = vmatpush1.bf16.msra.mxu1 %v25438_v2  ;;  %15038 = vmatprep.mubr.bf16.mxu1 %v25480_v57 }
 0xc0d   : > { %v14792_v3 = vpack.c.bf16 %v14615_v50, %v14613_v23  ;;  %15008 = vmatprep.subr.bf16.mxu1 %v14787_v47  ;;  %v26397_v23 = vld [vmem:[#allocation21_spill] sm:$0xff] }
 0xc0e   : > { %v14793_v40 = vpack.c.bf16 %v14616_v15, %v14614_v7  ;;  %v14212_v19 = vpop.f32.mrb[148].mxu1 }
 0xc0f   : > { %v14213_v30 = vadd.f32 %v14212_v19, %v26391_v52  ;;  %v14214_v8 = vpop.f32.mrb[149].mxu1 }
 0xc10   : > { %v14215_v22 = vadd.f32 %v14214_v8, %v26391_v52  ;;  %15009 = vmatpush1.bf16.msra.mxu1 %v25449_v20  ;;  %v14216_v12 = vpop.f32.mrb[150].mxu1 }
 0xc11   : > { %v14217_v10 = vadd.f32 %v14216_v12, %v26392_v28  ;;  %15010 = vmatprep.subr.bf16.mxu1 %v14789_v4  ;;  %v14218_v44 = vpop.f32.mrb[151].mxu1  ;;  %v14617_v9 = vmax.f32 %v14213_v30, 0.0  ;;  %v26394_v4 = vld [vmem:[#allocation18_spill] sm:$0xff] }
 0xc12   : > { %v14219_v2 = vadd.f32 %v14218_v44, %v26392_v28  ;;  %v14618_v49 = vmax.f32 %v14215_v22, 0.0 }
 0xc13   : > { %v14619_v53 = vmax.f32 %v14217_v10, 0.0 }
 0xc14   : > { %v14620_v47 = vmax.f32 %v14219_v2, 0.0  ;;  %15011 = vmatpush1.bf16.msra.mxu1 %v14788_v11 }
 0xc15   : > { %v14794_v31 = vpack.c.bf16 %v14619_v53, %v14617_v9  ;;  %15012 = vmatprep.subr.bf16.mxu1 %v14791_v24  ;;  %v26399_v9 = vld [vmem:[#allocation23_spill] sm:$0xff] }
 0xc16   : > { %v14795_v42 = vpack.c.bf16 %v14620_v47, %v14618_v49  ;;  %v14222_v13 = vpop.f32.mrb[152].mxu1 }
 0xc17   : > { %v14223_v62 = vadd.f32 %v14222_v13, %v26393_v27  ;;  %v14224_v14 = vpop.f32.mrb[153].mxu1 }
 0xc18   : > { %v14225_v20 = vadd.f32 %v14224_v14, %v26393_v27  ;;  %15013 = vmatpush1.bf16.msra.mxu1 %v14790_v16  ;;  %v14226_v48 = vpop.f32.mrb[154].mxu1 }
 0xc19   : > { %v14227_v63 = vadd.f32 %v14226_v48, %v26394_v4  ;;  %15014 = vmatprep.subr.bf16.mxu1 %v14793_v40  ;;  %v14228_v54 = vpop.f32.mrb[155].mxu1  ;;  %v14621_v43 = vmax.f32 %v14223_v62, 0.0  ;;  %v26398_v40 = vld [vmem:[#allocation22_spill] sm:$0xff] }
 0xc1a   : > { %v14229_v37 = vadd.f32 %v14228_v54, %v26394_v4  ;;  %v14622_v11 = vmax.f32 %v14225_v20, 0.0 }
 0xc1b   : > { %v14623_v51 = vmax.f32 %v14227_v63, 0.0 }
 0xc1c   : > { %v14624_v61 = vmax.f32 %v14229_v37, 0.0  ;;  %15015 = vmatpush1.bf16.msra.mxu1 %v14792_v3 }
 0xc1d   : > { %v14796_v26 = vpack.c.bf16 %v14623_v51, %v14621_v43  ;;  %15016 = vmatprep.subr.bf16.mxu1 %v14795_v42  ;;  %v26400_v42 = vld [vmem:[#allocation24_spill] sm:$0xff]  ;;  %v26401_v43 = vld [vmem:[#allocation25_spill] sm:$0xff] }
 0xc1e   : > { %v14797_v39 = vpack.c.bf16 %v14624_v61, %v14622_v11  ;;  %v14232_v18 = vpop.f32.mrb[156].mxu1 }
 0xc1f   : > { %v14233_v46 = vadd.f32 %v14232_v18, %v26395_v32  ;;  %v14234_v41 = vpop.f32.mrb[157].mxu1 }
 0xc20   : > { %v14235_v16 = vadd.f32 %v14234_v41, %v26395_v32  ;;  %15017 = vmatpush1.bf16.msra.mxu1 %v14794_v31  ;;  %v14236_v24 = vpop.f32.mrb[158].mxu1 }
 0xc21   : > { %v14237_v29 = vadd.f32 %v14236_v24, %v26396_v58  ;;  %15018 = vmatprep.subr.bf16.mxu1 %v14797_v39  ;;  %v14238_v45 = vpop.f32.mrb[159].mxu1  ;;  %v14625_v21 = vmax.f32 %v14233_v46, 0.0  ;;  %v26402_v39 = vld [vmem:[#allocation26_spill] sm:$0xff] }
 0xc22   : > { %v14239_v35 = vadd.f32 %v14238_v45, %v26396_v58  ;;  %v14626_v33 = vmax.f32 %v14235_v16, 0.0 }
 0xc23   : > { %v14627_v5 = vmax.f32 %v14237_v29, 0.0 }
 0xc24   : > { %v14628_v59 = vmax.f32 %v14239_v35, 0.0  ;;  %15019 = vmatpush1.bf16.msra.mxu1 %v14796_v26 }
 0xc25   : > { %v14798_v34 = vpack.c.bf16 %v14627_v5, %v14625_v21  ;;  %v26403_v21 = vld [vmem:[#allocation27_spill] sm:$0xff] }
 0xc26   : > { %v14799_v55 = vpack.c.bf16 %v14628_v59, %v14626_v33  ;;  %v14242_v1 = vpop.f32.mrb[160].mxu1 }
 0xc27   : > { %v14243_v50 = vadd.f32 %v14242_v1, %v26397_v23  ;;  %v14244_v7 = vpop.f32.mrb[161].mxu1 }
 0xc28   : > { %v14245_v15 = vadd.f32 %v14244_v7, %v26397_v23  ;;  %v14246_v3 = vpop.f32.mrb[162].mxu1  ;;  %15020 = vmatprep.subr.bf16.mxu1 %v14799_v55  ;;  %v26404_v23 = vld [vmem:[#allocation28_spill] sm:$0xff] }
 0xc29   : > { %v14247_v19 = vadd.f32 %v14246_v3, %v26398_v40  ;;  %v14248_v52 = vpop.f32.mrb[163].mxu1  ;;  %15021 = vmatpush1.bf16.msra.mxu1 %v14798_v34  ;;  %v14629_v8 = vmax.f32 %v14243_v50, 0.0 }
 0xc2a   : > { %v14249_v30 = vadd.f32 %v14248_v52, %v26398_v40  ;;  %v14630_v12 = vmax.f32 %v14245_v15, 0.0 }
 0xc2b   : > { %v14631_v22 = vmax.f32 %v14247_v19, 0.0 }
 0xc2c   : > { %v14632_v28 = vmax.f32 %v14249_v30, 0.0 }
 0xc2d   : > { %v14800_v10 = vpack.c.bf16 %v14631_v22, %v14629_v8 }
 0xc2e   : > { %v14801_v44 = vpack.c.bf16 %v14632_v28, %v14630_v12  ;;  %v14252_v2 = vpop.f32.mrb[164].mxu1 }
 0xc2f   : > { %v14253_v53 = vadd.f32 %v14252_v2, %v26399_v9  ;;  %v14254_v49 = vpop.f32.mrb[165].mxu1 }
 0xc30   : > { %v14255_v47 = vadd.f32 %v14254_v49, %v26399_v9  ;;  %v14256_v31 = vpop.f32.mrb[166].mxu1  ;;  %15022 = vmatprep.subr.bf16.mxu1 %v14801_v44  ;;  %v26406_v49 = vld [vmem:[#allocation30_spill] sm:$0xff] }
 0xc31   : > { %v14257_v13 = vadd.f32 %v14256_v31, %v26400_v42  ;;  %v14258_v27 = vpop.f32.mrb[167].mxu1  ;;  %15023 = vmatpush1.bf16.msra.mxu1 %v14800_v10  ;;  %v14633_v14 = vmax.f32 %v14253_v53, 0.0  ;;  %v26405_v10 = vld [vmem:[#allocation29_spill] sm:$0xff] }
 0xc32   : > { %v14259_v62 = vadd.f32 %v14258_v27, %v26400_v42  ;;  %v14634_v48 = vmax.f32 %v14255_v47, 0.0 }
 0xc33   : > { %v14635_v20 = vmax.f32 %v14257_v13, 0.0 }
 0xc34   : > { %v14636_v4 = vmax.f32 %v14259_v62, 0.0 }
 0xc35   : > { %v14802_v63 = vpack.c.bf16 %v14635_v20, %v14633_v14 }
 0xc36   : > { %v14803_v54 = vpack.c.bf16 %v14636_v4, %v14634_v48  ;;  %v14262_v37 = vpop.f32.mrb[168].mxu1 }
 0xc37   : > { %v14263_v51 = vadd.f32 %v14262_v37, %v26401_v43  ;;  %v14264_v11 = vpop.f32.mrb[169].mxu1 }
 0xc38   : > { %v14265_v61 = vadd.f32 %v14264_v11, %v26401_v43  ;;  %v14266_v26 = vpop.f32.mrb[170].mxu1  ;;  %15024 = vmatprep.subr.bf16.mxu1 %v14803_v54  ;;  %v26408_v11 = vld [vmem:[#allocation32_spill] sm:$0xff] }
 0xc39   : > { %v14267_v18 = vadd.f32 %v14266_v26, %v26402_v39  ;;  %v14268_v32 = vpop.f32.mrb[171].mxu1  ;;  %15025 = vmatpush1.bf16.msra.mxu1 %v14802_v63  ;;  %v14637_v41 = vmax.f32 %v14263_v51, 0.0  ;;  %v26407_v63 = vld [vmem:[#allocation31_spill] sm:$0xff] }
 0xc3a   : > { %v14269_v46 = vadd.f32 %v14268_v32, %v26402_v39  ;;  %v14638_v24 = vmax.f32 %v14265_v61, 0.0 }
 0xc3b   : > { %v14639_v16 = vmax.f32 %v14267_v18, 0.0 }
 0xc3c   : > { %v14640_v58 = vmax.f32 %v14269_v46, 0.0 }
 0xc3d   : > { %v14804_v29 = vpack.c.bf16 %v14639_v16, %v14637_v41 }
 0xc3e   : > { %v14805_v45 = vpack.c.bf16 %v14640_v58, %v14638_v24  ;;  %v14272_v35 = vpop.f32.mrb[172].mxu1 }
 0xc3f   : > { %v14273_v5 = vadd.f32 %v14272_v35, %v26403_v21  ;;  %v14274_v33 = vpop.f32.mrb[173].mxu1  ;;  %v25512_v59 = vpop.f32.mrb[128].mxu0 }
 0xc40   : > { %v14275_v34 = vadd.f32 %v14274_v33, %v26403_v21  ;;  %v14276_v55 = vpop.f32.mrb[174].mxu1  ;;  %v25515_v1 = vpop.f32.mrb[129].mxu0  ;;  %15026 = vmatprep.subr.bf16.mxu1 %v14805_v45  ;;  %v26410_v33 = vld [vmem:[#allocation34_spill] sm:$0xff] }
 0xc41   : > { %v14277_v50 = vadd.f32 %v14276_v55, %v26404_v23  ;;  %v14278_v7 = vpop.f32.mrb[175].mxu1  ;;  %15027 = vmatpush1.bf16.msra.mxu1 %v14804_v29  ;;  %v14962_v15 = vpop.f32.mrb[130].mxu0  ;;  %v14641_v19 = vmax.f32 %v14273_v5, 0.0  ;;  %v26409_v29 = vld [vmem:[#allocation33_spill] sm:$0xff] }
 0xc42   : > { %v14279_v3 = vadd.f32 %v14278_v7, %v26404_v23  ;;  %v14963_v40 = vpop.f32.mrb[131].mxu0  ;;  %v14642_v30 = vmax.f32 %v14275_v34, 0.0 }
 0xc43   : > { %v14643_v52 = vmax.f32 %v14277_v50, 0.0 }
 0xc44   : > { %v14644_v8 = vmax.f32 %v14279_v3, 0.0 }
 0xc45   : > { %v14806_v22 = vpack.c.bf16 %v14643_v52, %v14641_v19 }
 0xc46   : > { %v14807_v12 = vpack.c.bf16 %v14644_v8, %v14642_v30  ;;  %v14282_v28 = vpop.f32.mrb[176].mxu1  ;;  %v26411_v30 = vld [vmem:[#allocation35_spill] sm:$0xff] }
 0xc47   : > { %v14283_v44 = vadd.f32 %v14282_v28, %v26405_v10  ;;  %v14284_v2 = vpop.f32.mrb[177].mxu1 }
 0xc48   : > { %v14285_v9 = vadd.f32 %v14284_v2, %v26405_v10  ;;  %v14286_v53 = vpop.f32.mrb[178].mxu1  ;;  %15028 = vmatprep.subr.bf16.mxu1 %v14807_v12  ;;  %v26412_v10 = vld [vmem:[#allocation36_spill] sm:$0xff] }
 0xc49   : > { %v14287_v47 = vadd.f32 %v14286_v53, %v26406_v49  ;;  %v14288_v31 = vpop.f32.mrb[179].mxu1  ;;  %15029 = vmatpush1.bf16.msra.mxu1 %v14806_v22  ;;  %v14645_v13 = vmax.f32 %v14283_v44, 0.0 }
 0xc4a   : > { %v14289_v42 = vadd.f32 %v14288_v31, %v26406_v49  ;;  %v14646_v62 = vmax.f32 %v14285_v9, 0.0 }
 0xc4b   : > { %v14647_v27 = vmax.f32 %v14287_v47, 0.0 }
 0xc4c   : > { %v14648_v14 = vmax.f32 %v14289_v42, 0.0 }
 0xc4d   : > { %v14808_v20 = vpack.c.bf16 %v14647_v27, %v14645_v13 }
 0xc4e   : > { %v14809_v48 = vpack.c.bf16 %v14648_v14, %v14646_v62  ;;  %v14292_v4 = vpop.f32.mrb[180].mxu1  ;;  %v26413_v62 = vld [vmem:[#allocation37_spill] sm:$0xff] }
 0xc4f   : > { %v14293_v54 = vadd.f32 %v14292_v4, %v26407_v63  ;;  %v14294_v37 = vpop.f32.mrb[181].mxu1 }
 0xc50   : > { %v14295_v43 = vadd.f32 %v14294_v37, %v26407_v63  ;;  %v14296_v51 = vpop.f32.mrb[182].mxu1  ;;  %15030 = vmatprep.subr.bf16.mxu1 %v14809_v48  ;;  %v25539_v63 = vrot.slane %v25468_v36, %v25082_v60 }
 0xc51   : > { %v14297_v61 = vadd.f32 %v14296_v51, %v26408_v11  ;;  %v14298_v26 = vpop.f32.mrb[183].mxu1  ;;  %15031 = vmatpush1.bf16.msra.mxu1 %v14808_v20  ;;  %v14649_v18 = vmax.f32 %v14293_v54, 0.0  ;;  %v26414_v54 = vld [vmem:[#allocation38_spill] sm:$0xff]  ;;  %v14905_v51 = vcombine.high %v25480_v57, %v25480_v57  ;;  %v26416_v57 = vld [vmem:[#allocation40_spill] sm:$0xff] }
 0xc52   : > { %v14299_v39 = vadd.f32 %v14298_v26, %v26408_v11  ;;  %v14650_v46 = vmax.f32 %v14295_v43, 0.0 }
 0xc53   : > { %v14651_v32 = vmax.f32 %v14297_v61, 0.0 }
 0xc54   : > { %v14652_v41 = vmax.f32 %v14299_v39, 0.0 }
 0xc55   : > { %v14810_v16 = vpack.c.bf16 %v14651_v32, %v14649_v18 }
 0xc56   : > { %v14811_v24 = vpack.c.bf16 %v14652_v41, %v14650_v46  ;;  %v14302_v58 = vpop.f32.mrb[184].mxu1  ;;  %v26415_v41 = vld [vmem:[#allocation39_spill] sm:$0xff] }
 0xc57   : > { %v14303_v45 = vadd.f32 %v14302_v58, %v26409_v29  ;;  %v14304_v35 = vpop.f32.mrb[185].mxu1 }
 0xc58   : > { %v14305_v21 = vadd.f32 %v14304_v35, %v26409_v29  ;;  %v14306_v5 = vpop.f32.mrb[186].mxu1  ;;  %15032 = vmatprep.subr.bf16.mxu1 %v14811_v24 }
 0xc59   : > { %v14307_v34 = vadd.f32 %v14306_v5, %v26410_v33  ;;  %v14308_v55 = vpop.f32.mrb[187].mxu1  ;;  %15033 = vmatpush1.bf16.msra.mxu1 %v14810_v16  ;;  %v14653_v50 = vmax.f32 %v14303_v45, 0.0 }
 0xc5a   : > { %v14309_v23 = vadd.f32 %v14308_v55, %v26410_v33  ;;  %v14654_v15 = vmax.f32 %v14305_v21, 0.0 }
 0xc5b   : > { %v14655_v7 = vmax.f32 %v14307_v34, 0.0 }
 0xc5c   : > { %v14656_v3 = vmax.f32 %v14309_v23, 0.0 }
 0xc5d   : > { %v14812_v40 = vpack.c.bf16 %v14655_v7, %v14653_v50 }
 0xc5e   : > { %v14813_v19 = vpack.c.bf16 %v14656_v3, %v14654_v15  ;;  %v14312_v52 = vpop.f32.mrb[188].mxu1  ;;  %v26417_v15 = vld [vmem:[#allocation41_spill] sm:$0xff] }
 0xc5f   : > { %v14313_v8 = vadd.f32 %v14312_v52, %v26411_v30  ;;  %v14314_v22 = vpop.f32.mrb[189].mxu1 }
 0xc60   : > { %v14315_v12 = vadd.f32 %v14314_v22, %v26411_v30  ;;  %v14316_v28 = vpop.f32.mrb[190].mxu1  ;;  %15034 = vmatprep.subr.bf16.mxu1 %v14813_v19  ;;  %v26418_v30 = vld [vmem:[#allocation42_spill] sm:$0xff] }
 0xc61   : > { %v14317_v44 = vadd.f32 %v14316_v28, %v26412_v10  ;;  %v14318_v2 = vpop.f32.mrb[191].mxu1  ;;  %15035 = vmatpush1.bf16.msra.mxu1 %v14812_v40  ;;  %v14657_v53 = vmax.f32 %v14313_v8, 0.0 }
 0xc62   : > { %v14319_v9 = vadd.f32 %v14318_v2, %v26412_v10  ;;  %v14658_v47 = vmax.f32 %v14315_v12, 0.0 }
 0xc63   : > { %v14659_v49 = vmax.f32 %v14317_v44, 0.0 }
 0xc64   : > { %v14660_v31 = vmax.f32 %v14319_v9, 0.0 }
 0xc65   : > { %v14814_v42 = vpack.c.bf16 %v14659_v49, %v14657_v53 }
 0xc66   : > { %v14815_v13 = vpack.c.bf16 %v14660_v31, %v14658_v47  ;;  %v14322_v27 = vpop.f32.mrb[192].mxu1  ;;  %v26419_v47 = vld [vmem:[#allocation43_spill] sm:$0xff] }
 0xc67   : > { %v14323_v14 = vadd.f32 %v14322_v27, %v26413_v62  ;;  %v14324_v20 = vpop.f32.mrb[193].mxu1 }
 0xc68   : > { %v14325_v48 = vadd.f32 %v14324_v20, %v26413_v62  ;;  %v14326_v4 = vpop.f32.mrb[194].mxu1  ;;  %15036 = vmatprep.subr.bf16.mxu1 %v14815_v13  ;;  %v26420_v62 = vld [vmem:[#allocation44_spill] sm:$0xff] }
 0xc69   : > { %v14327_v37 = vadd.f32 %v14326_v4, %v26414_v54  ;;  %v14328_v43 = vpop.f32.mrb[195].mxu1  ;;  %15037 = vmatpush1.bf16.msra.mxu1 %v14814_v42  ;;  %v14661_v61 = vmax.f32 %v14323_v14, 0.0 }
 0xc6a   : > { %v14329_v11 = vadd.f32 %v14328_v43, %v26414_v54  ;;  %v14662_v39 = vmax.f32 %v14325_v48, 0.0 }
 0xc6b   : > { %v14663_v26 = vmax.f32 %v14327_v37, 0.0 }
 0xc6c   : > { %v14664_v18 = vmax.f32 %v14329_v11, 0.0  ;;  %15039 = vmatmul.mubr.bf16.vlgmr.msra.gmra.mrb[252].mxu1 %v25539_v63 }
 0xc6d   : > { %v14816_v32 = vpack.c.bf16 %v14663_v26, %v14661_v61  ;;  %16408 = vmatprep.mubr.msk.bf16.mxu1 %vm14913_vm1, %v14905_v51  ;;  %v26421_v26 = vld [vmem:[#allocation45_spill] sm:$0xff] }
 0xc6e   : > { %v14817_v36 = vpack.c.bf16 %v14664_v18, %v14662_v39  ;;  %v14332_v46 = vpop.f32.mrb[196].mxu1 }
 0xc6f   : > { %v14333_v16 = vadd.f32 %v14332_v46, %v26415_v41  ;;  %v14334_v24 = vpop.f32.mrb[197].mxu1  ;;  %v26422_v46 = vld [vmem:[#allocation46_spill] sm:$0xff] }
 0xc70   : > { %v14335_v58 = vadd.f32 %v14334_v24, %v26415_v41  ;;  %v14336_v29 = vpop.f32.mrb[198].mxu1  ;;  %15047 = vmatprep.subr.bf16.mxu1 %v14817_v36 }
 0xc71   : > { %v14337_v45 = vadd.f32 %v14336_v29, %v26416_v57  ;;  %v14338_v35 = vpop.f32.mrb[199].mxu1  ;;  %15048 = vmatpush1.bf16.msra.mxu1 %v14816_v32  ;;  %v14665_v5 = vmax.f32 %v14333_v16, 0.0 }
 0xc72   : > { %v14339_v21 = vadd.f32 %v14338_v35, %v26416_v57  ;;  %v14666_v34 = vmax.f32 %v14335_v58, 0.0 }
 0xc73   : > { %v14667_v33 = vmax.f32 %v14337_v45, 0.0 }
 0xc74   : > { %v14668_v55 = vmax.f32 %v14339_v21, 0.0 }
 0xc75   : > { %v14818_v23 = vpack.c.bf16 %v14667_v33, %v14665_v5 }
 0xc76   : > { %v14819_v50 = vpack.c.bf16 %v14668_v55, %v14666_v34  ;;  %v14342_v7 = vpop.f32.mrb[200].mxu1 }
 0xc77   : > { %v14343_v3 = vadd.f32 %v14342_v7, %v26417_v15  ;;  %v14344_v40 = vpop.f32.mrb[201].mxu1 }
 0xc78   : > { %v14345_v19 = vadd.f32 %v14344_v40, %v26417_v15  ;;  %v14346_v52 = vpop.f32.mrb[202].mxu1  ;;  %15049 = vmatprep.subr.bf16.mxu1 %v14819_v50  ;;  %v26423_v50 = vld [vmem:[#allocation47_spill] sm:$0xff] }
 0xc79   : > { %v14347_v8 = vadd.f32 %v14346_v52, %v26418_v30  ;;  %v14348_v22 = vpop.f32.mrb[203].mxu1  ;;  %15050 = vmatpush1.bf16.msra.mxu1 %v14818_v23  ;;  %v14669_v28 = vmax.f32 %v14343_v3, 0.0 }
 0xc7a   : > { %v14349_v12 = vadd.f32 %v14348_v22, %v26418_v30  ;;  %v14670_v44 = vmax.f32 %v14345_v19, 0.0 }
 0xc7b   : > { %v14671_v10 = vmax.f32 %v14347_v8, 0.0 }
 0xc7c   : > { %v14672_v2 = vmax.f32 %v14349_v12, 0.0 }
 0xc7d   : > { %v14820_v9 = vpack.c.bf16 %v14671_v10, %v14669_v28 }
 0xc7e   : > { %v14821_v53 = vpack.c.bf16 %v14672_v2, %v14670_v44  ;;  %v14352_v49 = vpop.f32.mrb[204].mxu1  ;;  %v26424_v2 = vld [vmem:[#allocation48_spill] sm:$0xff] }
 0xc7f   : > { %v14353_v31 = vadd.f32 %v14352_v49, %v26419_v47  ;;  %v14354_v42 = vpop.f32.mrb[205].mxu1 }
 0xc80   : > { %v14355_v13 = vadd.f32 %v14354_v42, %v26419_v47  ;;  %v14356_v27 = vpop.f32.mrb[206].mxu1  ;;  %15051 = vmatprep.subr.bf16.mxu1 %v14821_v53 }
 0xc81   : > { %v14357_v14 = vadd.f32 %v14356_v27, %v26420_v62  ;;  %v14358_v20 = vpop.f32.mrb[207].mxu1  ;;  %15052 = vmatpush1.bf16.msra.mxu1 %v14820_v9  ;;  %v14673_v4 = vmax.f32 %v14353_v31, 0.0 }
 0xc82   : > { %v14359_v48 = vadd.f32 %v14358_v20, %v26420_v62  ;;  %v14674_v37 = vmax.f32 %v14355_v13, 0.0 }
 0xc83   : > { %v14675_v54 = vmax.f32 %v14357_v14, 0.0 }
 0xc84   : > { %v14676_v43 = vmax.f32 %v14359_v48, 0.0 }
 0xc85   : > { %v14822_v51 = vpack.c.bf16 %v14675_v54, %v14673_v4  ;;  %v26425_v54 = vld [vmem:[#allocation49_spill] sm:$0xff] }
 0xc86   : > { %v14823_v11 = vpack.c.bf16 %v14676_v43, %v14674_v37  ;;  %v14362_v61 = vpop.f32.mrb[208].mxu1 }
 0xc87   : > { %v14363_v39 = vadd.f32 %v14362_v61, %v26421_v26  ;;  %v14364_v18 = vpop.f32.mrb[209].mxu1 }
 0xc88   : > { %v14365_v32 = vadd.f32 %v14364_v18, %v26421_v26  ;;  %v14366_v36 = vpop.f32.mrb[210].mxu1  ;;  %15053 = vmatprep.subr.bf16.mxu1 %v14823_v11 }
 0xc89   : > { %v14367_v41 = vadd.f32 %v14366_v36, %v26422_v46  ;;  %v14368_v16 = vpop.f32.mrb[211].mxu1  ;;  %15054 = vmatpush1.bf16.msra.mxu1 %v14822_v51  ;;  %v14677_v58 = vmax.f32 %v14363_v39, 0.0 }
 0xc8a   : > { %v14369_v24 = vadd.f32 %v14368_v16, %v26422_v46  ;;  %v14678_v57 = vmax.f32 %v14365_v32, 0.0  ;;  %v26426_v46 = vld [vmem:[#allocation50_spill] sm:$0xff] }
 0xc8b   : > { %v14679_v29 = vmax.f32 %v14367_v41, 0.0 }
 0xc8c   : > { %v14680_v45 = vmax.f32 %v14369_v24, 0.0 }
 0xc8d   : > { %v14824_v35 = vpack.c.bf16 %v14679_v29, %v14677_v58  ;;  %v26427_v58 = vld [vmem:[#allocation51_spill] sm:$0xff] }
 0xc8e   : > { %v14825_v21 = vpack.c.bf16 %v14680_v45, %v14678_v57  ;;  %v14372_v5 = vpop.f32.mrb[212].mxu1 }
 0xc8f   : > { %v14373_v33 = vadd.f32 %v14372_v5, %v25126_v25  ;;  %v14374_v34 = vpop.f32.mrb[213].mxu1 }
 0xc90   : > { %v14375_v55 = vadd.f32 %v14374_v34, %v25126_v25  ;;  %v14376_v23 = vpop.f32.mrb[214].mxu1  ;;  %15055 = vmatprep.subr.bf16.mxu1 %v14825_v21 }
 0xc91   : > { %v14377_v7 = vadd.f32 %v14376_v23, %v26423_v50  ;;  %v14378_v15 = vpop.f32.mrb[215].mxu1  ;;  %15056 = vmatpush1.bf16.msra.mxu1 %v14824_v35  ;;  %v14681_v40 = vmax.f32 %v14373_v33, 0.0 }
 0xc92   : > { %v14379_v3 = vadd.f32 %v14378_v15, %v26423_v50  ;;  %v14682_v52 = vmax.f32 %v14375_v55, 0.0  ;;  %v26428_v50 = vld [vmem:[#allocation52_spill] sm:$0xff] }
 0xc93   : > { %v14683_v19 = vmax.f32 %v14377_v7, 0.0 }
 0xc94   : > { %v14684_v30 = vmax.f32 %v14379_v3, 0.0 }
 0xc95   : > { %v14826_v8 = vpack.c.bf16 %v14683_v19, %v14681_v40  ;;  %v26429_v19 = vld [vmem:[#allocation53_spill] sm:$0xff] }
 0xc96   : > { %v14827_v22 = vpack.c.bf16 %v14684_v30, %v14682_v52  ;;  %v14382_v12 = vpop.f32.mrb[216].mxu1 }
 0xc97   : > { %v14383_v28 = vadd.f32 %v14382_v12, %v25150_v6  ;;  %v14384_v10 = vpop.f32.mrb[217].mxu1 }
 0xc98   : > { %v14385_v25 = vadd.f32 %v14384_v10, %v25150_v6  ;;  %v14386_v44 = vpop.f32.mrb[218].mxu1  ;;  %15057 = vmatprep.subr.bf16.mxu1 %v14827_v22 }
 0xc99   : > { %v14387_v9 = vadd.f32 %v14386_v44, %v26424_v2  ;;  %v14388_v53 = vpop.f32.mrb[219].mxu1  ;;  %15058 = vmatpush1.bf16.msra.mxu1 %v14826_v8  ;;  %v14685_v47 = vmax.f32 %v14383_v28, 0.0 }
 0xc9a   : > { %v14389_v49 = vadd.f32 %v14388_v53, %v26424_v2  ;;  %v14686_v42 = vmax.f32 %v14385_v25, 0.0 }
 0xc9b   : > { %v14687_v31 = vmax.f32 %v14387_v9, 0.0 }
 0xc9c   : > { %v14688_v13 = vmax.f32 %v14389_v49, 0.0 }
 0xc9d   : > { %v14828_v27 = vpack.c.bf16 %v14687_v31, %v14685_v47  ;;  %v26430_v31 = vld [vmem:[#allocation54_spill] sm:$0xff] }
 0xc9e   : > { %v14829_v62 = vpack.c.bf16 %v14688_v13, %v14686_v42  ;;  %v14392_v14 = vpop.f32.mrb[220].mxu1 }
 0xc9f   : > { %v14393_v20 = vadd.f32 %v14392_v14, %v25169_v38  ;;  %v14394_v48 = vpop.f32.mrb[221].mxu1 }
 0xca0   : > { %v14395_v6 = vadd.f32 %v14394_v48, %v25169_v38  ;;  %v14396_v4 = vpop.f32.mrb[222].mxu1  ;;  %15059 = vmatprep.subr.bf16.mxu1 %v14829_v62 }
 0xca1   : > { %v14397_v37 = vadd.f32 %v14396_v4, %v26425_v54  ;;  %v14398_v43 = vpop.f32.mrb[223].mxu1  ;;  %15060 = vmatpush1.bf16.msra.mxu1 %v14828_v27  ;;  %v14689_v11 = vmax.f32 %v14393_v20, 0.0 }
 0xca2   : > { %v14399_v51 = vadd.f32 %v14398_v43, %v26425_v54  ;;  %v14690_v26 = vmax.f32 %v14395_v6, 0.0 }
 0xca3   : > { %v14691_v61 = vmax.f32 %v14397_v37, 0.0  ;;  %v26431_v37 = vld [vmem:[#allocation55_spill] sm:$0xff] }
 0xca4   : > { %v14692_v39 = vmax.f32 %v14399_v51, 0.0 }
 0xca5   : > { %v14830_v18 = vpack.c.bf16 %v14691_v61, %v14689_v11  ;;  %v26432_v61 = vld [vmem:[#allocation56_spill] sm:$0xff] }
 0xca6   : > { %v14831_v32 = vpack.c.bf16 %v14692_v39, %v14690_v26  ;;  %v14402_v36 = vpop.f32.mrb[224].mxu1 }
 0xca7   : > { %v14403_v41 = vadd.f32 %v14402_v36, %v26426_v46  ;;  %v14404_v16 = vpop.f32.mrb[225].mxu1 }
 0xca8   : > { %v14405_v38 = vadd.f32 %v14404_v16, %v26426_v46  ;;  %v14406_v24 = vpop.f32.mrb[226].mxu1  ;;  %15061 = vmatprep.subr.bf16.mxu1 %v14831_v32 }
 0xca9   : > { %v14407_v29 = vadd.f32 %v14406_v24, %v26427_v58  ;;  %v14408_v57 = vpop.f32.mrb[227].mxu1  ;;  %15062 = vmatpush1.bf16.msra.mxu1 %v14830_v18  ;;  %v14693_v35 = vmax.f32 %v14403_v41, 0.0 }
 0xcaa   : > { %v14409_v45 = vadd.f32 %v14408_v57, %v26427_v58  ;;  %v14694_v5 = vmax.f32 %v14405_v38, 0.0 }
 0xcab   : > { %v14695_v21 = vmax.f32 %v14407_v29, 0.0 }
 0xcac   : > { %v14696_v33 = vmax.f32 %v14409_v45, 0.0 }
 0xcad   : > { %v14832_v34 = vpack.c.bf16 %v14695_v21, %v14693_v35  ;;  %v26433_v35 = vld [vmem:[#allocation57_spill] sm:$0xff] }
 0xcae   : > { %v14833_v55 = vpack.c.bf16 %v14696_v33, %v14694_v5  ;;  %v14412_v23 = vpop.f32.mrb[228].mxu1 }
 0xcaf   : > { %v14413_v7 = vadd.f32 %v14412_v23, %v26428_v50  ;;  %v14414_v15 = vpop.f32.mrb[229].mxu1 }
 0xcb0   : > { %v14415_v3 = vadd.f32 %v14414_v15, %v26428_v50  ;;  %v14416_v40 = vpop.f32.mrb[230].mxu1  ;;  %15063 = vmatprep.subr.bf16.mxu1 %v14833_v55 }
 0xcb1   : > { %v14417_v52 = vadd.f32 %v14416_v40, %v26429_v19  ;;  %v14418_v30 = vpop.f32.mrb[231].mxu1  ;;  %15064 = vmatpush1.bf16.msra.mxu1 %v14832_v34  ;;  %v14697_v22 = vmax.f32 %v14413_v7, 0.0 }
 0xcb2   : > { %v14419_v8 = vadd.f32 %v14418_v30, %v26429_v19  ;;  %v14698_v28 = vmax.f32 %v14415_v3, 0.0  ;;  %v26434_v30 = vld [vmem:[#allocation58_spill] sm:$0xff] }
 0xcb3   : > { %v14699_v12 = vmax.f32 %v14417_v52, 0.0 }
 0xcb4   : > { %v14700_v10 = vmax.f32 %v14419_v8, 0.0 }
 0xcb5   : > { %v14834_v25 = vpack.c.bf16 %v14699_v12, %v14697_v22 }
 0xcb6   : > { %v14835_v44 = vpack.c.bf16 %v14700_v10, %v14698_v28  ;;  %v14422_v2 = vpop.f32.mrb[232].mxu1 }
 0xcb7   : > { %v14423_v9 = vadd.f32 %v14422_v2, %v25230_v56  ;;  %v14424_v53 = vpop.f32.mrb[233].mxu1 }
 0xcb8   : > { %v14425_v49 = vadd.f32 %v14424_v53, %v25230_v56  ;;  %v14426_v47 = vpop.f32.mrb[234].mxu1  ;;  %15065 = vmatprep.subr.bf16.mxu1 %v14835_v44 }
 0xcb9   : > { %v14427_v42 = vadd.f32 %v14426_v47, %v26430_v31  ;;  %v14428_v13 = vpop.f32.mrb[235].mxu1  ;;  %15066 = vmatpush1.bf16.msra.mxu1 %v14834_v25  ;;  %v14701_v62 = vmax.f32 %v14423_v9, 0.0  ;;  %v13256_v9 = vpop.permute.xlu0 %13255 }
 0xcba   : > { %v14429_v27 = vadd.f32 %v14428_v13, %v26430_v31  ;;  %v14702_v20 = vmax.f32 %v14425_v49, 0.0 }
 0xcbb   : > { %v14703_v14 = vmax.f32 %v14427_v42, 0.0 }
 0xcbc   : > { %v14704_v48 = vmax.f32 %v14429_v27, 0.0 }
 0xcbd   : > { %v14836_v6 = vpack.c.bf16 %v14703_v14, %v14701_v62 }
 0xcbe   : > { %v14837_v4 = vpack.c.bf16 %v14704_v48, %v14702_v20  ;;  %v14432_v54 = vpop.f32.mrb[236].mxu1 }
 0xcbf   : > { %v14433_v43 = vadd.f32 %v14432_v54, %v26431_v37  ;;  %v14434_v51 = vpop.f32.mrb[237].mxu1  ;;  %v26435_v54 = vld [vmem:[#allocation207_spill] sm:$0xff] }
 0xcc0   : > { %v14435_v56 = vadd.f32 %v14434_v51, %v26431_v37  ;;  %v14436_v11 = vpop.f32.mrb[238].mxu1  ;;  %15067 = vmatprep.subr.bf16.mxu1 %v14837_v4  ;;  %v14850_v4 = vpop.permute.xlu1 %14849  ;;  %v26436_v37 = vsub.s32 0, %v26435_v54 }
 0xcc1   : > { %v14437_v26 = vadd.f32 %v14436_v11, %v26432_v61  ;;  %v14438_v39 = vpop.f32.mrb[239].mxu1  ;;  %15068 = vmatpush1.bf16.msra.mxu1 %v14836_v6  ;;  %v14705_v32 = vmax.f32 %v14433_v43, 0.0  ;;  %v14903_v6 = vcombine.high %v25539_v63, %v25539_v63 }
 0xcc2   : > { %v14439_v18 = vadd.f32 %v14438_v39, %v26432_v61  ;;  %v14706_v46 = vmax.f32 %v14435_v56, 0.0  ;;  %v14855_v43 = vrot.slane %v14850_v4, %v26436_v37 }
 0xcc3   : > { %v14707_v36 = vmax.f32 %v14437_v26, 0.0 }
 0xcc4   : > { %v14708_v41 = vmax.f32 %v14439_v18, 0.0  ;;  %v14959_v51 = vadd.f32 %v25512_v59, %v14855_v43  ;;  %v14961_v56 = vadd.f32 %v25515_v1, %v14855_v43 }
 0xcc5   : > { %v14838_v16 = vpack.c.bf16 %v14707_v36, %v14705_v32 }
 0xcc6   : > { %v14839_v38 = vpack.c.bf16 %v14708_v41, %v14706_v46  ;;  %v14442_v24 = vpop.f32.mrb[240].mxu1 }
 0xcc7   : > { %v14443_v58 = vadd.f32 %v14442_v24, %v25255_v17  ;;  %v14444_v29 = vpop.f32.mrb[241].mxu1 }
 0xcc8   : > { %v14445_v57 = vadd.f32 %v14444_v29, %v25255_v17  ;;  %v14446_v45 = vpop.f32.mrb[242].mxu1  ;;  %15069 = vmatprep.subr.bf16.mxu1 %v14839_v38 }
 0xcc9   : > { %v14447_v21 = vadd.f32 %v14446_v45, %v26433_v35  ;;  %v14448_v5 = vpop.f32.mrb[243].mxu1  ;;  %15070 = vmatpush1.bf16.msra.mxu1 %v14838_v16  ;;  %v14709_v34 = vmax.f32 %v14443_v58, 0.0  ;;  %v26437_v16 = vlaneseq }
 0xcca   : > { %v14449_v33 = vadd.f32 %v14448_v5, %v26433_v35  ;;  %v14710_v23 = vmax.f32 %v14445_v57, 0.0 }
 0xccb   : > { %v14711_v55 = vmax.f32 %v14447_v21, 0.0  ;;  %vm15110_vm3 = vcmp.lt.s32.totalorder %v26437_v16, 256 }
 0xccc   : > { %v14712_v50 = vmax.f32 %v14449_v33, 0.0 }
 0xccd   : > { %v14840_v7 = vpack.c.bf16 %v14711_v55, %v14709_v34 }
 0xcce   : > { %v14841_v15 = vpack.c.bf16 %v14712_v50, %v14710_v23  ;;  %v14452_v3 = vpop.f32.mrb[244].mxu1 }
 0xccf   : > { %v14453_v40 = vadd.f32 %v14452_v3, %v25266_v0  ;;  %v14454_v19 = vpop.f32.mrb[245].mxu1 }
 0xcd0   : > { %v14455_v17 = vadd.f32 %v14454_v19, %v25266_v0  ;;  %v14456_v52 = vpop.f32.mrb[246].mxu1  ;;  %15071 = vmatprep.subr.bf16.mxu1 %v14841_v15 }
 0xcd1   : > { %v14457_v8 = vadd.f32 %v14456_v52, %v26434_v30  ;;  %v14458_v22 = vpop.f32.mrb[247].mxu1  ;;  %15072 = vmatpush1.bf16.msra.mxu1 %v14840_v7  ;;  %v14713_v28 = vmax.f32 %v14453_v40, 0.0 }
 0xcd2   : > { %v14459_v12 = vadd.f32 %v14458_v22, %v26434_v30  ;;  %v14714_v25 = vmax.f32 %v14455_v17, 0.0 }
 0xcd3   : > { %v14715_v10 = vmax.f32 %v14457_v8, 0.0 }
 0xcd4   : > { %v14716_v44 = vmax.f32 %v14459_v12, 0.0 }
 0xcd5   : > { %v14842_v2 = vpack.c.bf16 %v14715_v10, %v14713_v28 }
 0xcd6   : > { %v14843_v53 = vpack.c.bf16 %v14716_v44, %v14714_v25  ;;  %v14462_v49 = vpop.f32.mrb[248].mxu1 }
 0xcd7   : > { %v14463_v47 = vadd.f32 %v14462_v49, %v13256_v9  ;;  %v14464_v31 = vpop.f32.mrb[249].mxu1 }
 0xcd8   : > { %v14465_v42 = vadd.f32 %v14464_v31, %v13256_v9  ;;  %15073 = vmatprep.subr.bf16.mxu1 %v14843_v53  ;;  %v14466_v0 = vpop.f32.mrb[250].mxu1 }
 0xcd9   : > { %v14717_v13 = vmax.f32 %v14463_v47, 0.0  ;;  %15074 = vmatpush1.bf16.msra.mxu1 %v14842_v2  ;;  %v14467_v27 = vpop.f32.mrb[251].mxu1 }
 0xcda   : > { %v14718_v62 = vmax.f32 %v14465_v42, 0.0 }
 0xcdb   : > { %v14844_v14 = vpack.c.bf16 %v14717_v13, %v14717_v13 }
 0xcdc   : > { %v14845_v20 = vpack.c.bf16 %v14718_v62, %v14718_v62 }
 0xcdd   : > { %v14919_v48 = vsel %vm14917_vm2, %v14844_v14, 0 }
 0xcde   : > { %16407 = vmatprep.subr.msk.bf16.mxu1 %vm14917_vm2, %v14845_v20 }
 0xcdf   : > { %15076 = vmatpush1.bf16.msra.mxu1 %v14919_v48 }
 0xce2   : > { %15080 = vmatmul.mubr.bf16.vlgmr.msra.gmra.mrb[252].mxu1 %v14903_v6 }
 0xdb5   : > { %v15081_v11 = vpop.f32.mrb[252].mxu1 }
 0xdb6   : > { %v16975_v61 = vadd.f32 %v15081_v11, %v14959_v51  ;;  %v15083_v26 = vpop.f32.mrb[253].mxu1 }
 0xdb7   : > { %v16977_v39 = vadd.f32 %v15083_v26, %v14961_v56  ;;  %v15085_v18 = vpop.f32.mrb[254].mxu1 }
 0xdb8   : > { %v15088_v63 = vmax.f32 %v16975_v61, 0.0  ;;  %v15086_v32 = vpop.f32.mrb[255].mxu1 }
 0xdb9   : > { %v15089_v36 = vmax.f32 %v16977_v39, 0.0 }
 0xdbb   : > { %v15092_v46 = vcombine.low %v15088_v63, %v15089_v36 }
 0xdbd   : > { %v15099_v41 = vrot.slane %v15092_v46, %v25082_v60 }
 0xdbf   : > { %v15106_v59 = vrot.slane %v15099_v41, %v25082_v60 }
 0xdc1   : > { %15112 = vst.msk [vmem:[%s330_s22] sm:$0x3] %vm15110_vm3, %v15106_v59 }
 0xdc2   : > { %19658 = shalt.err (!%p19655_p3)
}
 0xdc3   : > { %s19659_s30 = scalar_lea.hbm %s25612_s25, 32  ;;  %s19663_s18 = scalar_lea.hbm %s25663_s9, 128 }
 0xdc4   : > { %p19660_p4 = scmp.ne.s32.totalorder %s25612_s25, %s19659_s30  ;;  %p19664_p9 = scmp.lt.u32.totalorder %s25612_s25, %s25663_s9 }
 0xdc5   : > { %p19665_p10 = scmp.lt.u32.totalorder %s19663_s18, %s19659_s30  ;;  %p19667_p12 = scmp.lt.u32.totalorder %s19659_s30, %s25612_s25 }
 0xdc6   : > { %p19661_p7 = pnand %p19660_p4, %p19802_p5 }
 0xdc7   : > { %p19666_p11 = por %p19665_p10, %p19664_p9 }
 0xdc8   : > { %p19662_p8 = pneg %p19661_p7 }
 0xdc9   : > { %p19668_p13 = por %p19667_p12, %p19666_p11 }
 0xdcb   : > { %p19669_p0 = pnand %p19668_p13, %p19662_p8 }
 0xdcd   : > { %19672 = shalt.err (!%p19669_p0)
}
 0xdce   : > { %18338 = dma.vmem_to_hbm [thread:$0]  (%p19802_p5), %s25614_s23, 32, %s25612_s25, %s15114_s24  }
 0xdcf PF: > { %p18344_p1 = scmp.ge.s32.totalorder %s19707_s14, 2  ;;  %s15140_s15 = sand.u32 1, %s19695_s11  }
 0xdd0   : > { %s15141_s26 = scalar_lea.sflag [#allocation4], %s15140_s15 }
 0xdd1   : > { %p18341_p2 = pnand %p18344_p1, %p19806_p6 }
 0xdd3   : > { %19690 = dma.done.wait (!%p18341_p2), %s15141_s26, 32  }
 0xdd4   : > { %19692 = vsyncadd (!%p18341_p2), %s15141_s26, 4294967264  ;;  %p21_p3 = scmp.ge.s32.totalorder %s19788_s16, 6   ;;  %s26438_s11 = smov %s19699_s12 }
 0xdd5   : > { %s26439_s12 = smov %s19703_s13  ;;  %s26440_s13 = smov %s19800_s19 }
 0xdd6   : > { %s26441_s14 = smov %s19788_s16  ;;  %23 = sbr.rel (!%p21_p3) target bundleno = 6 (0x6), region = 91 }
 0xddd   :  { %15146 = vsyncpa [#allocation4], 1 }
 0xdde   :  { %15148 = vsyncpa [#allocation4 + $0x1], 1 }

</bundles_post_ra>
